<compile_context>
chip_gen: v7x
topology: tpu7x:2x2x1
jax: 0.10.0
libtpu: 0.0.40
codegen_flags: <defaults>
</compile_context>

<pallas_src>
import jax
import jax.numpy as jnp
from jax import lax
from jax.experimental import pallas as pl
from jax.experimental.pallas import tpu as pltpu


def _double_conv_kernel(x_ref, w1_ref, s1_ref, b1_ref, w2_ref, s2_ref, b2_ref,
                        o_ref, xpad_ref, midpad_ref, acc1_ref, acc2_ref):
    """Fused (3x3 conv -> folded BN -> ReLU) x 2 for one batch element.

    x_ref  : (1, H, W, Cin)        bf16 input tile
    w1_ref : (9, Cin, Cmid)        bf16 conv1 taps (tap = dy*3 + dx)
    s1_ref , b1_ref : (1, Cmid)    f32 folded BN scale / bias (incl. conv bias)
    w2_ref : (9, Cmid, Cout)       bf16 conv2 taps
    s2_ref , b2_ref : (1, Cout)    f32
    o_ref  : (1, H, W, Cout)       f32 output tile
    xpad_ref  : (H+2, W+2, Cin)    bf16 VMEM scratch (zero-padded input)
    midpad_ref: (H+2, W+2, Cmid)   bf16 VMEM scratch (zero-padded mid act)
    acc1_ref  : (H*W, Cmid)        f32 VMEM accumulator
    acc2_ref  : (H*W, Cout)        f32 VMEM accumulator
    """
    H = o_ref.shape[1]
    W = o_ref.shape[2]

    def conv3x3_bn_relu(src_pad_ref, w_ref, s_ref, b_ref, acc_ref):
        # src_pad_ref: (H+2, W+2, C) bf16 with a zero 1-px border (= padding=1).
        src = src_pad_ref[...]
        cin = src.shape[-1]
        acc_ref[...] = jnp.zeros_like(acc_ref)
        # 9 shifted views; each (H*W, Cin) @ (Cin, Cl) bf16 matmul accumulates
        # in f32 directly into the VMEM scratch accumulator.
        for dy in range(3):
            for dx in range(3):
                patch = src[dy:dy + H, dx:dx + W, :].reshape(H * W, cin)
                acc_ref[...] += jnp.dot(patch, w_ref[dy * 3 + dx],
                                        preferred_element_type=jnp.float32)
        # Folded BN (scale/bias) + ReLU epilogue in f32.
        return jnp.maximum(acc_ref[...] * s_ref[...] + b_ref[...], 0.0)

    # ---- Layer 1: zero-pad the input inside VMEM (no HBM pad pass). ----
    xpad_ref[...] = jnp.zeros_like(xpad_ref)
    xpad_ref[pl.ds(1, H), pl.ds(1, W), :] = x_ref[0]
    mid = conv3x3_bn_relu(xpad_ref, w1_ref, s1_ref, b1_ref, acc1_ref)

    # ---- Layer 2: mid activation stays in VMEM (stored as bf16), fused. ----
    cmid = midpad_ref.shape[-1]
    midpad_ref[...] = jnp.zeros_like(midpad_ref)
    midpad_ref[pl.ds(1, H), pl.ds(1, W), :] = (
        mid.reshape(H, W, cmid).astype(midpad_ref.dtype))
    out = conv3x3_bn_relu(midpad_ref, w2_ref, s2_ref, b2_ref, acc2_ref)

    o_ref[...] = out.reshape(1, H, W, o_ref.shape[3]).astype(o_ref.dtype)


def double_conv_nhwc(x_nhwc, params):
    """Fused DoubleConv in NHWC.  One pallas_call for the whole batch."""
    N, H, W, Cin = x_nhwc.shape
    w1, s1, b1 = params["w1"], params["s1"], params["b1"]
    w2, s2, b2 = params["w2"], params["s2"], params["b2"]
    Cmid, Cout = w1.shape[2], w2.shape[2]

    return pl.pallas_call(
        _double_conv_kernel,
        out_shape=jax.ShapeDtypeStruct((N, H, W, Cout), jnp.float32),
        grid=(N,),
        in_specs=[
            pl.BlockSpec((1, H, W, Cin), lambda n: (n, 0, 0, 0)),
            pl.BlockSpec((9, Cin, Cmid), lambda n: (0, 0, 0)),
            pl.BlockSpec((1, Cmid), lambda n: (0, 0)),
            pl.BlockSpec((1, Cmid), lambda n: (0, 0)),
            pl.BlockSpec((9, Cmid, Cout), lambda n: (0, 0, 0)),
            pl.BlockSpec((1, Cout), lambda n: (0, 0)),
            pl.BlockSpec((1, Cout), lambda n: (0, 0)),
        ],
        out_specs=pl.BlockSpec((1, H, W, Cout), lambda n: (n, 0, 0, 0)),
        scratch_shapes=[
            pltpu.VMEM((H + 2, W + 2, Cin), jnp.bfloat16),
            pltpu.VMEM((H + 2, W + 2, Cmid), jnp.bfloat16),
            pltpu.VMEM((H * W, Cmid), jnp.float32),
            pltpu.VMEM((H * W, Cout), jnp.float32),
        ],
        compiler_params=pltpu.CompilerParams(
            dimension_semantics=("parallel",),
            vmem_limit_bytes=32 * 1024 * 1024,
        ),
    )(x_nhwc.astype(jnp.bfloat16),
      w1.astype(jnp.bfloat16), s1, b1,
      w2.astype(jnp.bfloat16), s2, b2)


def init_double_conv_params(key, in_channels, out_channels, mid_channels=None):
    """Deterministic synthetic parameters matching nn.Conv2d/nn.BatchNorm2d shapes."""
    if not mid_channels:
        mid_channels = out_channels
    eps = 1e-5

    def make_layer(key, cin, cout):
        k_w, k_b, k_g, k_beta = jax.random.split(key, 4)
        # Conv2d weight (cout, cin, 3, 3) equivalent, stored as (9, cin, cout).
        w = 0.1 * jax.random.normal(k_w, (9, cin, cout), jnp.float32)
        conv_bias = 0.1 * jax.random.normal(k_b, (cout,), jnp.float32)
        gamma = 1.0 + 0.1 * jax.random.normal(k_g, (cout,), jnp.float32)
        beta = 0.1 * jax.random.normal(k_beta, (cout,), jnp.float32)
        running_mean = jnp.zeros((cout,), jnp.float32)
        running_var = jnp.ones((cout,), jnp.float32)
        scale = gamma / jnp.sqrt(running_var + eps)
        bias = beta + scale * (conv_bias - running_mean)
        return w, scale.reshape(1, cout), bias.reshape(1, cout)

    k1, k2 = jax.random.split(key)
    w1, s1, b1 = make_layer(k1, in_channels, mid_channels)
    w2, s2, b2 = make_layer(k2, mid_channels, out_channels)
    return dict(w1=w1, s1=s1, b1=b1, w2=w2, s2=s2, b2=b2)


@jax.jit
def double_conv(x_nchw, params):
    """PyTorch-compatible NCHW interface around the fused NHWC kernel."""
    # TODO(synk): keep the surrounding model in NHWC (call double_conv_nhwc
    # directly) to drop these two boundary transpose passes over HBM.
    x = jnp.transpose(x_nchw, (0, 2, 3, 1))                  # NCHW -> NHWC
    y = double_conv_nhwc(x, params)
    return jnp.transpose(y, (0, 3, 1, 2))                    # NHWC -> NCHW


def _reference_double_conv(x_nchw, params):
    """Pure-JAX reference (lax.conv) mirroring the kernel's bf16 compute precision."""
    bf = lambda a: a.astype(jnp.bfloat16).astype(jnp.float32)
    x = bf(jnp.transpose(x_nchw, (0, 2, 3, 1)))
    dn = ("NHWC", "HWIO", "NHWC")

    def layer(x, w, s, b):
        cin, cout = w.shape[1], w.shape[2]
        w_hwio = bf(w).reshape(3, 3, cin, cout)
        y = lax.conv_general_dilated(x, w_hwio, (1, 1), "SAME",
                                     dimension_numbers=dn,
                                     precision=lax.Precision.HIGHEST)
        return jnp.maximum(
            y * s.reshape(1, 1, 1, cout) + b.reshape(1, 1, 1, cout), 0.0)

    y = layer(x, params["w1"], params["s1"], params["b1"])
    y = bf(y)  # kernel stores the mid activation as bf16 in VMEM
    y = layer(y, params["w2"], params["s2"], params["b2"])
    return jnp.transpose(y, (0, 3, 1, 2))


if __name__ == "__main__":
    key = jax.random.PRNGKey(0)
    k_x, k_p = jax.random.split(key)

    N, Cin, H, W = 2, 4, 16, 16
    Cout = 8
    x = jax.random.normal(k_x, (N, Cin, H, W), jnp.float32)
    params = init_double_conv_params(k_p, Cin, Cout)

    out = jax.block_until_ready(double_conv(x, params))
    ref = jax.block_until_ready(_reference_double_conv(x, params))

    assert out.shape == (N, Cout, H, W), out.shape
    assert jnp.allclose(out, ref, atol=1e-3, rtol=1e-3), \
        float(jnp.max(jnp.abs(out - ref)))

    print("KERNEL_OK")
</pallas_src>

<mosaic_0001>
module attributes {stable_mosaic.version = 11 : i64} {
  func.func @_double_conv_kernel(%arg0: i32, %arg1: memref<1x16x16x4xbf16, #tpu.memory_space<vmem>>, %arg2: memref<9x4x8xbf16, #tpu.memory_space<vmem>>, %arg3: memref<1x8xf32, #tpu.memory_space<vmem>>, %arg4: memref<1x8xf32, #tpu.memory_space<vmem>>, %arg5: memref<9x8x8xbf16, #tpu.memory_space<vmem>>, %arg6: memref<1x8xf32, #tpu.memory_space<vmem>>, %arg7: memref<1x8xf32, #tpu.memory_space<vmem>>, %arg8: memref<1x16x16x8xf32, #tpu.memory_space<vmem>>, %arg9: memref<18x18x4xbf16, #tpu.memory_space<vmem>>, %arg10: memref<18x18x8xbf16, #tpu.memory_space<vmem>>, %arg11: memref<256x8xf32, #tpu.memory_space<vmem>>, %arg12: memref<256x8xf32, #tpu.memory_space<vmem>>) attributes {dimension_semantics = [#tpu.dimension_semantics<parallel>], iteration_bounds = array<i64: 2>, scalar_prefetch = 0 : i64, scratch_operands = 4 : i64, tpu.core_type = #tpu.core_type<tc>, window_params = [{transform_indices = @transform_0, window_bounds = array<i64: 1, 16, 16, 4>}, {pipeline_mode = #tpu.pipeline_mode<synchronous>, transform_indices = @transform_1, window_bounds = array<i64: 9, 4, 8>}, {pipeline_mode = #tpu.pipeline_mode<synchronous>, transform_indices = @transform_2, window_bounds = array<i64: 1, 8>}, {pipeline_mode = #tpu.pipeline_mode<synchronous>, transform_indices = @transform_3, window_bounds = array<i64: 1, 8>}, {pipeline_mode = #tpu.pipeline_mode<synchronous>, transform_indices = @transform_4, window_bounds = array<i64: 9, 8, 8>}, {pipeline_mode = #tpu.pipeline_mode<synchronous>, transform_indices = @transform_5, window_bounds = array<i64: 1, 8>}, {pipeline_mode = #tpu.pipeline_mode<synchronous>, transform_indices = @transform_6, window_bounds = array<i64: 1, 8>}, {transform_indices = @transform_7, window_bounds = array<i64: 1, 16, 16, 8>}]} {
    %cst = arith.constant 0.000000e+00 : bf16
    %0 = vector.broadcast %cst : bf16 to vector<18x18x4xbf16>
    %c0 = arith.constant 0 : index
    %c0_0 = arith.constant 0 : index
    %c0_1 = arith.constant 0 : index
    %1 = vector.load %arg9[%c0, %c0_0, %c0_1] : memref<18x18x4xbf16, #tpu.memory_space<vmem>>, vector<18x18x4xbf16>
    tpu.vector_store %arg9[%c0, %c0_0, %c0_1], %0 {strides = array<i32>} : memref<18x18x4xbf16, #tpu.memory_space<vmem>>, vector<18x18x4xbf16>,
    %c0_2 = arith.constant 0 : index
    %c0_3 = arith.constant 0 : index
    %c0_4 = arith.constant 0 : index
    %c0_5 = arith.constant 0 : index
    %2 = vector.load %arg1[%c0_2, %c0_3, %c0_4, %c0_5] : memref<1x16x16x4xbf16, #tpu.memory_space<vmem>>, vector<1x16x16x4xbf16>
    %3 = vector.shape_cast %2 : vector<1x16x16x4xbf16> to vector<16x16x4xbf16>
    %c1 = arith.constant 1 : index
    %c1_6 = arith.constant 1 : index
    %c0_7 = arith.constant 0 : index
    %4 = vector.load %arg9[%c1, %c1_6, %c0_7] : memref<18x18x4xbf16, #tpu.memory_space<vmem>>, vector<16x16x4xbf16>
    tpu.vector_store %arg9[%c1, %c1_6, %c0_7], %3 {strides = array<i32>} : memref<18x18x4xbf16, #tpu.memory_space<vmem>>, vector<16x16x4xbf16>,
    %c0_8 = arith.constant 0 : index
    %c0_9 = arith.constant 0 : index
    %c0_10 = arith.constant 0 : index
    %5 = vector.load %arg9[%c0_8, %c0_9, %c0_10] : memref<18x18x4xbf16, #tpu.memory_space<vmem>>, vector<18x18x4xbf16>
    %cst_11 = arith.constant 0.000000e+00 : f32
    %6 = vector.broadcast %cst_11 : f32 to vector<256x8xf32>
    %c0_12 = arith.constant 0 : index
    %c0_13 = arith.constant 0 : index
    %7 = vector.load %arg11[%c0_12, %c0_13] : memref<256x8xf32, #tpu.memory_space<vmem>>, vector<256x8xf32>
    tpu.vector_store %arg11[%c0_12, %c0_13], %6 {strides = array<i32>} : memref<256x8xf32, #tpu.memory_space<vmem>>, vector<256x8xf32>,
    %8 = vector.extract_strided_slice %5 {offsets = [0, 0, 0], sizes = [16, 16, 4], strides = [1, 1, 1]} : vector<18x18x4xbf16> to vector<16x16x4xbf16>
    %9 = vector.shape_cast %8 : vector<16x16x4xbf16> to vector<256x4xbf16>
    %c0_14 = arith.constant 0 : index
    %c0_15 = arith.constant 0 : index
    %10 = vector.load %arg11[%c0_14, %c0_15] : memref<256x8xf32, #tpu.memory_space<vmem>>, vector<256x8xf32>
    %c0_16 = arith.constant 0 : index
    %c0_17 = arith.constant 0 : index
    %c0_18 = arith.constant 0 : index
    %11 = vector.load %arg2[%c0_16, %c0_17, %c0_18] : memref<9x4x8xbf16, #tpu.memory_space<vmem>>, vector<1x4x8xbf16>
    %12 = vector.shape_cast %11 : vector<1x4x8xbf16> to vector<4x8xbf16>
    %cst_19 = arith.constant dense<0.000000e+00> : vector<256x8xf32>
    %13 = tpu.matmul %9, %12, %cst_19 {dimension_numbers = #tpu.dot_dimension_numbers<[1], [0], [0], [1], [0, 0, 1, 1], [], []>} : vector<256x4xbf16>, vector<4x8xbf16>, vector<256x8xf32> -> vector<256x8xf32>
    %14 = arith.addf %10, %13 : vector<256x8xf32>
    %c0_20 = arith.constant 0 : index
    %c0_21 = arith.constant 0 : index
    %15 = vector.load %arg11[%c0_20, %c0_21] : memref<256x8xf32, #tpu.memory_space<vmem>>, vector<256x8xf32>
    tpu.vector_store %arg11[%c0_20, %c0_21], %14 {strides = array<i32>} : memref<256x8xf32, #tpu.memory_space<vmem>>, vector<256x8xf32>,
    %16 = vector.extract_strided_slice %5 {offsets = [0, 1, 0], sizes = [16, 16, 4], strides = [1, 1, 1]} : vector<18x18x4xbf16> to vector<16x16x4xbf16>
    %17 = vector.shape_cast %16 : vector<16x16x4xbf16> to vector<256x4xbf16>
    %c0_22 = arith.constant 0 : index
    %c0_23 = arith.constant 0 : index
    %18 = vector.load %arg11[%c0_22, %c0_23] : memref<256x8xf32, #tpu.memory_space<vmem>>, vector<256x8xf32>
    %c1_24 = arith.constant 1 : index
    %c0_25 = arith.constant 0 : index
    %c0_26 = arith.constant 0 : index
    %19 = vector.load %arg2[%c1_24, %c0_25, %c0_26] : memref<9x4x8xbf16, #tpu.memory_space<vmem>>, vector<1x4x8xbf16>
    %20 = vector.shape_cast %19 : vector<1x4x8xbf16> to vector<4x8xbf16>
    %cst_27 = arith.constant dense<0.000000e+00> : vector<256x8xf32>
    %21 = tpu.matmul %17, %20, %cst_27 {dimension_numbers = #tpu.dot_dimension_numbers<[1], [0], [0], [1], [0, 0, 1, 1], [], []>} : vector<256x4xbf16>, vector<4x8xbf16>, vector<256x8xf32> -> vector<256x8xf32>
    %22 = arith.addf %18, %21 : vector<256x8xf32>
    %c0_28 = arith.constant 0 : index
    %c0_29 = arith.constant 0 : index
    %23 = vector.load %arg11[%c0_28, %c0_29] : memref<256x8xf32, #tpu.memory_space<vmem>>, vector<256x8xf32>
    tpu.vector_store %arg11[%c0_28, %c0_29], %22 {strides = array<i32>} : memref<256x8xf32, #tpu.memory_space<vmem>>, vector<256x8xf32>,
    %24 = vector.extract_strided_slice %5 {offsets = [0, 2, 0], sizes = [16, 16, 4], strides = [1, 1, 1]} : vector<18x18x4xbf16> to vector<16x16x4xbf16>
    %25 = vector.shape_cast %24 : vector<16x16x4xbf16> to vector<256x4xbf16>
    %c0_30 = arith.constant 0 : index
    %c0_31 = arith.constant 0 : index
    %26 = vector.load %arg11[%c0_30, %c0_31] : memref<256x8xf32, #tpu.memory_space<vmem>>, vector<256x8xf32>
    %c2 = arith.constant 2 : index
    %c0_32 = arith.constant 0 : index
    %c0_33 = arith.constant 0 : index
    %27 = vector.load %arg2[%c2, %c0_32, %c0_33] : memref<9x4x8xbf16, #tpu.memory_space<vmem>>, vector<1x4x8xbf16>
    %28 = vector.shape_cast %27 : vector<1x4x8xbf16> to vector<4x8xbf16>
    %cst_34 = arith.constant dense<0.000000e+00> : vector<256x8xf32>
    %29 = tpu.matmul %25, %28, %cst_34 {dimension_numbers = #tpu.dot_dimension_numbers<[1], [0], [0], [1], [0, 0, 1, 1], [], []>} : vector<256x4xbf16>, vector<4x8xbf16>, vector<256x8xf32> -> vector<256x8xf32>
    %30 = arith.addf %26, %29 : vector<256x8xf32>
    %c0_35 = arith.constant 0 : index
    %c0_36 = arith.constant 0 : index
    %31 = vector.load %arg11[%c0_35, %c0_36] : memref<256x8xf32, #tpu.memory_space<vmem>>, vector<256x8xf32>
    tpu.vector_store %arg11[%c0_35, %c0_36], %30 {strides = array<i32>} : memref<256x8xf32, #tpu.memory_space<vmem>>, vector<256x8xf32>,
    %32 = vector.extract_strided_slice %5 {offsets = [1, 0, 0], sizes = [16, 16, 4], strides = [1, 1, 1]} : vector<18x18x4xbf16> to vector<16x16x4xbf16>
    %33 = vector.shape_cast %32 : vector<16x16x4xbf16> to vector<256x4xbf16>
    %c0_37 = arith.constant 0 : index
    %c0_38 = arith.constant 0 : index
    %34 = vector.load %arg11[%c0_37, %c0_38] : memref<256x8xf32, #tpu.memory_space<vmem>>, vector<256x8xf32>
    %c3 = arith.constant 3 : index
    %c0_39 = arith.constant 0 : index
    %c0_40 = arith.constant 0 : index
    %35 = vector.load %arg2[%c3, %c0_39, %c0_40] : memref<9x4x8xbf16, #tpu.memory_space<vmem>>, vector<1x4x8xbf16>
    %36 = vector.shape_cast %35 : vector<1x4x8xbf16> to vector<4x8xbf16>
    %cst_41 = arith.constant dense<0.000000e+00> : vector<256x8xf32>
    %37 = tpu.matmul %33, %36, %cst_41 {dimension_numbers = #tpu.dot_dimension_numbers<[1], [0], [0], [1], [0, 0, 1, 1], [], []>} : vector<256x4xbf16>, vector<4x8xbf16>, vector<256x8xf32> -> vector<256x8xf32>
    %38 = arith.addf %34, %37 : vector<256x8xf32>
    %c0_42 = arith.constant 0 : index
    %c0_43 = arith.constant 0 : index
    %39 = vector.load %arg11[%c0_42, %c0_43] : memref<256x8xf32, #tpu.memory_space<vmem>>, vector<256x8xf32>
    tpu.vector_store %arg11[%c0_42, %c0_43], %38 {strides = array<i32>} : memref<256x8xf32, #tpu.memory_space<vmem>>, vector<256x8xf32>,
    %40 = vector.extract_strided_slice %5 {offsets = [1, 1, 0], sizes = [16, 16, 4], strides = [1, 1, 1]} : vector<18x18x4xbf16> to vector<16x16x4xbf16>
    %41 = vector.shape_cast %40 : vector<16x16x4xbf16> to vector<256x4xbf16>
    %c0_44 = arith.constant 0 : index
    %c0_45 = arith.constant 0 : index
    %42 = vector.load %arg11[%c0_44, %c0_45] : memref<256x8xf32, #tpu.memory_space<vmem>>, vector<256x8xf32>
    %c4 = arith.constant 4 : index
    %c0_46 = arith.constant 0 : index
    %c0_47 = arith.constant 0 : index
    %43 = vector.load %arg2[%c4, %c0_46, %c0_47] : memref<9x4x8xbf16, #tpu.memory_space<vmem>>, vector<1x4x8xbf16>
    %44 = vector.shape_cast %43 : vector<1x4x8xbf16> to vector<4x8xbf16>
    %cst_48 = arith.constant dense<0.000000e+00> : vector<256x8xf32>
    %45 = tpu.matmul %41, %44, %cst_48 {dimension_numbers = #tpu.dot_dimension_numbers<[1], [0], [0], [1], [0, 0, 1, 1], [], []>} : vector<256x4xbf16>, vector<4x8xbf16>, vector<256x8xf32> -> vector<256x8xf32>
    %46 = arith.addf %42, %45 : vector<256x8xf32>
    %c0_49 = arith.constant 0 : index
    %c0_50 = arith.constant 0 : index
    %47 = vector.load %arg11[%c0_49, %c0_50] : memref<256x8xf32, #tpu.memory_space<vmem>>, vector<256x8xf32>
    tpu.vector_store %arg11[%c0_49, %c0_50], %46 {strides = array<i32>} : memref<256x8xf32, #tpu.memory_space<vmem>>, vector<256x8xf32>,
    %48 = vector.extract_strided_slice %5 {offsets = [1, 2, 0], sizes = [16, 16, 4], strides = [1, 1, 1]} : vector<18x18x4xbf16> to vector<16x16x4xbf16>
    %49 = vector.shape_cast %48 : vector<16x16x4xbf16> to vector<256x4xbf16>
    %c0_51 = arith.constant 0 : index
    %c0_52 = arith.constant 0 : index
    %50 = vector.load %arg11[%c0_51, %c0_52] : memref<256x8xf32, #tpu.memory_space<vmem>>, vector<256x8xf32>
    %c5 = arith.constant 5 : index
    %c0_53 = arith.constant 0 : index
    %c0_54 = arith.constant 0 : index
    %51 = vector.load %arg2[%c5, %c0_53, %c0_54] : memref<9x4x8xbf16, #tpu.memory_space<vmem>>, vector<1x4x8xbf16>
    %52 = vector.shape_cast %51 : vector<1x4x8xbf16> to vector<4x8xbf16>
    %cst_55 = arith.constant dense<0.000000e+00> : vector<256x8xf32>
    %53 = tpu.matmul %49, %52, %cst_55 {dimension_numbers = #tpu.dot_dimension_numbers<[1], [0], [0], [1], [0, 0, 1, 1], [], []>} : vector<256x4xbf16>, vector<4x8xbf16>, vector<256x8xf32> -> vector<256x8xf32>
    %54 = arith.addf %50, %53 : vector<256x8xf32>
    %c0_56 = arith.constant 0 : index
    %c0_57 = arith.constant 0 : index
    %55 = vector.load %arg11[%c0_56, %c0_57] : memref<256x8xf32, #tpu.memory_space<vmem>>, vector<256x8xf32>
    tpu.vector_store %arg11[%c0_56, %c0_57], %54 {strides = array<i32>} : memref<256x8xf32, #tpu.memory_space<vmem>>, vector<256x8xf32>,
    %56 = vector.extract_strided_slice %5 {offsets = [2, 0, 0], sizes = [16, 16, 4], strides = [1, 1, 1]} : vector<18x18x4xbf16> to vector<16x16x4xbf16>
    %57 = vector.shape_cast %56 : vector<16x16x4xbf16> to vector<256x4xbf16>
    %c0_58 = arith.constant 0 : index
    %c0_59 = arith.constant 0 : index
    %58 = vector.load %arg11[%c0_58, %c0_59] : memref<256x8xf32, #tpu.memory_space<vmem>>, vector<256x8xf32>
    %c6 = arith.constant 6 : index
    %c0_60 = arith.constant 0 : index
    %c0_61 = arith.constant 0 : index
    %59 = vector.load %arg2[%c6, %c0_60, %c0_61] : memref<9x4x8xbf16, #tpu.memory_space<vmem>>, vector<1x4x8xbf16>
    %60 = vector.shape_cast %59 : vector<1x4x8xbf16> to vector<4x8xbf16>
    %cst_62 = arith.constant dense<0.000000e+00> : vector<256x8xf32>
    %61 = tpu.matmul %57, %60, %cst_62 {dimension_numbers = #tpu.dot_dimension_numbers<[1], [0], [0], [1], [0, 0, 1, 1], [], []>} : vector<256x4xbf16>, vector<4x8xbf16>, vector<256x8xf32> -> vector<256x8xf32>
    %62 = arith.addf %58, %61 : vector<256x8xf32>
    %c0_63 = arith.constant 0 : index
    %c0_64 = arith.constant 0 : index
    %63 = vector.load %arg11[%c0_63, %c0_64] : memref<256x8xf32, #tpu.memory_space<vmem>>, vector<256x8xf32>
    tpu.vector_store %arg11[%c0_63, %c0_64], %62 {strides = array<i32>} : memref<256x8xf32, #tpu.memory_space<vmem>>, vector<256x8xf32>,
    %64 = vector.extract_strided_slice %5 {offsets = [2, 1, 0], sizes = [16, 16, 4], strides = [1, 1, 1]} : vector<18x18x4xbf16> to vector<16x16x4xbf16>
    %65 = vector.shape_cast %64 : vector<16x16x4xbf16> to vector<256x4xbf16>
    %c0_65 = arith.constant 0 : index
    %c0_66 = arith.constant 0 : index
    %66 = vector.load %arg11[%c0_65, %c0_66] : memref<256x8xf32, #tpu.memory_space<vmem>>, vector<256x8xf32>
    %c7 = arith.constant 7 : index
    %c0_67 = arith.constant 0 : index
    %c0_68 = arith.constant 0 : index
    %67 = vector.load %arg2[%c7, %c0_67, %c0_68] : memref<9x4x8xbf16, #tpu.memory_space<vmem>>, vector<1x4x8xbf16>
    %68 = vector.shape_cast %67 : vector<1x4x8xbf16> to vector<4x8xbf16>
    %cst_69 = arith.constant dense<0.000000e+00> : vector<256x8xf32>
    %69 = tpu.matmul %65, %68, %cst_69 {dimension_numbers = #tpu.dot_dimension_numbers<[1], [0], [0], [1], [0, 0, 1, 1], [], []>} : vector<256x4xbf16>, vector<4x8xbf16>, vector<256x8xf32> -> vector<256x8xf32>
    %70 = arith.addf %66, %69 : vector<256x8xf32>
    %c0_70 = arith.constant 0 : index
    %c0_71 = arith.constant 0 : index
    %71 = vector.load %arg11[%c0_70, %c0_71] : memref<256x8xf32, #tpu.memory_space<vmem>>, vector<256x8xf32>
    tpu.vector_store %arg11[%c0_70, %c0_71], %70 {strides = array<i32>} : memref<256x8xf32, #tpu.memory_space<vmem>>, vector<256x8xf32>,
    %72 = vector.extract_strided_slice %5 {offsets = [2, 2, 0], sizes = [16, 16, 4], strides = [1, 1, 1]} : vector<18x18x4xbf16> to vector<16x16x4xbf16>
    %73 = vector.shape_cast %72 : vector<16x16x4xbf16> to vector<256x4xbf16>
    %c0_72 = arith.constant 0 : index
    %c0_73 = arith.constant 0 : index
    %74 = vector.load %arg11[%c0_72, %c0_73] : memref<256x8xf32, #tpu.memory_space<vmem>>, vector<256x8xf32>
    %c8 = arith.constant 8 : index
    %c0_74 = arith.constant 0 : index
    %c0_75 = arith.constant 0 : index
    %75 = vector.load %arg2[%c8, %c0_74, %c0_75] : memref<9x4x8xbf16, #tpu.memory_space<vmem>>, vector<1x4x8xbf16>
    %76 = vector.shape_cast %75 : vector<1x4x8xbf16> to vector<4x8xbf16>
    %cst_76 = arith.constant dense<0.000000e+00> : vector<256x8xf32>
    %77 = tpu.matmul %73, %76, %cst_76 {dimension_numbers = #tpu.dot_dimension_numbers<[1], [0], [0], [1], [0, 0, 1, 1], [], []>} : vector<256x4xbf16>, vector<4x8xbf16>, vector<256x8xf32> -> vector<256x8xf32>
    %78 = arith.addf %74, %77 : vector<256x8xf32>
    %c0_77 = arith.constant 0 : index
    %c0_78 = arith.constant 0 : index
    %79 = vector.load %arg11[%c0_77, %c0_78] : memref<256x8xf32, #tpu.memory_space<vmem>>, vector<256x8xf32>
    tpu.vector_store %arg11[%c0_77, %c0_78], %78 {strides = array<i32>} : memref<256x8xf32, #tpu.memory_space<vmem>>, vector<256x8xf32>,
    %c0_79 = arith.constant 0 : index
    %c0_80 = arith.constant 0 : index
    %80 = vector.load %arg11[%c0_79, %c0_80] : memref<256x8xf32, #tpu.memory_space<vmem>>, vector<256x8xf32>
    %c0_81 = arith.constant 0 : index
    %c0_82 = arith.constant 0 : index
    %81 = vector.load %arg3[%c0_81, %c0_82] : memref<1x8xf32, #tpu.memory_space<vmem>>, vector<1x8xf32>
    %82 = vector.broadcast %81 : vector<1x8xf32> to vector<256x8xf32>
    %83 = arith.mulf %80, %82 : vector<256x8xf32>
    %c0_83 = arith.constant 0 : index
    %c0_84 = arith.constant 0 : index
    %84 = vector.load %arg4[%c0_83, %c0_84] : memref<1x8xf32, #tpu.memory_space<vmem>>, vector<1x8xf32>
    %85 = vector.broadcast %84 : vector<1x8xf32> to vector<256x8xf32>
    %86 = arith.addf %83, %85 : vector<256x8xf32>
    %cst_85 = arith.constant 0.000000e+00 : f32
    %87 = vector.broadcast %cst_85 : f32 to vector<256x8xf32>
    %88 = arith.maximumf %86, %87 : vector<256x8xf32>
    %cst_86 = arith.constant 0.000000e+00 : bf16
    %89 = vector.broadcast %cst_86 : bf16 to vector<18x18x8xbf16>
    %c0_87 = arith.constant 0 : index
    %c0_88 = arith.constant 0 : index
    %c0_89 = arith.constant 0 : index
    %90 = vector.load %arg10[%c0_87, %c0_88, %c0_89] : memref<18x18x8xbf16, #tpu.memory_space<vmem>>, vector<18x18x8xbf16>
    tpu.vector_store %arg10[%c0_87, %c0_88, %c0_89], %89 {strides = array<i32>} : memref<18x18x8xbf16, #tpu.memory_space<vmem>>, vector<18x18x8xbf16>,
    %91 = vector.shape_cast %88 : vector<256x8xf32> to vector<16x16x8xf32>
    %92 = arith.truncf %91 : vector<16x16x8xf32> to vector<16x16x8xbf16>
    %c1_90 = arith.constant 1 : index
    %c1_91 = arith.constant 1 : index
    %c0_92 = arith.constant 0 : index
    %93 = vector.load %arg10[%c1_90, %c1_91, %c0_92] : memref<18x18x8xbf16, #tpu.memory_space<vmem>>, vector<16x16x8xbf16>
    tpu.vector_store %arg10[%c1_90, %c1_91, %c0_92], %92 {strides = array<i32>} : memref<18x18x8xbf16, #tpu.memory_space<vmem>>, vector<16x16x8xbf16>,
    %c0_93 = arith.constant 0 : index
    %c0_94 = arith.constant 0 : index
    %c0_95 = arith.constant 0 : index
    %94 = vector.load %arg10[%c0_93, %c0_94, %c0_95] : memref<18x18x8xbf16, #tpu.memory_space<vmem>>, vector<18x18x8xbf16>
    %cst_96 = arith.constant 0.000000e+00 : f32
    %95 = vector.broadcast %cst_96 : f32 to vector<256x8xf32>
    %c0_97 = arith.constant 0 : index
    %c0_98 = arith.constant 0 : index
    %96 = vector.load %arg12[%c0_97, %c0_98] : memref<256x8xf32, #tpu.memory_space<vmem>>, vector<256x8xf32>
    tpu.vector_store %arg12[%c0_97, %c0_98], %95 {strides = array<i32>} : memref<256x8xf32, #tpu.memory_space<vmem>>, vector<256x8xf32>,
    %97 = vector.extract_strided_slice %94 {offsets = [0, 0, 0], sizes = [16, 16, 8], strides = [1, 1, 1]} : vector<18x18x8xbf16> to vector<16x16x8xbf16>
    %98 = vector.shape_cast %97 : vector<16x16x8xbf16> to vector<256x8xbf16>
    %c0_99 = arith.constant 0 : index
    %c0_100 = arith.constant 0 : index
    %99 = vector.load %arg12[%c0_99, %c0_100] : memref<256x8xf32, #tpu.memory_space<vmem>>, vector<256x8xf32>
    %c0_101 = arith.constant 0 : index
    %c0_102 = arith.constant 0 : index
    %c0_103 = arith.constant 0 : index
    %100 = vector.load %arg5[%c0_101, %c0_102, %c0_103] : memref<9x8x8xbf16, #tpu.memory_space<vmem>>, vector<1x8x8xbf16>
    %101 = vector.shape_cast %100 : vector<1x8x8xbf16> to vector<8x8xbf16>
    %cst_104 = arith.constant dense<0.000000e+00> : vector<256x8xf32>
    %102 = tpu.matmul %98, %101, %cst_104 {dimension_numbers = #tpu.dot_dimension_numbers<[1], [0], [0], [1], [0, 0, 1, 1], [], []>} : vector<256x8xbf16>, vector<8x8xbf16>, vector<256x8xf32> -> vector<256x8xf32>
    %103 = arith.addf %99, %102 : vector<256x8xf32>
    %c0_105 = arith.constant 0 : index
    %c0_106 = arith.constant 0 : index
    %104 = vector.load %arg12[%c0_105, %c0_106] : memref<256x8xf32, #tpu.memory_space<vmem>>, vector<256x8xf32>
    tpu.vector_store %arg12[%c0_105, %c0_106], %103 {strides = array<i32>} : memref<256x8xf32, #tpu.memory_space<vmem>>, vector<256x8xf32>,
    %105 = vector.extract_strided_slice %94 {offsets = [0, 1, 0], sizes = [16, 16, 8], strides = [1, 1, 1]} : vector<18x18x8xbf16> to vector<16x16x8xbf16>
    %106 = vector.shape_cast %105 : vector<16x16x8xbf16> to vector<256x8xbf16>
    %c0_107 = arith.constant 0 : index
    %c0_108 = arith.constant 0 : index
    %107 = vector.load %arg12[%c0_107, %c0_108] : memref<256x8xf32, #tpu.memory_space<vmem>>, vector<256x8xf32>
    %c1_109 = arith.constant 1 : index
    %c0_110 = arith.constant 0 : index
    %c0_111 = arith.constant 0 : index
    %108 = vector.load %arg5[%c1_109, %c0_110, %c0_111] : memref<9x8x8xbf16, #tpu.memory_space<vmem>>, vector<1x8x8xbf16>
    %109 = vector.shape_cast %108 : vector<1x8x8xbf16> to vector<8x8xbf16>
    %cst_112 = arith.constant dense<0.000000e+00> : vector<256x8xf32>
    %110 = tpu.matmul %106, %109, %cst_112 {dimension_numbers = #tpu.dot_dimension_numbers<[1], [0], [0], [1], [0, 0, 1, 1], [], []>} : vector<256x8xbf16>, vector<8x8xbf16>, vector<256x8xf32> -> vector<256x8xf32>
    %111 = arith.addf %107, %110 : vector<256x8xf32>
    %c0_113 = arith.constant 0 : index
    %c0_114 = arith.constant 0 : index
    %112 = vector.load %arg12[%c0_113, %c0_114] : memref<256x8xf32, #tpu.memory_space<vmem>>, vector<256x8xf32>
    tpu.vector_store %arg12[%c0_113, %c0_114], %111 {strides = array<i32>} : memref<256x8xf32, #tpu.memory_space<vmem>>, vector<256x8xf32>,
    %113 = vector.extract_strided_slice %94 {offsets = [0, 2, 0], sizes = [16, 16, 8], strides = [1, 1, 1]} : vector<18x18x8xbf16> to vector<16x16x8xbf16>
    %114 = vector.shape_cast %113 : vector<16x16x8xbf16> to vector<256x8xbf16>
    %c0_115 = arith.constant 0 : index
    %c0_116 = arith.constant 0 : index
    %115 = vector.load %arg12[%c0_115, %c0_116] : memref<256x8xf32, #tpu.memory_space<vmem>>, vector<256x8xf32>
    %c2_117 = arith.constant 2 : index
    %c0_118 = arith.constant 0 : index
    %c0_119 = arith.constant 0 : index
    %116 = vector.load %arg5[%c2_117, %c0_118, %c0_119] : memref<9x8x8xbf16, #tpu.memory_space<vmem>>, vector<1x8x8xbf16>
    %117 = vector.shape_cast %116 : vector<1x8x8xbf16> to vector<8x8xbf16>
    %cst_120 = arith.constant dense<0.000000e+00> : vector<256x8xf32>
    %118 = tpu.matmul %114, %117, %cst_120 {dimension_numbers = #tpu.dot_dimension_numbers<[1], [0], [0], [1], [0, 0, 1, 1], [], []>} : vector<256x8xbf16>, vector<8x8xbf16>, vector<256x8xf32> -> vector<256x8xf32>
    %119 = arith.addf %115, %118 : vector<256x8xf32>
    %c0_121 = arith.constant 0 : index
    %c0_122 = arith.constant 0 : index
    %120 = vector.load %arg12[%c0_121, %c0_122] : memref<256x8xf32, #tpu.memory_space<vmem>>, vector<256x8xf32>
    tpu.vector_store %arg12[%c0_121, %c0_122], %119 {strides = array<i32>} : memref<256x8xf32, #tpu.memory_space<vmem>>, vector<256x8xf32>,
    %121 = vector.extract_strided_slice %94 {offsets = [1, 0, 0], sizes = [16, 16, 8], strides = [1, 1, 1]} : vector<18x18x8xbf16> to vector<16x16x8xbf16>
    %122 = vector.shape_cast %121 : vector<16x16x8xbf16> to vector<256x8xbf16>
    %c0_123 = arith.constant 0 : index
    %c0_124 = arith.constant 0 : index
    %123 = vector.load %arg12[%c0_123, %c0_124] : memref<256x8xf32, #tpu.memory_space<vmem>>, vector<256x8xf32>
    %c3_125 = arith.constant 3 : index
    %c0_126 = arith.constant 0 : index
    %c0_127 = arith.constant 0 : index
    %124 = vector.load %arg5[%c3_125, %c0_126, %c0_127] : memref<9x8x8xbf16, #tpu.memory_space<vmem>>, vector<1x8x8xbf16>
    %125 = vector.shape_cast %124 : vector<1x8x8xbf16> to vector<8x8xbf16>
    %cst_128 = arith.constant dense<0.000000e+00> : vector<256x8xf32>
    %126 = tpu.matmul %122, %125, %cst_128 {dimension_numbers = #tpu.dot_dimension_numbers<[1], [0], [0], [1], [0, 0, 1, 1], [], []>} : vector<256x8xbf16>, vector<8x8xbf16>, vector<256x8xf32> -> vector<256x8xf32>
    %127 = arith.addf %123, %126 : vector<256x8xf32>
    %c0_129 = arith.constant 0 : index
    %c0_130 = arith.constant 0 : index
    %128 = vector.load %arg12[%c0_129, %c0_130] : memref<256x8xf32, #tpu.memory_space<vmem>>, vector<256x8xf32>
    tpu.vector_store %arg12[%c0_129, %c0_130], %127 {strides = array<i32>} : memref<256x8xf32, #tpu.memory_space<vmem>>, vector<256x8xf32>,
    %129 = vector.extract_strided_slice %94 {offsets = [1, 1, 0], sizes = [16, 16, 8], strides = [1, 1, 1]} : vector<18x18x8xbf16> to vector<16x16x8xbf16>
    %130 = vector.shape_cast %129 : vector<16x16x8xbf16> to vector<256x8xbf16>
    %c0_131 = arith.constant 0 : index
    %c0_132 = arith.constant 0 : index
    %131 = vector.load %arg12[%c0_131, %c0_132] : memref<256x8xf32, #tpu.memory_space<vmem>>, vector<256x8xf32>
    %c4_133 = arith.constant 4 : index
    %c0_134 = arith.constant 0 : index
    %c0_135 = arith.constant 0 : index
    %132 = vector.load %arg5[%c4_133, %c0_134, %c0_135] : memref<9x8x8xbf16, #tpu.memory_space<vmem>>, vector<1x8x8xbf16>
    %133 = vector.shape_cast %132 : vector<1x8x8xbf16> to vector<8x8xbf16>
    %cst_136 = arith.constant dense<0.000000e+00> : vector<256x8xf32>
    %134 = tpu.matmul %130, %133, %cst_136 {dimension_numbers = #tpu.dot_dimension_numbers<[1], [0], [0], [1], [0, 0, 1, 1], [], []>} : vector<256x8xbf16>, vector<8x8xbf16>, vector<256x8xf32> -> vector<256x8xf32>
    %135 = arith.addf %131, %134 : vector<256x8xf32>
    %c0_137 = arith.constant 0 : index
    %c0_138 = arith.constant 0 : index
    %136 = vector.load %arg12[%c0_137, %c0_138] : memref<256x8xf32, #tpu.memory_space<vmem>>, vector<256x8xf32>
    tpu.vector_store %arg12[%c0_137, %c0_138], %135 {strides = array<i32>} : memref<256x8xf32, #tpu.memory_space<vmem>>, vector<256x8xf32>,
    %137 = vector.extract_strided_slice %94 {offsets = [1, 2, 0], sizes = [16, 16, 8], strides = [1, 1, 1]} : vector<18x18x8xbf16> to vector<16x16x8xbf16>
    %138 = vector.shape_cast %137 : vector<16x16x8xbf16> to vector<256x8xbf16>
    %c0_139 = arith.constant 0 : index
    %c0_140 = arith.constant 0 : index
    %139 = vector.load %arg12[%c0_139, %c0_140] : memref<256x8xf32, #tpu.memory_space<vmem>>, vector<256x8xf32>
    %c5_141 = arith.constant 5 : index
    %c0_142 = arith.constant 0 : index
    %c0_143 = arith.constant 0 : index
    %140 = vector.load %arg5[%c5_141, %c0_142, %c0_143] : memref<9x8x8xbf16, #tpu.memory_space<vmem>>, vector<1x8x8xbf16>
    %141 = vector.shape_cast %140 : vector<1x8x8xbf16> to vector<8x8xbf16>
    %cst_144 = arith.constant dense<0.000000e+00> : vector<256x8xf32>
    %142 = tpu.matmul %138, %141, %cst_144 {dimension_numbers = #tpu.dot_dimension_numbers<[1], [0], [0], [1], [0, 0, 1, 1], [], []>} : vector<256x8xbf16>, vector<8x8xbf16>, vector<256x8xf32> -> vector<256x8xf32>
    %143 = arith.addf %139, %142 : vector<256x8xf32>
    %c0_145 = arith.constant 0 : index
    %c0_146 = arith.constant 0 : index
    %144 = vector.load %arg12[%c0_145, %c0_146] : memref<256x8xf32, #tpu.memory_space<vmem>>, vector<256x8xf32>
    tpu.vector_store %arg12[%c0_145, %c0_146], %143 {strides = array<i32>} : memref<256x8xf32, #tpu.memory_space<vmem>>, vector<256x8xf32>,
    %145 = vector.extract_strided_slice %94 {offsets = [2, 0, 0], sizes = [16, 16, 8], strides = [1, 1, 1]} : vector<18x18x8xbf16> to vector<16x16x8xbf16>
    %146 = vector.shape_cast %145 : vector<16x16x8xbf16> to vector<256x8xbf16>
    %c0_147 = arith.constant 0 : index
    %c0_148 = arith.constant 0 : index
    %147 = vector.load %arg12[%c0_147, %c0_148] : memref<256x8xf32, #tpu.memory_space<vmem>>, vector<256x8xf32>
    %c6_149 = arith.constant 6 : index
    %c0_150 = arith.constant 0 : index
    %c0_151 = arith.constant 0 : index
    %148 = vector.load %arg5[%c6_149, %c0_150, %c0_151] : memref<9x8x8xbf16, #tpu.memory_space<vmem>>, vector<1x8x8xbf16>
    %149 = vector.shape_cast %148 : vector<1x8x8xbf16> to vector<8x8xbf16>
    %cst_152 = arith.constant dense<0.000000e+00> : vector<256x8xf32>
    %150 = tpu.matmul %146, %149, %cst_152 {dimension_numbers = #tpu.dot_dimension_numbers<[1], [0], [0], [1], [0, 0, 1, 1], [], []>} : vector<256x8xbf16>, vector<8x8xbf16>, vector<256x8xf32> -> vector<256x8xf32>
    %151 = arith.addf %147, %150 : vector<256x8xf32>
    %c0_153 = arith.constant 0 : index
    %c0_154 = arith.constant 0 : index
    %152 = vector.load %arg12[%c0_153, %c0_154] : memref<256x8xf32, #tpu.memory_space<vmem>>, vector<256x8xf32>
    tpu.vector_store %arg12[%c0_153, %c0_154], %151 {strides = array<i32>} : memref<256x8xf32, #tpu.memory_space<vmem>>, vector<256x8xf32>,
    %153 = vector.extract_strided_slice %94 {offsets = [2, 1, 0], sizes = [16, 16, 8], strides = [1, 1, 1]} : vector<18x18x8xbf16> to vector<16x16x8xbf16>
    %154 = vector.shape_cast %153 : vector<16x16x8xbf16> to vector<256x8xbf16>
    %c0_155 = arith.constant 0 : index
    %c0_156 = arith.constant 0 : index
    %155 = vector.load %arg12[%c0_155, %c0_156] : memref<256x8xf32, #tpu.memory_space<vmem>>, vector<256x8xf32>
    %c7_157 = arith.constant 7 : index
    %c0_158 = arith.constant 0 : index
    %c0_159 = arith.constant 0 : index
    %156 = vector.load %arg5[%c7_157, %c0_158, %c0_159] : memref<9x8x8xbf16, #tpu.memory_space<vmem>>, vector<1x8x8xbf16>
    %157 = vector.shape_cast %156 : vector<1x8x8xbf16> to vector<8x8xbf16>
    %cst_160 = arith.constant dense<0.000000e+00> : vector<256x8xf32>
    %158 = tpu.matmul %154, %157, %cst_160 {dimension_numbers = #tpu.dot_dimension_numbers<[1], [0], [0], [1], [0, 0, 1, 1], [], []>} : vector<256x8xbf16>, vector<8x8xbf16>, vector<256x8xf32> -> vector<256x8xf32>
    %159 = arith.addf %155, %158 : vector<256x8xf32>
    %c0_161 = arith.constant 0 : index
    %c0_162 = arith.constant 0 : index
    %160 = vector.load %arg12[%c0_161, %c0_162] : memref<256x8xf32, #tpu.memory_space<vmem>>, vector<256x8xf32>
    tpu.vector_store %arg12[%c0_161, %c0_162], %159 {strides = array<i32>} : memref<256x8xf32, #tpu.memory_space<vmem>>, vector<256x8xf32>,
    %161 = vector.extract_strided_slice %94 {offsets = [2, 2, 0], sizes = [16, 16, 8], strides = [1, 1, 1]} : vector<18x18x8xbf16> to vector<16x16x8xbf16>
    %162 = vector.shape_cast %161 : vector<16x16x8xbf16> to vector<256x8xbf16>
    %c0_163 = arith.constant 0 : index
    %c0_164 = arith.constant 0 : index
    %163 = vector.load %arg12[%c0_163, %c0_164] : memref<256x8xf32, #tpu.memory_space<vmem>>, vector<256x8xf32>
    %c8_165 = arith.constant 8 : index
    %c0_166 = arith.constant 0 : index
    %c0_167 = arith.constant 0 : index
    %164 = vector.load %arg5[%c8_165, %c0_166, %c0_167] : memref<9x8x8xbf16, #tpu.memory_space<vmem>>, vector<1x8x8xbf16>
    %165 = vector.shape_cast %164 : vector<1x8x8xbf16> to vector<8x8xbf16>
    %cst_168 = arith.constant dense<0.000000e+00> : vector<256x8xf32>
    %166 = tpu.matmul %162, %165, %cst_168 {dimension_numbers = #tpu.dot_dimension_numbers<[1], [0], [0], [1], [0, 0, 1, 1], [], []>} : vector<256x8xbf16>, vector<8x8xbf16>, vector<256x8xf32> -> vector<256x8xf32>
    %167 = arith.addf %163, %166 : vector<256x8xf32>
    %c0_169 = arith.constant 0 : index
    %c0_170 = arith.constant 0 : index
    %168 = vector.load %arg12[%c0_169, %c0_170] : memref<256x8xf32, #tpu.memory_space<vmem>>, vector<256x8xf32>
    tpu.vector_store %arg12[%c0_169, %c0_170], %167 {strides = array<i32>} : memref<256x8xf32, #tpu.memory_space<vmem>>, vector<256x8xf32>,
    %c0_171 = arith.constant 0 : index
    %c0_172 = arith.constant 0 : index
    %169 = vector.load %arg12[%c0_171, %c0_172] : memref<256x8xf32, #tpu.memory_space<vmem>>, vector<256x8xf32>
    %c0_173 = arith.constant 0 : index
    %c0_174 = arith.constant 0 : index
    %170 = vector.load %arg6[%c0_173, %c0_174] : memref<1x8xf32, #tpu.memory_space<vmem>>, vector<1x8xf32>
    %171 = vector.broadcast %170 : vector<1x8xf32> to vector<256x8xf32>
    %172 = arith.mulf %169, %171 : vector<256x8xf32>
    %c0_175 = arith.constant 0 : index
    %c0_176 = arith.constant 0 : index
    %173 = vector.load %arg7[%c0_175, %c0_176] : memref<1x8xf32, #tpu.memory_space<vmem>>, vector<1x8xf32>
    %174 = vector.broadcast %173 : vector<1x8xf32> to vector<256x8xf32>
    %175 = arith.addf %172, %174 : vector<256x8xf32>
    %cst_177 = arith.constant 0.000000e+00 : f32
    %176 = vector.broadcast %cst_177 : f32 to vector<256x8xf32>
    %177 = arith.maximumf %175, %176 : vector<256x8xf32>
    %178 = vector.shape_cast %177 : vector<256x8xf32> to vector<1x16x16x8xf32>
    %c0_178 = arith.constant 0 : index
    %c0_179 = arith.constant 0 : index
    %c0_180 = arith.constant 0 : index
    %c0_181 = arith.constant 0 : index
    %179 = vector.load %arg8[%c0_178, %c0_179, %c0_180, %c0_181] : memref<1x16x16x8xf32, #tpu.memory_space<vmem>>, vector<1x16x16x8xf32>
    tpu.vector_store %arg8[%c0_178, %c0_179, %c0_180, %c0_181], %178 {strides = array<i32>} : memref<1x16x16x8xf32, #tpu.memory_space<vmem>>, vector<1x16x16x8xf32>,
    return
  }
  func.func @transform_0(%arg0: i32) -> (i32, i32, i32, i32) {
    %c0_i32 = arith.constant 0 : i32
    %c0_i32_0 = arith.constant 0 : i32
    %c0_i32_1 = arith.constant 0 : i32
    %c0_i32_2 = arith.constant 0 : i32
    return %arg0, %c0_i32, %c0_i32_0, %c0_i32_1 : i32, i32, i32, i32
  }
  func.func @transform_1(%arg0: i32) -> (i32, i32, i32) {
    %c0_i32 = arith.constant 0 : i32
    %c0_i32_0 = arith.constant 0 : i32
    %c0_i32_1 = arith.constant 0 : i32
    %c0_i32_2 = arith.constant 0 : i32
    return %c0_i32, %c0_i32_0, %c0_i32_1 : i32, i32, i32
  }
  func.func @transform_2(%arg0: i32) -> (i32, i32) {
    %c0_i32 = arith.constant 0 : i32
    %c0_i32_0 = arith.constant 0 : i32
    %c0_i32_1 = arith.constant 0 : i32
    return %c0_i32, %c0_i32_0 : i32, i32
  }
  func.func @transform_3(%arg0: i32) -> (i32, i32) {
    %c0_i32 = arith.constant 0 : i32
    %c0_i32_0 = arith.constant 0 : i32
    %c0_i32_1 = arith.constant 0 : i32
    return %c0_i32, %c0_i32_0 : i32, i32
  }
  func.func @transform_4(%arg0: i32) -> (i32, i32, i32) {
    %c0_i32 = arith.constant 0 : i32
    %c0_i32_0 = arith.constant 0 : i32
    %c0_i32_1 = arith.constant 0 : i32
    %c0_i32_2 = arith.constant 0 : i32
    return %c0_i32, %c0_i32_0, %c0_i32_1 : i32, i32, i32
  }
  func.func @transform_5(%arg0: i32) -> (i32, i32) {
    %c0_i32 = arith.constant 0 : i32
    %c0_i32_0 = arith.constant 0 : i32
    %c0_i32_1 = arith.constant 0 : i32
    return %c0_i32, %c0_i32_0 : i32, i32
  }
  func.func @transform_6(%arg0: i32) -> (i32, i32) {
    %c0_i32 = arith.constant 0 : i32
    %c0_i32_0 = arith.constant 0 : i32
    %c0_i32_1 = arith.constant 0 : i32
    return %c0_i32, %c0_i32_0 : i32, i32
  }
  func.func @transform_7(%arg0: i32) -> (i32, i32, i32, i32) {
    %c0_i32 = arith.constant 0 : i32
    %c0_i32_0 = arith.constant 0 : i32
    %c0_i32_1 = arith.constant 0 : i32
    %c0_i32_2 = arith.constant 0 : i32
    return %arg0, %c0_i32, %c0_i32_0, %c0_i32_1 : i32, i32, i32, i32
  }
}

</mosaic_0001>

<bundles_post_ra>
// kernel: double_conv.1
= control target key start
LH: loop header
LB: loop body
LE: loop exit
PB: predicated region body
PF: predicated region fallthrough
CT: control target
= control target key end

     0   :  { %s10121_s24 = smov 0   ;;  %s13887_s0 = inlined_call_operand.vmem [shape: bf16[2,16,16,4], index: 0, kind: input, shape index: {}]   ;;  %s13888_s1 = inlined_call_operand.vmem [shape: bf16[9,4,8], index: 1, kind: input, shape index: {}]   ;;  %s13889_s2 = inlined_call_operand.vmem [shape: f32[1,8], index: 2, kind: input, shape index: {}]   ;;  %s13890_s3 = inlined_call_operand.vmem [shape: f32[1,8], index: 3, kind: input, shape index: {}]   ;;  %s13891_s4 = inlined_call_operand.vmem [shape: bf16[9,8,8], index: 4, kind: input, shape index: {}]   ;;  %s13892_s5 = inlined_call_operand.vmem [shape: f32[1,8], index: 5, kind: input, shape index: {}]   ;;  %s13893_s6 = inlined_call_operand.vmem [shape: f32[1,8], index: 6, kind: input, shape index: {}]   ;;  %s13894_s7 = inlined_call_operand.vmem [shape: f32[2,16,16,8], index: 7, kind: output, shape index: {}]  }
   0x1 LB: > { %s8537_s25 = sadd.s32 4294967295, %s10077_s24   ;;  %p8541_p0 = scmp.ge.s32.totalorder %s10077_s24, 1  ;;  %s10077_s24 = sphi %s10121_s24, %s17_s24  }
   0x2   : > { %p237_p1 = scmp.lt.s32.totalorder %s10077_s24, 3 }
   0x4   : > { %p238_p2 = pnand %p8541_p0, %p237_p1 }
   0x6   : > { %241 = sbr.rel (%p238_p2) target bundleno = 1240 (0x4d8), region = 48 }
   0xd   : > { %v928_v0 = vld [vmem:[%s13888_s1] sm:$0x3]  ;;  %vm1058_vm0 = vcmask 1041408   ;;  %vm280_vm1 = vcmask 27648   ;;  %v13895_v2 = vmov 0   ;;  %p269_p3 = scmp.lt.s32.totalorder %s8537_s25, 1 }
   0xe   : > { %9984 = vmatprep.subr.msk.bf16.mxu0 %vm1058_vm0, %v928_v0  ;;  %v1060_v1 = vsel %vm1058_vm0, %v928_v0, 0  ;;  %281 = vst.msk [vmem:[#allocation2] sm:$0xf] %vm280_vm1, %v13895_v2  ;;  %282 = vst.msk [vmem:[#allocation2 + $0x4] sm:$0xf] %vm280_vm1, %v13895_v2  ;;  %vm4339_vm2 = vcmask 60416  }
   0xf   : > { %285 = vst.msk [vmem:[#allocation2 + $0xc] sm:$0xf] %vm280_vm1, %v13895_v2  ;;  %286 = vst.msk [vmem:[#allocation2 + $0x10] sm:$0xf] %vm280_vm1, %v13895_v2  ;;  %v10209_v3 = vld [vmem:[%s13888_s1 + $0x4] sm:$0x3]  ;;  %9373 = vmatpush3.bf16.msra.mxu0 %v1060_v1 }
  0x10   : > { %288 = vst.msk [vmem:[#allocation2 + $0x18] sm:$0xf] %vm280_vm1, %v13895_v2  ;;  %289 = vst.msk [vmem:[#allocation2 + $0x1c] sm:$0xf] %vm280_vm1, %v13895_v2  ;;  %9986 = vmatprep.subr.msk.bf16.mxu0 %vm1058_vm0, %v10209_v3  ;;  %s14252_s25 = smov (!%p269_p3, %s8537_s25), 1  ;;  %vm283_vm3 = vcmask 24576  }
  0x11   : > { %291 = vst.msk [vmem:[#allocation2 + $0x24] sm:$0xf] %vm280_vm1, %v13895_v2  ;;  %292 = vst.msk [vmem:[#allocation2 + $0x28] sm:$0xf] %vm280_vm1, %v13895_v2  ;;  %v8578_v4 = vld [vmem:[%s13888_s1 + $0x2] sm:$0x3] }
  0x12   : > { %294 = vst.msk [vmem:[#allocation2 + $0x30] sm:$0xf] %vm280_vm1, %v13895_v2  ;;  %295 = vst.msk [vmem:[#allocation2 + $0x34] sm:$0xf] %vm280_vm1, %v13895_v2  ;;  %9985 = vmatprep.subr.msk.bf16.mxu1 %vm1058_vm0, %v8578_v4  ;;  %v1805_v5 = vsel %vm1058_vm0, %v8578_v4, 0  ;;  %vm1009_vm4 = vcmask 31744  }
  0x13   : > { %297 = vst.msk [vmem:[#allocation2 + $0x3c] sm:$0xf] %vm280_vm1, %v13895_v2  ;;  %298 = vst.msk [vmem:[#allocation2 + $0x40] sm:$0xf] %vm280_vm1, %v13895_v2  ;;  %v8660_v6 = vld [vmem:[%s13888_s1 + $0x6] sm:$0x3]  ;;  %9407 = vmatpush3.bf16.msra.mxu1 %v1805_v5 }
  0x14   : > { %300 = vst.msk [vmem:[#allocation2 + $0x48] sm:$0xf] %vm280_vm1, %v13895_v2  ;;  %301 = vst.msk [vmem:[#allocation2 + $0x4c] sm:$0xf] %vm280_vm1, %v13895_v2  ;;  %s9032_s11 = sshll.u32 %s14252_s25, 7  ;;  %v10343_v7 = vsel %vm1058_vm0, %v10209_v3, 0  ;;  %9987 = vmatprep.subr.msk.bf16.mxu1 %vm1058_vm0, %v8660_v6 }
  0x15   : > { %303 = vst.msk [vmem:[#allocation2 + $0x54] sm:$0xf] %vm280_vm1, %v13895_v2  ;;  %304 = vst.msk [vmem:[#allocation2 + $0x58] sm:$0xf] %vm280_vm1, %v13895_v2  ;;  %vm368_vm5 = vsmask.f32 256  ;;  %s10339_s14 = scalar_lea.vmem %s13887_s0, %s9032_s11 }
  0x16   : > { %306 = vst.msk [vmem:[#allocation2 + $0x60] sm:$0xf] %vm280_vm1, %v13895_v2  ;;  %307 = vst.msk [vmem:[#allocation2 + $0x64] sm:$0xf] %vm280_vm1, %v13895_v2  ;;  %vm369_vm6 = vsmask.f32 4368 }
  0x17   : > { %309 = vst.msk [vmem:[#allocation2 + $0x6c] sm:$0xf] %vm280_vm1, %v13895_v2  ;;  %310 = vst.msk [vmem:[#allocation2 + $0x70] sm:$0xf] %vm280_vm1, %v13895_v2  ;;  %vm693_vm7 = vsmask.f32 7938 }
  0x18   : > { %312 = vst.msk [vmem:[#allocation2 + $0x78] sm:$0xf] %vm280_vm1, %v13895_v2  ;;  %313 = vst.msk [vmem:[#allocation2 + $0x7c] sm:$0xf] %vm280_vm1, %v13895_v2  ;;  %v10347_v8 = vsel %vm1058_vm0, %v8660_v6, 0  ;;  %v14030_v36 = vmov 0 }
  0x19   : > { %315 = vst.msk [vmem:[#allocation2 + $0x84] sm:$0xf] %vm280_vm1, %v13895_v2  ;;  %316 = vst.msk [vmem:[#allocation2 + $0x88] sm:$0xf] %vm280_vm1, %v13895_v2  ;;  %v336_v9 = vld [vmem:[%s10339_s14] sm:$0xf] }
  0x1a   : > { %318 = vst.msk [vmem:[#allocation2 + $0x90] sm:$0xf] %vm280_vm1, %v13895_v2  ;;  %319 = vst.msk [vmem:[#allocation2 + $0x94] sm:$0xf] %vm280_vm1, %v13895_v2  ;;  %v337_v10 = vld [vmem:[%s10339_s14 + $0x4] sm:$0xf] }
  0x1b   : > { %321 = vst.msk [vmem:[#allocation2 + $0x9c] sm:$0xf] %vm280_vm1, %v13895_v2  ;;  %322 = vst.msk [vmem:[#allocation2 + $0xa0] sm:$0xf] %vm280_vm1, %v13895_v2  ;;  %v338_v11 = vld [vmem:[%s10339_s14 + $0x8] sm:$0xf] }
  0x1c   : > { %324 = vst.msk [vmem:[#allocation2 + $0xa8] sm:$0xf] %vm280_vm1, %v13895_v2  ;;  %325 = vst.msk [vmem:[#allocation2 + $0xac] sm:$0xf] %vm280_vm1, %v13895_v2  ;;  %v10352_v12 = vld [vmem:[#allocation2] sm:$0xf] }
  0x1d   : > { %327 = vst.msk [vmem:[#allocation2 + $0xb4] sm:$0xf] %vm280_vm1, %v13895_v2  ;;  %328 = vst.msk [vmem:[#allocation2 + $0xb8] sm:$0xf] %vm280_vm1, %v13895_v2  ;;  %v10354_v13 = vld [vmem:[#allocation2 + $0x4] sm:$0xf] }
  0x1e   : > { %330 = vst.msk [vmem:[#allocation2 + $0xc0] sm:$0xf] %vm280_vm1, %v13895_v2  ;;  %331 = vst.msk [vmem:[#allocation2 + $0xc4] sm:$0xf] %vm280_vm1, %v13895_v2  ;;  %v372_v14 = vshrl.u32 %v336_v9, 16  ;;  %v375_v15 = vshll.u32 %v336_v9, 16  ;;  %v8546_v16 = vcombine.low %v10352_v12, %v10354_v13 }
  0x1f   : > { %333 = vst.msk [vmem:[#allocation2 + $0xcc] sm:$0xf] %vm280_vm1, %v13895_v2  ;;  %334 = vst.msk [vmem:[#allocation2 + $0xd0] sm:$0xf] %vm280_vm1, %v13895_v2  ;;  %v1291_v17 = vshrl.u32 %v10352_v12, 16  ;;  %v1294_v18 = vshll.u32 %v10352_v12, 16 }
  0x20   : > { %4340 = vst.msk [vmem:[#allocation3] sm:$0xf] %vm4339_vm2, %v13895_v2  ;;  %4341 = vst.msk [vmem:[#allocation3 + $0x4] sm:$0xf] %vm4339_vm2, %v13895_v2  ;;  %v1304_v19 = vshrl.u32 %v10354_v13, 16  ;;  %v8611_v20 = vrot.slane %v10352_v12, 9  ;;  %9374 = vmatprep.mubr.msk.bf16.mxu0 %vm1009_vm4, %v8546_v16 }
  0x21   : > { %4344 = vst.msk [vmem:[#allocation3 + $0xc] sm:$0xf] %vm4339_vm2, %v13895_v2  ;;  %4345 = vst.msk [vmem:[#allocation3 + $0x10] sm:$0xf] %vm4339_vm2, %v13895_v2  ;;  %v2053_v21 = vrot.slane %v10354_v13, 5  ;;  %v374_v22 = vrot.slane %v372_v14, 7 }
  0x22   : > { %4347 = vst.msk [vmem:[#allocation3 + $0x18] sm:$0xf] %vm4339_vm2, %v13895_v2  ;;  %4348 = vst.msk [vmem:[#allocation3 + $0x1c] sm:$0xf] %vm4339_vm2, %v13895_v2  ;;  %v380_v23 = vshrl.u32 %v337_v10, 16  ;;  %v383_v25 = vshll.u32 %v337_v10, 16 }
  0x23   : > { %4350 = vst.msk [vmem:[#allocation3 + $0x24] sm:$0xf] %vm4339_vm2, %v13895_v2  ;;  %4351 = vst.msk [vmem:[#allocation3 + $0x28] sm:$0xf] %vm4339_vm2, %v13895_v2  ;;  %v339_v24 = vld [vmem:[%s10339_s14 + $0xc] sm:$0xf]  ;;  %v377_v32 = vor.u32 %v375_v15, %v374_v22 }
  0x24   : > { %4353 = vst.msk [vmem:[#allocation3 + $0x30] sm:$0xf] %vm4339_vm2, %v13895_v2  ;;  %4354 = vst.msk [vmem:[#allocation3 + $0x34] sm:$0xf] %vm4339_vm2, %v13895_v2  ;;  %vm1287_vm8 = vsmask.f32 3328 }
  0x25   : > { %4356 = vst.msk [vmem:[#allocation3 + $0x3c] sm:$0xf] %vm4339_vm2, %v13895_v2  ;;  %4357 = vst.msk [vmem:[#allocation3 + $0x40] sm:$0xf] %vm4339_vm2, %v13895_v2  ;;  %vm1288_vm9 = vsmask.f32 7440 }
  0x26   : > { %4359 = vst.msk [vmem:[#allocation3 + $0x48] sm:$0xf] %vm4339_vm2, %v13895_v2  ;;  %4360 = vst.msk [vmem:[#allocation3 + $0x4c] sm:$0xf] %vm4339_vm2, %v13895_v2  ;;  %v695_v27 = vld [vmem:[#allocation2 + $0xc] sm:$0xf] }
  0x27   : > { %4362 = vst.msk [vmem:[#allocation3 + $0x54] sm:$0xf] %vm4339_vm2, %v13895_v2  ;;  %4363 = vst.msk [vmem:[#allocation3 + $0x58] sm:$0xf] %vm4339_vm2, %v13895_v2  ;;  %v389_v28 = vshrl.u32 %v338_v11, 16  ;;  %v392_v29 = vshll.u32 %v338_v11, 16 }
  0x28   : > { %4365 = vst.msk [vmem:[#allocation3 + $0x60] sm:$0xf] %vm4339_vm2, %v13895_v2  ;;  %4366 = vst.msk [vmem:[#allocation3 + $0x64] sm:$0xf] %vm4339_vm2, %v13895_v2  ;;  %v397_v30 = vshrl.u32 %v339_v24, 16  ;;  %v10373_v31 = vrot.slane %v2053_v21, 4 }
  0x29   : > { %4368 = vst.msk [vmem:[#allocation3 + $0x6c] sm:$0xf] %vm4339_vm2, %v13895_v2  ;;  %4369 = vst.msk [vmem:[#allocation3 + $0x70] sm:$0xf] %vm4339_vm2, %v13895_v2  ;;  %v378_v33 = vrot.slane %v374_v22, 4  ;;  %v382_v34 = vrot.slane %v380_v23, 7 }
  0x2a   : > { %4371 = vst.msk [vmem:[#allocation3 + $0x78] sm:$0xf] %vm4339_vm2, %v13895_v2  ;;  %4372 = vst.msk [vmem:[#allocation3 + $0x7c] sm:$0xf] %vm4339_vm2, %v13895_v2  ;;  %v340_v35 = vld [vmem:[%s10339_s14 + $0x10] sm:$0xf] }
  0x2b   : > { %4374 = vst.msk [vmem:[#allocation3 + $0x84] sm:$0xf] %vm4339_vm2, %v13895_v2  ;;  %4375 = vst.msk [vmem:[#allocation3 + $0x88] sm:$0xf] %vm4339_vm2, %v13895_v2  ;;  %v391_v37 = vrot.slane %v389_v28, 7  ;;  %v10382_v38 = vrot.slane %v397_v30, 7  ;;  %v385_v42 = vor.u32 %v383_v25, %v382_v34 }
  0x2c   : > { %4377 = vst.msk [vmem:[#allocation3 + $0x90] sm:$0xf] %vm4339_vm2, %v13895_v2  ;;  %4378 = vst.msk [vmem:[#allocation3 + $0x94] sm:$0xf] %vm4339_vm2, %v13895_v2  ;;  %v400_v39 = vshll.u32 %v339_v24, 16  ;;  %v406_v41 = vshrl.u32 %v340_v35, 16 }
  0x2d   : > { %4380 = vst.msk [vmem:[#allocation3 + $0x9c] sm:$0xf] %vm4339_vm2, %v13895_v2  ;;  %4381 = vst.msk [vmem:[#allocation3 + $0xa0] sm:$0xf] %vm4339_vm2, %v13895_v2  ;;  %v341_v40 = vld [vmem:[%s10339_s14 + $0x14] sm:$0xf]  ;;  %v394_v47 = vor.u32 %v392_v29, %v391_v37 }
  0x2e   : > { %4383 = vst.msk [vmem:[#allocation3 + $0xa8] sm:$0xf] %vm4339_vm2, %v13895_v2  ;;  %4384 = vst.msk [vmem:[#allocation3 + $0xac] sm:$0xf] %vm4339_vm2, %v13895_v2  ;;  %v704_v44 = vld [vmem:[#allocation2 + $0x18] sm:$0xf]  ;;  %v402_v49 = vor.u32 %v400_v39, %v10382_v38 }
  0x2f   : > { %4386 = vst.msk [vmem:[#allocation3 + $0xb4] sm:$0xf] %vm4339_vm2, %v13895_v2  ;;  %4387 = vst.msk [vmem:[#allocation3 + $0xb8] sm:$0xf] %vm4339_vm2, %v13895_v2  ;;  %v409_v45 = vshll.u32 %v340_v35, 16  ;;  %v414_v46 = vshrl.u32 %v341_v40, 16 }
  0x30   : > { %4389 = vst.msk [vmem:[#allocation3 + $0xc0] sm:$0xf] %vm4339_vm2, %v13895_v2  ;;  %4390 = vst.msk [vmem:[#allocation3 + $0xc4] sm:$0xf] %vm4339_vm2, %v13895_v2  ;;  %v395_v48 = vrot.slane %v391_v37, 4  ;;  %v408_v50 = vrot.slane %v406_v41, 7 }
  0x31   : > { %4392 = vst.msk [vmem:[#allocation3 + $0xcc] sm:$0xf] %vm4339_vm2, %v13895_v2  ;;  %4393 = vst.msk [vmem:[#allocation3 + $0xd0] sm:$0xf] %vm4339_vm2, %v13895_v2  ;;  %v711_v51 = vld [vmem:[#allocation2 + $0x24] sm:$0xf] }
  0x32   : > { %284 = vst.msk [vmem:[#allocation2 + $0x8] sm:$0x1] %vm283_vm3, %v13895_v2  ;;  %287 = vst.msk [vmem:[#allocation2 + $0x14] sm:$0x1] %vm283_vm3, %v13895_v2  ;;  %v10390_v53 = vrot.slane %v414_v46, 7  ;;  %v417_v54 = vshll.u32 %v341_v40, 16  ;;  %v411_v59 = vor.u32 %v409_v45, %v408_v50 }
  0x33   : > { %290 = vst.msk [vmem:[#allocation2 + $0x20] sm:$0x1] %vm283_vm3, %v13895_v2  ;;  %293 = vst.msk [vmem:[#allocation2 + $0x2c] sm:$0x1] %vm283_vm3, %v13895_v2  ;;  %v1293_v56 = vrot.slane %v1291_v17, 4  ;;  %v412_v60 = vrot.slane %v408_v50, 4 }
  0x34   : > { %296 = vst.msk [vmem:[#allocation2 + $0x38] sm:$0x1] %vm283_vm3, %v13895_v2  ;;  %299 = vst.msk [vmem:[#allocation2 + $0x44] sm:$0x1] %vm283_vm3, %v13895_v2  ;;  %v342_v62 = vld [vmem:[%s10339_s14 + $0x18] sm:$0xf]  ;;  %v419_v63 = vor.u32 %v417_v54, %v10390_v53 }
  0x35   : > { %302 = vst.msk [vmem:[#allocation2 + $0x50] sm:$0x1] %vm283_vm3, %v13895_v2  ;;  %305 = vst.msk [vmem:[#allocation2 + $0x5c] sm:$0x1] %vm283_vm3, %v13895_v2  ;;  %v1296_v0 = vrot.slane %v1294_v18, 5  ;;  %v1300_v1 = vshll.u32 %v10354_v13, 16 }
  0x36   : > { %308 = vst.msk [vmem:[#allocation2 + $0x68] sm:$0x1] %vm283_vm3, %v13895_v2  ;;  %311 = vst.msk [vmem:[#allocation2 + $0x74] sm:$0x1] %vm283_vm3, %v13895_v2  ;;  %v1306_v3 = vrot.slane %v1304_v19, 4  ;;  %v387_v11 = vrot.slane %v382_v34, 4 }
  0x37   : > { %314 = vst.msk [vmem:[#allocation2 + $0x80] sm:$0x1] %vm283_vm3, %v13895_v2  ;;  %317 = vst.msk [vmem:[#allocation2 + $0x8c] sm:$0x1] %vm283_vm3, %v13895_v2  ;;  %v343_v5 = vld [vmem:[%s10339_s14 + $0x1c] sm:$0xf]  ;;  %v1297_v15 = vor.u32 %v1296_v0, %v1293_v56 }
  0x38   : > { %320 = vst.msk [vmem:[#allocation2 + $0x98] sm:$0x1] %vm283_vm3, %v13895_v2  ;;  %323 = vst.msk [vmem:[#allocation2 + $0xa4] sm:$0x1] %vm283_vm3, %v13895_v2  ;;  %v1302_v16 = vrot.slane %v1300_v1, 5  ;;  %v423_v17 = vshrl.u32 %v342_v62, 16 }
  0x39   : > { %326 = vst.msk [vmem:[#allocation2 + $0xb0] sm:$0x1] %vm283_vm3, %v13895_v2  ;;  %329 = vst.msk [vmem:[#allocation2 + $0xbc] sm:$0x1] %vm283_vm3, %v13895_v2  ;;  %v10392_v55 = vld [vmem:[#allocation2 + $0x8] sm:$0x1] }
  0x3a   : > { %332 = vst.msk [vmem:[#allocation2 + $0xc8] sm:$0x1] %vm283_vm3, %v13895_v2  ;;  %335 = vst.msk [vmem:[#allocation2 + $0xd4] sm:$0x1] %vm283_vm3, %v13895_v2  ;;  %v701_v61 = vld [vmem:[#allocation2 + $0x14] sm:$0x1]  ;;  %v1307_v28 = vor.u32 %v1306_v3, %v1302_v16 }
  0x3b   : > { %vm10367_vm10 = vmand %vm280_vm1, %vm693_vm7  ;;  %v1310_v9 = vshll.u32 %v10392_v55, 16  ;;  %v426_v23 = vshll.u32 %v342_v62, 16  ;;  %v431_v24 = vshrl.u32 %v343_v5, 16  ;;  %v425_v29 = vrot.slane %v423_v17, 7  ;;  %v718_v56 = vld [vmem:[#allocation2 + $0x30] sm:$0xf] }
  0x3c   : > { %vm10378_vm11 = vmor %vm368_vm5, %vm369_vm6  ;;  %v696_v43 = vsel %vm10367_vm10, %v377_v32, %v695_v27  ;;  %v705_v58 = vsel %vm10367_vm10, %v394_v47, %v704_v44  ;;  %v712_v6 = vsel %vm10367_vm10, %v411_v59, %v711_v51  ;;  %v1298_v27 = vrot.slane %v1297_v15, 4  ;;  %v345_v15 = vld [vmem:[%s10339_s14 + $0x24] sm:$0xf]  ;;  %s9033_s19 = sshll.u32 %s14252_s25, 8 }
  0x3d   : > { %v14031_v36 = vsel %vm10378_vm11, 4294967295, %v14030_v36  ;;  %697 = vst [vmem:[#allocation2 + $0xc] sm:$0xf] %v696_v43  ;;  %v386_v52 = vsel %vm10378_vm11, %v378_v33, %v385_v42  ;;  %v403_v57 = vsel %vm10378_vm11, %v395_v48, %v402_v49  ;;  %706 = vst [vmem:[#allocation2 + $0x18] sm:$0xf] %v705_v58  ;;  %v420_v14 = vsel %vm10378_vm11, %v412_v60, %v419_v63  ;;  %s13733_s21 = scalar_lea.vmem %s13894_s7, %s9033_s19 }
  0x3e   : > { %14032 = vst [vmem:[#allocation6_spill] sm:$0xff] %v14031_v36  ;;  %698 = vst.msk [vmem:[#allocation2 + $0x10] sm:$0xf] %vm280_vm1, %v386_v52  ;;  %v1312_v19 = vrot.slane %v1310_v9, 5  ;;  %v434_v30 = vshll.u32 %v343_v5, 16  ;;  %v10430_v35 = vrot.slane %v431_v24, 7  ;;  %v428_v41 = vor.u32 %v426_v23, %v425_v29 }
  0x3f   : > { %707 = vst.msk [vmem:[#allocation2 + $0x1c] sm:$0xf] %vm280_vm1, %v403_v57  ;;  %vm10405_vm12 = vmand %vm283_vm3, %vm368_vm5  ;;  %v1308_v40 = vrot.slane %v1307_v28, 4  ;;  %v429_v42 = vrot.slane %v425_v29, 4  ;;  %v8678_v43 = vld [vmem:[%s13888_s1 + $0x8] sm:$0x3] }
  0x40   : > { %713 = vst [vmem:[#allocation2 + $0x24] sm:$0xf] %v712_v6  ;;  %714 = vst.msk [vmem:[#allocation2 + $0x28] sm:$0xf] %vm280_vm1, %v420_v14  ;;  %v702_v22 = vsel %vm10405_vm12, %v387_v11, %v701_v61  ;;  %v436_v49 = vor.u32 %v434_v30, %v10430_v35  ;;  %v344_v57 = vld [vmem:[%s10339_s14 + $0x20] sm:$0xf]  ;;  %v719_v24 = vsel %vm10367_vm10, %v428_v41, %v718_v56 }
  0x41   : > { %vm10419_vm13 = vmor %vm1287_vm8, %vm1288_vm9  ;;  %703 = vst [vmem:[#allocation2 + $0x14] sm:$0x1] %v702_v22  ;;  %v443_v28 = vshll.u32 %v344_v57, 16  ;;  %v725_v41 = vld [vmem:[#allocation2 + $0x3c] sm:$0xf]  ;;  %vm2048_vm14 = vcmask 1042432  }
  0x42   : > { %v1303_v39 = vsel %vm10419_vm13, %v1298_v27, %v1302_v16  ;;  %v1313_v60 = vsel %vm10419_vm13, %v1308_v40, %v1312_v19  ;;  %v437_v22 = vsel %vm10378_vm11, %v429_v42, %v436_v49  ;;  %v440_v27 = vshrl.u32 %v344_v57, 16  ;;  %720 = vst [vmem:[#allocation2 + $0x30] sm:$0xf] %v719_v24 }
  0x43   : > { %v8579_v3 = vcombine.low %v1303_v39, %v1313_v60  ;;  %721 = vst.msk [vmem:[#allocation2 + $0x34] sm:$0xf] %vm280_vm1, %v437_v22  ;;  %v708_v39 = vld [vmem:[#allocation2 + $0x20] sm:$0x1]  ;;  %v404_v42 = vrot.slane %v10382_v38, 4  ;;  %vm2049_vm15 = vcmask 1046532  }
  0x44   : > { %v10425_v25 = vld [vmem:[#allocation2 + $0xc] sm:$0xf]  ;;  %v815_v47 = vld [vmem:[#allocation2 + $0x18] sm:$0xf]  ;;  %vm10625_vm3 = vmor %vm2048_vm14, %vm2049_vm15  ;;  %vm863_vm6 = vcmask 64512  }
  0x45   : > { %v1315_v32 = vshrl.u32 %v10425_v25, 16  ;;  %v1318_v33 = vshll.u32 %v10425_v25, 16  ;;  %v10432_v37 = vld [vmem:[#allocation2 + $0x10] sm:$0xf]  ;;  %v1339_v51 = vshrl.u32 %v815_v47, 16  ;;  %v1342_v52 = vshll.u32 %v815_v47, 16  ;;  %9408 = vmatprep.mubr.msk.bf16.mxu1 %vm1009_vm4, %v8579_v3 }
  0x46   : > { %v10441_v44 = vcombine.low %v10425_v25, %v10432_v37  ;;  %v1328_v45 = vshrl.u32 %v10432_v37, 16  ;;  %v13897_v46 = vrot.slane %v10432_v37, 5  ;;  %v816_v48 = vld [vmem:[#allocation2 + $0x1c] sm:$0xf]  ;;  %v1324_v5 = vshll.u32 %v10432_v37, 16 }
  0x47   : > { %v10446_v50 = vcombine.low %v815_v47, %v816_v48  ;;  %v1352_v54 = vshrl.u32 %v816_v48, 16  ;;  %v10455_v59 = vld [vmem:[#allocation2 + $0x24] sm:$0xf]  ;;  %v1317_v61 = vrot.slane %v1315_v32, 4  ;;  %v1320_v62 = vrot.slane %v1318_v33, 5 }
  0x48   : > { %9375 = vmatmul.mubr.msk.bf16.vlgmr.msra.gmra.mrb[0].mxu0 %vm1009_vm4, %v10441_v44  ;;  %v10453_v58 = vrot.slane %v13897_v46, 4  ;;  %v10462_v63 = vld [vmem:[#allocation2 + $0x28] sm:$0xf]  ;;  %v1363_v0 = vshrl.u32 %v10455_v59, 16  ;;  %v1366_v1 = vshll.u32 %v10455_v59, 16  ;;  %v1330_v14 = vrot.slane %v1328_v45, 4 }
  0x49   : > { %14037 = vst [vmem:[#allocation7_spill] sm:$0xff] %v10446_v50  ;;  %9441 = vmatpush3.bf16.msra.mxu0 %v10343_v7  ;;  %9378 = vmatprep.mubr.msk.bf16.mxu0 %vm1009_vm4, %v10446_v50  ;;  %v10469_v6 = vcombine.low %v10455_v59, %v10462_v63  ;;  %v1376_v9 = vshrl.u32 %v10462_v63, 16  ;;  %v10472_v11 = vld [vmem:[#allocation2 + $0x14] sm:$0x1]  ;;  %v1321_v7 = vor.u32 %v1320_v62, %v1317_v61  ;;  %v1326_v16 = vrot.slane %v1324_v5, 5 }
  0x4a   : > { %9988 = vmatprep.subr.msk.bf16.mxu0 %vm1058_vm0, %v8678_v43  ;;  %v1334_v17 = vshll.u32 %v10472_v11, 16  ;;  %v448_v32 = vshrl.u32 %v345_v15, 16  ;;  %v451_v33 = vshll.u32 %v345_v15, 16  ;;  %v442_v43 = vrot.slane %v440_v27, 7  ;;  %v715_v3 = vld [vmem:[#allocation2 + $0x2c] sm:$0x1] }
  0x4b   : > { %14038 = vst [vmem:[#allocation8_spill] sm:$0xff] %v10469_v6  ;;  %v1322_v23 = vrot.slane %v1321_v7, 4  ;;  %v1331_v29 = vor.u32 %v1330_v14, %v1326_v16  ;;  %v1341_v45 = vrot.slane %v1339_v51, 4  ;;  %v1344_v56 = vrot.slane %v1342_v52, 5 }
  0x4c   : > { %v1336_v30 = vrot.slane %v1334_v17, 5  ;;  %v10487_v49 = vrot.slane %v448_v32, 7  ;;  %v1348_v59 = vshll.u32 %v816_v48, 16  ;;  %v445_v57 = vor.u32 %v443_v28, %v442_v43  ;;  %v10505_v17 = vld [vmem:[#allocation2 + $0x34] sm:$0xf] }
  0x4d   : > { %v1327_v40 = vsel %vm10419_vm13, %v1322_v23, %v1326_v16  ;;  %v1332_v47 = vrot.slane %v1331_v29, 4  ;;  %v446_v60 = vrot.slane %v442_v43, 4  ;;  %v709_v61 = vsel %vm10405_vm12, %v404_v42, %v708_v39  ;;  %v347_v16 = vld [vmem:[%s10339_s14 + $0x2c] sm:$0xf]  ;;  %v348_v28 = vld [vmem:[%s10339_s14 + $0x30] sm:$0xf] }
  0x4e   : > { %v1354_v62 = vrot.slane %v1352_v54, 4  ;;  %v453_v51 = vor.u32 %v451_v33, %v10487_v49  ;;  %710 = vst [vmem:[#allocation2 + $0x20] sm:$0x1] %v709_v61  ;;  %v1345_v52 = vor.u32 %v1344_v56, %v1341_v45  ;;  %v10496_v48 = vrot.slane %v1348_v59, 5  ;;  %v346_v54 = vld [vmem:[%s10339_s14 + $0x28] sm:$0xf] }
  0x4f   : > { %v1337_v38 = vsel %vm10419_vm13, %v1332_v47, %v1336_v30  ;;  %v726_v7 = vsel %vm10367_vm10, %v445_v57, %v725_v41  ;;  %v421_v14 = vrot.slane %v10390_v53, 4  ;;  %v1365_v15 = vrot.slane %v1363_v0, 4  ;;  %v10513_v29 = vld [vmem:[#allocation2 + $0x30] sm:$0xf] }
  0x50   : > { %9379 = vmatmul.mubr.msk.bf16.gmra.mrb[4].mxu0 %vm1009_vm4, %v10469_v6  ;;  %v10498_v5 = vcombine.low %v1327_v40, %v1337_v38  ;;  %v454_v22 = vsel %vm10378_vm11, %v446_v60, %v453_v51  ;;  %727 = vst [vmem:[#allocation2 + $0x3c] sm:$0xf] %v726_v7  ;;  %v1346_v23 = vrot.slane %v1345_v52, 4  ;;  %v1355_v24 = vor.u32 %v1354_v62, %v10496_v48  ;;  %v732_v52 = vld [vmem:[#allocation2 + $0x48] sm:$0xf] }
  0x51   : > { %v1368_v27 = vrot.slane %v1366_v1, 5  ;;  %v1400_v53 = vshrl.u32 %v10505_v17, 16  ;;  %728 = vst.msk [vmem:[#allocation2 + $0x40] sm:$0xf] %vm280_vm1, %v454_v22  ;;  %v716_v0 = vsel %vm10405_vm12, %v421_v14, %v715_v3  ;;  %v1372_v30 = vshll.u32 %v10462_v63, 16 }
  0x52   : > { %14039 = vst [vmem:[#allocation9_spill] sm:$0xff] %v10498_v5  ;;  %9409 = vmatmul.mubr.msk.bf16.vlgmr.msra.gmra.mrb[0].mxu1 %vm1009_vm4, %v10498_v5  ;;  %v1378_v32 = vrot.slane %v1376_v9, 4  ;;  %v10522_v1 = vcombine.low %v10513_v29, %v10505_v17  ;;  %v1387_v33 = vshrl.u32 %v10513_v29, 16  ;;  %v1390_v39 = vshll.u32 %v10513_v29, 16  ;;  %717 = vst [vmem:[#allocation2 + $0x2c] sm:$0x1] %v716_v0 }
  0x53   : > { %v1351_v40 = vsel %vm10419_vm13, %v1346_v23, %v10496_v48  ;;  %9475 = vmatpush3.bf16.msra.mxu1 %v10347_v8  ;;  %v1356_v43 = vrot.slane %v1355_v24, 4  ;;  %v1369_v42 = vor.u32 %v1368_v27, %v1365_v15  ;;  %v10530_v45 = vrot.slane %v1372_v30, 5  ;;  %v349_v9 = vld [vmem:[%s10339_s14 + $0x34] sm:$0xf] }
  0x54   : > { %14040 = vst [vmem:[#allocation10_spill] sm:$0xff] %v10522_v1  ;;  %v457_v63 = vshrl.u32 %v346_v54, 16  ;;  %9382 = vmatprep.mubr.msk.bf16.mxu0 %vm1009_vm4, %v10522_v1  ;;  %v460_v47 = vshll.u32 %v346_v54, 16  ;;  %v465_v41 = vshrl.u32 %v347_v16, 16  ;;  %v468_v56 = vshll.u32 %v347_v16, 16 }
  0x55   : > { %v474_v59 = vshrl.u32 %v348_v28, 16  ;;  %v10535_v57 = vld [vmem:[#allocation2 + $0x20] sm:$0x1]  ;;  %v1370_v60 = vrot.slane %v1369_v42, 4  ;;  %v1379_v61 = vor.u32 %v1378_v32, %v10530_v45  ;;  %v477_v8 = vshll.u32 %v348_v28, 16 }
  0x56   : > { %v459_v62 = vrot.slane %v457_v63, 7  ;;  %v1358_v38 = vshll.u32 %v10535_v57, 16  ;;  %v10539_v51 = vrot.slane %v465_v41, 7  ;;  %v482_v3 = vshrl.u32 %v349_v9, 16  ;;  %v739_v22 = vld [vmem:[#allocation2 + $0x54] sm:$0xf] }
  0x57   : > { %v476_v48 = vrot.slane %v474_v59, 7  ;;  %v10541_v7 = vld [vmem:[#allocation2 + $0x3c] sm:$0xf]  ;;  %v1375_v14 = vsel %vm10419_vm13, %v1370_v60, %v10530_v45  ;;  %v1380_v15 = vrot.slane %v1379_v61, 4  ;;  %v485_v61 = vshll.u32 %v349_v9, 16 }
  0x58   : > { %v462_v54 = vor.u32 %v460_v47, %v459_v62  ;;  %v463_v16 = vrot.slane %v459_v62, 4  ;;  %v10546_v23 = vld [vmem:[#allocation2 + $0x40] sm:$0xf]  ;;  %v1411_v24 = vshrl.u32 %v10541_v7, 16  ;;  %v1414_v27 = vshll.u32 %v10541_v7, 16 }
  0x59   : > { %v1360_v28 = vrot.slane %v1358_v38, 5  ;;  %v470_v29 = vor.u32 %v468_v56, %v10539_v51  ;;  %v10553_v0 = vcombine.low %v10541_v7, %v10546_v23  ;;  %v1424_v30 = vshrl.u32 %v10546_v23, 16  ;;  %v10556_v32 = vld [vmem:[#allocation2 + $0x2c] sm:$0x1]  ;;  %v722_v62 = vld [vmem:[#allocation2 + $0x38] sm:$0x1] }
  0x5a   : > { %v733_v42 = vsel %vm10367_vm10, %v462_v54, %v732_v52  ;;  %v479_v45 = vor.u32 %v477_v8, %v476_v48  ;;  %v1382_v47 = vshll.u32 %v10556_v32, 16  ;;  %v480_v56 = vrot.slane %v476_v48, 4  ;;  %v729_v54 = vld [vmem:[#allocation2 + $0x44] sm:$0x1] }
  0x5b   : > { %14041 = vst [vmem:[#allocation11_spill] sm:$0xff] %v10553_v0  ;;  %v1361_v63 = vsel %vm10419_vm13, %v1356_v43, %v1360_v28  ;;  %v471_v41 = vsel %vm10378_vm11, %v463_v16, %v470_v29  ;;  %734 = vst [vmem:[#allocation2 + $0x48] sm:$0xf] %v733_v42  ;;  %9383 = vmatmul.mubr.msk.bf16.gmra.mrb[8].mxu0 %vm1009_vm4, %v10553_v0  ;;  %v10570_v60 = vrot.slane %v482_v3, 7  ;;  %v438_v38 = vrot.slane %v10430_v35, 4 }
  0x5c   : > { %v10567_v59 = vcombine.low %v1351_v40, %v1361_v63  ;;  %735 = vst.msk [vmem:[#allocation2 + $0x4c] sm:$0xf] %vm280_vm1, %v471_v41  ;;  %v740_v43 = vsel %vm10367_vm10, %v479_v45, %v739_v22  ;;  %v1384_v8 = vrot.slane %v1382_v47, 5  ;;  %v1389_v52 = vrot.slane %v1387_v33, 4  ;;  %v350_v28 = vld [vmem:[%s10339_s14 + $0x38] sm:$0xf] }
  0x5d   : > { %741 = vst [vmem:[#allocation2 + $0x54] sm:$0xf] %v740_v43  ;;  %v1392_v48 = vrot.slane %v1390_v39, 5  ;;  %v487_v40 = vor.u32 %v485_v61, %v10570_v60  ;;  %v1396_v9 = vshll.u32 %v10505_v17, 16  ;;  %v1402_v3 = vrot.slane %v1400_v53, 4 }
  0x5e   : > { %14042 = vst [vmem:[#allocation12_spill] sm:$0xff] %v10567_v59  ;;  %9412 = vmatprep.mubr.msk.bf16.mxu1 %vm1009_vm4, %v10567_v59  ;;  %v455_v16 = vrot.slane %v10487_v49, 4  ;;  %v1385_v22 = vsel %vm10419_vm13, %v1380_v15, %v1384_v8  ;;  %v723_v35 = vsel %vm10405_vm12, %v438_v38, %v722_v62  ;;  %v1413_v39 = vrot.slane %v1411_v24, 4  ;;  %v351_v29 = vld [vmem:[%s10339_s14 + $0x3c] sm:$0xf] }
  0x5f   : > { %v1393_v33 = vor.u32 %v1392_v48, %v1389_v52  ;;  %v10588_v42 = vcombine.low %v1375_v14, %v1385_v22  ;;  %v488_v45 = vsel %vm10378_vm11, %v480_v56, %v487_v40  ;;  %724 = vst [vmem:[#allocation2 + $0x38] sm:$0x1] %v723_v35  ;;  %v10592_v17 = vrot.slane %v1396_v9, 5  ;;  %v352_v38 = vld [vmem:[%s10339_s14 + $0x40] sm:$0xf] }
  0x60   : > { %v730_v49 = vsel %vm10405_vm12, %v455_v16, %v729_v54  ;;  %742 = vst.msk [vmem:[#allocation2 + $0x58] sm:$0xf] %vm280_vm1, %v488_v45  ;;  %v1416_v15 = vrot.slane %v1414_v27, 5  ;;  %v1420_v24 = vshll.u32 %v10546_v23, 16  ;;  %v1426_v14 = vrot.slane %v1424_v30, 4 }
  0x61   : > { %14043 = vst [vmem:[#allocation13_spill] sm:$0xff] %v10588_v42  ;;  %v10597_v53 = vrot.slane %v1393_v33, 4  ;;  %731 = vst [vmem:[#allocation2 + $0x44] sm:$0x1] %v730_v49  ;;  %9413 = vmatmul.mubr.msk.bf16.gmra.mrb[4].mxu1 %vm1009_vm4, %v10588_v42  ;;  %v1403_v47 = vor.u32 %v1402_v3, %v10592_v17  ;;  %v491_v41 = vshrl.u32 %v350_v28, 16  ;;  %v494_v56 = vshll.u32 %v350_v28, 16 }
  0x62   : > { %v10602_v63 = vld [vmem:[#allocation2 + $0x48] sm:$0xf]  ;;  %v499_v61 = vshrl.u32 %v351_v29, 16  ;;  %v1417_v30 = vor.u32 %v1416_v15, %v1413_v39  ;;  %v1422_v9 = vrot.slane %v1420_v24, 5  ;;  %v14045_v33 = vmov 0 }
  0x63   : > { %v10605_v43 = vld [vmem:[#allocation2 + $0x4c] sm:$0xf]  ;;  %v1435_v62 = vshrl.u32 %v10602_v63, 16  ;;  %v1438_v8 = vshll.u32 %v10602_v63, 16  ;;  %v1399_v27 = vsel %vm10419_vm13, %v10597_v53, %v10592_v17  ;;  %v1404_v40 = vrot.slane %v1403_v47, 4 }
  0x64   : > { %v10616_v52 = vcombine.low %v10602_v63, %v10605_v43  ;;  %v1448_v48 = vshrl.u32 %v10605_v43, 16  ;;  %v10619_v54 = vld [vmem:[#allocation2 + $0x54] sm:$0xf]  ;;  %v1418_v22 = vrot.slane %v1417_v30, 4  ;;  %v493_v35 = vrot.slane %v491_v41, 7 }
  0x65   : > { %v1459_v3 = vshrl.u32 %v10619_v54, 16  ;;  %v14046_v33 = vsel %vm10625_vm3, 4294967295, %v14045_v33  ;;  %v1427_v39 = vor.u32 %v1426_v14, %v1422_v9  ;;  %v10631_v28 = vrot.slane %v499_v61, 7  ;;  %v746_v17 = vld [vmem:[#allocation2 + $0x60] sm:$0xf] }
  0x66   : > { %14044 = vst [vmem:[#allocation14_spill] sm:$0xff] %v10616_v52  ;;  %14047 = vst [vmem:[#allocation15_spill] sm:$0xff] %v14046_v33  ;;  %9386 = vmatprep.mubr.msk.bf16.mxu0 %vm1009_vm4, %v10616_v52  ;;  %v502_v45 = vshll.u32 %v351_v29, 16  ;;  %v508_v49 = vshrl.u32 %v352_v38, 16  ;;  %v10633_v53 = vld [vmem:[#allocation2 + $0x38] sm:$0x1]  ;;  %v1423_v15 = vsel %vm10419_vm13, %v1418_v22, %v1422_v9  ;;  %v496_v24 = vor.u32 %v494_v56, %v493_v35 }
  0x67   : > { %v497_v47 = vrot.slane %v493_v35, 4  ;;  %v353_v41 = vld [vmem:[%s10339_s14 + $0x44] sm:$0xf]  ;;  %v511_v30 = vshll.u32 %v352_v38, 16  ;;  %v10638_v2 = vld [vmem:[#allocation2 + $0x58] sm:$0xf]  ;;  %v10650_v61 = vsel %vm10625_vm3, %v8611_v20, %v2053_v21 }
  0x68   : > { %v1406_v19 = vshll.u32 %v10633_v53, 16  ;;  %v10641_v34 = vld [vmem:[#allocation2 + $0x44] sm:$0x1]  ;;  %v1428_v14 = vrot.slane %v1427_v39, 4  ;;  %v504_v29 = vor.u32 %v502_v45, %v10631_v28  ;;  %v10654_v56 = vcombine.low %v10619_v54, %v10638_v2  ;;  %v753_v35 = vld [vmem:[#allocation2 + $0x6c] sm:$0xf] }
  0x69   : > { %v1472_v38 = vshrl.u32 %v10638_v2, 16  ;;  %v1430_v9 = vshll.u32 %v10641_v34, 16  ;;  %v747_v22 = vsel %vm10367_vm10, %v496_v24, %v746_v17  ;;  %v510_v13 = vrot.slane %v508_v49, 7  ;;  %v736_v21 = vld [vmem:[#allocation2 + $0x50] sm:$0x1] }
  0x6a   : > { %14048 = vst [vmem:[#allocation16_spill] sm:$0xff] %v10654_v56  ;;  %v1408_v39 = vrot.slane %v1406_v19, 5  ;;  %v505_v12 = vsel %vm10378_vm11, %v497_v47, %v504_v29  ;;  %748 = vst [vmem:[#allocation2 + $0x60] sm:$0xf] %v747_v22  ;;  %v516_v20 = vshrl.u32 %v353_v41, 16  ;;  %9387 = vmatmul.mubr.msk.bf16.gmra.mrb[12].mxu0 %vm1009_vm4, %v10654_v56  ;;  %v519_v46 = vshll.u32 %v353_v41, 16 }
  0x6b   : > { %v1432_v45 = vrot.slane %v1430_v9, 5  ;;  %749 = vst.msk [vmem:[#allocation2 + $0x64] sm:$0xf] %vm280_vm1, %v505_v12  ;;  %v472_v10 = vrot.slane %v10539_v51, 4  ;;  %v1437_v16 = vrot.slane %v1435_v62, 4  ;;  %v513_v49 = vor.u32 %v511_v30, %v510_v13 }
  0x6c   : > { %v10669_v19 = vld [vmem:[%s13888_s1 + $0xa] sm:$0x3]  ;;  %v1409_v17 = vsel %vm10419_vm13, %v1404_v40, %v1408_v39  ;;  %v514_v24 = vrot.slane %v510_v13, 4  ;;  %v10673_v47 = vrot.slane %v516_v20, 7  ;;  %v1440_v29 = vrot.slane %v1438_v8, 5 }
  0x6d   : > { %14049 = vst [vmem:[#allocation17_spill] sm:$0xff] %v10669_v19  ;;  %9989 = vmatprep.subr.msk.bf16.mxu1 %vm1058_vm0, %v10669_v19  ;;  %v10677_v41 = vcombine.low %v1399_v27, %v1409_v17  ;;  %v1433_v51 = vsel %vm10419_vm13, %v1428_v14, %v1432_v45  ;;  %v737_v62 = vsel %vm10405_vm12, %v472_v10, %v736_v21  ;;  %v1444_v22 = vshll.u32 %v10605_v43, 16  ;;  %v743_v27 = vld [vmem:[#allocation2 + $0x5c] sm:$0x1]  ;;  %v354_v39 = vld [vmem:[%s10339_s14 + $0x48] sm:$0xf] }
  0x6e   : > { %v10683_v9 = vcombine.low %v1423_v15, %v1433_v51  ;;  %v521_v40 = vor.u32 %v519_v46, %v10673_v47  ;;  %v754_v30 = vsel %vm10367_vm10, %v513_v49, %v753_v35  ;;  %738 = vst [vmem:[#allocation2 + $0x50] sm:$0x1] %v737_v62  ;;  %v1441_v14 = vor.u32 %v1440_v29, %v1437_v16  ;;  %v355_v16 = vld [vmem:[%s10339_s14 + $0x4c] sm:$0xf]  ;;  %v356_v29 = vld [vmem:[%s10339_s14 + $0x50] sm:$0xf] }
  0x6f   : > { %14050 = vst [vmem:[#allocation18_spill] sm:$0xff] %v10677_v41  ;;  %9416 = vmatprep.mubr.msk.bf16.mxu1 %vm1009_vm4, %v10677_v41  ;;  %755 = vst [vmem:[#allocation2 + $0x6c] sm:$0xf] %v754_v30  ;;  %v1450_v10 = vrot.slane %v1448_v48, 4  ;;  %v489_v8 = vrot.slane %v10570_v60, 4  ;;  %v1461_v46 = vrot.slane %v1459_v3, 4 }
  0x70   : > { %14051 = vst [vmem:[#allocation19_spill] sm:$0xff] %v10683_v9  ;;  %9417 = vmatmul.mubr.msk.bf16.gmra.mrb[8].mxu1 %vm1009_vm4, %v10683_v9  ;;  %v522_v15 = vsel %vm10378_vm11, %v514_v24, %v521_v40  ;;  %v1446_v35 = vrot.slane %v1444_v22, 5  ;;  %v14052_v12 = vshll.u32 %v10619_v54, 16  ;;  %v1468_v20 = vshll.u32 %v10638_v2, 16 }
  0x71   : > { %v10703_v21 = vld [vmem:[#allocation2 + $0x60] sm:$0xf]  ;;  %756 = vst.msk [vmem:[#allocation2 + $0x70] sm:$0xf] %vm280_vm1, %v522_v15  ;;  %v1442_v60 = vrot.slane %v1441_v14, 4  ;;  %v744_v48 = vsel %vm10405_vm12, %v489_v8, %v743_v27  ;;  %v1474_v3 = vrot.slane %v1472_v38, 4 }
  0x72   : > { %v1464_v13 = vrot.slane %v14052_v12, 5  ;;  %v525_v45 = vshrl.u32 %v354_v39, 16  ;;  %v10708_v17 = vld [vmem:[#allocation2 + $0x64] sm:$0xf]  ;;  %v1483_v49 = vshrl.u32 %v10703_v21, 16  ;;  %v1486_v24 = vshll.u32 %v10703_v21, 16 }
  0x73   : > { %v1451_v51 = vor.u32 %v1450_v10, %v1446_v35  ;;  %745 = vst [vmem:[#allocation2 + $0x5c] sm:$0x1] %v744_v48  ;;  %v10715_v40 = vcombine.low %v10703_v21, %v10708_v17  ;;  %v1496_v30 = vshrl.u32 %v10708_v17, 16  ;;  %v1447_v38 = vsel %vm10419_vm13, %v1442_v60, %v1446_v35  ;;  %v760_v12 = vld [vmem:[#allocation2 + $0x78] sm:$0xf]  ;;  %v14100_v26 = vld [vmem:[#allocation16_spill] sm:$0xff] }
  0x74   : > { %v1465_v62 = vor.u32 %v1464_v13, %v1461_v46  ;;  %v1470_v22 = vrot.slane %v1468_v20, 5  ;;  %v527_v8 = vrot.slane %v525_v45, 7  ;;  %v528_v15 = vshll.u32 %v354_v39, 16  ;;  %v357_v39 = vld [vmem:[%s10339_s14 + $0x54] sm:$0xf] }
  0x75   : > { %14053 = vst [vmem:[#allocation20_spill] sm:$0xff] %v10715_v40  ;;  %v1452_v27 = vrot.slane %v1451_v51, 4  ;;  %9390 = vmatprep.mubr.msk.bf16.mxu0 %vm1009_vm4, %v10715_v40  ;;  %v10722_v10 = vld [vmem:[#allocation2 + $0x50] sm:$0x1]  ;;  %v533_v13 = vshrl.u32 %v355_v16, 16  ;;  %v536_v48 = vshll.u32 %v355_v16, 16 }
  0x76   : > { %v1466_v14 = vrot.slane %v1465_v62, 4  ;;  %v1475_v46 = vor.u32 %v1474_v3, %v1470_v22  ;;  %v542_v9 = vshrl.u32 %v356_v29, 16  ;;  %v10724_v41 = vld [vmem:[#allocation2 + $0x6c] sm:$0xf]  ;;  %v1454_v35 = vshll.u32 %v10722_v10, 16 }
  0x77   : > { %14054 = vst [vmem:[#allocation21_spill] sm:$0xff] %v10724_v41  ;;  %v530_v60 = vor.u32 %v528_v15, %v527_v8  ;;  %v531_v45 = vrot.slane %v527_v8, 4  ;;  %v1507_v51 = vshrl.u32 %v10724_v41, 16  ;;  %v1510_v62 = vshll.u32 %v10724_v41, 16 }
  0x78   : > { %v1471_v20 = vsel %vm10419_vm13, %v1466_v14, %v1470_v22  ;;  %v1476_v42 = vrot.slane %v1475_v46, 4  ;;  %v10732_v59 = vrot.slane %v533_v13, 7  ;;  %v10734_v3 = vld [vmem:[#allocation2 + $0x70] sm:$0xf]  ;;  %v1456_v16 = vrot.slane %v1454_v35, 5 }
  0x79   : > { %14055 = vst [vmem:[#allocation22_spill] sm:$0xff] %v10734_v3  ;;  %v761_v5 = vsel %vm10367_vm10, %v530_v60, %v760_v12  ;;  %v544_v40 = vrot.slane %v542_v9, 7  ;;  %v545_v56 = vshll.u32 %v356_v29, 16  ;;  %v10740_v22 = vcombine.low %v10724_v41, %v10734_v3  ;;  %v767_v13 = vld [vmem:[#allocation2 + $0x84] sm:$0xf] }
  0x7a   : > { %v1520_v14 = vshrl.u32 %v10734_v3, 16  ;;  %v10743_v8 = vld [vmem:[#allocation2 + $0x5c] sm:$0x1]  ;;  %v538_v15 = vor.u32 %v536_v48, %v10732_v59  ;;  %762 = vst [vmem:[#allocation2 + $0x78] sm:$0xf] %v761_v5  ;;  %v550_v46 = vshrl.u32 %v357_v39, 16  ;;  %v1457_v35 = vsel %vm10419_vm13, %v1452_v27, %v1456_v16 }
  0x7b   : > { %14056 = vst [vmem:[#allocation23_spill] sm:$0xff] %v10740_v22  ;;  %v1478_v12 = vshll.u32 %v10743_v8, 16  ;;  %v547_v9 = vor.u32 %v545_v56, %v544_v40  ;;  %v548_v29 = vrot.slane %v544_v40, 4  ;;  %9391 = vmatmul.mubr.msk.bf16.gmra.mrb[16].mxu0 %vm1009_vm4, %v10740_v22  ;;  %v10751_v60 = vcombine.low %v1447_v38, %v1457_v35  ;;  %v750_v48 = vld [vmem:[#allocation2 + $0x68] sm:$0x1] }
  0x7c   : > { %v539_v52 = vsel %vm10378_vm11, %v531_v45, %v538_v15  ;;  %v10755_v0 = vrot.slane %v550_v46, 7  ;;  %v553_v5 = vshll.u32 %v357_v39, 16  ;;  %v506_v56 = vrot.slane %v10631_v28, 4  ;;  %v757_v15 = vld [vmem:[#allocation2 + $0x74] sm:$0x1] }
  0x7d   : > { %14057 = vst [vmem:[#allocation24_spill] sm:$0xff] %v10751_v60  ;;  %v1480_v1 = vrot.slane %v1478_v12, 5  ;;  %763 = vst.msk [vmem:[#allocation2 + $0x7c] sm:$0xf] %vm280_vm1, %v539_v52  ;;  %v768_v27 = vsel %vm10367_vm10, %v547_v9, %v767_v13  ;;  %v1485_v40 = vrot.slane %v1483_v49, 4  ;;  %9420 = vmatprep.mubr.msk.bf16.mxu1 %vm1009_vm4, %v10751_v60  ;;  %v1488_v45 = vrot.slane %v1486_v24, 5 }
  0x7e   : > { %v555_v38 = vor.u32 %v553_v5, %v10755_v0  ;;  %769 = vst [vmem:[#allocation2 + $0x84] sm:$0xf] %v768_v27  ;;  %v1492_v39 = vshll.u32 %v10708_v17, 16  ;;  %v1498_v16 = vrot.slane %v1496_v30, 4  ;;  %v751_v28 = vsel %vm10405_vm12, %v506_v56, %v750_v48  ;;  %v358_v30 = vld [vmem:[%s10339_s14 + $0x58] sm:$0xf] }
  0x7f   : > { %v1481_v52 = vsel %vm10419_vm13, %v1476_v42, %v1480_v1  ;;  %v523_v49 = vrot.slane %v10673_v47, 4  ;;  %v1509_v46 = vrot.slane %v1507_v51, 4  ;;  %752 = vst [vmem:[#allocation2 + $0x68] sm:$0x1] %v751_v28  ;;  %v1489_v24 = vor.u32 %v1488_v45, %v1485_v40  ;;  %v359_v9 = vld [vmem:[%s10339_s14 + $0x5c] sm:$0xf] }
  0x80   : > { %v10770_v13 = vcombine.low %v1471_v20, %v1481_v52  ;;  %v556_v35 = vsel %vm10378_vm11, %v548_v29, %v555_v38  ;;  %v10774_v12 = vrot.slane %v1492_v39, 5  ;;  %v1512_v42 = vrot.slane %v1510_v62, 5  ;;  %v360_v62 = vld [vmem:[%s10339_s14 + $0x60] sm:$0xf] }
  0x81   : > { %v10778_v5 = vld [vmem:[#allocation2 + $0x78] sm:$0xf]  ;;  %770 = vst.msk [vmem:[#allocation2 + $0x88] sm:$0xf] %vm280_vm1, %v556_v35  ;;  %v758_v1 = vsel %vm10405_vm12, %v523_v49, %v757_v15  ;;  %v1516_v47 = vshll.u32 %v10734_v3, 16  ;;  %v1522_v20 = vrot.slane %v1520_v14, 4 }
  0x82   : > { %14058 = vst [vmem:[#allocation25_spill] sm:$0xff] %v10770_v13  ;;  %9421 = vmatmul.mubr.msk.bf16.gmra.mrb[12].mxu1 %vm1009_vm4, %v10770_v13  ;;  %v1531_v51 = vshrl.u32 %v10778_v5, 16  ;;  %v1534_v29 = vshll.u32 %v10778_v5, 16  ;;  %v1490_v48 = vrot.slane %v1489_v24, 4  ;;  %v1499_v27 = vor.u32 %v1498_v16, %v10774_v12  ;;  %759 = vst [vmem:[#allocation2 + $0x74] sm:$0x1] %v758_v1 }
  0x83   : > { %v1513_v56 = vor.u32 %v1512_v42, %v1509_v46  ;;  %v10789_v40 = vrot.slane %v1516_v47, 5  ;;  %v559_v38 = vshrl.u32 %v358_v30, 16  ;;  %v562_v45 = vshll.u32 %v358_v30, 16  ;;  %v774_v30 = vld [vmem:[#allocation2 + $0x90] sm:$0xf] }
  0x84   : > { %v10792_v39 = vld [vmem:[#allocation2 + $0x7c] sm:$0xf]  ;;  %v1495_v14 = vsel %vm10419_vm13, %v1490_v48, %v10774_v12  ;;  %v1500_v15 = vrot.slane %v1499_v27, 4  ;;  %v567_v52 = vshrl.u32 %v359_v9, 16  ;;  %v570_v28 = vshll.u32 %v359_v9, 16 }
  0x85   : > { %14059 = vst [vmem:[#allocation26_spill] sm:$0xff] %v10792_v39  ;;  %v10799_v16 = vcombine.low %v10778_v5, %v10792_v39  ;;  %v1544_v49 = vshrl.u32 %v10792_v39, 16  ;;  %v10802_v46 = vld [vmem:[#allocation2 + $0x84] sm:$0xf]  ;;  %v1514_v35 = vrot.slane %v1513_v56, 4  ;;  %v1523_v24 = vor.u32 %v1522_v20, %v10789_v40 }
  0x86   : > { %14061 = vst [vmem:[#allocation28_spill] sm:$0xff] %v10802_v46  ;;  %v1555_v1 = vshrl.u32 %v10802_v46, 16  ;;  %v1558_v42 = vshll.u32 %v10802_v46, 16  ;;  %v561_v12 = vrot.slane %v559_v38, 7  ;;  %v10807_v47 = vrot.slane %v567_v52, 7 }
  0x87   : > { %14060 = vst [vmem:[#allocation27_spill] sm:$0xff] %v10799_v16  ;;  %v361_v9 = vld [vmem:[%s10339_s14 + $0x64] sm:$0xf]  ;;  %9394 = vmatprep.mubr.msk.bf16.mxu0 %vm1009_vm4, %v10799_v16  ;;  %v10812_v48 = vld [vmem:[#allocation2 + $0x68] sm:$0x1]  ;;  %v1519_v27 = vsel %vm10419_vm13, %v1514_v35, %v10789_v40  ;;  %v1524_v56 = vrot.slane %v1523_v24, 4 }
  0x88   : > { %14062 = vst [vmem:[#allocation29_spill] sm:$0xff] %v10812_v48  ;;  %v576_v20 = vshrl.u32 %v360_v62, 16  ;;  %v579_v13 = vshll.u32 %v360_v62, 16  ;;  %v10817_v60 = vld [vmem:[#allocation2 + $0x88] sm:$0xf]  ;;  %v1502_v22 = vshll.u32 %v10812_v48, 16  ;;  %v564_v38 = vor.u32 %v562_v45, %v561_v12 }
  0x89   : > { %14063 = vst [vmem:[#allocation30_spill] sm:$0xff] %v10817_v60  ;;  %v565_v52 = vrot.slane %v561_v12, 4  ;;  %v572_v41 = vor.u32 %v570_v28, %v10807_v47  ;;  %v10823_v16 = vcombine.low %v10802_v46, %v10817_v60  ;;  %v1568_v19 = vshrl.u32 %v10817_v60, 16  ;;  %v10826_v6 = vld [vmem:[#allocation2 + $0x74] sm:$0x1] }
  0x8a   : > { %14065 = vst [vmem:[#allocation32_spill] sm:$0xff] %v10826_v6  ;;  %v578_v40 = vrot.slane %v576_v20, 7  ;;  %v584_v35 = vshrl.u32 %v361_v9, 16  ;;  %v1504_v24 = vrot.slane %v1502_v22, 5  ;;  %v1526_v62 = vshll.u32 %v10826_v6, 16 }
  0x8b   : > { %14064 = vst [vmem:[#allocation31_spill] sm:$0xff] %v10823_v16  ;;  %v573_v50 = vsel %vm10378_vm11, %v565_v52, %v572_v41  ;;  %v775_v45 = vsel %vm10367_vm10, %v564_v38, %v774_v30  ;;  %v781_v28 = vld [vmem:[#allocation2 + $0x9c] sm:$0xf]  ;;  %9395 = vmatmul.mubr.msk.bf16.gmra.mrb[20].mxu0 %vm1009_vm4, %v10823_v16  ;;  %v587_v22 = vshll.u32 %v361_v9, 16  ;;  %v764_v6 = vld [vmem:[#allocation2 + $0x80] sm:$0x1] }
  0x8c   : > { %776 = vst [vmem:[#allocation2 + $0x90] sm:$0xf] %v775_v45  ;;  %777 = vst.msk [vmem:[#allocation2 + $0x94] sm:$0xf] %vm280_vm1, %v573_v50  ;;  %v581_v12 = vor.u32 %v579_v13, %v578_v40  ;;  %v582_v46 = vrot.slane %v578_v40, 4  ;;  %v10836_v20 = vrot.slane %v584_v35, 7  ;;  %v1505_v41 = vsel %vm10419_vm13, %v1500_v15, %v1504_v24 }
  0x8d   : > { %v1528_v52 = vrot.slane %v1526_v62, 5  ;;  %v540_v30 = vrot.slane %v10732_v59, 4  ;;  %v1533_v38 = vrot.slane %v1531_v51, 4  ;;  %v10841_v3 = vcombine.low %v1495_v14, %v1505_v41  ;;  %v771_v51 = vld [vmem:[#allocation2 + $0x8c] sm:$0x1] }
  0x8e   : > { %v589_v45 = vor.u32 %v587_v22, %v10836_v20  ;;  %v782_v50 = vsel %vm10367_vm10, %v581_v12, %v781_v28  ;;  %v1536_v13 = vrot.slane %v1534_v29, 5  ;;  %v1540_v15 = vshll.u32 %v10792_v39, 16  ;;  %v362_v14 = vld [vmem:[%s10339_s14 + $0x68] sm:$0xf]  ;;  %v363_v12 = vld [vmem:[%s10339_s14 + $0x6c] sm:$0xf] }
  0x8f   : > { %14066 = vst [vmem:[#allocation33_spill] sm:$0xff] %v10841_v3  ;;  %v1529_v9 = vsel %vm10419_vm13, %v1524_v56, %v1528_v52  ;;  %783 = vst [vmem:[#allocation2 + $0x9c] sm:$0xf] %v782_v50  ;;  %v765_v40 = vsel %vm10405_vm12, %v540_v30, %v764_v6  ;;  %v1546_v59 = vrot.slane %v1544_v49, 4  ;;  %9424 = vmatprep.mubr.msk.bf16.mxu1 %vm1009_vm4, %v10841_v3  ;;  %v557_v24 = vrot.slane %v10755_v0, 4 }
  0x90   : > { %v10854_v35 = vcombine.low %v1519_v27, %v1529_v9  ;;  %v590_v29 = vsel %vm10378_vm11, %v582_v46, %v589_v45  ;;  %766 = vst [vmem:[#allocation2 + $0x80] sm:$0x1] %v765_v40  ;;  %v1537_v56 = vor.u32 %v1536_v13, %v1533_v38  ;;  %v10860_v6 = vrot.slane %v1540_v15, 5  ;;  %v364_v52 = vld [vmem:[%s10339_s14 + $0x70] sm:$0xf] }
  0x91   : > { %784 = vst.msk [vmem:[#allocation2 + $0xa0] sm:$0xf] %vm280_vm1, %v590_v29  ;;  %v1557_v49 = vrot.slane %v1555_v1, 4  ;;  %v1560_v62 = vrot.slane %v1558_v42, 5  ;;  %v1564_v28 = vshll.u32 %v10817_v60, 16  ;;  %v772_v46 = vsel %vm10405_vm12, %v557_v24, %v771_v51 }
  0x92   : > { %14067 = vst [vmem:[#allocation34_spill] sm:$0xff] %v10854_v35  ;;  %9425 = vmatmul.mubr.msk.bf16.gmra.mrb[16].mxu1 %vm1009_vm4, %v10854_v35  ;;  %v1538_v27 = vrot.slane %v1537_v56, 4  ;;  %v1570_v22 = vrot.slane %v1568_v19, 4  ;;  %v593_v41 = vshrl.u32 %v362_v14, 16  ;;  %v1547_v1 = vor.u32 %v1546_v59, %v10860_v6  ;;  %773 = vst [vmem:[#allocation2 + $0x8c] sm:$0x1] %v772_v46 }
  0x93   : > { %v10869_v0 = vld [vmem:[#allocation2 + $0x90] sm:$0xf]  ;;  %v10871_v30 = vld [vmem:[#allocation2 + $0x94] sm:$0xf]  ;;  %v1561_v42 = vor.u32 %v1560_v62, %v1557_v49  ;;  %v10874_v38 = vrot.slane %v1564_v28, 5  ;;  %v596_v45 = vshll.u32 %v362_v14, 16 }
  0x94   : > { %14068 = vst [vmem:[#allocation35_spill] sm:$0xff] %v10869_v0  ;;  %v10878_v50 = vcombine.low %v10869_v0, %v10871_v30  ;;  %v1579_v19 = vshrl.u32 %v10869_v0, 16  ;;  %v1582_v13 = vshll.u32 %v10869_v0, 16  ;;  %v1592_v9 = vshrl.u32 %v10871_v30, 16  ;;  %v788_v29 = vld [vmem:[#allocation2 + $0xa8] sm:$0xf] }
  0x95   : > { %v1543_v40 = vsel %vm10419_vm13, %v1538_v27, %v10860_v6  ;;  %v1548_v15 = vrot.slane %v1547_v1, 4  ;;  %v1562_v59 = vrot.slane %v1561_v42, 4  ;;  %v1571_v51 = vor.u32 %v1570_v22, %v10874_v38  ;;  %v365_v14 = vld [vmem:[%s10339_s14 + $0x74] sm:$0xf] }
  0x96   : > { %14069 = vst [vmem:[#allocation36_spill] sm:$0xff] %v10878_v50  ;;  %9398 = vmatprep.mubr.msk.bf16.mxu0 %vm1009_vm4, %v10878_v50  ;;  %v10890_v56 = vld [vmem:[#allocation2 + $0x9c] sm:$0xf]  ;;  %v595_v24 = vrot.slane %v593_v41, 7  ;;  %v601_v49 = vshrl.u32 %v363_v12, 16  ;;  %v604_v62 = vshll.u32 %v363_v12, 16 }
  0x97   : > { %14070 = vst [vmem:[#allocation37_spill] sm:$0xff] %v10890_v56  ;;  %v610_v28 = vshrl.u32 %v364_v52, 16  ;;  %v1603_v46 = vshrl.u32 %v10890_v56, 16  ;;  %v1606_v35 = vshll.u32 %v10890_v56, 16  ;;  %v10894_v6 = vld [vmem:[#allocation2 + $0x80] sm:$0x1]  ;;  %v1567_v27 = vsel %vm10419_vm13, %v1562_v59, %v10874_v38 }
  0x98   : > { %14071 = vst [vmem:[#allocation38_spill] sm:$0xff] %v10894_v6  ;;  %v1572_v22 = vrot.slane %v1571_v51, 4  ;;  %v10899_v1 = vld [vmem:[#allocation2 + $0xa0] sm:$0xf]  ;;  %v1550_v42 = vshll.u32 %v10894_v6, 16  ;;  %v598_v3 = vor.u32 %v596_v45, %v595_v24  ;;  %v599_v41 = vrot.slane %v595_v24, 4 }
  0x99   : > { %v10902_v50 = vrot.slane %v601_v49, 7  ;;  %v10906_v12 = vcombine.low %v10890_v56, %v10899_v1  ;;  %v1616_v16 = vshrl.u32 %v10899_v1, 16  ;;  %v612_v0 = vrot.slane %v610_v28, 7  ;;  %v10909_v48 = vld [vmem:[#allocation2 + $0x8c] sm:$0x1] }
  0x9a   : > { %v613_v60 = vshll.u32 %v364_v52, 16  ;;  %v1552_v39 = vrot.slane %v1550_v42, 5  ;;  %v789_v59 = vsel %vm10367_vm10, %v598_v3, %v788_v29  ;;  %v618_v45 = vshrl.u32 %v365_v14, 16  ;;  %v795_v51 = vld [vmem:[#allocation2 + $0xb4] sm:$0xf] }
  0x9b   : > { %14072 = vst [vmem:[#allocation39_spill] sm:$0xff] %v10906_v12  ;;  %v606_v38 = vor.u32 %v604_v62, %v10902_v50  ;;  %9399 = vmatmul.mubr.msk.bf16.gmra.mrb[24].mxu0 %vm1009_vm4, %v10906_v12  ;;  %v1574_v24 = vshll.u32 %v10909_v48, 16  ;;  %790 = vst [vmem:[#allocation2 + $0xa8] sm:$0xf] %v789_v59  ;;  %v616_v56 = vrot.slane %v612_v0, 4  ;;  %v621_v28 = vshll.u32 %v365_v14, 16 }
  0x9c   : > { %v615_v49 = vor.u32 %v613_v60, %v612_v0  ;;  %v778_v52 = vld [vmem:[#allocation2 + $0x98] sm:$0x1]  ;;  %v1553_v42 = vsel %vm10419_vm13, %v1548_v15, %v1552_v39  ;;  %v10921_v6 = vrot.slane %v618_v45, 7  ;;  %v574_v3 = vrot.slane %v10807_v47, 4 }
  0x9d   : > { %v607_v62 = vsel %vm10378_vm11, %v599_v41, %v606_v38  ;;  %v10924_v29 = vcombine.low %v1543_v40, %v1553_v42  ;;  %v1576_v12 = vrot.slane %v1574_v24, 5  ;;  %v1581_v0 = vrot.slane %v1579_v19, 4  ;;  %v785_v38 = vld [vmem:[#allocation2 + $0xa4] sm:$0x1] }
  0x9e   : > { %791 = vst.msk [vmem:[#allocation2 + $0xac] sm:$0xf] %vm280_vm1, %v607_v62  ;;  %v796_v60 = vsel %vm10367_vm10, %v615_v49, %v795_v51  ;;  %v623_v14 = vor.u32 %v621_v28, %v10921_v6  ;;  %v779_v39 = vsel %vm10405_vm12, %v574_v3, %v778_v52  ;;  %v1584_v15 = vrot.slane %v1582_v13, 5 }
  0x9f   : > { %797 = vst [vmem:[#allocation2 + $0xb4] sm:$0xf] %v796_v60  ;;  %v1588_v41 = vshll.u32 %v10871_v30, 16  ;;  %9428 = vmatprep.mubr.msk.bf16.mxu1 %vm1009_vm4, %v10924_v29  ;;  %v1577_v47 = vsel %vm10419_vm13, %v1572_v22, %v1576_v12  ;;  %780 = vst [vmem:[#allocation2 + $0x98] sm:$0x1] %v779_v39  ;;  %v1594_v40 = vrot.slane %v1592_v9, 4 }
  0xa0   : > { %v591_v19 = vrot.slane %v10836_v20, 4  ;;  %v1605_v59 = vrot.slane %v1603_v46, 4  ;;  %v10938_v45 = vcombine.low %v1567_v27, %v1577_v47  ;;  %v624_v51 = vsel %vm10378_vm11, %v616_v56, %v623_v14 }
  0xa1   : > { %v1585_v13 = vor.u32 %v1584_v15, %v1581_v0  ;;  %v1590_v24 = vrot.slane %v1588_v41, 5  ;;  %798 = vst.msk [vmem:[#allocation2 + $0xb8] sm:$0xf] %vm280_vm1, %v624_v51  ;;  %v1608_v28 = vrot.slane %v1606_v35, 5  ;;  %v1612_v22 = vshll.u32 %v10899_v1, 16 }
  0xa2   : > { %v786_v49 = vsel %vm10405_vm12, %v591_v19, %v785_v38  ;;  %v1618_v12 = vrot.slane %v1616_v16, 4  ;;  %9429 = vmatmul.mubr.msk.bf16.gmra.mrb[20].mxu1 %vm1009_vm4, %v10938_v45  ;;  %v10948_v20 = vld [vmem:[#allocation2 + $0xa8] sm:$0xf]  ;;  %v14073_v56 = vrot.slane %v10392_v55, 5  ;;  %v14074_v52 = vrot.slane %v10432_v37, 5 }
  0xa3   : > { %v1586_v9 = vrot.slane %v1585_v13, 4  ;;  %v1595_v46 = vor.u32 %v1594_v40, %v1590_v24  ;;  %787 = vst [vmem:[#allocation2 + $0xa4] sm:$0x1] %v786_v49  ;;  %v14075_v35 = vrot.slane %v10425_v25, 9  ;;  %v1627_v42 = vshrl.u32 %v10948_v20, 16 }
  0xa4   : > { %v2057_v27 = vsel %vm10625_vm3, %v10373_v31, %v14073_v56  ;;  %v1630_v62 = vshll.u32 %v10948_v20, 16  ;;  %v1609_v3 = vor.u32 %v1608_v28, %v1605_v59  ;;  %v1614_v60 = vrot.slane %v1612_v22, 5  ;;  %v792_v40 = vld [vmem:[#allocation2 + $0xb0] sm:$0x1]  ;;  %v799_v28 = vld [vmem:[#allocation2 + $0xbc] sm:$0x1] }
  0xa5   : > { %v2061_v16 = vsel %vm10625_vm3, %v14075_v35, %v14074_v52  ;;  %v10963_v0 = vld [vmem:[#allocation2 + $0xac] sm:$0xf]  ;;  %v1591_v55 = vsel %vm10419_vm13, %v1586_v9, %v1590_v24  ;;  %v1596_v14 = vrot.slane %v1595_v46, 4  ;;  %v8628_v31 = vcombine.low %v10650_v61, %v2057_v27 }
  0xa6   : > { %v14076_v37 = vrot.slane %v10472_v11, 5  ;;  %v10975_v39 = vcombine.low %v10948_v20, %v10963_v0  ;;  %v1640_v15 = vshrl.u32 %v10963_v0, 16  ;;  %v10978_v41 = vld [vmem:[#allocation2 + $0xb4] sm:$0xf]  ;;  %v1610_v38 = vrot.slane %v1609_v3, 4 }
  0xa7   : > { %v1619_v47 = vor.u32 %v1618_v12, %v1614_v60  ;;  %v1651_v19 = vshrl.u32 %v10978_v41, 16  ;;  %v1654_v61 = vshll.u32 %v10978_v41, 16  ;;  %v10982_v11 = vld [vmem:[#allocation2 + $0x98] sm:$0x1]  ;;  %v1629_v49 = vrot.slane %v1627_v42, 4 }
  0xa8   : > { %v2064_v25 = vsel %vm10625_vm3, %v10453_v58, %v14076_v37  ;;  %v608_v58 = vrot.slane %v10902_v50, 4  ;;  %9402 = vmatprep.mubr.msk.bf16.mxu0 %vm1009_vm4, %v10975_v39  ;;  %v1598_v51 = vshll.u32 %v10982_v11, 16  ;;  %v1615_v13 = vsel %vm10419_vm13, %v1610_v38, %v1614_v60  ;;  %v10992_v22 = vld [vmem:[#allocation2 + $0xb8] sm:$0xf] }
  0xa9   : > { %v10984_v59 = vcombine.low %v2061_v16, %v2064_v25  ;;  %v1620_v24 = vrot.slane %v1619_v47, 4  ;;  %v1632_v9 = vrot.slane %v1630_v62, 5  ;;  %v1636_v46 = vshll.u32 %v10963_v0, 16 }
  0xaa   : > { %v793_v12 = vsel %vm10405_vm12, %v608_v58, %v792_v40  ;;  %v1642_v50 = vrot.slane %v1640_v15, 4  ;;  %v10999_v56 = vcombine.low %v10978_v41, %v10992_v22  ;;  %v1664_v27 = vshrl.u32 %v10992_v22, 16  ;;  %v11002_v35 = vld [vmem:[#allocation2 + $0xa4] sm:$0x1] }
  0xab   : > { %v1600_v52 = vrot.slane %v1598_v51, 5  ;;  %794 = vst [vmem:[#allocation2 + $0xb0] sm:$0x1] %v793_v12  ;;  %v625_v16 = vrot.slane %v10921_v6, 4  ;;  %v1622_v42 = vshll.u32 %v11002_v35, 16  ;;  %v1633_v3 = vor.u32 %v1632_v9, %v1629_v49 }
  0xac   : > { %v11006_v60 = vrot.slane %v1636_v46, 5  ;;  %v1653_v62 = vrot.slane %v1651_v19, 4  ;;  %9403 = vmatmul.mubr.msk.bf16.gmra.mrb[28].mxu0 %vm1009_vm4, %v10999_v56  ;;  %v1656_v15 = vrot.slane %v1654_v61, 5  ;;  %v1660_v38 = vshll.u32 %v10992_v22, 16  ;;  %v10050_v9 = vld [vmem:[#allocation2 + $0x1c] sm:$0xf] }
  0xad   : > { %v1601_v37 = vsel %vm10419_vm13, %v1596_v14, %v1600_v52  ;;  %v800_v25 = vsel %vm10405_vm12, %v625_v16, %v799_v28  ;;  %v1624_v6 = vrot.slane %v1622_v42, 5  ;;  %9442 = vmatprep.mubr.msk.bf16.mxu0 %vm1009_vm4, %v8628_v31  ;;  %v1634_v40 = vrot.slane %v1633_v3, 4  ;;  %v10048_v14 = vld [vmem:[#allocation2 + $0x18] sm:$0xf]  ;;  %v10049_v31 = vld [vmem:[%s13888_s1 + $0x8] sm:$0x3] }
  0xae   : > { %v11015_v47 = vcombine.low %v1591_v55, %v1601_v37  ;;  %v1643_v19 = vor.u32 %v1642_v50, %v11006_v60  ;;  %801 = vst [vmem:[#allocation2 + $0xbc] sm:$0x1] %v800_v25  ;;  %v1657_v58 = vor.u32 %v1656_v15, %v1653_v62  ;;  %v11019_v51 = vrot.slane %v1660_v38, 5  ;;  %v10051_v62 = vld [vmem:[#allocation2 + $0x24] sm:$0xf] }
  0xaf   : > { %v1666_v49 = vrot.slane %v1664_v27, 4  ;;  %v8613_v12 = vrot.slane %v10048_v14, 9  ;;  %v1625_v55 = vsel %vm10419_vm13, %v1620_v24, %v1624_v6  ;;  %v2856_v61 = vsel %vm1058_vm0, %v10049_v31, 0  ;;  %v10052_v25 = vld [vmem:[#allocation2 + $0x28] sm:$0xf] }
  0xb0   : > { %9432 = vmatprep.mubr.msk.bf16.mxu1 %vm1009_vm4, %v11015_v47  ;;  %v1639_v28 = vsel %vm10419_vm13, %v1634_v40, %v11006_v60  ;;  %v2067_v46 = vrot.slane %v10050_v9, 5  ;;  %v11032_v50 = vcombine.low %v1615_v13, %v1625_v55  ;;  %v1658_v27 = vrot.slane %v1657_v58, 4  ;;  %v10054_v55 = vld [vmem:[#allocation2 + $0x34] sm:$0xf] }
  0xb1   : > { %v1667_v52 = vor.u32 %v1666_v49, %v11019_v51  ;;  %v2070_v16 = vrot.slane %v10535_v57, 5  ;;  %v8614_v37 = vrot.slane %v10051_v62, 9  ;;  %v2074_v15 = vrot.slane %v10052_v25, 5  ;;  %v10053_v49 = vld [vmem:[#allocation2 + $0x30] sm:$0xf] }
  0xb2   : > { %v11036_v24 = vld [vmem:[#allocation2 + $0xb0] sm:$0x1]  ;;  %v2068_v42 = vsel %vm10625_vm3, %v8613_v12, %v2067_v46  ;;  %v2069_v3 = vrot.slane %v2067_v46, 4  ;;  %9433 = vmatmul.mubr.msk.bf16.gmra.mrb[24].mxu1 %vm1009_vm4, %v11032_v50  ;;  %v1644_v13 = vrot.slane %v1643_v19, 4  ;;  %v1663_v57 = vsel %vm10419_vm13, %v1658_v27, %v11019_v51  ;;  %v11054_v19 = vld [vmem:[%s13888_s1 + $0xc] sm:$0x3] }
  0xb3   : > { %v1646_v60 = vshll.u32 %v11036_v24, 16  ;;  %v2077_v38 = vrot.slane %v10556_v32, 5  ;;  %v2075_v40 = vsel %vm10625_vm3, %v8614_v37, %v2074_v15  ;;  %v2076_v58 = vrot.slane %v2074_v15, 4 }
  0xb4   : > { %v2071_v6 = vsel %vm10625_vm3, %v2069_v3, %v2070_v16  ;;  %v8615_v14 = vrot.slane %v10053_v49, 9  ;;  %9443 = vmatmul.mubr.msk.bf16.vlgmr.msra.gmra.mrb[32].mxu0 %vm1009_vm4, %v10984_v59  ;;  %v2081_v31 = vrot.slane %v10054_v55, 5  ;;  %v2084_v9 = vrot.slane %v10633_v53, 5 }
  0xb5   : > { %v1648_v51 = vrot.slane %v1646_v60, 5  ;;  %v11058_v12 = vld [vmem:[#allocation2 + $0xbc] sm:$0x1]  ;;  %v11060_v32 = vcombine.low %v2068_v42, %v2071_v6  ;;  %9509 = vmatpush3.bf16.msra.mxu0 %v2856_v61  ;;  %v1668_v46 = vrot.slane %v1667_v52, 4  ;;  %v2078_v16 = vsel %vm10625_vm3, %v2076_v58, %v2077_v38 }
  0xb6   : > { %v1670_v27 = vshll.u32 %v11058_v12, 16  ;;  %v2088_v3 = vrot.slane %v10546_v23, 5  ;;  %v2082_v42 = vsel %vm10625_vm3, %v8615_v14, %v2081_v31  ;;  %v2083_v37 = vrot.slane %v2081_v31, 4  ;;  %9990 = vmatprep.subr.msk.bf16.mxu0 %vm1058_vm0, %v11054_v19 }
  0xb7   : > { %v1649_v62 = vsel %vm10419_vm13, %v1644_v13, %v1648_v51  ;;  %9446 = vmatprep.mubr.msk.bf16.mxu0 %vm1009_vm4, %v11060_v32  ;;  %v8616_v53 = vrot.slane %v10541_v7, 9  ;;  %v11078_v25 = vcombine.low %v2075_v40, %v2078_v16  ;;  %v2091_v13 = vrot.slane %v10641_v34, 5  ;;  %v14082_v16 = vld [vmem:[#allocation26_spill] sm:$0xff] }
  0xb8   : > { %v11076_v61 = vcombine.low %v1639_v28, %v1649_v62  ;;  %v1672_v52 = vrot.slane %v1670_v27, 5  ;;  %v2090_v23 = vrot.slane %v2088_v3, 4  ;;  %v2085_v15 = vsel %vm10625_vm3, %v2083_v37, %v2084_v9  ;;  %v14083_v62 = vld [vmem:[#allocation22_spill] sm:$0xff]  ;;  %v14085_v37 = vld [vmem:[#allocation28_spill] sm:$0xff] }
  0xb9   : > { %14077 = vst [vmem:[#allocation40_spill] sm:$0xff] %v11078_v25  ;;  %v8617_v60 = vrot.slane %v10602_v63, 9  ;;  %v2095_v38 = vrot.slane %v10605_v43, 5  ;;  %v11089_v28 = vcombine.low %v2082_v42, %v2085_v15  ;;  %v2098_v6 = vrot.slane %v10722_v10, 5  ;;  %v14084_v42 = vld [vmem:[#allocation38_spill] sm:$0xff] }
  0xba   : > { %9436 = vmatprep.mubr.msk.bf16.mxu1 %vm1009_vm4, %v11076_v61  ;;  %v1673_v7 = vsel %vm10419_vm13, %v1668_v46, %v1672_v52  ;;  %v2089_v34 = vsel %vm10625_vm3, %v8616_v53, %v2088_v3  ;;  %v2102_v63 = vrot.slane %v10638_v2, 5  ;;  %v2092_v43 = vsel %vm10625_vm3, %v2090_v23, %v2091_v13  ;;  %v14086_v13 = vld [vmem:[#allocation30_spill] sm:$0xff] }
  0xbb   : > { %14078 = vst [vmem:[#allocation41_spill] sm:$0xff] %v11089_v28  ;;  %v11092_v40 = vcombine.low %v1663_v57, %v1673_v7  ;;  %v2097_v58 = vrot.slane %v2095_v38, 4  ;;  %v2096_v10 = vsel %vm10625_vm3, %v8617_v60, %v2095_v38  ;;  %v8618_v49 = vrot.slane %v10619_v54, 9  ;;  %v14081_v54 = vld [vmem:[#allocation29_spill] sm:$0xff]  ;;  %v14087_v7 = vld [vmem:[#allocation35_spill] sm:$0xff] }
  0xbc   : > { %9447 = vmatmul.mubr.msk.bf16.gmra.mrb[36].mxu0 %vm1009_vm4, %v11078_v25  ;;  %v8619_v2 = vrot.slane %v10703_v21, 9  ;;  %v2109_v14 = vrot.slane %v10708_v17, 5  ;;  %v2104_v51 = vrot.slane %v2102_v63, 4  ;;  %v2105_v55 = vrot.slane %v10743_v8, 5 }
  0xbd   : > { %9437 = vmatmul.mubr.msk.bf16.gmra.mrb[28].mxu1 %vm1009_vm4, %v11092_v40  ;;  %v2099_v57 = vsel %vm10625_vm3, %v2097_v58, %v2098_v6  ;;  %9450 = vmatprep.mubr.msk.bf16.mxu0 %vm1009_vm4, %v11089_v28  ;;  %v8621_v31 = vrot.slane %v10778_v5, 9  ;;  %v11116_v9 = vcombine.low %v2089_v34, %v2092_v43  ;;  %v2112_v27 = vrot.slane %v14081_v54, 5  ;;  %v14088_v43 = vld [vmem:[#allocation37_spill] sm:$0xff] }
  0xbe   : > { %9476 = vmatprep.mubr.msk.bf16.mxu1 %vm1009_vm4, %v10441_v44  ;;  %v11118_v46 = vcombine.low %v2096_v10, %v2099_v57  ;;  %v2123_v44 = vrot.slane %v14082_v16, 5  ;;  %v2103_v3 = vsel %vm10625_vm3, %v8618_v49, %v2102_v63  ;;  %v2116_v21 = vrot.slane %v14083_v62, 5  ;;  %v14089_v57 = vld [vmem:[#allocation7_spill] sm:$0xff]  ;;  %v14091_v54 = vld [vmem:[#allocation17_spill] sm:$0xff] }
  0xbf   : > { %14079 = vst [vmem:[#allocation42_spill] sm:$0xff] %v11116_v9  ;;  %v2126_v17 = vrot.slane %v14084_v42, 5  ;;  %v8622_v53 = vrot.slane %v14085_v37, 9  ;;  %v2110_v8 = vsel %vm10625_vm3, %v8619_v2, %v2109_v14  ;;  %v2111_v5 = vrot.slane %v2109_v14, 4 }
  0xc0   : > { %14080 = vst [vmem:[#allocation43_spill] sm:$0xff] %v11118_v46  ;;  %v2124_v52 = vsel %vm10625_vm3, %v8621_v31, %v2123_v44  ;;  %v2125_v23 = vrot.slane %v2123_v44, 4  ;;  %v2106_v15 = vsel %vm10625_vm3, %v2104_v51, %v2105_v55  ;;  %v2130_v60 = vrot.slane %v14086_v13, 5  ;;  %v367_v13 = vld [vmem:[%s10339_s14 + $0x7c] sm:$0xf] }
  0xc1   : > { %v2133_v38 = vrot.slane %v10909_v48, 5  ;;  %v8623_v6 = vrot.slane %v14087_v7, 9  ;;  %v2137_v34 = vrot.slane %v10871_v30, 5  ;;  %v2140_v63 = vrot.slane %v10982_v11, 5  ;;  %v11153_v30 = vld [vmem:[%s13888_s1 + $0xe] sm:$0x3] }
  0xc2   : > { %v2127_v58 = vsel %vm10625_vm3, %v2125_v23, %v2126_v17  ;;  %v8624_v10 = vrot.slane %v14088_v43, 9  ;;  %v2131_v48 = vsel %vm10625_vm3, %v8622_v53, %v2130_v60  ;;  %v2132_v2 = vrot.slane %v2130_v60, 4  ;;  %v14090_v11 = vld [vmem:[#allocation8_spill] sm:$0xff] }
  0xc3   : > { %v11145_v49 = vcombine.low %v2124_v52, %v2127_v58  ;;  %v2144_v14 = vrot.slane %v10899_v1, 5  ;;  %v2138_v51 = vsel %vm10625_vm3, %v8623_v6, %v2137_v34  ;;  %v2139_v55 = vrot.slane %v2137_v34, 4  ;;  %v14095_v7 = vld [vmem:[#allocation32_spill] sm:$0xff] }
  0xc4   : > { %9451 = vmatmul.mubr.msk.bf16.gmra.mrb[40].mxu0 %vm1009_vm4, %v11116_v9  ;;  %v2147_v31 = vrot.slane %v11002_v35, 5  ;;  %v3132_v1 = vsel %vm1058_vm0, %v14091_v54, 0  ;;  %v2113_v16 = vsel %vm10625_vm3, %v2111_v5, %v2112_v27  ;;  %v2134_v44 = vsel %vm10625_vm3, %v2132_v2, %v2133_v38  ;;  %v366_v35 = vld [vmem:[%s10339_s14 + $0x78] sm:$0xf]  ;;  %v14093_v27 = vld [vmem:[#allocation21_spill] sm:$0xff] }
  0xc5   : > { %9477 = vmatmul.mubr.msk.bf16.vlgmr.msra.gmra.mrb[32].mxu1 %vm1009_vm4, %v14089_v57  ;;  %9454 = vmatprep.mubr.msk.bf16.mxu0 %vm1009_vm4, %v11118_v46  ;;  %v2145_v62 = vsel %vm10625_vm3, %v8624_v10, %v2144_v14  ;;  %v2146_v42 = vrot.slane %v2144_v14, 4  ;;  %v11170_v17 = vcombine.low %v2131_v48, %v2134_v44  ;;  %v2141_v37 = vsel %vm10625_vm3, %v2139_v55, %v2140_v63  ;;  %v14097_v48 = vld [vmem:[#allocation11_spill] sm:$0xff]  ;;  %v11216_v54 = vld [vmem:[#allocation2 + $0xc8] sm:$0x1] }
  0xc6   : > { %9480 = vmatprep.mubr.msk.bf16.mxu1 %vm1009_vm4, %v14090_v11  ;;  %9543 = vmatpush3.bf16.msra.mxu1 %v3132_v1  ;;  %v11177_v53 = vcombine.low %v2103_v3, %v2106_v15  ;;  %v8620_v5 = vrot.slane %v14093_v27, 9  ;;  %v11180_v52 = vcombine.low %v2138_v51, %v2141_v37  ;;  %v11185_v60 = vcombine.low %v2110_v8, %v2113_v16  ;;  %v14096_v15 = vld [vmem:[#allocation10_spill] sm:$0xff]  ;;  %v11210_v51 = vld [vmem:[#allocation2 + $0xc0] sm:$0xf] }
  0xc7   : > { %9991 = vmatprep.subr.msk.bf16.mxu1 %vm1058_vm0, %v11153_v30  ;;  %v2148_v23 = vsel %vm10625_vm3, %v2146_v42, %v2147_v31  ;;  %v2118_v38 = vrot.slane %v2116_v21, 4  ;;  %v2119_v6 = vrot.slane %v14095_v7, 5  ;;  %v627_v34 = vshrl.u32 %v366_v35, 16 }
  0xc8   : > { %14092 = vst [vmem:[#allocation29_spill] sm:$0xff] %v11177_v53  ;;  %14094 = vst [vmem:[#allocation26_spill] sm:$0xff] %v11185_v60  ;;  %v11188_v58 = vcombine.low %v2145_v62, %v2148_v23  ;;  %v630_v63 = vshll.u32 %v366_v35, 16  ;;  %v635_v43 = vshrl.u32 %v367_v13, 16  ;;  %v638_v3 = vshll.u32 %v367_v13, 16  ;;  %v14099_v35 = vld [vmem:[#allocation14_spill] sm:$0xff] }
  0xc9   : > { %v11194_v10 = vrot.slane %v627_v34, 7  ;;  %v11202_v8 = vsel %vm10625_vm3, %v8620_v5, %v2116_v21  ;;  %v11206_v2 = vsel %vm10625_vm3, %v2118_v38, %v2119_v6  ;;  %v10080_v16 = vmov 0.0   ;;  %v14101_v13 = vld [vmem:[#allocation20_spill] sm:$0xff]  ;;  %v14102_v38 = vld [vmem:[#allocation23_spill] sm:$0xff] }
  0xca   : > { %v11208_v14 = vrot.slane %v635_v43, 7  ;;  %866 = vst.msk [vmem:[#allocation4 + $0x10] sm:$0xff] %vm863_vm6, %v10080_v16  ;;  %864 = vst.msk [vmem:[#allocation4] sm:$0xff] %vm863_vm6, %v10080_v16  ;;  %v11352_v44 = vcombine.low %v11202_v8, %v11206_v2  ;;  %v2151_v27 = vrot.slane %v10963_v0, 5  ;;  %v8625_v4 = vrot.slane %v10948_v20, 9  ;;  %v14103_v43 = vld [vmem:[#allocation27_spill] sm:$0xff] }
  0xcb   : > { %v11213_v55 = vor.u32 %v630_v63, %v11194_v10  ;;  %v633_v31 = vrot.slane %v11194_v10, 4  ;;  %865 = vst.msk [vmem:[#allocation4 + $0x8] sm:$0xff] %vm863_vm6, %v10080_v16  ;;  %867 = vst.msk [vmem:[#allocation4 + $0x18] sm:$0xff] %vm863_vm6, %v10080_v16  ;;  %v2154_v23 = vrot.slane %v11036_v24, 5  ;;  %v2158_v7 = vrot.slane %v10992_v22, 5  ;;  %v14104_v22 = vld [vmem:[#allocation31_spill] sm:$0xff] }
  0xcc   : > { %9455 = vmatmul.mubr.msk.bf16.gmra.mrb[44].mxu0 %vm1009_vm4, %v11177_v53  ;;  %v11219_v1 = vor.u32 %v638_v3, %v11208_v14  ;;  %v642_v21 = vrot.slane %v11208_v14, 4  ;;  %868 = vst.msk [vmem:[#allocation4 + $0x20] sm:$0xff] %vm863_vm6, %v10080_v16  ;;  %869 = vst.msk [vmem:[#allocation4 + $0x28] sm:$0xff] %vm863_vm6, %v10080_v16  ;;  %v2153_v5 = vrot.slane %v2151_v27, 4  ;;  %v2152_v20 = vsel %vm10625_vm3, %v8625_v4, %v2151_v27  ;;  %v14106_v8 = vld [vmem:[#allocation39_spill] sm:$0xff]  ;;  %v14107_v2 = vld [vmem:[#allocation9_spill] sm:$0xff] }
  0xcd   : > { %9481 = vmatmul.mubr.msk.bf16.gmra.mrb[36].mxu1 %vm1009_vm4, %v14096_v15  ;;  %9458 = vmatprep.mubr.msk.bf16.mxu0 %vm1009_vm4, %v11185_v60  ;;  %870 = vst.msk [vmem:[#allocation4 + $0x30] sm:$0xff] %vm863_vm6, %v10080_v16  ;;  %871 = vst.msk [vmem:[#allocation4 + $0x38] sm:$0xff] %vm863_vm6, %v10080_v16  ;;  %v803_v62 = vsel %vm10367_vm10, %v11213_v55, %v11210_v51  ;;  %v8626_v6 = vrot.slane %v10978_v41, 9  ;;  %v2160_v34 = vrot.slane %v2158_v7, 4  ;;  %v2161_v63 = vrot.slane %v11058_v12, 5  ;;  %v14105_v12 = vld [vmem:[#allocation36_spill] sm:$0xff] }
  0xce   : > { %9484 = vmatprep.mubr.msk.bf16.mxu1 %vm1009_vm4, %v14097_v48  ;;  %872 = vst.msk [vmem:[#allocation4 + $0x40] sm:$0xff] %vm863_vm6, %v10080_v16  ;;  %873 = vst.msk [vmem:[#allocation4 + $0x48] sm:$0xff] %vm863_vm6, %v10080_v16  ;;  %v641_v42 = vsel %vm10378_vm11, %v633_v31, %v11219_v1  ;;  %v807_v37 = vsel %vm10405_vm12, %v642_v21, %v11216_v54  ;;  %v2155_v0 = vsel %vm10625_vm3, %v2153_v5, %v2154_v23  ;;  %v11424_v51 = vld [vmem:[%s13888_s1 + $0x10] sm:$0x3]  ;;  %v14108_v55 = vld [vmem:[#allocation12_spill] sm:$0xff] }
  0xcf   : > { %874 = vst.msk [vmem:[#allocation4 + $0x50] sm:$0xff] %vm863_vm6, %v10080_v16  ;;  %875 = vst.msk [vmem:[#allocation4 + $0x58] sm:$0xff] %vm863_vm6, %v10080_v16  ;;  %v11393_v24 = vcombine.low %v2152_v20, %v2155_v0  ;;  %v2159_v3 = vsel %vm10625_vm3, %v8626_v6, %v2158_v7  ;;  %v2162_v41 = vsel %vm10625_vm3, %v2160_v34, %v2161_v63  ;;  %v3402_v14 = vsel %vm1058_vm0, %v11054_v19, 0  ;;  %v14109_v19 = vld [vmem:[#allocation13_spill] sm:$0xff]  ;;  %v14110_v21 = vld [vmem:[#allocation18_spill] sm:$0xff] }
  0xd0   : > { %876 = vst.msk [vmem:[#allocation4 + $0x60] sm:$0xff] %vm863_vm6, %v10080_v16  ;;  %877 = vst.msk [vmem:[#allocation4 + $0x68] sm:$0xff] %vm863_vm6, %v10080_v16  ;;  %v11409_v10 = vcombine.low %v2159_v3, %v2162_v41 }
  0xd1   : > { %878 = vst.msk [vmem:[#allocation4 + $0x70] sm:$0xff] %vm863_vm6, %v10080_v16  ;;  %879 = vst.msk [vmem:[#allocation4 + $0x78] sm:$0xff] %vm863_vm6, %v10080_v16  ;;  %v898_v63 = vld [vmem:[#allocation4 + $0x10] sm:$0xff]  ;;  %v896_v3 = vld [vmem:[#allocation4] sm:$0xff] }
  0xd2   : > { %880 = vst.msk [vmem:[#allocation4 + $0x80] sm:$0xff] %vm863_vm6, %v10080_v16  ;;  %881 = vst.msk [vmem:[#allocation4 + $0x88] sm:$0xff] %vm863_vm6, %v10080_v16 }
  0xd3   : > { %882 = vst.msk [vmem:[#allocation4 + $0x90] sm:$0xff] %vm863_vm6, %v10080_v16  ;;  %883 = vst.msk [vmem:[#allocation4 + $0x98] sm:$0xff] %vm863_vm6, %v10080_v16 }
  0xd4   : > { %884 = vst.msk [vmem:[#allocation4 + $0xa0] sm:$0xff] %vm863_vm6, %v10080_v16  ;;  %885 = vst.msk [vmem:[#allocation4 + $0xa8] sm:$0xff] %vm863_vm6, %v10080_v16  ;;  %9459 = vmatmul.mubr.msk.bf16.gmra.mrb[48].mxu0 %vm1009_vm4, %v11352_v44 }
  0xd5   : > { %886 = vst.msk [vmem:[#allocation4 + $0xb0] sm:$0xff] %vm863_vm6, %v10080_v16  ;;  %887 = vst.msk [vmem:[#allocation4 + $0xb8] sm:$0xff] %vm863_vm6, %v10080_v16  ;;  %9485 = vmatmul.mubr.msk.bf16.gmra.mrb[40].mxu1 %vm1009_vm4, %v14099_v35  ;;  %9462 = vmatprep.mubr.msk.bf16.mxu0 %vm1009_vm4, %v11145_v49 }
  0xd6   : > { %888 = vst.msk [vmem:[#allocation4 + $0xc0] sm:$0xff] %vm863_vm6, %v10080_v16  ;;  %889 = vst.msk [vmem:[#allocation4 + $0xc8] sm:$0xff] %vm863_vm6, %v10080_v16  ;;  %9488 = vmatprep.mubr.msk.bf16.mxu1 %vm1009_vm4, %v14100_v26 }
  0xd7   : > { %890 = vst.msk [vmem:[#allocation4 + $0xd0] sm:$0xff] %vm863_vm6, %v10080_v16  ;;  %891 = vst.msk [vmem:[#allocation4 + $0xd8] sm:$0xff] %vm863_vm6, %v10080_v16 }
  0xd8   : > { %892 = vst.msk [vmem:[#allocation4 + $0xe0] sm:$0xff] %vm863_vm6, %v10080_v16  ;;  %893 = vst.msk [vmem:[#allocation4 + $0xe8] sm:$0xff] %vm863_vm6, %v10080_v16 }
  0xd9   : > { %894 = vst.msk [vmem:[#allocation4 + $0xf0] sm:$0xff] %vm863_vm6, %v10080_v16  ;;  %895 = vst.msk [vmem:[#allocation4 + $0xf8] sm:$0xff] %vm863_vm6, %v10080_v16 }
  0xda   : > { %4982 = vst.msk [vmem:[#allocation5] sm:$0xff] %vm863_vm6, %v10080_v16  ;;  %4983 = vst.msk [vmem:[#allocation5 + $0x8] sm:$0xff] %vm863_vm6, %v10080_v16 }
  0xdb   : > { %4984 = vst.msk [vmem:[#allocation5 + $0x10] sm:$0xff] %vm863_vm6, %v10080_v16  ;;  %4985 = vst.msk [vmem:[#allocation5 + $0x18] sm:$0xff] %vm863_vm6, %v10080_v16 }
  0xdc   : > { %4986 = vst.msk [vmem:[#allocation5 + $0x20] sm:$0xff] %vm863_vm6, %v10080_v16  ;;  %4987 = vst.msk [vmem:[#allocation5 + $0x28] sm:$0xff] %vm863_vm6, %v10080_v16  ;;  %9463 = vmatmul.mubr.msk.bf16.gmra.mrb[52].mxu0 %vm1009_vm4, %v11170_v17 }
  0xdd   : > { %4988 = vst.msk [vmem:[#allocation5 + $0x30] sm:$0xff] %vm863_vm6, %v10080_v16  ;;  %4989 = vst.msk [vmem:[#allocation5 + $0x38] sm:$0xff] %vm863_vm6, %v10080_v16  ;;  %9489 = vmatmul.mubr.msk.bf16.gmra.mrb[44].mxu1 %vm1009_vm4, %v14101_v13  ;;  %9466 = vmatprep.mubr.msk.bf16.mxu0 %vm1009_vm4, %v11180_v52 }
  0xde   : > { %4990 = vst.msk [vmem:[#allocation5 + $0x40] sm:$0xff] %vm863_vm6, %v10080_v16  ;;  %4991 = vst.msk [vmem:[#allocation5 + $0x48] sm:$0xff] %vm863_vm6, %v10080_v16  ;;  %9492 = vmatprep.mubr.msk.bf16.mxu1 %vm1009_vm4, %v14102_v38 }
  0xdf   : > { %4992 = vst.msk [vmem:[#allocation5 + $0x50] sm:$0xff] %vm863_vm6, %v10080_v16  ;;  %4993 = vst.msk [vmem:[#allocation5 + $0x58] sm:$0xff] %vm863_vm6, %v10080_v16 }
  0xe0   : > { %4994 = vst.msk [vmem:[#allocation5 + $0x60] sm:$0xff] %vm863_vm6, %v10080_v16  ;;  %4995 = vst.msk [vmem:[#allocation5 + $0x68] sm:$0xff] %vm863_vm6, %v10080_v16 }
  0xe1   : > { %4996 = vst.msk [vmem:[#allocation5 + $0x70] sm:$0xff] %vm863_vm6, %v10080_v16  ;;  %4997 = vst.msk [vmem:[#allocation5 + $0x78] sm:$0xff] %vm863_vm6, %v10080_v16 }
  0xe2   : > { %4998 = vst.msk [vmem:[#allocation5 + $0x80] sm:$0xff] %vm863_vm6, %v10080_v16  ;;  %4999 = vst.msk [vmem:[#allocation5 + $0x88] sm:$0xff] %vm863_vm6, %v10080_v16 }
  0xe3   : > { %5000 = vst.msk [vmem:[#allocation5 + $0x90] sm:$0xff] %vm863_vm6, %v10080_v16  ;;  %5001 = vst.msk [vmem:[#allocation5 + $0x98] sm:$0xff] %vm863_vm6, %v10080_v16 }
  0xe4   : > { %5002 = vst.msk [vmem:[#allocation5 + $0xa0] sm:$0xff] %vm863_vm6, %v10080_v16  ;;  %5003 = vst.msk [vmem:[#allocation5 + $0xa8] sm:$0xff] %vm863_vm6, %v10080_v16  ;;  %9467 = vmatmul.mubr.msk.bf16.gmra.mrb[56].mxu0 %vm1009_vm4, %v11188_v58 }
  0xe5   : > { %5004 = vst.msk [vmem:[#allocation5 + $0xb0] sm:$0xff] %vm863_vm6, %v10080_v16  ;;  %5005 = vst.msk [vmem:[#allocation5 + $0xb8] sm:$0xff] %vm863_vm6, %v10080_v16  ;;  %9493 = vmatmul.mubr.msk.bf16.gmra.mrb[48].mxu1 %vm1009_vm4, %v14103_v43  ;;  %9470 = vmatprep.mubr.msk.bf16.mxu0 %vm1009_vm4, %v11393_v24 }
  0xe6   : > { %5006 = vst.msk [vmem:[#allocation5 + $0xc0] sm:$0xff] %vm863_vm6, %v10080_v16  ;;  %5007 = vst.msk [vmem:[#allocation5 + $0xc8] sm:$0xff] %vm863_vm6, %v10080_v16  ;;  %9496 = vmatprep.mubr.msk.bf16.mxu1 %vm1009_vm4, %v14104_v22 }
  0xe7   : > { %5008 = vst.msk [vmem:[#allocation5 + $0xd0] sm:$0xff] %vm863_vm6, %v10080_v16  ;;  %5009 = vst.msk [vmem:[#allocation5 + $0xd8] sm:$0xff] %vm863_vm6, %v10080_v16 }
  0xe8   : > { %5010 = vst.msk [vmem:[#allocation5 + $0xe0] sm:$0xff] %vm863_vm6, %v10080_v16  ;;  %5011 = vst.msk [vmem:[#allocation5 + $0xe8] sm:$0xff] %vm863_vm6, %v10080_v16 }
  0xe9   : > { %5012 = vst.msk [vmem:[#allocation5 + $0xf0] sm:$0xff] %vm863_vm6, %v10080_v16  ;;  %5013 = vst.msk [vmem:[#allocation5 + $0xf8] sm:$0xff] %vm863_vm6, %v10080_v16  ;;  %v14111_v16 = vld [vmem:[#allocation19_spill] sm:$0xff] }
  0xea   : > { %14098 = vst [vmem:[#allocation22_spill] sm:$0xff] %v11352_v44  ;;  %804 = vst [vmem:[#allocation2 + $0xc0] sm:$0xf] %v803_v62  ;;  %v3694_v62 = vsel %vm1058_vm0, %v11153_v30, 0  ;;  %v14115_v30 = vld [vmem:[#allocation34_spill] sm:$0xff] }
  0xeb   : > { %805 = vst.msk [vmem:[#allocation2 + $0xc4] sm:$0xf] %vm280_vm1, %v641_v42  ;;  %808 = vst [vmem:[#allocation2 + $0xc8] sm:$0x1] %v807_v37  ;;  %v14112_v42 = vld [vmem:[#allocation24_spill] sm:$0xff]  ;;  %v14113_v37 = vld [vmem:[#allocation25_spill] sm:$0xff] }
  0xec   : > { %9471 = vmatmul.mubr.msk.bf16.gmra.mrb[60].mxu0 %vm1009_vm4, %v11409_v10  ;;  %vm4342_vm1 = vcmask 57344  }
  0xed   : > { %9497 = vmatmul.mubr.msk.bf16.gmra.mrb[52].mxu1 %vm1009_vm4, %v14105_v12  ;;  %9510 = vmatprep.mubr.msk.bf16.mxu0 %vm1009_vm4, %v14107_v2  ;;  %v899_v2 = vld [vmem:[#allocation4 + $0x18] sm:$0xff]  ;;  %vm12016_vm8 = vmand %vm4342_vm1, %vm368_vm5 }
  0xee   : > { %9500 = vmatprep.mubr.msk.bf16.mxu1 %vm1009_vm4, %v14106_v8 }
  0xf1   : > { %v11432_v31 = vld [vmem:[#allocation2 + $0xc0] sm:$0xf] }
  0xf2   : > { %v11434_v54 = vld [vmem:[#allocation2 + $0xc4] sm:$0xf]  ;;  %v2792_v27 = vshrl.u32 %v11432_v31, 16  ;;  %v2795_v4 = vshll.u32 %v11432_v31, 16  ;;  %v11482_v34 = vld [vmem:[#allocation2 + $0xc8] sm:$0x1] }
  0xf3   : > { %v11442_v1 = vcombine.low %v11432_v31, %v11434_v54  ;;  %v2805_v5 = vshrl.u32 %v11434_v54, 16  ;;  %v2801_v23 = vshll.u32 %v11434_v54, 16 }
  0xf4   : > { %9511 = vmatmul.mubr.msk.bf16.vlgmr.msra.gmra.mrb[64].mxu0 %vm1009_vm4, %v14108_v55  ;;  %v2794_v7 = vrot.slane %v2792_v27, 4  ;;  %v2797_v20 = vrot.slane %v2795_v4, 5  ;;  %v2811_v27 = vshll.u32 %v11482_v34, 16 }
  0xf5   : > { %9501 = vmatmul.mubr.msk.bf16.gmra.mrb[56].mxu1 %vm1009_vm4, %v10975_v39  ;;  %9577 = vmatpush3.bf16.msra.mxu0 %v3402_v14  ;;  %v2803_v0 = vrot.slane %v2801_v23, 5  ;;  %v2807_v6 = vrot.slane %v2805_v5, 4  ;;  %v897_v23 = vld [vmem:[#allocation4 + $0x8] sm:$0xff] }
  0xf6   : > { %9504 = vmatprep.mubr.msk.bf16.mxu1 %vm1009_vm4, %v10999_v56  ;;  %9514 = vmatprep.mubr.msk.bf16.mxu0 %vm1009_vm4, %v14109_v19  ;;  %v2798_v14 = vor.u32 %v2797_v20, %v2794_v7  ;;  %v902_v7 = vld [vmem:[#allocation4 + $0x30] sm:$0xff]  ;;  %v900_v20 = vld [vmem:[#allocation4 + $0x20] sm:$0xff] }
  0xf7   : > { %9992 = vmatprep.subr.msk.bf16.mxu0 %vm1058_vm0, %v11424_v51 }
  0xfc   : > { %9515 = vmatmul.mubr.msk.bf16.gmra.mrb[68].mxu0 %vm1009_vm4, %v14110_v21 }
  0xfd   : > { %9505 = vmatmul.mubr.msk.bf16.gmra.mrb[60].mxu1 %vm1009_vm4, %v11442_v1  ;;  %9518 = vmatprep.mubr.msk.bf16.mxu0 %vm1009_vm4, %v14111_v16 }
  0xfe   : > { %9544 = vmatprep.mubr.msk.bf16.mxu1 %vm1009_vm4, %v10984_v59  ;;  %v14114_v59 = vld [vmem:[#allocation33_spill] sm:$0xff] }
 0x104   : > { %9519 = vmatmul.mubr.msk.bf16.gmra.mrb[72].mxu0 %vm1009_vm4, %v14112_v42 }
 0x105   : > { %9545 = vmatmul.mubr.msk.bf16.vlgmr.msra.gmra.mrb[64].mxu1 %vm1009_vm4, %v11060_v32  ;;  %9522 = vmatprep.mubr.msk.bf16.mxu0 %vm1009_vm4, %v14113_v37 }
 0x106   : > { %9548 = vmatprep.mubr.msk.bf16.mxu1 %vm1009_vm4, %v11078_v25  ;;  %9611 = vmatpush3.bf16.msra.mxu1 %v3694_v62  ;;  %v2808_v62 = vor.u32 %v2807_v6, %v2803_v0  ;;  %v2813_v25 = vrot.slane %v2811_v27, 5  ;;  %v903_v6 = vld [vmem:[#allocation4 + $0x38] sm:$0xff] }
 0x10c   : > { %9523 = vmatmul.mubr.msk.bf16.gmra.mrb[76].mxu0 %vm1009_vm4, %v14114_v59 }
 0x10d   : > { %9549 = vmatmul.mubr.msk.bf16.gmra.mrb[68].mxu1 %vm1009_vm4, %v11089_v28  ;;  %9526 = vmatprep.mubr.msk.bf16.mxu0 %vm1009_vm4, %v14115_v30  ;;  %v2809_v28 = vrot.slane %v2808_v62, 4 }
 0x10e   : > { %9552 = vmatprep.mubr.msk.bf16.mxu1 %vm1009_vm4, %v11116_v9 }
 0x114   : > { %9527 = vmatmul.mubr.msk.bf16.gmra.mrb[80].mxu0 %vm1009_vm4, %v10924_v29 }
 0x115   : > { %9553 = vmatmul.mubr.msk.bf16.gmra.mrb[72].mxu1 %vm1009_vm4, %v11118_v46  ;;  %9530 = vmatprep.mubr.msk.bf16.mxu0 %vm1009_vm4, %v10938_v45 }
 0x116   : > { %9556 = vmatprep.mubr.msk.bf16.mxu1 %vm1009_vm4, %v11177_v53 }
 0x11b   : > { %v9376_v41 = vpop.f32.mrb[0].mxu0 }
 0x11c   : > { %9531 = vmatmul.mubr.msk.bf16.gmra.mrb[84].mxu0 %vm1009_vm4, %v11015_v47  ;;  %v1225_v4 = vadd.f32 %v9376_v41, %v898_v63  ;;  %v1096_v5 = vpop.f32.mrb[1].mxu0  ;;  %v901_v63 = vld [vmem:[#allocation4 + $0x28] sm:$0xff] }
 0x11d   : > { %9557 = vmatmul.mubr.msk.bf16.gmra.mrb[76].mxu1 %vm1009_vm4, %v11185_v60  ;;  %9534 = vmatprep.mubr.msk.bf16.mxu0 %vm1009_vm4, %v11032_v50  ;;  %v1223_v36 = vadd.f32 %v1096_v5, %v896_v3  ;;  %v9377_v60 = vpop.f32.mrb[2].mxu0 }
 0x11e   : > { %9560 = vmatprep.mubr.msk.bf16.mxu1 %vm1009_vm4, %v11352_v44  ;;  %1257 = vst.msk [vmem:[#allocation4 + $0x10] sm:$0xff] %vm863_vm6, %v1225_v4  ;;  %v1226_v53 = vadd.f32 %v9377_v60, %v899_v2  ;;  %v1099_v46 = vpop.f32.mrb[3].mxu0  ;;  %v2799_v44 = vrot.slane %v2798_v14, 4 }
 0x11f   : > { %1255 = vst.msk [vmem:[#allocation4] sm:$0xff] %vm863_vm6, %v1223_v36  ;;  %v1224_v9 = vadd.f32 %v1099_v46, %v897_v23 }
 0x120   : > { %1258 = vst.msk [vmem:[#allocation4 + $0x18] sm:$0xff] %vm863_vm6, %v1226_v53  ;;  %v2804_v36 = vsel %vm10419_vm13, %v2799_v44, %v2803_v0 }
 0x121   : > { %1256 = vst.msk [vmem:[#allocation4 + $0x8] sm:$0xff] %vm863_vm6, %v1224_v9  ;;  %v2814_v9 = vsel %vm10419_vm13, %v2809_v28, %v2813_v25 }
 0x122   : > { %v11510_v4 = vcombine.low %v2804_v36, %v2814_v9  ;;  %v3086_v9 = vrot.slane %v11434_v54, 5 }
 0x123   : > { %v9380_v60 = vpop.f32.mrb[4].mxu0 }
 0x124   : > { %9535 = vmatmul.mubr.msk.bf16.gmra.mrb[88].mxu0 %vm1009_vm4, %v11076_v61  ;;  %v1229_v46 = vadd.f32 %v9380_v60, %v902_v7  ;;  %v1112_v53 = vpop.f32.mrb[5].mxu0 }
 0x125   : > { %9561 = vmatmul.mubr.msk.bf16.gmra.mrb[80].mxu1 %vm1009_vm4, %v11145_v49  ;;  %9538 = vmatprep.mubr.msk.bf16.mxu0 %vm1009_vm4, %v11092_v40  ;;  %v1227_v3 = vadd.f32 %v1112_v53, %v900_v20  ;;  %v9381_v41 = vpop.f32.mrb[6].mxu0  ;;  %v1676_v2 = vld [vmem:[#allocation4 + $0x10] sm:$0xff]  ;;  %v9410_v5 = vpop.f32.mrb[0].mxu1  ;;  %v8696_v53 = vrot.slane %v11432_v31, 9 }
 0x126   : > { %9564 = vmatprep.mubr.msk.bf16.mxu1 %vm1009_vm4, %v11170_v17  ;;  %1261 = vst.msk [vmem:[#allocation4 + $0x30] sm:$0xff] %vm863_vm6, %v1229_v46  ;;  %v1230_v14 = vadd.f32 %v9381_v41, %v903_v6  ;;  %v1115_v62 = vpop.f32.mrb[7].mxu0  ;;  %v1674_v27 = vld [vmem:[#allocation4] sm:$0xff]  ;;  %v1970_v25 = vadd.f32 %v9410_v5, %v1676_v2  ;;  %v1841_v28 = vpop.f32.mrb[1].mxu1  ;;  %v906_v46 = vld [vmem:[#allocation4 + $0x50] sm:$0xff]  ;;  %v3970_v2 = vsel %vm1058_vm0, %v11424_v51, 0 }
 0x127   : > { %1259 = vst.msk [vmem:[#allocation4 + $0x20] sm:$0xff] %vm863_vm6, %v1227_v3  ;;  %v1228_v44 = vadd.f32 %v1115_v62, %v901_v63  ;;  %v1677_v0 = vld [vmem:[#allocation4 + $0x18] sm:$0xff]  ;;  %v1968_v7 = vadd.f32 %v1841_v28, %v1674_v27  ;;  %v9411_v20 = vpop.f32.mrb[2].mxu1  ;;  %v3088_v63 = vrot.slane %v3086_v9, 4  ;;  %v3089_v3 = vrot.slane %v11482_v34, 5  ;;  %v904_v41 = vld [vmem:[#allocation4 + $0x40] sm:$0xff] }
 0x128   : > { %1262 = vst.msk [vmem:[#allocation4 + $0x38] sm:$0xff] %vm863_vm6, %v1230_v14  ;;  %v1675_v23 = vld [vmem:[#allocation4 + $0x8] sm:$0xff]  ;;  %2002 = vst.msk [vmem:[#allocation4 + $0x10] sm:$0xff] %vm863_vm6, %v1970_v25  ;;  %v1971_v60 = vadd.f32 %v9411_v20, %v1677_v0  ;;  %v1844_v6 = vpop.f32.mrb[3].mxu1  ;;  %v907_v62 = vld [vmem:[#allocation4 + $0x58] sm:$0xff]  ;;  %v3087_v51 = vsel %vm10625_vm3, %v8696_v53, %v3086_v9  ;;  %vm5175_vm0 = vcmask 1043456  }
 0x129   : > { %1260 = vst.msk [vmem:[#allocation4 + $0x28] sm:$0xff] %vm863_vm6, %v1228_v44  ;;  %2000 = vst.msk [vmem:[#allocation4] sm:$0xff] %vm863_vm6, %v1968_v7  ;;  %v1969_v36 = vadd.f32 %v1844_v6, %v1675_v23  ;;  %v905_v5 = vld [vmem:[#allocation4 + $0x48] sm:$0xff]  ;;  %v3090_v34 = vsel %vm10625_vm3, %v3088_v63, %v3089_v3  ;;  %v910_v3 = vld [vmem:[#allocation4 + $0x70] sm:$0xff] }
 0x12a   : > { %2003 = vst.msk [vmem:[#allocation4 + $0x18] sm:$0xff] %vm863_vm6, %v1971_v60  ;;  %v11547_v23 = vcombine.low %v3087_v51, %v3090_v34 }
 0x12b   : > { %2001 = vst.msk [vmem:[#allocation4 + $0x8] sm:$0xff] %vm863_vm6, %v1969_v36 }
 0x12c   : > { %9539 = vmatmul.mubr.msk.bf16.gmra.mrb[92].mxu0 %vm1009_vm4, %v11510_v4 }
 0x12d   : > { %9565 = vmatmul.mubr.msk.bf16.gmra.mrb[84].mxu1 %vm1009_vm4, %v11180_v52  ;;  %9578 = vmatprep.mubr.msk.bf16.mxu0 %vm1009_vm4, %v14089_v57 }
 0x12e   : > { %9568 = vmatprep.mubr.msk.bf16.mxu1 %vm1009_vm4, %v11188_v58  ;;  %v9384_v14 = vpop.f32.mrb[8].mxu0  ;;  %v1678_v28 = vld [vmem:[#allocation4 + $0x20] sm:$0xff] }
 0x12f   : > { %v1233_v27 = vadd.f32 %v9384_v14, %v906_v46  ;;  %v1128_v57 = vpop.f32.mrb[9].mxu0  ;;  %v1681_v20 = vld [vmem:[#allocation4 + $0x38] sm:$0xff] }
 0x130   : > { %v1231_v54 = vadd.f32 %v1128_v57, %v904_v41  ;;  %v9385_v31 = vpop.f32.mrb[10].mxu0  ;;  %v1679_v36 = vld [vmem:[#allocation4 + $0x28] sm:$0xff]  ;;  %v908_v41 = vld [vmem:[#allocation4 + $0x60] sm:$0xff]  ;;  %v911_v14 = vld [vmem:[#allocation4 + $0x78] sm:$0xff] }
 0x131   : > { %1265 = vst.msk [vmem:[#allocation4 + $0x50] sm:$0xff] %vm863_vm6, %v1233_v27  ;;  %v1234_v44 = vadd.f32 %v9385_v31, %v907_v62  ;;  %v1131_v0 = vpop.f32.mrb[11].mxu0 }
 0x132   : > { %1263 = vst.msk [vmem:[#allocation4 + $0x40] sm:$0xff] %vm863_vm6, %v1231_v54  ;;  %v1232_v25 = vadd.f32 %v1131_v0, %v905_v5 }
 0x133   : > { %1266 = vst.msk [vmem:[#allocation4 + $0x58] sm:$0xff] %vm863_vm6, %v1234_v44 }
 0x134   : > { %9579 = vmatmul.mubr.msk.bf16.vlgmr.msra.gmra.mrb[96].mxu0 %vm1009_vm4, %v14090_v11  ;;  %v1680_v11 = vld [vmem:[#allocation4 + $0x30] sm:$0xff]  ;;  %v9414_v7 = vpop.f32.mrb[4].mxu1  ;;  %1264 = vst.msk [vmem:[#allocation4 + $0x48] sm:$0xff] %vm863_vm6, %v1232_v25 }
 0x135   : > { %9569 = vmatmul.mubr.msk.bf16.gmra.mrb[88].mxu1 %vm1009_vm4, %v11393_v24  ;;  %9645 = vmatpush3.bf16.msra.mxu0 %v3970_v2  ;;  %v1974_v60 = vadd.f32 %v9414_v7, %v1680_v11  ;;  %v1857_v6 = vpop.f32.mrb[5].mxu1  ;;  %v914_v7 = vld [vmem:[#allocation4 + $0x90] sm:$0xff] }
 0x136   : > { %9572 = vmatprep.mubr.msk.bf16.mxu1 %vm1009_vm4, %v11409_v10  ;;  %9582 = vmatprep.mubr.msk.bf16.mxu0 %vm1009_vm4, %v14096_v15  ;;  %v1972_v9 = vadd.f32 %v1857_v6, %v1678_v28  ;;  %v9415_v46 = vpop.f32.mrb[6].mxu1  ;;  %v915_v6 = vld [vmem:[#allocation4 + $0x98] sm:$0xff] }
 0x137   : > { %2006 = vst.msk [vmem:[#allocation4 + $0x30] sm:$0xff] %vm863_vm6, %v1974_v60  ;;  %v1975_v15 = vadd.f32 %v9415_v46, %v1681_v20  ;;  %v1860_v53 = vpop.f32.mrb[7].mxu1  ;;  %v912_v20 = vld [vmem:[#allocation4 + $0x80] sm:$0xff]  ;;  %v913_v46 = vld [vmem:[#allocation4 + $0x88] sm:$0xff] }
 0x138   : > { %2004 = vst.msk [vmem:[#allocation4 + $0x20] sm:$0xff] %vm863_vm6, %v1972_v9  ;;  %v1973_v63 = vadd.f32 %v1860_v53, %v1679_v36 }
 0x139   : > { %2007 = vst.msk [vmem:[#allocation4 + $0x38] sm:$0xff] %vm863_vm6, %v1975_v15  ;;  %v1682_v51 = vld [vmem:[#allocation4 + $0x40] sm:$0xff] }
 0x13a   : > { %2005 = vst.msk [vmem:[#allocation4 + $0x28] sm:$0xff] %vm863_vm6, %v1973_v63  ;;  %v1685_v34 = vld [vmem:[#allocation4 + $0x58] sm:$0xff] }
 0x13b   : > { %v1683_v0 = vld [vmem:[#allocation4 + $0x48] sm:$0xff] }
 0x13c   : > { %9583 = vmatmul.mubr.msk.bf16.gmra.mrb[100].mxu0 %vm1009_vm4, %v14097_v48  ;;  %v909_v48 = vld [vmem:[#allocation4 + $0x68] sm:$0xff] }
 0x13d   : > { %9573 = vmatmul.mubr.msk.bf16.gmra.mrb[92].mxu1 %vm1009_vm4, %v11547_v23  ;;  %9586 = vmatprep.mubr.msk.bf16.mxu0 %vm1009_vm4, %v14099_v35  ;;  %v9388_v2 = vpop.f32.mrb[12].mxu0 }
 0x13e   : > { %9612 = vmatprep.mubr.msk.bf16.mxu1 %vm1009_vm4, %v14108_v55  ;;  %v1237_v62 = vadd.f32 %v9388_v2, %v910_v3  ;;  %v1144_v27 = vpop.f32.mrb[13].mxu0  ;;  %v1684_v55 = vld [vmem:[#allocation4 + $0x50] sm:$0xff] }
 0x13f   : > { %v1235_v57 = vadd.f32 %v1144_v27, %v908_v41  ;;  %v9389_v5 = vpop.f32.mrb[14].mxu0 }
 0x140   : > { %1269 = vst.msk [vmem:[#allocation4 + $0x70] sm:$0xff] %vm863_vm6, %v1237_v62  ;;  %v1238_v35 = vadd.f32 %v9389_v5, %v911_v14  ;;  %v1147_v54 = vpop.f32.mrb[15].mxu0 }
 0x141   : > { %1267 = vst.msk [vmem:[#allocation4 + $0x60] sm:$0xff] %vm863_vm6, %v1235_v57  ;;  %v1236_v31 = vadd.f32 %v1147_v54, %v909_v48  ;;  %v918_v48 = vld [vmem:[#allocation4 + $0xb0] sm:$0xff]  ;;  %v916_v57 = vld [vmem:[#allocation4 + $0xa0] sm:$0xff] }
 0x142   : > { %1270 = vst.msk [vmem:[#allocation4 + $0x78] sm:$0xff] %vm863_vm6, %v1238_v35  ;;  %v919_v35 = vld [vmem:[#allocation4 + $0xb8] sm:$0xff] }
 0x143   : > { %1268 = vst.msk [vmem:[#allocation4 + $0x68] sm:$0xff] %vm863_vm6, %v1236_v31  ;;  %v917_v31 = vld [vmem:[#allocation4 + $0xa8] sm:$0xff] }
 0x144   : > { %9587 = vmatmul.mubr.msk.bf16.gmra.mrb[104].mxu0 %vm1009_vm4, %v14100_v26 }
 0x145   : > { %9613 = vmatmul.mubr.msk.bf16.vlgmr.msra.gmra.mrb[96].mxu1 %vm1009_vm4, %v14109_v19  ;;  %9590 = vmatprep.mubr.msk.bf16.mxu0 %vm1009_vm4, %v14101_v13  ;;  %v9418_v19 = vpop.f32.mrb[8].mxu1 }
 0x146   : > { %9616 = vmatprep.mubr.msk.bf16.mxu1 %vm1009_vm4, %v14110_v21  ;;  %v1978_v26 = vadd.f32 %v9418_v19, %v1684_v55  ;;  %v1873_v44 = vpop.f32.mrb[9].mxu1  ;;  %v11610_v55 = vld [vmem:[#allocation2 + $0xcc] sm:$0xf] }
 0x147   : > { %v1976_v11 = vadd.f32 %v1873_v44, %v1682_v51  ;;  %v9419_v25 = vpop.f32.mrb[10].mxu1 }
 0x148   : > { %2010 = vst.msk [vmem:[#allocation4 + $0x50] sm:$0xff] %vm863_vm6, %v1978_v26  ;;  %v1979_v21 = vadd.f32 %v9419_v25, %v1685_v34  ;;  %v1876_v28 = vpop.f32.mrb[11].mxu1 }
 0x149   : > { %2008 = vst.msk [vmem:[#allocation4 + $0x40] sm:$0xff] %vm863_vm6, %v1976_v11  ;;  %v1977_v13 = vadd.f32 %v1876_v28, %v1683_v0  ;;  %v3633_v0 = vshll.u32 %v11610_v55, 16 }
 0x14a   : > { %2011 = vst.msk [vmem:[#allocation4 + $0x58] sm:$0xff] %vm863_vm6, %v1979_v21  ;;  %v1687_v2 = vld [vmem:[#allocation4 + $0x68] sm:$0xff] }
 0x14b   : > { %2009 = vst.msk [vmem:[#allocation4 + $0x48] sm:$0xff] %vm863_vm6, %v1977_v13 }
 0x14c   : > { %9591 = vmatmul.mubr.msk.bf16.gmra.mrb[108].mxu0 %vm1009_vm4, %v14102_v38 }
 0x14d   : > { %9617 = vmatmul.mubr.msk.bf16.gmra.mrb[100].mxu1 %vm1009_vm4, %v14111_v16  ;;  %9594 = vmatprep.mubr.msk.bf16.mxu0 %vm1009_vm4, %v14103_v43  ;;  %v1688_v43 = vld [vmem:[#allocation4 + $0x70] sm:$0xff] }
 0x14e   : > { %9620 = vmatprep.mubr.msk.bf16.mxu1 %vm1009_vm4, %v14112_v42  ;;  %v9392_v60 = vpop.f32.mrb[16].mxu0 }
 0x14f   : > { %v1241_v36 = vadd.f32 %v9392_v60, %v914_v7  ;;  %v1160_v9 = vpop.f32.mrb[17].mxu0 }
 0x150   : > { %v1239_v15 = vadd.f32 %v1160_v9, %v912_v20  ;;  %v9393_v16 = vpop.f32.mrb[18].mxu0  ;;  %v3635_v9 = vrot.slane %v3633_v0, 5 }
 0x151   : > { %1273 = vst.msk [vmem:[#allocation4 + $0x90] sm:$0xff] %vm863_vm6, %v1241_v36  ;;  %v1242_v38 = vadd.f32 %v9393_v16, %v915_v6  ;;  %v1163_v42 = vpop.f32.mrb[19].mxu0 }
 0x152   : > { %1271 = vst.msk [vmem:[#allocation4 + $0x80] sm:$0xff] %vm863_vm6, %v1239_v15  ;;  %v1240_v53 = vadd.f32 %v1163_v42, %v913_v46 }
 0x153   : > { %1274 = vst.msk [vmem:[#allocation4 + $0x98] sm:$0xff] %vm863_vm6, %v1242_v38  ;;  %v11634_v38 = vld [vmem:[#allocation2 + $0xd4] sm:$0x1] }
 0x154   : > { %9595 = vmatmul.mubr.msk.bf16.gmra.mrb[112].mxu0 %vm1009_vm4, %v14104_v22  ;;  %1272 = vst.msk [vmem:[#allocation4 + $0x88] sm:$0xff] %vm863_vm6, %v1240_v53  ;;  %v1689_v22 = vld [vmem:[#allocation4 + $0x78] sm:$0xff]  ;;  %v3649_v53 = vshll.u32 %v11634_v38, 16 }
 0x155   : > { %9621 = vmatmul.mubr.msk.bf16.gmra.mrb[104].mxu1 %vm1009_vm4, %v14113_v37  ;;  %9598 = vmatprep.mubr.msk.bf16.mxu0 %vm1009_vm4, %v14105_v12  ;;  %v1686_v37 = vld [vmem:[#allocation4 + $0x60] sm:$0xff]  ;;  %v9422_v63 = vpop.f32.mrb[12].mxu1 }
 0x156   : > { %9624 = vmatprep.mubr.msk.bf16.mxu1 %vm1009_vm4, %v14114_v59  ;;  %v1982_v3 = vadd.f32 %v9422_v63, %v1688_v43  ;;  %v1889_v41 = vpop.f32.mrb[13].mxu1  ;;  %v920_v63 = vld [vmem:[#allocation4 + $0xc0] sm:$0xff] }
 0x157   : > { %v1980_v14 = vadd.f32 %v1889_v41, %v1686_v37  ;;  %v9423_v62 = vpop.f32.mrb[14].mxu1  ;;  %v922_v37 = vld [vmem:[#allocation4 + $0xd0] sm:$0xff] }
 0x158   : > { %2014 = vst.msk [vmem:[#allocation4 + $0x70] sm:$0xff] %vm863_vm6, %v1982_v3  ;;  %v1983_v59 = vadd.f32 %v9423_v62, %v1689_v22  ;;  %v1892_v12 = vpop.f32.mrb[15].mxu1  ;;  %v1692_v26 = vld [vmem:[#allocation4 + $0x90] sm:$0xff]  ;;  %v923_v3 = vld [vmem:[#allocation4 + $0xd8] sm:$0xff] }
 0x159   : > { %2012 = vst.msk [vmem:[#allocation4 + $0x60] sm:$0xff] %vm863_vm6, %v1980_v14  ;;  %v1981_v27 = vadd.f32 %v1892_v12, %v1687_v2  ;;  %v921_v2 = vld [vmem:[#allocation4 + $0xc8] sm:$0xff] }
 0x15a   : > { %2015 = vst.msk [vmem:[#allocation4 + $0x78] sm:$0xff] %vm863_vm6, %v1983_v59  ;;  %v1693_v21 = vld [vmem:[#allocation4 + $0x98] sm:$0xff]  ;;  %v3651_v59 = vrot.slane %v3649_v53, 5  ;;  %v14121_v53 = vld [vmem:[#allocation26_spill] sm:$0xff] }
 0x15b   : > { %2013 = vst.msk [vmem:[#allocation4 + $0x68] sm:$0xff] %vm863_vm6, %v1981_v27  ;;  %v1691_v7 = vld [vmem:[#allocation4 + $0x88] sm:$0xff] }
 0x15c   : > { %9599 = vmatmul.mubr.msk.bf16.gmra.mrb[116].mxu0 %vm1009_vm4, %v14106_v8  ;;  %v11612_v8 = vld [vmem:[#allocation2 + $0xd0] sm:$0xf] }
 0x15d   : > { %9625 = vmatmul.mubr.msk.bf16.gmra.mrb[108].mxu1 %vm1009_vm4, %v14115_v30  ;;  %9602 = vmatprep.mubr.msk.bf16.mxu0 %vm1009_vm4, %v10975_v39  ;;  %v3630_v39 = vshrl.u32 %v11610_v55, 16  ;;  %v3643_v11 = vshrl.u32 %v11612_v8, 16 }
 0x15e   : > { %9628 = vmatprep.mubr.msk.bf16.mxu1 %vm1009_vm4, %v10924_v29  ;;  %v9396_v5 = vpop.f32.mrb[20].mxu0 }
 0x15f   : > { %v1245_v30 = vadd.f32 %v9396_v5, %v918_v48  ;;  %v1176_v54 = vpop.f32.mrb[21].mxu0  ;;  %v3632_v60 = vrot.slane %v3630_v39, 4  ;;  %v3645_v15 = vrot.slane %v3643_v11, 4 }
 0x160   : > { %v1243_v51 = vadd.f32 %v1176_v54, %v916_v57  ;;  %v9397_v19 = vpop.f32.mrb[22].mxu0  ;;  %v14116_v57 = vld [vmem:[#allocation40_spill] sm:$0xff] }
 0x161   : > { %1277 = vst.msk [vmem:[#allocation4 + $0xb0] sm:$0xff] %vm863_vm6, %v1245_v30  ;;  %v1246_v29 = vadd.f32 %v9397_v19, %v919_v35  ;;  %v1179_v34 = vpop.f32.mrb[23].mxu0  ;;  %v3636_v42 = vor.u32 %v3635_v9, %v3632_v60 }
 0x162   : > { %1275 = vst.msk [vmem:[#allocation4 + $0xa0] sm:$0xff] %vm863_vm6, %v1243_v51  ;;  %v1244_v44 = vadd.f32 %v1179_v34, %v917_v31  ;;  %v14117_v31 = vld [vmem:[#allocation41_spill] sm:$0xff] }
 0x163   : > { %1278 = vst.msk [vmem:[#allocation4 + $0xb8] sm:$0xff] %vm863_vm6, %v1246_v29  ;;  %v3637_v14 = vrot.slane %v3636_v42, 4 }
 0x164   : > { %9603 = vmatmul.mubr.msk.bf16.gmra.mrb[120].mxu0 %vm1009_vm4, %v10999_v56  ;;  %v3639_v56 = vshll.u32 %v11612_v8, 16  ;;  %1276 = vst.msk [vmem:[#allocation4 + $0xa8] sm:$0xff] %vm863_vm6, %v1244_v44 }
 0x165   : > { %9629 = vmatmul.mubr.msk.bf16.gmra.mrb[112].mxu1 %vm1009_vm4, %v10938_v45  ;;  %9606 = vmatprep.mubr.msk.bf16.mxu0 %vm1009_vm4, %v11442_v1  ;;  %v1690_v45 = vld [vmem:[#allocation4 + $0x80] sm:$0xff]  ;;  %v9426_v25 = vpop.f32.mrb[16].mxu1 }
 0x166   : > { %9632 = vmatprep.mubr.msk.bf16.mxu1 %vm1009_vm4, %v11015_v47  ;;  %v1986_v28 = vadd.f32 %v9426_v25, %v1692_v26  ;;  %v1905_v13 = vpop.f32.mrb[17].mxu1  ;;  %v8716_v47 = vcombine.low %v11610_v55, %v11612_v8  ;;  %v3641_v46 = vrot.slane %v3639_v56, 5  ;;  %v926_v56 = vld [vmem:[#allocation4 + $0xf0] sm:$0xff]  ;;  %v14119_v25 = vld [vmem:[#allocation43_spill] sm:$0xff] }
 0x167   : > { %v1984_v1 = vadd.f32 %v1905_v13, %v1690_v45  ;;  %v9427_v20 = vpop.f32.mrb[18].mxu1  ;;  %v14118_v45 = vld [vmem:[#allocation42_spill] sm:$0xff]  ;;  %v927_v13 = vld [vmem:[#allocation4 + $0xf8] sm:$0xff] }
 0x168   : > { %2018 = vst.msk [vmem:[#allocation4 + $0x90] sm:$0xff] %vm863_vm6, %v1986_v28  ;;  %v1987_v6 = vadd.f32 %v9427_v20, %v1693_v21  ;;  %v1908_v36 = vpop.f32.mrb[19].mxu1  ;;  %v3646_v43 = vor.u32 %v3645_v15, %v3641_v46  ;;  %v1696_v5 = vld [vmem:[#allocation4 + $0xb0] sm:$0xff]  ;;  %v3642_v35 = vsel %vm10419_vm13, %v3637_v14, %v3641_v46  ;;  %v924_v21 = vld [vmem:[#allocation4 + $0xe0] sm:$0xff] }
 0x169   : > { %2016 = vst.msk [vmem:[#allocation4 + $0x80] sm:$0xff] %vm863_vm6, %v1984_v1  ;;  %v1985_v16 = vadd.f32 %v1908_v36, %v1691_v7  ;;  %v1694_v54 = vld [vmem:[#allocation4 + $0xa0] sm:$0xff]  ;;  %v925_v1 = vld [vmem:[#allocation4 + $0xe8] sm:$0xff] }
 0x16a   : > { %2019 = vst.msk [vmem:[#allocation4 + $0x98] sm:$0xff] %vm863_vm6, %v1987_v6  ;;  %v3647_v62 = vrot.slane %v3646_v43, 4  ;;  %v1697_v51 = vld [vmem:[#allocation4 + $0xb8] sm:$0xff] }
 0x16b   : > { %2017 = vst.msk [vmem:[#allocation4 + $0x88] sm:$0xff] %vm863_vm6, %v1985_v16  ;;  %v1695_v34 = vld [vmem:[#allocation4 + $0xa8] sm:$0xff]  ;;  %v14120_v16 = vld [vmem:[#allocation29_spill] sm:$0xff] }
 0x16c   : > { %9607 = vmatmul.mubr.msk.bf16.gmra.mrb[124].mxu0 %vm1009_vm4, %v8716_v47  ;;  %v3652_v30 = vsel %vm10419_vm13, %v3647_v62, %v3651_v59 }
 0x16d   : > { %9633 = vmatmul.mubr.msk.bf16.gmra.mrb[116].mxu1 %vm1009_vm4, %v11032_v50  ;;  %9646 = vmatprep.mubr.msk.bf16.mxu0 %vm1009_vm4, %v11060_v32  ;;  %v8734_v39 = vcombine.low %v3642_v35, %v3652_v30  ;;  %v2164_v35 = vld [vmem:[#allocation4 + $0x8] sm:$0xff] }
 0x16e   : > { %9636 = vmatprep.mubr.msk.bf16.mxu1 %vm1009_vm4, %v11076_v61  ;;  %v9400_v22 = vpop.f32.mrb[24].mxu0 }
 0x16f   : > { %v1249_v41 = vadd.f32 %v9400_v22, %v922_v37  ;;  %v1192_v50 = vpop.f32.mrb[25].mxu0 }
 0x170   : > { %v1247_v12 = vadd.f32 %v1192_v50, %v920_v63  ;;  %v9401_v27 = vpop.f32.mrb[26].mxu0  ;;  %v2165_v50 = vld [vmem:[#allocation4 + $0x10] sm:$0xff] }
 0x171   : > { %1281 = vst.msk [vmem:[#allocation4 + $0xd0] sm:$0xff] %vm863_vm6, %v1249_v41  ;;  %v1250_v61 = vadd.f32 %v9401_v27, %v923_v3  ;;  %v1195_v32 = vpop.f32.mrb[27].mxu0 }
 0x172   : > { %1279 = vst.msk [vmem:[#allocation4 + $0xc0] sm:$0xff] %vm863_vm6, %v1247_v12  ;;  %v1248_v48 = vadd.f32 %v1195_v32, %v921_v2  ;;  %v2163_v12 = vld [vmem:[#allocation4] sm:$0xff] }
 0x173   : > { %1282 = vst.msk [vmem:[#allocation4 + $0xd8] sm:$0xff] %vm863_vm6, %v1250_v61 }
 0x174   : > { %9647 = vmatmul.mubr.msk.bf16.vlgmr.msra.gmra.mrb[128].mxu0 %vm1009_vm4, %v14116_v57  ;;  %1280 = vst.msk [vmem:[#allocation4 + $0xc8] sm:$0xff] %vm863_vm6, %v1248_v48  ;;  %v2166_v48 = vld [vmem:[#allocation4 + $0x18] sm:$0xff] }
 0x175   : > { %9637 = vmatmul.mubr.msk.bf16.gmra.mrb[120].mxu1 %vm1009_vm4, %v11092_v40  ;;  %9650 = vmatprep.mubr.msk.bf16.mxu0 %vm1009_vm4, %v14117_v31  ;;  %v9430_v40 = vpop.f32.mrb[20].mxu1  ;;  %v14122_v31 = vld [vmem:[#allocation22_spill] sm:$0xff] }
 0x176   : > { %9640 = vmatprep.mubr.msk.bf16.mxu1 %vm1009_vm4, %v11510_v4  ;;  %v1990_v19 = vadd.f32 %v9430_v40, %v1696_v5  ;;  %v1921_v29 = vpop.f32.mrb[21].mxu1 }
 0x177   : > { %v1988_v26 = vadd.f32 %v1921_v29, %v1694_v54  ;;  %v9431_v4 = vpop.f32.mrb[22].mxu1 }
 0x178   : > { %2022 = vst.msk [vmem:[#allocation4 + $0xb0] sm:$0xff] %vm863_vm6, %v1990_v19  ;;  %v1991_v44 = vadd.f32 %v9431_v4, %v1697_v51  ;;  %v1924_v0 = vpop.f32.mrb[23].mxu1  ;;  %v1700_v9 = vld [vmem:[#allocation4 + $0xd0] sm:$0xff] }
 0x179   : > { %2020 = vst.msk [vmem:[#allocation4 + $0xa0] sm:$0xff] %vm863_vm6, %v1988_v26  ;;  %v1989_v11 = vadd.f32 %v1924_v0, %v1695_v34  ;;  %v1698_v15 = vld [vmem:[#allocation4 + $0xc0] sm:$0xff]  ;;  %v2169_v34 = vld [vmem:[#allocation4 + $0x30] sm:$0xff] }
 0x17a   : > { %2023 = vst.msk [vmem:[#allocation4 + $0xb8] sm:$0xff] %vm863_vm6, %v1991_v44  ;;  %v1701_v43 = vld [vmem:[#allocation4 + $0xd8] sm:$0xff] }
 0x17b   : > { %2021 = vst.msk [vmem:[#allocation4 + $0xa8] sm:$0xff] %vm863_vm6, %v1989_v11  ;;  %v1699_v22 = vld [vmem:[#allocation4 + $0xc8] sm:$0xff]  ;;  %v2167_v11 = vld [vmem:[#allocation4 + $0x20] sm:$0xff] }
 0x17c   : > { %9651 = vmatmul.mubr.msk.bf16.gmra.mrb[132].mxu0 %vm1009_vm4, %v14118_v45 }
 0x17d   : > { %9641 = vmatmul.mubr.msk.bf16.gmra.mrb[124].mxu1 %vm1009_vm4, %v8734_v39  ;;  %9654 = vmatprep.mubr.msk.bf16.mxu0 %vm1009_vm4, %v14119_v25 }
 0x17f   : > { %v9404_v28 = vpop.f32.mrb[28].mxu0 }
 0x180   : > { %v1253_v7 = vadd.f32 %v9404_v28, %v926_v56  ;;  %v1208_v47 = vpop.f32.mrb[29].mxu0  ;;  %v2170_v28 = vld [vmem:[#allocation4 + $0x38] sm:$0xff] }
 0x181   : > { %v1251_v20 = vadd.f32 %v1208_v47, %v924_v21  ;;  %v9405_v60 = vpop.f32.mrb[30].mxu0 }
 0x182   : > { %1285 = vst.msk [vmem:[#allocation4 + $0xf0] sm:$0xff] %vm863_vm6, %v1253_v7  ;;  %v1254_v6 = vadd.f32 %v9405_v60, %v927_v13  ;;  %v1211_v36 = vpop.f32.mrb[31].mxu0 }
 0x183   : > { %1283 = vst.msk [vmem:[#allocation4 + $0xe0] sm:$0xff] %vm863_vm6, %v1251_v20  ;;  %v1252_v46 = vadd.f32 %v1211_v36, %v925_v1  ;;  %v2168_v1 = vld [vmem:[#allocation4 + $0x28] sm:$0xff] }
 0x184   : > { %1286 = vst.msk [vmem:[#allocation4 + $0xf8] sm:$0xff] %vm863_vm6, %v1254_v6  ;;  %9655 = vmatmul.mubr.msk.bf16.gmra.mrb[136].mxu0 %vm1009_vm4, %v14120_v16  ;;  %v2173_v16 = vld [vmem:[#allocation4 + $0x50] sm:$0xff] }
 0x185   : > { %v9434_v42 = vpop.f32.mrb[24].mxu1  ;;  %1284 = vst.msk [vmem:[#allocation4 + $0xe8] sm:$0xff] %vm863_vm6, %v1252_v46  ;;  %9658 = vmatprep.mubr.msk.bf16.mxu0 %vm1009_vm4, %v14121_v53 }
 0x186   : > { %v1994_v37 = vadd.f32 %v9434_v42, %v1700_v9  ;;  %v1937_v63 = vpop.f32.mrb[25].mxu1 }
 0x187   : > { %v1992_v3 = vadd.f32 %v1937_v63, %v1698_v15  ;;  %v9435_v41 = vpop.f32.mrb[26].mxu1  ;;  %v9444_v2 = vpop.f32.mrb[32].mxu0 }
 0x188   : > { %2026 = vst.msk [vmem:[#allocation4 + $0xd0] sm:$0xff] %vm863_vm6, %v1994_v37  ;;  %v1995_v14 = vadd.f32 %v9435_v41, %v1701_v43  ;;  %v1940_v62 = vpop.f32.mrb[27].mxu1  ;;  %v2459_v59 = vadd.f32 %v9444_v2, %v2165_v50  ;;  %v2330_v27 = vpop.f32.mrb[33].mxu0  ;;  %v2174_v2 = vld [vmem:[#allocation4 + $0x58] sm:$0xff] }
 0x189   : > { %2024 = vst.msk [vmem:[#allocation4 + $0xc0] sm:$0xff] %vm863_vm6, %v1992_v3  ;;  %v1993_v61 = vadd.f32 %v1940_v62, %v1699_v22  ;;  %v2457_v32 = vadd.f32 %v2330_v27, %v2163_v12  ;;  %v9445_v57 = vpop.f32.mrb[34].mxu0  ;;  %v1704_v40 = vld [vmem:[#allocation4 + $0xf0] sm:$0xff]  ;;  %v2171_v22 = vld [vmem:[#allocation4 + $0x40] sm:$0xff]  ;;  %v2172_v12 = vld [vmem:[#allocation4 + $0x48] sm:$0xff] }
 0x18a   : > { %2027 = vst.msk [vmem:[#allocation4 + $0xd8] sm:$0xff] %vm863_vm6, %v1995_v14  ;;  %2491 = vst.msk [vmem:[#allocation4 + $0x10] sm:$0xff] %vm863_vm6, %v2459_v59  ;;  %v2460_v5 = vadd.f32 %v9445_v57, %v2166_v48  ;;  %v2333_v30 = vpop.f32.mrb[35].mxu0  ;;  %v1702_v51 = vld [vmem:[#allocation4 + $0xe0] sm:$0xff]  ;;  %v3924_v57 = vrot.slane %v11612_v8, 5  ;;  %v3927_v8 = vrot.slane %v11634_v38, 5 }
 0x18b   : > { %2025 = vst.msk [vmem:[#allocation4 + $0xc8] sm:$0xff] %vm863_vm6, %v1993_v61  ;;  %2489 = vst.msk [vmem:[#allocation4] sm:$0xff] %vm863_vm6, %v2457_v32  ;;  %v2458_v54 = vadd.f32 %v2333_v30, %v2164_v35  ;;  %v1705_v29 = vld [vmem:[#allocation4 + $0xf8] sm:$0xff] }
 0x18c   : > { %2492 = vst.msk [vmem:[#allocation4 + $0x18] sm:$0xff] %vm863_vm6, %v2460_v5  ;;  %9659 = vmatmul.mubr.msk.bf16.gmra.mrb[140].mxu0 %vm1009_vm4, %v14122_v31  ;;  %v1703_v44 = vld [vmem:[#allocation4 + $0xe8] sm:$0xff] }
 0x18d   : > { %2490 = vst.msk [vmem:[#allocation4 + $0x8] sm:$0xff] %vm863_vm6, %v2458_v54  ;;  %9662 = vmatprep.mubr.msk.bf16.mxu0 %vm1009_vm4, %v11145_v49  ;;  %v2177_v54 = vld [vmem:[#allocation4 + $0x70] sm:$0xff] }
 0x18f   : > { %v9448_v39 = vpop.f32.mrb[36].mxu0 }
 0x190   : > { %v9438_v19 = vpop.f32.mrb[28].mxu1  ;;  %v2463_v0 = vadd.f32 %v9448_v39, %v2169_v34  ;;  %v2346_v45 = vpop.f32.mrb[37].mxu0  ;;  %v8751_v39 = vrot.slane %v11610_v55, 9 }
 0x191   : > { %v1998_v26 = vadd.f32 %v9438_v19, %v1704_v40  ;;  %v1953_v4 = vpop.f32.mrb[29].mxu1  ;;  %v2461_v21 = vadd.f32 %v2346_v45, %v2167_v11  ;;  %v9449_v13 = vpop.f32.mrb[38].mxu0  ;;  %v2523_v36 = vld [vmem:[#allocation4 + $0x10] sm:$0xff]  ;;  %v3926_v11 = vrot.slane %v3924_v57, 4 }
 0x192   : > { %v1996_v56 = vadd.f32 %v1953_v4, %v1702_v51  ;;  %v9439_v25 = vpop.f32.mrb[30].mxu1  ;;  %2495 = vst.msk [vmem:[#allocation4 + $0x30] sm:$0xff] %vm863_vm6, %v2463_v0  ;;  %v2464_v47 = vadd.f32 %v9449_v13, %v2170_v28  ;;  %v2349_v20 = vpop.f32.mrb[39].mxu0  ;;  %v2521_v9 = vld [vmem:[#allocation4] sm:$0xff]  ;;  %v2178_v0 = vld [vmem:[#allocation4 + $0x78] sm:$0xff] }
 0x193   : > { %2030 = vst.msk [vmem:[#allocation4 + $0xf0] sm:$0xff] %vm863_vm6, %v1998_v26  ;;  %v1999_v7 = vadd.f32 %v9439_v25, %v1705_v29  ;;  %v1956_v49 = vpop.f32.mrb[31].mxu1  ;;  %2493 = vst.msk [vmem:[#allocation4 + $0x20] sm:$0xff] %vm863_vm6, %v2461_v21  ;;  %v2462_v6 = vadd.f32 %v2349_v20, %v2168_v1  ;;  %v2524_v15 = vld [vmem:[#allocation4 + $0x18] sm:$0xff]  ;;  %v2176_v21 = vld [vmem:[#allocation4 + $0x68] sm:$0xff] }
 0x194   : > { %2028 = vst.msk [vmem:[#allocation4 + $0xe0] sm:$0xff] %vm863_vm6, %v1996_v56  ;;  %v1997_v60 = vadd.f32 %v1956_v49, %v1703_v44  ;;  %2496 = vst.msk [vmem:[#allocation4 + $0x38] sm:$0xff] %vm863_vm6, %v2464_v47  ;;  %9663 = vmatmul.mubr.msk.bf16.gmra.mrb[144].mxu0 %vm1009_vm4, %v11170_v17  ;;  %v2522_v37 = vld [vmem:[#allocation4 + $0x8] sm:$0xff]  ;;  %v3928_v49 = vsel %vm10625_vm3, %v3926_v11, %v3927_v8 }
 0x195   : > { %2031 = vst.msk [vmem:[#allocation4 + $0xf8] sm:$0xff] %vm863_vm6, %v1999_v7  ;;  %2494 = vst.msk [vmem:[#allocation4 + $0x28] sm:$0xff] %vm863_vm6, %v2462_v6  ;;  %9666 = vmatprep.mubr.msk.bf16.mxu0 %vm1009_vm4, %v11180_v52  ;;  %v3925_v7 = vsel %vm10625_vm3, %v8751_v39, %v3924_v57  ;;  %v2184_v39 = vld [vmem:[#allocation4 + $0xa8] sm:$0xff] }
 0x196   : > { %2029 = vst.msk [vmem:[#allocation4 + $0xe8] sm:$0xff] %vm863_vm6, %v1997_v60  ;;  %v2181_v60 = vld [vmem:[#allocation4 + $0x90] sm:$0xff] }
 0x197   : > { %v9452_v42 = vpop.f32.mrb[40].mxu0 }
 0x198   : > { %v9478_v46 = vpop.f32.mrb[32].mxu1  ;;  %v2467_v63 = vadd.f32 %v9452_v42, %v2173_v16  ;;  %v2362_v3 = vpop.f32.mrb[41].mxu0  ;;  %v8753_v42 = vcombine.low %v3925_v7, %v3928_v49  ;;  %v2187_v7 = vld [vmem:[#allocation4 + $0xc0] sm:$0xff] }
 0x199   : > { %v2729_v43 = vadd.f32 %v9478_v46, %v2523_v36  ;;  %v2600_v53 = vpop.f32.mrb[33].mxu1  ;;  %v2465_v50 = vadd.f32 %v2362_v3, %v2171_v22  ;;  %v9453_v14 = vpop.f32.mrb[42].mxu0  ;;  %v2527_v48 = vld [vmem:[#allocation4 + $0x30] sm:$0xff] }
 0x19a   : > { %v2727_v17 = vadd.f32 %v2600_v53, %v2521_v9  ;;  %v9479_v41 = vpop.f32.mrb[34].mxu1  ;;  %2499 = vst.msk [vmem:[#allocation4 + $0x50] sm:$0xff] %vm863_vm6, %v2467_v63  ;;  %v2468_v59 = vadd.f32 %v9453_v14, %v2174_v2  ;;  %v2365_v27 = vpop.f32.mrb[43].mxu0  ;;  %v2525_v5 = vld [vmem:[#allocation4 + $0x20] sm:$0xff] }
 0x19b   : > { %2761 = vst.msk [vmem:[#allocation4 + $0x10] sm:$0xff] %vm863_vm6, %v2729_v43  ;;  %v2730_v62 = vadd.f32 %v9479_v41, %v2524_v15  ;;  %v2603_v52 = vpop.f32.mrb[35].mxu1  ;;  %2497 = vst.msk [vmem:[#allocation4 + $0x40] sm:$0xff] %vm863_vm6, %v2465_v50  ;;  %v2466_v32 = vadd.f32 %v2365_v27, %v2172_v12  ;;  %v2528_v30 = vld [vmem:[#allocation4 + $0x38] sm:$0xff]  ;;  %v2179_v15 = vld [vmem:[#allocation4 + $0x80] sm:$0xff] }
 0x19c   : > { %2759 = vst.msk [vmem:[#allocation4] sm:$0xff] %vm863_vm6, %v2727_v17  ;;  %v2728_v61 = vadd.f32 %v2603_v52, %v2522_v37  ;;  %2500 = vst.msk [vmem:[#allocation4 + $0x58] sm:$0xff] %vm863_vm6, %v2468_v59  ;;  %9667 = vmatmul.mubr.msk.bf16.gmra.mrb[148].mxu0 %vm1009_vm4, %v11188_v58  ;;  %v2526_v19 = vld [vmem:[#allocation4 + $0x28] sm:$0xff]  ;;  %v2175_v58 = vld [vmem:[#allocation4 + $0x60] sm:$0xff] }
 0x19d   : > { %2762 = vst.msk [vmem:[#allocation4 + $0x18] sm:$0xff] %vm863_vm6, %v2730_v62  ;;  %2498 = vst.msk [vmem:[#allocation4 + $0x48] sm:$0xff] %vm863_vm6, %v2466_v32  ;;  %9670 = vmatprep.mubr.msk.bf16.mxu0 %vm1009_vm4, %v11393_v24  ;;  %v2182_v37 = vld [vmem:[#allocation4 + $0x98] sm:$0xff]  ;;  %v2180_v41 = vld [vmem:[#allocation4 + $0x88] sm:$0xff] }
 0x19e   : > { %2760 = vst.msk [vmem:[#allocation4 + $0x8] sm:$0xff] %vm863_vm6, %v2728_v61  ;;  %v2185_v27 = vld [vmem:[#allocation4 + $0xb0] sm:$0xff] }
 0x19f   : > { %v9456_v31 = vpop.f32.mrb[44].mxu0 }
 0x1a0   : > { %v9482_v35 = vpop.f32.mrb[36].mxu1  ;;  %v2471_v29 = vadd.f32 %v9456_v31, %v2177_v54  ;;  %v2378_v34 = vpop.f32.mrb[45].mxu0 }
 0x1a1   : > { %v2733_v40 = vadd.f32 %v9482_v35, %v2527_v48  ;;  %v2616_v51 = vpop.f32.mrb[37].mxu1  ;;  %v2469_v44 = vadd.f32 %v2378_v34, %v2175_v58  ;;  %v9457_v24 = vpop.f32.mrb[46].mxu0  ;;  %v2531_v38 = vld [vmem:[#allocation4 + $0x50] sm:$0xff]  ;;  %v2183_v35 = vld [vmem:[#allocation4 + $0xa0] sm:$0xff] }
 0x1a2   : > { %v2731_v26 = vadd.f32 %v2616_v51, %v2525_v5  ;;  %v9483_v4 = vpop.f32.mrb[38].mxu1  ;;  %2503 = vst.msk [vmem:[#allocation4 + $0x70] sm:$0xff] %vm863_vm6, %v2471_v29  ;;  %v2472_v25 = vadd.f32 %v9457_v24, %v2178_v0  ;;  %v2381_v28 = vpop.f32.mrb[47].mxu0  ;;  %v2529_v47 = vld [vmem:[#allocation4 + $0x40] sm:$0xff]  ;;  %v2186_v51 = vld [vmem:[#allocation4 + $0xb8] sm:$0xff] }
 0x1a3   : > { %2765 = vst.msk [vmem:[#allocation4 + $0x30] sm:$0xff] %vm863_vm6, %v2733_v40  ;;  %v2734_v45 = vadd.f32 %v9483_v4, %v2528_v30  ;;  %v2619_v56 = vpop.f32.mrb[39].mxu1  ;;  %2501 = vst.msk [vmem:[#allocation4 + $0x60] sm:$0xff] %vm863_vm6, %v2469_v44  ;;  %v2470_v13 = vadd.f32 %v2381_v28, %v2176_v21  ;;  %v2532_v20 = vld [vmem:[#allocation4 + $0x58] sm:$0xff]  ;;  %v5046_v24 = vld [vmem:[%s13891_s4] sm:$0xf] }
 0x1a4   : > { %2763 = vst.msk [vmem:[#allocation4 + $0x20] sm:$0xff] %vm863_vm6, %v2731_v26  ;;  %v2732_v55 = vadd.f32 %v2619_v56, %v2526_v19  ;;  %2504 = vst.msk [vmem:[#allocation4 + $0x78] sm:$0xff] %vm863_vm6, %v2472_v25  ;;  %9671 = vmatmul.mubr.msk.bf16.gmra.mrb[152].mxu0 %vm1009_vm4, %v11409_v10  ;;  %v2530_v9 = vld [vmem:[#allocation4 + $0x48] sm:$0xff]  ;;  %9993 = vmatprep.subr.msk.bf16.mxu1 %vm5175_vm0, %v5046_v24  ;;  %v5177_v8 = vsel %vm5175_vm0, %v5046_v24, 0  ;;  %v2189_v25 = vld [vmem:[#allocation4 + $0xd0] sm:$0xff] }
 0x1a5   : > { %2766 = vst.msk [vmem:[#allocation4 + $0x38] sm:$0xff] %vm863_vm6, %v2734_v45  ;;  %2502 = vst.msk [vmem:[#allocation4 + $0x68] sm:$0xff] %vm863_vm6, %v2470_v13  ;;  %9674 = vmatprep.mubr.msk.bf16.mxu0 %vm1009_vm4, %v11547_v23  ;;  %9679 = vmatpush3.bf16.msra.mxu1 %v5177_v8  ;;  %v2818_v8 = vld [vmem:[#allocation4 + $0x18] sm:$0xff] }
 0x1a6   : > { %2764 = vst.msk [vmem:[#allocation4 + $0x28] sm:$0xff] %vm863_vm6, %v2732_v55 }
 0x1a7   : > { %v9460_v6 = vpop.f32.mrb[48].mxu0 }
 0x1a8   : > { %v9486_v1 = vpop.f32.mrb[40].mxu1  ;;  %v2475_v46 = vadd.f32 %v9460_v6, %v2181_v60  ;;  %v2394_v16 = vpop.f32.mrb[49].mxu0  ;;  %v2190_v60 = vld [vmem:[#allocation4 + $0xd8] sm:$0xff] }
 0x1a9   : > { %v2737_v10 = vadd.f32 %v9486_v1, %v2531_v38  ;;  %v2632_v36 = vpop.f32.mrb[41].mxu1  ;;  %v2473_v53 = vadd.f32 %v2394_v16, %v2179_v15  ;;  %v9461_v63 = vpop.f32.mrb[50].mxu0  ;;  %v2535_v62 = vld [vmem:[#allocation4 + $0x70] sm:$0xff] }
 0x1aa   : > { %v2735_v43 = vadd.f32 %v2632_v36, %v2529_v47  ;;  %v9487_v23 = vpop.f32.mrb[42].mxu1  ;;  %2507 = vst.msk [vmem:[#allocation4 + $0x90] sm:$0xff] %vm863_vm6, %v2475_v46  ;;  %v2476_v17 = vadd.f32 %v9461_v63, %v2182_v37  ;;  %v2397_v50 = vpop.f32.mrb[51].mxu0  ;;  %v2533_v52 = vld [vmem:[#allocation4 + $0x60] sm:$0xff]  ;;  %v2188_v46 = vld [vmem:[#allocation4 + $0xc8] sm:$0xff]  ;;  %v2193_v63 = vld [vmem:[#allocation4 + $0xf0] sm:$0xff] }
 0x1ab   : > { %2769 = vst.msk [vmem:[#allocation4 + $0x50] sm:$0xff] %vm863_vm6, %v2737_v10  ;;  %v2738_v22 = vadd.f32 %v9487_v23, %v2532_v20  ;;  %v2635_v3 = vpop.f32.mrb[43].mxu1  ;;  %2505 = vst.msk [vmem:[#allocation4 + $0x80] sm:$0xff] %vm863_vm6, %v2473_v53  ;;  %v2474_v14 = vadd.f32 %v2397_v50, %v2180_v41  ;;  %v2536_v12 = vld [vmem:[#allocation4 + $0x78] sm:$0xff] }
 0x1ac   : > { %2767 = vst.msk [vmem:[#allocation4 + $0x40] sm:$0xff] %vm863_vm6, %v2735_v43  ;;  %v2736_v2 = vadd.f32 %v2635_v3, %v2530_v9  ;;  %2508 = vst.msk [vmem:[#allocation4 + $0x98] sm:$0xff] %vm863_vm6, %v2476_v17  ;;  %9675 = vmatmul.mubr.msk.bf16.gmra.mrb[156].mxu0 %vm1009_vm4, %v8753_v42  ;;  %v2534_v57 = vld [vmem:[#allocation4 + $0x68] sm:$0xff] }
 0x1ad   : > { %2770 = vst.msk [vmem:[#allocation4 + $0x58] sm:$0xff] %vm863_vm6, %v2738_v22  ;;  %2506 = vst.msk [vmem:[#allocation4 + $0x88] sm:$0xff] %vm863_vm6, %v2474_v14 }
 0x1ae   : > { %2768 = vst.msk [vmem:[#allocation4 + $0x48] sm:$0xff] %vm863_vm6, %v2736_v2  ;;  %v2191_v2 = vld [vmem:[#allocation4 + $0xe0] sm:$0xff]  ;;  %vm12006_vm4 = vmand %vm4339_vm2, %vm693_vm7 }
 0x1af   : > { %v9464_v61 = vpop.f32.mrb[52].mxu0 }
 0x1b0   : > { %v9490_v59 = vpop.f32.mrb[44].mxu1  ;;  %v2479_v5 = vadd.f32 %v9464_v61, %v2185_v27  ;;  %v2410_v30 = vpop.f32.mrb[53].mxu0 }
 0x1b1   : > { %v2741_v32 = vadd.f32 %v9490_v59, %v2535_v62  ;;  %v2648_v48 = vpop.f32.mrb[45].mxu1  ;;  %v2477_v40 = vadd.f32 %v2410_v30, %v2183_v35  ;;  %v9465_v19 = vpop.f32.mrb[54].mxu0  ;;  %v2539_v0 = vld [vmem:[#allocation4 + $0x90] sm:$0xff] }
 0x1b2   : > { %v2739_v54 = vadd.f32 %v2648_v48, %v2533_v52  ;;  %v9491_v31 = vpop.f32.mrb[46].mxu1  ;;  %2511 = vst.msk [vmem:[#allocation4 + $0xb0] sm:$0xff] %vm863_vm6, %v2479_v5  ;;  %v2480_v34 = vadd.f32 %v9465_v19, %v2186_v51  ;;  %v2413_v26 = vpop.f32.mrb[55].mxu0  ;;  %v2537_v11 = vld [vmem:[#allocation4 + $0x80] sm:$0xff]  ;;  %v2817_v19 = vld [vmem:[#allocation4 + $0x10] sm:$0xff] }
 0x1b3   : > { %2773 = vst.msk [vmem:[#allocation4 + $0x70] sm:$0xff] %vm863_vm6, %v2741_v32  ;;  %v2742_v29 = vadd.f32 %v9491_v31, %v2536_v12  ;;  %v2651_v58 = vpop.f32.mrb[47].mxu1  ;;  %2509 = vst.msk [vmem:[#allocation4 + $0xa0] sm:$0xff] %vm863_vm6, %v2477_v40  ;;  %v2478_v44 = vadd.f32 %v2413_v26, %v2184_v39  ;;  %v2540_v56 = vld [vmem:[#allocation4 + $0x98] sm:$0xff] }
 0x1b4   : > { %2771 = vst.msk [vmem:[#allocation4 + $0x60] sm:$0xff] %vm863_vm6, %v2739_v54  ;;  %v2740_v4 = vadd.f32 %v2651_v58, %v2534_v57  ;;  %2512 = vst.msk [vmem:[#allocation4 + $0xb8] sm:$0xff] %vm863_vm6, %v2480_v34  ;;  %v2538_v13 = vld [vmem:[#allocation4 + $0x88] sm:$0xff]  ;;  %v2194_v12 = vld [vmem:[#allocation4 + $0xf8] sm:$0xff] }
 0x1b5   : > { %2774 = vst.msk [vmem:[#allocation4 + $0x78] sm:$0xff] %vm863_vm6, %v2742_v29  ;;  %2510 = vst.msk [vmem:[#allocation4 + $0xa8] sm:$0xff] %vm863_vm6, %v2478_v44  ;;  %v2192_v57 = vld [vmem:[#allocation4 + $0xe8] sm:$0xff] }
 0x1b6   : > { %2772 = vst.msk [vmem:[#allocation4 + $0x68] sm:$0xff] %vm863_vm6, %v2740_v4  ;;  %v2815_v4 = vld [vmem:[#allocation4] sm:$0xff] }
 0x1b7   : > { %v9468_v21 = vpop.f32.mrb[56].mxu0 }
 0x1b8   : > { %v9494_v45 = vpop.f32.mrb[48].mxu1  ;;  %v2483_v38 = vadd.f32 %v9468_v21, %v2189_v25  ;;  %v2426_v49 = vpop.f32.mrb[57].mxu0 }
 0x1b9   : > { %v2745_v28 = vadd.f32 %v9494_v45, %v2539_v0  ;;  %v2664_v55 = vpop.f32.mrb[49].mxu1  ;;  %v2481_v20 = vadd.f32 %v2426_v49, %v2187_v7  ;;  %v9469_v6 = vpop.f32.mrb[58].mxu0  ;;  %v2543_v43 = vld [vmem:[#allocation4 + $0xb0] sm:$0xff] }
 0x1ba   : > { %v2743_v47 = vadd.f32 %v2664_v55, %v2537_v11  ;;  %v9495_v1 = vpop.f32.mrb[50].mxu1  ;;  %2515 = vst.msk [vmem:[#allocation4 + $0xd0] sm:$0xff] %vm863_vm6, %v2483_v38  ;;  %v2484_v9 = vadd.f32 %v9469_v6, %v2190_v60  ;;  %v2429_v15 = vpop.f32.mrb[59].mxu0  ;;  %v2541_v23 = vld [vmem:[#allocation4 + $0xa0] sm:$0xff] }
 0x1bb   : > { %2777 = vst.msk [vmem:[#allocation4 + $0x90] sm:$0xff] %vm863_vm6, %v2745_v28  ;;  %v2746_v10 = vadd.f32 %v9495_v1, %v2540_v56  ;;  %v2667_v36 = vpop.f32.mrb[51].mxu1  ;;  %2513 = vst.msk [vmem:[#allocation4 + $0xc0] sm:$0xff] %vm863_vm6, %v2481_v20  ;;  %v2482_v42 = vadd.f32 %v2429_v15, %v2188_v46  ;;  %v2544_v37 = vld [vmem:[#allocation4 + $0xb8] sm:$0xff]  ;;  %v2816_v28 = vld [vmem:[#allocation4 + $0x8] sm:$0xff] }
 0x1bc   : > { %2775 = vst.msk [vmem:[#allocation4 + $0x80] sm:$0xff] %vm863_vm6, %v2743_v47  ;;  %v2744_v16 = vadd.f32 %v2667_v36, %v2538_v13  ;;  %2516 = vst.msk [vmem:[#allocation4 + $0xd8] sm:$0xff] %vm863_vm6, %v2484_v9  ;;  %v2542_v41 = vld [vmem:[#allocation4 + $0xa8] sm:$0xff]  ;;  %v2821_v20 = vld [vmem:[#allocation4 + $0x30] sm:$0xff] }
 0x1bd   : > { %2778 = vst.msk [vmem:[#allocation4 + $0x98] sm:$0xff] %vm863_vm6, %v2746_v10  ;;  %2514 = vst.msk [vmem:[#allocation4 + $0xc8] sm:$0xff] %vm863_vm6, %v2482_v42  ;;  %v2819_v46 = vld [vmem:[#allocation4 + $0x20] sm:$0xff] }
 0x1be   : > { %2776 = vst.msk [vmem:[#allocation4 + $0x88] sm:$0xff] %vm863_vm6, %v2744_v16 }
 0x1bf   : > { %v9472_v22 = vpop.f32.mrb[60].mxu0 }
 0x1c0   : > { %v9498_v53 = vpop.f32.mrb[52].mxu1  ;;  %v2487_v50 = vadd.f32 %v9472_v22, %v2193_v63  ;;  %v2442_v14 = vpop.f32.mrb[61].mxu0 }
 0x1c1   : > { %v2749_v3 = vadd.f32 %v9498_v53, %v2543_v43  ;;  %v2680_v17 = vpop.f32.mrb[53].mxu1  ;;  %v2485_v59 = vadd.f32 %v2442_v14, %v2191_v2  ;;  %v9473_v27 = vpop.f32.mrb[62].mxu0  ;;  %v2547_v54 = vld [vmem:[#allocation4 + $0xd0] sm:$0xff] }
 0x1c2   : > { %v2747_v62 = vadd.f32 %v2680_v17, %v2541_v23  ;;  %v9499_v52 = vpop.f32.mrb[54].mxu1  ;;  %2519 = vst.msk [vmem:[#allocation4 + $0xf0] sm:$0xff] %vm863_vm6, %v2487_v50  ;;  %v2488_v48 = vadd.f32 %v9473_v27, %v2194_v12  ;;  %v2445_v5 = vpop.f32.mrb[63].mxu0  ;;  %v2545_v31 = vld [vmem:[#allocation4 + $0xc0] sm:$0xff]  ;;  %v2822_v23 = vld [vmem:[#allocation4 + $0x38] sm:$0xff] }
 0x1c3   : > { %2781 = vst.msk [vmem:[#allocation4 + $0xb0] sm:$0xff] %vm863_vm6, %v2749_v3  ;;  %v2750_v61 = vadd.f32 %v9499_v52, %v2544_v37  ;;  %v2683_v32 = vpop.f32.mrb[55].mxu1  ;;  %2517 = vst.msk [vmem:[#allocation4 + $0xe0] sm:$0xff] %vm863_vm6, %v2485_v59  ;;  %v2486_v30 = vadd.f32 %v2445_v5, %v2192_v57  ;;  %v2548_v51 = vld [vmem:[#allocation4 + $0xd8] sm:$0xff]  ;;  %v2820_v3 = vld [vmem:[#allocation4 + $0x28] sm:$0xff] }
 0x1c4   : > { %2779 = vst.msk [vmem:[#allocation4 + $0xa0] sm:$0xff] %vm863_vm6, %v2747_v62  ;;  %v2748_v35 = vadd.f32 %v2683_v32, %v2542_v41  ;;  %2520 = vst.msk [vmem:[#allocation4 + $0xf8] sm:$0xff] %vm863_vm6, %v2488_v48  ;;  %v2546_v39 = vld [vmem:[#allocation4 + $0xc8] sm:$0xff]  ;;  %v2825_v59 = vld [vmem:[#allocation4 + $0x50] sm:$0xff] }
 0x1c5   : > { %2782 = vst.msk [vmem:[#allocation4 + $0xb8] sm:$0xff] %vm863_vm6, %v2750_v61  ;;  %2518 = vst.msk [vmem:[#allocation4 + $0xe8] sm:$0xff] %vm863_vm6, %v2486_v30  ;;  %v2823_v57 = vld [vmem:[#allocation4 + $0x40] sm:$0xff] }
 0x1c6   : > { %2780 = vst.msk [vmem:[#allocation4 + $0xa8] sm:$0xff] %vm863_vm6, %v2748_v35 }
 0x1c7   : > { %v9512_v29 = vpop.f32.mrb[64].mxu0 }
 0x1c8   : > { %v9502_v40 = vpop.f32.mrb[56].mxu1  ;;  %v3021_v26 = vadd.f32 %v9512_v29, %v2817_v19  ;;  %v2892_v44 = vpop.f32.mrb[65].mxu0 }
 0x1c9   : > { %v2753_v58 = vadd.f32 %v9502_v40, %v2547_v54  ;;  %v2696_v34 = vpop.f32.mrb[57].mxu1  ;;  %v3019_v11 = vadd.f32 %v2892_v44, %v2815_v4  ;;  %v9513_v45 = vpop.f32.mrb[66].mxu0  ;;  %v2551_v7 = vld [vmem:[#allocation4 + $0xf0] sm:$0xff] }
 0x1ca   : > { %v2751_v0 = vadd.f32 %v2696_v34, %v2545_v31  ;;  %v9503_v24 = vpop.f32.mrb[58].mxu1  ;;  %3053 = vst.msk [vmem:[#allocation4 + $0x10] sm:$0xff] %vm863_vm6, %v3021_v26  ;;  %v3022_v21 = vadd.f32 %v9513_v45, %v2818_v8  ;;  %v2895_v55 = vpop.f32.mrb[67].mxu0  ;;  %v2549_v49 = vld [vmem:[#allocation4 + $0xe0] sm:$0xff]  ;;  %v2826_v31 = vld [vmem:[#allocation4 + $0x58] sm:$0xff] }
 0x1cb   : > { %2785 = vst.msk [vmem:[#allocation4 + $0xd0] sm:$0xff] %vm863_vm6, %v2753_v58  ;;  %v2754_v56 = vadd.f32 %v9503_v24, %v2548_v51  ;;  %v2699_v25 = vpop.f32.mrb[59].mxu1  ;;  %3051 = vst.msk [vmem:[#allocation4] sm:$0xff] %vm863_vm6, %v3019_v11  ;;  %v3020_v38 = vadd.f32 %v2895_v55, %v2816_v28  ;;  %v2552_v1 = vld [vmem:[#allocation4 + $0xf8] sm:$0xff]  ;;  %v2824_v58 = vld [vmem:[#allocation4 + $0x48] sm:$0xff] }
 0x1cc   : > { %2783 = vst.msk [vmem:[#allocation4 + $0xc0] sm:$0xff] %vm863_vm6, %v2751_v0  ;;  %v2752_v13 = vadd.f32 %v2699_v25, %v2546_v39  ;;  %3054 = vst.msk [vmem:[#allocation4 + $0x18] sm:$0xff] %vm863_vm6, %v3022_v21  ;;  %v2550_v36 = vld [vmem:[#allocation4 + $0xe8] sm:$0xff]  ;;  %v2829_v11 = vld [vmem:[#allocation4 + $0x70] sm:$0xff] }
 0x1cd   : > { %2786 = vst.msk [vmem:[#allocation4 + $0xd8] sm:$0xff] %vm863_vm6, %v2754_v56  ;;  %3052 = vst.msk [vmem:[#allocation4 + $0x8] sm:$0xff] %vm863_vm6, %v3020_v38  ;;  %v2827_v28 = vld [vmem:[#allocation4 + $0x60] sm:$0xff] }
 0x1ce   : > { %2784 = vst.msk [vmem:[#allocation4 + $0xc8] sm:$0xff] %vm863_vm6, %v2752_v13  ;;  %v14123_v13 = vmov 0  }
 0x1cf   : > { %v9516_v60 = vpop.f32.mrb[68].mxu0  ;;  %4346 = vst.msk [vmem:[#allocation3 + $0x14] sm:$0x1] %vm4342_vm1, %v14123_v13  ;;  %4343 = vst.msk [vmem:[#allocation3 + $0x8] sm:$0x1] %vm4342_vm1, %v14123_v13 }
 0x1d0   : > { %v9506_v47 = vpop.f32.mrb[60].mxu1  ;;  %v3025_v9 = vadd.f32 %v9516_v60, %v2821_v20  ;;  %v2908_v15 = vpop.f32.mrb[69].mxu0  ;;  %4349 = vst.msk [vmem:[#allocation3 + $0x20] sm:$0x1] %vm4342_vm1, %v14123_v13  ;;  %4352 = vst.msk [vmem:[#allocation3 + $0x2c] sm:$0x1] %vm4342_vm1, %v14123_v13 }
 0x1d1   : > { %v2757_v6 = vadd.f32 %v9506_v47, %v2551_v7  ;;  %v2712_v10 = vpop.f32.mrb[61].mxu1  ;;  %v3023_v43 = vadd.f32 %v2908_v15, %v2819_v46  ;;  %v9517_v53 = vpop.f32.mrb[70].mxu0  ;;  %v3093_v2 = vld [vmem:[#allocation4 + $0x10] sm:$0xff]  ;;  %4355 = vst.msk [vmem:[#allocation3 + $0x38] sm:$0x1] %vm4342_vm1, %v14123_v13  ;;  %v2830_v47 = vld [vmem:[#allocation4 + $0x78] sm:$0xff] }
 0x1d2   : > { %v2755_v16 = vadd.f32 %v2712_v10, %v2549_v49  ;;  %v9507_v42 = vpop.f32.mrb[62].mxu1  ;;  %3057 = vst.msk [vmem:[#allocation4 + $0x30] sm:$0xff] %vm863_vm6, %v3025_v9  ;;  %v3026_v22 = vadd.f32 %v9517_v53, %v2822_v23  ;;  %v2911_v17 = vpop.f32.mrb[71].mxu0  ;;  %v3091_v14 = vld [vmem:[#allocation4] sm:$0xff]  ;;  %v2828_v10 = vld [vmem:[#allocation4 + $0x68] sm:$0xff]  ;;  %v2833_v23 = vld [vmem:[#allocation4 + $0x90] sm:$0xff] }
 0x1d3   : > { %2789 = vst.msk [vmem:[#allocation4 + $0xf0] sm:$0xff] %vm863_vm6, %v2757_v6  ;;  %v2758_v37 = vadd.f32 %v9507_v42, %v2552_v1  ;;  %v2715_v63 = vpop.f32.mrb[63].mxu1  ;;  %3055 = vst.msk [vmem:[#allocation4 + $0x20] sm:$0xff] %vm863_vm6, %v3023_v43  ;;  %v3024_v50 = vadd.f32 %v2911_v17, %v2820_v3  ;;  %v3094_v52 = vld [vmem:[#allocation4 + $0x18] sm:$0xff]  ;;  %v2831_v17 = vld [vmem:[#allocation4 + $0x80] sm:$0xff] }
 0x1d4   : > { %2787 = vst.msk [vmem:[#allocation4 + $0xe0] sm:$0xff] %vm863_vm6, %v2755_v16  ;;  %v2756_v41 = vadd.f32 %v2715_v63, %v2550_v36  ;;  %3058 = vst.msk [vmem:[#allocation4 + $0x38] sm:$0xff] %vm863_vm6, %v3026_v22  ;;  %v3092_v32 = vld [vmem:[#allocation4 + $0x8] sm:$0xff] }
 0x1d5   : > { %2790 = vst.msk [vmem:[#allocation4 + $0xf8] sm:$0xff] %vm863_vm6, %v2758_v37  ;;  %3056 = vst.msk [vmem:[#allocation4 + $0x28] sm:$0xff] %vm863_vm6, %v3024_v50 }
 0x1d6   : > { %2788 = vst.msk [vmem:[#allocation4 + $0xe8] sm:$0xff] %vm863_vm6, %v2756_v41 }
 0x1d7   : > { %v9520_v12 = vpop.f32.mrb[72].mxu0  ;;  %4358 = vst.msk [vmem:[#allocation3 + $0x44] sm:$0x1] %vm4342_vm1, %v14123_v13  ;;  %4361 = vst.msk [vmem:[#allocation3 + $0x50] sm:$0x1] %vm4342_vm1, %v14123_v13 }
 0x1d8   : > { %v9546_v62 = vpop.f32.mrb[64].mxu1  ;;  %v3029_v48 = vadd.f32 %v9520_v12, %v2825_v59  ;;  %v2924_v5 = vpop.f32.mrb[73].mxu0  ;;  %4364 = vst.msk [vmem:[#allocation3 + $0x5c] sm:$0x1] %vm4342_vm1, %v14123_v13  ;;  %4367 = vst.msk [vmem:[#allocation3 + $0x68] sm:$0x1] %vm4342_vm1, %v14123_v13 }
 0x1d9   : > { %v3297_v27 = vadd.f32 %v9546_v62, %v3093_v2  ;;  %v3168_v61 = vpop.f32.mrb[65].mxu1  ;;  %v3027_v54 = vadd.f32 %v2924_v5, %v2823_v57  ;;  %v9521_v40 = vpop.f32.mrb[74].mxu0  ;;  %v3097_v4 = vld [vmem:[#allocation4 + $0x30] sm:$0xff]  ;;  %4370 = vst.msk [vmem:[#allocation3 + $0x74] sm:$0x1] %vm4342_vm1, %v14123_v13  ;;  %v2834_v62 = vld [vmem:[#allocation4 + $0x98] sm:$0xff] }
 0x1da   : > { %v3295_v35 = vadd.f32 %v3168_v61, %v3091_v14  ;;  %v9547_v30 = vpop.f32.mrb[66].mxu1  ;;  %3061 = vst.msk [vmem:[#allocation4 + $0x50] sm:$0xff] %vm863_vm6, %v3029_v48  ;;  %v3030_v29 = vadd.f32 %v9521_v40, %v2826_v31  ;;  %v2927_v34 = vpop.f32.mrb[75].mxu0  ;;  %v3095_v44 = vld [vmem:[#allocation4 + $0x20] sm:$0xff]  ;;  %v2832_v61 = vld [vmem:[#allocation4 + $0x88] sm:$0xff]  ;;  %v2837_v31 = vld [vmem:[#allocation4 + $0xb0] sm:$0xff] }
 0x1db   : > { %3329 = vst.msk [vmem:[#allocation4 + $0x10] sm:$0xff] %vm863_vm6, %v3297_v27  ;;  %v3298_v51 = vadd.f32 %v9547_v30, %v3094_v52  ;;  %v3171_v19 = vpop.f32.mrb[67].mxu1  ;;  %3059 = vst.msk [vmem:[#allocation4 + $0x40] sm:$0xff] %vm863_vm6, %v3027_v54  ;;  %v3028_v26 = vadd.f32 %v2927_v34, %v2824_v58  ;;  %v3098_v24 = vld [vmem:[#allocation4 + $0x38] sm:$0xff]  ;;  %v2835_v34 = vld [vmem:[#allocation4 + $0xa0] sm:$0xff] }
 0x1dc   : > { %3327 = vst.msk [vmem:[#allocation4] sm:$0xff] %vm863_vm6, %v3295_v35  ;;  %v3296_v39 = vadd.f32 %v3171_v19, %v3092_v32  ;;  %3062 = vst.msk [vmem:[#allocation4 + $0x58] sm:$0xff] %vm863_vm6, %v3030_v29  ;;  %v3096_v25 = vld [vmem:[#allocation4 + $0x28] sm:$0xff] }
 0x1dd   : > { %3330 = vst.msk [vmem:[#allocation4 + $0x18] sm:$0xff] %vm863_vm6, %v3298_v51  ;;  %3060 = vst.msk [vmem:[#allocation4 + $0x48] sm:$0xff] %vm863_vm6, %v3028_v26 }
 0x1de   : > { %3328 = vst.msk [vmem:[#allocation4 + $0x8] sm:$0xff] %vm863_vm6, %v3296_v39 }
 0x1df   : > { %v9524_v8 = vpop.f32.mrb[76].mxu0  ;;  %4373 = vst.msk [vmem:[#allocation3 + $0x80] sm:$0x1] %vm4342_vm1, %v14123_v13  ;;  %4376 = vst.msk [vmem:[#allocation3 + $0x8c] sm:$0x1] %vm4342_vm1, %v14123_v13 }
 0x1e0   : > { %v9550_v0 = vpop.f32.mrb[68].mxu1  ;;  %v3033_v21 = vadd.f32 %v9524_v8, %v2829_v11  ;;  %v2940_v55 = vpop.f32.mrb[77].mxu0  ;;  %4379 = vst.msk [vmem:[#allocation3 + $0x98] sm:$0x1] %vm4342_vm1, %v14123_v13  ;;  %4382 = vst.msk [vmem:[#allocation3 + $0xa4] sm:$0x1] %vm4342_vm1, %v14123_v13 }
 0x1e1   : > { %v3301_v45 = vadd.f32 %v9550_v0, %v3097_v4  ;;  %v3184_v56 = vpop.f32.mrb[69].mxu1  ;;  %4385 = vst.msk [vmem:[#allocation3 + $0xb0] sm:$0x1] %vm4342_vm1, %v14123_v13  ;;  %4388 = vst.msk [vmem:[#allocation3 + $0xbc] sm:$0x1] %vm4342_vm1, %v14123_v13  ;;  %v3031_v49 = vadd.f32 %v2940_v55, %v2827_v28  ;;  %v9525_v1 = vpop.f32.mrb[78].mxu0 }
 0x1e2   : > { %4391 = vst.msk [vmem:[#allocation3 + $0xc8] sm:$0x1] %vm4342_vm1, %v14123_v13  ;;  %4394 = vst.msk [vmem:[#allocation3 + $0xd4] sm:$0x1] %vm4342_vm1, %v14123_v13  ;;  %v3299_v38 = vadd.f32 %v3184_v56, %v3095_v44  ;;  %v9551_v7 = vpop.f32.mrb[70].mxu1  ;;  %v3034_v6 = vadd.f32 %v9525_v1, %v2830_v47  ;;  %v2943_v36 = vpop.f32.mrb[79].mxu0 }
 0x1e3   : > { %3333 = vst.msk [vmem:[#allocation4 + $0x30] sm:$0xff] %vm863_vm6, %v3301_v45  ;;  %v3302_v20 = vadd.f32 %v9551_v7, %v3098_v24  ;;  %v3187_v60 = vpop.f32.mrb[71].mxu1  ;;  %3065 = vst.msk [vmem:[#allocation4 + $0x70] sm:$0xff] %vm863_vm6, %v3033_v21  ;;  %v3032_v46 = vadd.f32 %v2943_v36, %v2828_v10  ;;  %v3101_v15 = vld [vmem:[#allocation4 + $0x50] sm:$0xff]  ;;  %v3099_v16 = vld [vmem:[#allocation4 + $0x40] sm:$0xff] }
 0x1e4   : > { %3331 = vst.msk [vmem:[#allocation4 + $0x20] sm:$0xff] %vm863_vm6, %v3299_v38  ;;  %v3300_v9 = vadd.f32 %v3187_v60, %v3096_v25  ;;  %3063 = vst.msk [vmem:[#allocation4 + $0x60] sm:$0xff] %vm863_vm6, %v3031_v49  ;;  %v3102_v43 = vld [vmem:[#allocation4 + $0x58] sm:$0xff]  ;;  %v3100_v22 = vld [vmem:[#allocation4 + $0x48] sm:$0xff] }
 0x1e5   : > { %3334 = vst.msk [vmem:[#allocation4 + $0x38] sm:$0xff] %vm863_vm6, %v3302_v20  ;;  %3066 = vst.msk [vmem:[#allocation4 + $0x78] sm:$0xff] %vm863_vm6, %v3034_v6  ;;  %v2838_v0 = vld [vmem:[#allocation4 + $0xb8] sm:$0xff]  ;;  %v2836_v56 = vld [vmem:[#allocation4 + $0xa8] sm:$0xff] }
 0x1e6   : > { %3332 = vst.msk [vmem:[#allocation4 + $0x28] sm:$0xff] %vm863_vm6, %v3300_v9  ;;  %3064 = vst.msk [vmem:[#allocation4 + $0x68] sm:$0xff] %vm863_vm6, %v3032_v46  ;;  %v2841_v38 = vld [vmem:[#allocation4 + $0xd0] sm:$0xff]  ;;  %v2839_v20 = vld [vmem:[#allocation4 + $0xc0] sm:$0xff] }
 0x1e7   : > { %v9528_v53 = vpop.f32.mrb[80].mxu0  ;;  %v11856_v9 = vld [vmem:[#allocation3] sm:$0xf]  ;;  %v11858_v46 = vld [vmem:[#allocation3 + $0x4] sm:$0xf] }
 0x1e8   : > { %v9554_v42 = vpop.f32.mrb[72].mxu1  ;;  %v3037_v3 = vadd.f32 %v9528_v53, %v2833_v23  ;;  %v2956_v41 = vpop.f32.mrb[81].mxu0  ;;  %v8804_v53 = vcombine.low %v11856_v9, %v11858_v46 }
 0x1e9   : > { %v3305_v37 = vadd.f32 %v9554_v42, %v3101_v15  ;;  %v3200_v63 = vpop.f32.mrb[73].mxu1  ;;  %v3035_v14 = vadd.f32 %v2956_v41, %v2831_v17  ;;  %v9529_v52 = vpop.f32.mrb[82].mxu0 }
 0x1ea   : > { %v3303_v50 = vadd.f32 %v3200_v63, %v3099_v16  ;;  %v9555_v2 = vpop.f32.mrb[74].mxu1  ;;  %3069 = vst.msk [vmem:[#allocation4 + $0x90] sm:$0xff] %vm863_vm6, %v3037_v3  ;;  %v3038_v27 = vadd.f32 %v9529_v52, %v2834_v62  ;;  %v2959_v32 = vpop.f32.mrb[83].mxu0  ;;  %v3105_v5 = vld [vmem:[#allocation4 + $0x70] sm:$0xff]  ;;  %v2840_v3 = vld [vmem:[#allocation4 + $0xc8] sm:$0xff]  ;;  %9680 = vmatprep.mubr.msk.bf16.mxu1 %vm863_vm6, %v8804_v53 }
 0x1eb   : > { %3337 = vst.msk [vmem:[#allocation4 + $0x50] sm:$0xff] %vm863_vm6, %v3305_v37  ;;  %v3306_v59 = vadd.f32 %v9555_v2, %v3102_v43  ;;  %v3203_v12 = vpop.f32.mrb[75].mxu1  ;;  %3067 = vst.msk [vmem:[#allocation4 + $0x80] sm:$0xff] %vm863_vm6, %v3035_v14  ;;  %v3036_v57 = vadd.f32 %v2959_v32, %v2832_v61  ;;  %v3103_v35 = vld [vmem:[#allocation4 + $0x60] sm:$0xff]  ;;  %v2842_v43 = vld [vmem:[#allocation4 + $0xd8] sm:$0xff] }
 0x1ec   : > { %3335 = vst.msk [vmem:[#allocation4 + $0x40] sm:$0xff] %vm863_vm6, %v3303_v50  ;;  %v3304_v48 = vadd.f32 %v3203_v12, %v3100_v22  ;;  %3070 = vst.msk [vmem:[#allocation4 + $0x98] sm:$0xff] %vm863_vm6, %v3038_v27  ;;  %v3106_v54 = vld [vmem:[#allocation4 + $0x78] sm:$0xff]  ;;  %v8836_v62 = vld [vmem:[%s13891_s4 + $0x4] sm:$0xf] }
 0x1ed   : > { %3338 = vst.msk [vmem:[#allocation4 + $0x58] sm:$0xff] %vm863_vm6, %v3306_v59  ;;  %3068 = vst.msk [vmem:[#allocation4 + $0x88] sm:$0xff] %vm863_vm6, %v3036_v57  ;;  %v3104_v29 = vld [vmem:[#allocation4 + $0x68] sm:$0xff]  ;;  %v2845_v12 = vld [vmem:[#allocation4 + $0xf0] sm:$0xff]  ;;  %9994 = vmatprep.subr.msk.bf16.mxu0 %vm5175_vm0, %v8836_v62  ;;  %v5919_v61 = vsel %vm5175_vm0, %v8836_v62, 0 }
 0x1ee   : > { %3336 = vst.msk [vmem:[#allocation4 + $0x48] sm:$0xff] %vm863_vm6, %v3304_v48  ;;  %9713 = vmatpush3.bf16.msra.mxu0 %v5919_v61 }
 0x1ef   : > { %v9532_v40 = vpop.f32.mrb[84].mxu0 }
 0x1f0   : > { %v9558_v30 = vpop.f32.mrb[76].mxu1  ;;  %v3041_v58 = vadd.f32 %v9532_v40, %v2837_v31  ;;  %v2972_v39 = vpop.f32.mrb[85].mxu0 }
 0x1f1   : > { %v3309_v51 = vadd.f32 %v9558_v30, %v3105_v5  ;;  %v3216_v19 = vpop.f32.mrb[77].mxu1  ;;  %v3039_v44 = vadd.f32 %v2972_v39, %v2835_v34  ;;  %v9533_v24 = vpop.f32.mrb[86].mxu0  ;;  %v3109_v55 = vld [vmem:[#allocation4 + $0x90] sm:$0xff]  ;;  %v2844_v39 = vld [vmem:[#allocation4 + $0xe8] sm:$0xff] }
 0x1f2   : > { %v3307_v26 = vadd.f32 %v3216_v19, %v3103_v35  ;;  %v9559_v4 = vpop.f32.mrb[78].mxu1  ;;  %3073 = vst.msk [vmem:[#allocation4 + $0xb0] sm:$0xff] %vm863_vm6, %v3041_v58  ;;  %v3042_v45 = vadd.f32 %v9533_v24, %v2838_v0  ;;  %v2975_v25 = vpop.f32.mrb[87].mxu0  ;;  %v3107_v13 = vld [vmem:[#allocation4 + $0x80] sm:$0xff] }
 0x1f3   : > { %3341 = vst.msk [vmem:[#allocation4 + $0x70] sm:$0xff] %vm863_vm6, %v3309_v51  ;;  %v3310_v11 = vadd.f32 %v9559_v4, %v3106_v54  ;;  %v3219_v8 = vpop.f32.mrb[79].mxu1  ;;  %3071 = vst.msk [vmem:[#allocation4 + $0xa0] sm:$0xff] %vm863_vm6, %v3039_v44  ;;  %v3040_v28 = vadd.f32 %v2975_v25, %v2836_v56  ;;  %v3110_v49 = vld [vmem:[#allocation4 + $0x98] sm:$0xff]  ;;  %v2843_v35 = vld [vmem:[#allocation4 + $0xe0] sm:$0xff] }
 0x1f4   : > { %3339 = vst.msk [vmem:[#allocation4 + $0x60] sm:$0xff] %vm863_vm6, %v3307_v26  ;;  %v3308_v21 = vadd.f32 %v3219_v8, %v3104_v29  ;;  %3074 = vst.msk [vmem:[#allocation4 + $0xb8] sm:$0xff] %vm863_vm6, %v3042_v45  ;;  %v3108_v47 = vld [vmem:[#allocation4 + $0x88] sm:$0xff]  ;;  %v2846_v51 = vld [vmem:[#allocation4 + $0xf8] sm:$0xff] }
 0x1f5   : > { %3342 = vst.msk [vmem:[#allocation4 + $0x78] sm:$0xff] %vm863_vm6, %v3310_v11  ;;  %3072 = vst.msk [vmem:[#allocation4 + $0xa8] sm:$0xff] %vm863_vm6, %v3040_v28  ;;  %v3361_v45 = vld [vmem:[#allocation4 + $0x10] sm:$0xff] }
 0x1f6   : > { %3340 = vst.msk [vmem:[#allocation4 + $0x68] sm:$0xff] %vm863_vm6, %v3308_v21 }
 0x1f7   : > { %v9536_v1 = vpop.f32.mrb[88].mxu0 }
 0x1f8   : > { %v9562_v7 = vpop.f32.mrb[80].mxu1  ;;  %v3045_v10 = vadd.f32 %v9536_v1, %v2841_v38  ;;  %v2988_v36 = vpop.f32.mrb[89].mxu0  ;;  %v3362_v1 = vld [vmem:[#allocation4 + $0x18] sm:$0xff] }
 0x1f9   : > { %v3313_v60 = vadd.f32 %v9562_v7, %v3109_v55  ;;  %v3232_v6 = vpop.f32.mrb[81].mxu1  ;;  %v3043_v42 = vadd.f32 %v2988_v36, %v2839_v20  ;;  %v9537_v23 = vpop.f32.mrb[90].mxu0  ;;  %v3113_v2 = vld [vmem:[#allocation4 + $0xb0] sm:$0xff] }
 0x1fa   : > { %v3311_v15 = vadd.f32 %v3232_v6, %v3107_v13  ;;  %v9563_v16 = vpop.f32.mrb[82].mxu1  ;;  %3077 = vst.msk [vmem:[#allocation4 + $0xd0] sm:$0xff] %vm863_vm6, %v3045_v10  ;;  %v3046_v22 = vadd.f32 %v9537_v23, %v2842_v43  ;;  %v2991_v17 = vpop.f32.mrb[91].mxu0  ;;  %v3111_v14 = vld [vmem:[#allocation4 + $0xa0] sm:$0xff]  ;;  %v5418_v43 = vshrl.u32 %v11858_v46, 16 }
 0x1fb   : > { %3345 = vst.msk [vmem:[#allocation4 + $0x90] sm:$0xff] %vm863_vm6, %v3313_v60  ;;  %v3314_v37 = vadd.f32 %v9563_v16, %v3110_v49  ;;  %v3235_v63 = vpop.f32.mrb[83].mxu1  ;;  %3075 = vst.msk [vmem:[#allocation4 + $0xc0] sm:$0xff] %vm863_vm6, %v3043_v42  ;;  %v3044_v50 = vadd.f32 %v2991_v17, %v2840_v3  ;;  %v3114_v59 = vld [vmem:[#allocation4 + $0xb8] sm:$0xff]  ;;  %v3359_v13 = vld [vmem:[#allocation4] sm:$0xff]  ;;  %v5405_v60 = vshrl.u32 %v11856_v9, 16 }
 0x1fc   : > { %3343 = vst.msk [vmem:[#allocation4 + $0x80] sm:$0xff] %vm863_vm6, %v3311_v15  ;;  %v3312_v41 = vadd.f32 %v3235_v63, %v3108_v47  ;;  %3078 = vst.msk [vmem:[#allocation4 + $0xd8] sm:$0xff] %vm863_vm6, %v3046_v22  ;;  %v3112_v57 = vld [vmem:[#allocation4 + $0xa8] sm:$0xff]  ;;  %v5408_v42 = vshll.u32 %v11856_v9, 16  ;;  %v3365_v9 = vld [vmem:[#allocation4 + $0x30] sm:$0xff] }
 0x1fd   : > { %3346 = vst.msk [vmem:[#allocation4 + $0x98] sm:$0xff] %vm863_vm6, %v3314_v37  ;;  %3076 = vst.msk [vmem:[#allocation4 + $0xc8] sm:$0xff] %vm863_vm6, %v3044_v50  ;;  %v3360_v15 = vld [vmem:[#allocation4 + $0x8] sm:$0xff]  ;;  %v5414_v37 = vshll.u32 %v11858_v46, 16  ;;  %v5407_v17 = vrot.slane %v5405_v60, 4 }
 0x1fe   : > { %3344 = vst.msk [vmem:[#allocation4 + $0x88] sm:$0xff] %vm863_vm6, %v3312_v41  ;;  %v5410_v41 = vrot.slane %v5408_v42, 5  ;;  %v4930_v46 = vld [vmem:[#allocation3 + $0x8] sm:$0x1] }
 0x1ff   : > { %v9540_v27 = vpop.f32.mrb[92].mxu0  ;;  %v5416_v50 = vrot.slane %v5414_v37, 5 }
 0x200   : > { %v9566_v52 = vpop.f32.mrb[84].mxu1  ;;  %v3049_v5 = vadd.f32 %v9540_v27, %v2845_v12  ;;  %v3004_v30 = vpop.f32.mrb[93].mxu0 }
 0x201   : > { %v3317_v32 = vadd.f32 %v9566_v52, %v3113_v2  ;;  %v3248_v48 = vpop.f32.mrb[85].mxu1  ;;  %v3047_v40 = vadd.f32 %v3004_v30, %v2843_v35  ;;  %v9541_v19 = vpop.f32.mrb[94].mxu0  ;;  %v3117_v0 = vld [vmem:[#allocation4 + $0xd0] sm:$0xff]  ;;  %v5420_v2 = vrot.slane %v5418_v43, 4  ;;  %v11899_v52 = vld [vmem:[%s13891_s4 + $0x8] sm:$0xf] }
 0x202   : > { %v3315_v54 = vadd.f32 %v3248_v48, %v3111_v14  ;;  %v9567_v31 = vpop.f32.mrb[86].mxu1  ;;  %3081 = vst.msk [vmem:[#allocation4 + $0xf0] sm:$0xff] %vm863_vm6, %v3049_v5  ;;  %v3050_v34 = vadd.f32 %v9541_v19, %v2846_v51  ;;  %v3007_v26 = vpop.f32.mrb[95].mxu0  ;;  %v3115_v24 = vld [vmem:[#allocation4 + $0xc0] sm:$0xff]  ;;  %9995 = vmatprep.subr.msk.bf16.mxu1 %vm5175_vm0, %v11899_v52  ;;  %v5424_v51 = vshll.u32 %v4930_v46, 16 }
 0x203   : > { %3349 = vst.msk [vmem:[#allocation4 + $0xb0] sm:$0xff] %vm863_vm6, %v3317_v32  ;;  %v3318_v29 = vadd.f32 %v9567_v31, %v3114_v59  ;;  %v3251_v58 = vpop.f32.mrb[87].mxu1  ;;  %3079 = vst.msk [vmem:[#allocation4 + $0xe0] sm:$0xff] %vm863_vm6, %v3047_v40  ;;  %v3048_v44 = vadd.f32 %v3007_v26, %v2844_v39  ;;  %v3118_v8 = vld [vmem:[#allocation4 + $0xd8] sm:$0xff]  ;;  %v3363_v32 = vld [vmem:[#allocation4 + $0x20] sm:$0xff]  ;;  %v5421_v40 = vor.u32 %v5420_v2, %v5416_v50 }
 0x204   : > { %3347 = vst.msk [vmem:[#allocation4 + $0xa0] sm:$0xff] %vm863_vm6, %v3315_v54  ;;  %v3316_v4 = vadd.f32 %v3251_v58, %v3112_v57  ;;  %3082 = vst.msk [vmem:[#allocation4 + $0xf8] sm:$0xff] %vm863_vm6, %v3050_v34  ;;  %v3116_v28 = vld [vmem:[#allocation4 + $0xc8] sm:$0xff]  ;;  %v5411_v57 = vor.u32 %v5410_v41, %v5407_v17  ;;  %v3366_v54 = vld [vmem:[#allocation4 + $0x38] sm:$0xff] }
 0x205   : > { %3350 = vst.msk [vmem:[#allocation4 + $0xb8] sm:$0xff] %vm863_vm6, %v3318_v29  ;;  %3080 = vst.msk [vmem:[#allocation4 + $0xe8] sm:$0xff] %vm863_vm6, %v3048_v44  ;;  %v3364_v34 = vld [vmem:[#allocation4 + $0x28] sm:$0xff]  ;;  %v3373_v41 = vld [vmem:[#allocation4 + $0x70] sm:$0xff] }
 0x206   : > { %3348 = vst.msk [vmem:[#allocation4 + $0xa8] sm:$0xff] %vm863_vm6, %v3316_v4  ;;  %v5412_v26 = vrot.slane %v5411_v57, 4 }
 0x207   : > { %v9580_v56 = vpop.f32.mrb[96].mxu0 }
 0x208   : > { %v9570_v11 = vpop.f32.mrb[88].mxu1  ;;  %v3567_v55 = vadd.f32 %v9580_v56, %v3361_v45  ;;  %v3438_v38 = vpop.f32.mrb[97].mxu0 }
 0x209   : > { %v3321_v25 = vadd.f32 %v9570_v11, %v3117_v0  ;;  %v3264_v21 = vpop.f32.mrb[89].mxu1  ;;  %v3565_v47 = vadd.f32 %v3438_v38, %v3359_v13  ;;  %v9581_v20 = vpop.f32.mrb[98].mxu0  ;;  %v3121_v63 = vld [vmem:[#allocation4 + $0xf0] sm:$0xff]  ;;  %v5422_v0 = vrot.slane %v5421_v40, 4  ;;  %v5417_v11 = vsel %vm10419_vm13, %v5412_v26, %v5416_v50 }
 0x20a   : > { %v3319_v7 = vadd.f32 %v3264_v21, %v3115_v24  ;;  %v9571_v49 = vpop.f32.mrb[90].mxu1  ;;  %3599 = vst.msk [vmem:[#allocation4 + $0x10] sm:$0xff] %vm863_vm6, %v3567_v55  ;;  %v3568_v36 = vadd.f32 %v9581_v20, %v3362_v1  ;;  %v3441_v16 = vpop.f32.mrb[99].mxu0  ;;  %v3119_v22 = vld [vmem:[#allocation4 + $0xe0] sm:$0xff]  ;;  %v5426_v24 = vrot.slane %v5424_v51, 5  ;;  %v3369_v55 = vld [vmem:[#allocation4 + $0x50] sm:$0xff] }
 0x20b   : > { %3353 = vst.msk [vmem:[#allocation4 + $0xd0] sm:$0xff] %vm863_vm6, %v3321_v25  ;;  %v3322_v6 = vadd.f32 %v9571_v49, %v3118_v8  ;;  %v3267_v10 = vpop.f32.mrb[91].mxu1  ;;  %3597 = vst.msk [vmem:[#allocation4] sm:$0xff] %vm863_vm6, %v3565_v47  ;;  %v3566_v53 = vadd.f32 %v3441_v16, %v3360_v15  ;;  %v3122_v3 = vld [vmem:[#allocation4 + $0xf8] sm:$0xff]  ;;  %v3367_v1 = vld [vmem:[#allocation4 + $0x40] sm:$0xff] }
 0x20c   : > { %3351 = vst.msk [vmem:[#allocation4 + $0xc0] sm:$0xff] %vm863_vm6, %v3319_v7  ;;  %v3320_v23 = vadd.f32 %v3267_v10, %v3116_v28  ;;  %3600 = vst.msk [vmem:[#allocation4 + $0x18] sm:$0xff] %vm863_vm6, %v3568_v36  ;;  %v3120_v27 = vld [vmem:[#allocation4 + $0xe8] sm:$0xff]  ;;  %v5427_v45 = vsel %vm10419_vm13, %v5422_v0, %v5426_v24  ;;  %v3370_v36 = vld [vmem:[#allocation4 + $0x58] sm:$0xff] }
 0x20d   : > { %3354 = vst.msk [vmem:[#allocation4 + $0xd8] sm:$0xff] %vm863_vm6, %v3322_v6  ;;  %3598 = vst.msk [vmem:[#allocation4 + $0x8] sm:$0xff] %vm863_vm6, %v3566_v53  ;;  %v8837_v25 = vcombine.low %v5417_v11, %v5427_v45  ;;  %v3375_v11 = vld [vmem:[#allocation4 + $0x80] sm:$0xff] }
 0x20e   : > { %3352 = vst.msk [vmem:[#allocation4 + $0xc8] sm:$0xff] %vm863_vm6, %v3320_v23  ;;  %v3368_v23 = vld [vmem:[#allocation4 + $0x48] sm:$0xff] }
 0x20f   : > { %v9584_v62 = vpop.f32.mrb[100].mxu0  ;;  %9714 = vmatprep.mubr.msk.bf16.mxu0 %vm863_vm6, %v8837_v25 }
 0x210   : > { %v9574_v14 = vpop.f32.mrb[92].mxu1  ;;  %v3571_v61 = vadd.f32 %v9584_v62, %v3365_v9  ;;  %v3454_v48 = vpop.f32.mrb[101].mxu0 }
 0x211   : > { %v3325_v59 = vadd.f32 %v9574_v14, %v3121_v63  ;;  %v3280_v12 = vpop.f32.mrb[93].mxu1  ;;  %v3569_v30 = vadd.f32 %v3454_v48, %v3363_v32  ;;  %v9585_v31 = vpop.f32.mrb[102].mxu0  ;;  %v3655_v8 = vld [vmem:[#allocation4 + $0x10] sm:$0xff]  ;;  %v3374_v48 = vld [vmem:[#allocation4 + $0x78] sm:$0xff] }
 0x212   : > { %v3323_v5 = vadd.f32 %v3280_v12, %v3119_v22  ;;  %v9575_v35 = vpop.f32.mrb[94].mxu1  ;;  %3603 = vst.msk [vmem:[#allocation4 + $0x30] sm:$0xff] %vm863_vm6, %v3571_v61  ;;  %v3572_v58 = vadd.f32 %v9585_v31, %v3366_v54  ;;  %v3457_v39 = vpop.f32.mrb[103].mxu0  ;;  %v3653_v56 = vld [vmem:[#allocation4] sm:$0xff]  ;;  %v3372_v54 = vld [vmem:[#allocation4 + $0x68] sm:$0xff] }
 0x213   : > { %3357 = vst.msk [vmem:[#allocation4 + $0xf0] sm:$0xff] %vm863_vm6, %v3325_v59  ;;  %v3326_v19 = vadd.f32 %v9575_v35, %v3122_v3  ;;  %v3283_v29 = vpop.f32.mrb[95].mxu1  ;;  %3601 = vst.msk [vmem:[#allocation4 + $0x20] sm:$0xff] %vm863_vm6, %v3569_v30  ;;  %v3570_v44 = vadd.f32 %v3457_v39, %v3364_v34  ;;  %v3656_v28 = vld [vmem:[#allocation4 + $0x18] sm:$0xff]  ;;  %v3371_v59 = vld [vmem:[#allocation4 + $0x60] sm:$0xff] }
 0x214   : > { %3355 = vst.msk [vmem:[#allocation4 + $0xe0] sm:$0xff] %vm863_vm6, %v3323_v5  ;;  %v3324_v4 = vadd.f32 %v3283_v29, %v3120_v27  ;;  %3604 = vst.msk [vmem:[#allocation4 + $0x38] sm:$0xff] %vm863_vm6, %v3572_v58  ;;  %v3654_v49 = vld [vmem:[#allocation4 + $0x8] sm:$0xff]  ;;  %v3377_v39 = vld [vmem:[#allocation4 + $0x90] sm:$0xff] }
 0x215   : > { %3358 = vst.msk [vmem:[#allocation4 + $0xf8] sm:$0xff] %vm863_vm6, %v3326_v19  ;;  %3602 = vst.msk [vmem:[#allocation4 + $0x28] sm:$0xff] %vm863_vm6, %v3570_v44 }
 0x216   : > { %3356 = vst.msk [vmem:[#allocation4 + $0xe8] sm:$0xff] %vm863_vm6, %v3324_v4 }
 0x217   : > { %v9588_v13 = vpop.f32.mrb[104].mxu0 }
 0x218   : > { %v9614_v21 = vpop.f32.mrb[96].mxu1  ;;  %v3575_v47 = vadd.f32 %v9588_v13, %v3369_v55  ;;  %v3470_v20 = vpop.f32.mrb[105].mxu0 }
 0x219   : > { %v3859_v38 = vadd.f32 %v9614_v21, %v3655_v8  ;;  %v3730_v7 = vpop.f32.mrb[97].mxu1  ;;  %v3573_v10 = vadd.f32 %v3470_v20, %v3367_v1  ;;  %v9589_v15 = vpop.f32.mrb[106].mxu0  ;;  %v3659_v9 = vld [vmem:[#allocation4 + $0x30] sm:$0xff]  ;;  %v3378_v21 = vld [vmem:[#allocation4 + $0x98] sm:$0xff] }
 0x21a   : > { %v3857_v60 = vadd.f32 %v3730_v7, %v3653_v56  ;;  %v9615_v6 = vpop.f32.mrb[98].mxu1  ;;  %3607 = vst.msk [vmem:[#allocation4 + $0x50] sm:$0xff] %vm863_vm6, %v3575_v47  ;;  %v3576_v43 = vadd.f32 %v9589_v15, %v3370_v36  ;;  %v3473_v53 = vpop.f32.mrb[107].mxu0  ;;  %v3657_v22 = vld [vmem:[#allocation4 + $0x20] sm:$0xff]  ;;  %v3376_v7 = vld [vmem:[#allocation4 + $0x88] sm:$0xff]  ;;  %v3381_v36 = vld [vmem:[#allocation4 + $0xb0] sm:$0xff] }
 0x21b   : > { %3891 = vst.msk [vmem:[#allocation4 + $0x10] sm:$0xff] %vm863_vm6, %v3859_v38  ;;  %v3860_v16 = vadd.f32 %v9615_v6, %v3656_v28  ;;  %v3733_v42 = vpop.f32.mrb[99].mxu1  ;;  %3605 = vst.msk [vmem:[#allocation4 + $0x40] sm:$0xff] %vm863_vm6, %v3573_v10  ;;  %v3574_v63 = vadd.f32 %v3473_v53, %v3368_v23  ;;  %v3660_v17 = vld [vmem:[#allocation4 + $0x38] sm:$0xff]  ;;  %v3379_v53 = vld [vmem:[#allocation4 + $0xa0] sm:$0xff] }
 0x21c   : > { %3889 = vst.msk [vmem:[#allocation4] sm:$0xff] %vm863_vm6, %v3857_v60  ;;  %v3858_v37 = vadd.f32 %v3733_v42, %v3654_v49  ;;  %3608 = vst.msk [vmem:[#allocation4 + $0x58] sm:$0xff] %vm863_vm6, %v3576_v43  ;;  %v3658_v62 = vld [vmem:[#allocation4 + $0x28] sm:$0xff] }
 0x21d   : > { %3892 = vst.msk [vmem:[#allocation4 + $0x18] sm:$0xff] %vm863_vm6, %v3860_v16  ;;  %3606 = vst.msk [vmem:[#allocation4 + $0x48] sm:$0xff] %vm863_vm6, %v3574_v63 }
 0x21e   : > { %3890 = vst.msk [vmem:[#allocation4 + $0x8] sm:$0xff] %vm863_vm6, %v3858_v37 }
 0x21f   : > { %v9592_v50 = vpop.f32.mrb[108].mxu0 }
 0x220   : > { %v9618_v3 = vpop.f32.mrb[100].mxu1  ;;  %v3579_v46 = vadd.f32 %v9592_v50, %v3373_v41  ;;  %v3486_v12 = vpop.f32.mrb[109].mxu0 }
 0x221   : > { %v3863_v2 = vadd.f32 %v9618_v3, %v3659_v9  ;;  %v3746_v14 = vpop.f32.mrb[101].mxu1  ;;  %v3577_v32 = vadd.f32 %v3486_v12, %v3371_v59  ;;  %v9593_v57 = vpop.f32.mrb[110].mxu0  ;;  %v3663_v19 = vld [vmem:[#allocation4 + $0x50] sm:$0xff]  ;;  %v3382_v3 = vld [vmem:[#allocation4 + $0xb8] sm:$0xff] }
 0x222   : > { %v3861_v27 = vadd.f32 %v3746_v14, %v3657_v22  ;;  %v9619_v61 = vpop.f32.mrb[102].mxu1  ;;  %3611 = vst.msk [vmem:[#allocation4 + $0x70] sm:$0xff] %vm863_vm6, %v3579_v46  ;;  %v3580_v30 = vadd.f32 %v9593_v57, %v3374_v48  ;;  %v3489_v31 = vpop.f32.mrb[111].mxu0  ;;  %v3661_v29 = vld [vmem:[#allocation4 + $0x40] sm:$0xff]  ;;  %v3380_v14 = vld [vmem:[#allocation4 + $0xa8] sm:$0xff]  ;;  %v3385_v48 = vld [vmem:[#allocation4 + $0xd0] sm:$0xff] }
 0x223   : > { %3895 = vst.msk [vmem:[#allocation4 + $0x30] sm:$0xff] %vm863_vm6, %v3863_v2  ;;  %v3864_v5 = vadd.f32 %v9619_v61, %v3660_v17  ;;  %v3749_v35 = vpop.f32.mrb[103].mxu1  ;;  %3609 = vst.msk [vmem:[#allocation4 + $0x60] sm:$0xff] %vm863_vm6, %v3577_v32  ;;  %v3578_v51 = vadd.f32 %v3489_v31, %v3372_v54  ;;  %v3664_v34 = vld [vmem:[#allocation4 + $0x58] sm:$0xff]  ;;  %v3383_v31 = vld [vmem:[#allocation4 + $0xc0] sm:$0xff] }
 0x224   : > { %3893 = vst.msk [vmem:[#allocation4 + $0x20] sm:$0xff] %vm863_vm6, %v3861_v27  ;;  %v3862_v40 = vadd.f32 %v3749_v35, %v3658_v62  ;;  %3612 = vst.msk [vmem:[#allocation4 + $0x78] sm:$0xff] %vm863_vm6, %v3580_v30  ;;  %v3662_v0 = vld [vmem:[#allocation4 + $0x48] sm:$0xff] }
 0x225   : > { %3896 = vst.msk [vmem:[#allocation4 + $0x38] sm:$0xff] %vm863_vm6, %v3864_v5  ;;  %3610 = vst.msk [vmem:[#allocation4 + $0x68] sm:$0xff] %vm863_vm6, %v3578_v51 }
 0x226   : > { %3894 = vst.msk [vmem:[#allocation4 + $0x28] sm:$0xff] %vm863_vm6, %v3862_v40 }
 0x227   : > { %v9596_v26 = vpop.f32.mrb[112].mxu0 }
 0x228   : > { %v9622_v58 = vpop.f32.mrb[104].mxu1  ;;  %v3583_v24 = vadd.f32 %v9596_v26, %v3377_v39  ;;  %v3502_v8 = vpop.f32.mrb[113].mxu0 }
 0x229   : > { %v3867_v4 = vadd.f32 %v9622_v58, %v3663_v19  ;;  %v3762_v44 = vpop.f32.mrb[105].mxu1  ;;  %v3581_v25 = vadd.f32 %v3502_v8, %v3375_v11  ;;  %v9597_v28 = vpop.f32.mrb[114].mxu0  ;;  %v3667_v20 = vld [vmem:[#allocation4 + $0x70] sm:$0xff]  ;;  %v3386_v58 = vld [vmem:[#allocation4 + $0xd8] sm:$0xff] }
 0x22a   : > { %v3865_v45 = vadd.f32 %v3762_v44, %v3661_v29  ;;  %v9623_v56 = vpop.f32.mrb[106].mxu1  ;;  %3615 = vst.msk [vmem:[#allocation4 + $0x90] sm:$0xff] %vm863_vm6, %v3583_v24  ;;  %v3584_v38 = vadd.f32 %v9597_v28, %v3378_v21  ;;  %v3505_v49 = vpop.f32.mrb[115].mxu0  ;;  %v3665_v60 = vld [vmem:[#allocation4 + $0x60] sm:$0xff]  ;;  %v3384_v44 = vld [vmem:[#allocation4 + $0xc8] sm:$0xff]  ;;  %v3389_v21 = vld [vmem:[#allocation4 + $0xf0] sm:$0xff] }
 0x22b   : > { %3899 = vst.msk [vmem:[#allocation4 + $0x50] sm:$0xff] %vm863_vm6, %v3867_v4  ;;  %v3868_v55 = vadd.f32 %v9623_v56, %v3664_v34  ;;  %v3765_v13 = vpop.f32.mrb[107].mxu1  ;;  %3613 = vst.msk [vmem:[#allocation4 + $0x80] sm:$0xff] %vm863_vm6, %v3581_v25  ;;  %v3582_v1 = vadd.f32 %v3505_v49, %v3376_v7  ;;  %v3668_v10 = vld [vmem:[#allocation4 + $0x78] sm:$0xff]  ;;  %v3387_v49 = vld [vmem:[#allocation4 + $0xe0] sm:$0xff] }
 0x22c   : > { %3897 = vst.msk [vmem:[#allocation4 + $0x40] sm:$0xff] %vm863_vm6, %v3865_v45  ;;  %v3866_v47 = vadd.f32 %v3765_v13, %v3662_v0  ;;  %3616 = vst.msk [vmem:[#allocation4 + $0x98] sm:$0xff] %vm863_vm6, %v3584_v38  ;;  %v3666_v43 = vld [vmem:[#allocation4 + $0x68] sm:$0xff] }
 0x22d   : > { %3900 = vst.msk [vmem:[#allocation4 + $0x58] sm:$0xff] %vm863_vm6, %v3868_v55  ;;  %3614 = vst.msk [vmem:[#allocation4 + $0x88] sm:$0xff] %vm863_vm6, %v3582_v1 }
 0x22e   : > { %3898 = vst.msk [vmem:[#allocation4 + $0x48] sm:$0xff] %vm863_vm6, %v3866_v47 }
 0x22f   : > { %v9600_v15 = vpop.f32.mrb[116].mxu0 }
 0x230   : > { %v9626_v6 = vpop.f32.mrb[108].mxu1  ;;  %v3587_v23 = vadd.f32 %v9600_v15, %v3381_v36  ;;  %v3518_v37 = vpop.f32.mrb[117].mxu0 }
 0x231   : > { %v3871_v16 = vadd.f32 %v9626_v6, %v3667_v20  ;;  %v3778_v42 = vpop.f32.mrb[109].mxu1  ;;  %v3585_v22 = vadd.f32 %v3518_v37, %v3379_v53  ;;  %v9601_v17 = vpop.f32.mrb[118].mxu0  ;;  %v3671_v12 = vld [vmem:[#allocation4 + $0x90] sm:$0xff]  ;;  %v3390_v6 = vld [vmem:[#allocation4 + $0xf8] sm:$0xff] }
 0x232   : > { %v3869_v63 = vadd.f32 %v3778_v42, %v3665_v60  ;;  %v9627_v9 = vpop.f32.mrb[110].mxu1  ;;  %3619 = vst.msk [vmem:[#allocation4 + $0xb0] sm:$0xff] %vm863_vm6, %v3587_v23  ;;  %v3588_v2 = vadd.f32 %v9601_v17, %v3382_v3  ;;  %v3521_v62 = vpop.f32.mrb[119].mxu0  ;;  %v3669_v27 = vld [vmem:[#allocation4 + $0x80] sm:$0xff]  ;;  %v3388_v42 = vld [vmem:[#allocation4 + $0xe8] sm:$0xff]  ;;  %v3931_v3 = vld [vmem:[#allocation4 + $0x10] sm:$0xff] }
 0x233   : > { %3903 = vst.msk [vmem:[#allocation4 + $0x70] sm:$0xff] %vm863_vm6, %v3871_v16  ;;  %v3872_v41 = vadd.f32 %v9627_v9, %v3668_v10  ;;  %v3781_v50 = vpop.f32.mrb[111].mxu1  ;;  %3617 = vst.msk [vmem:[#allocation4 + $0xa0] sm:$0xff] %vm863_vm6, %v3585_v22  ;;  %v3586_v59 = vadd.f32 %v3521_v62, %v3380_v14  ;;  %v3672_v32 = vld [vmem:[#allocation4 + $0x98] sm:$0xff]  ;;  %v3929_v62 = vld [vmem:[#allocation4] sm:$0xff] }
 0x234   : > { %3901 = vst.msk [vmem:[#allocation4 + $0x60] sm:$0xff] %vm863_vm6, %v3869_v63  ;;  %v3870_v46 = vadd.f32 %v3781_v50, %v3666_v43  ;;  %3620 = vst.msk [vmem:[#allocation4 + $0xb8] sm:$0xff] %vm863_vm6, %v3588_v2  ;;  %v3670_v30 = vld [vmem:[#allocation4 + $0x88] sm:$0xff] }
 0x235   : > { %3904 = vst.msk [vmem:[#allocation4 + $0x78] sm:$0xff] %vm863_vm6, %v3872_v41  ;;  %3618 = vst.msk [vmem:[#allocation4 + $0xa8] sm:$0xff] %vm863_vm6, %v3586_v59 }
 0x236   : > { %3902 = vst.msk [vmem:[#allocation4 + $0x68] sm:$0xff] %vm863_vm6, %v3870_v46 }
 0x237   : > { %v9604_v57 = vpop.f32.mrb[120].mxu0 }
 0x238   : > { %v9630_v61 = vpop.f32.mrb[112].mxu1  ;;  %v3591_v54 = vadd.f32 %v9604_v57, %v3385_v48  ;;  %v3534_v40 = vpop.f32.mrb[121].mxu0 }
 0x239   : > { %v3875_v5 = vadd.f32 %v9630_v61, %v3671_v12  ;;  %v3794_v35 = vpop.f32.mrb[113].mxu1  ;;  %v3589_v29 = vadd.f32 %v3534_v40, %v3383_v31  ;;  %v9605_v34 = vpop.f32.mrb[122].mxu0  ;;  %v3675_v8 = vld [vmem:[#allocation4 + $0xb0] sm:$0xff]  ;;  %v3932_v61 = vld [vmem:[#allocation4 + $0x18] sm:$0xff] }
 0x23a   : > { %v3873_v51 = vadd.f32 %v3794_v35, %v3669_v27  ;;  %v9631_v19 = vpop.f32.mrb[114].mxu1  ;;  %3623 = vst.msk [vmem:[#allocation4 + $0xd0] sm:$0xff] %vm863_vm6, %v3591_v54  ;;  %v3592_v4 = vadd.f32 %v9605_v34, %v3386_v58  ;;  %v3537_v0 = vpop.f32.mrb[123].mxu0  ;;  %v3673_v45 = vld [vmem:[#allocation4 + $0xa0] sm:$0xff]  ;;  %v3930_v35 = vld [vmem:[#allocation4 + $0x8] sm:$0xff]  ;;  %v3935_v34 = vld [vmem:[#allocation4 + $0x30] sm:$0xff] }
 0x23b   : > { %3907 = vst.msk [vmem:[#allocation4 + $0x90] sm:$0xff] %vm863_vm6, %v3875_v5  ;;  %v3876_v39 = vadd.f32 %v9631_v19, %v3672_v32  ;;  %v3797_v26 = vpop.f32.mrb[115].mxu1  ;;  %3621 = vst.msk [vmem:[#allocation4 + $0xc0] sm:$0xff] %vm863_vm6, %v3589_v29  ;;  %v3590_v11 = vadd.f32 %v3537_v0, %v3384_v44  ;;  %v3676_v25 = vld [vmem:[#allocation4 + $0xb8] sm:$0xff]  ;;  %v11975_v19 = vld [vmem:[%s13889_s2] ss:$0 sm:$0xff] }
 0x23c   : > { %3905 = vst.msk [vmem:[#allocation4 + $0x80] sm:$0xff] %vm863_vm6, %v3873_v51  ;;  %v3874_v24 = vadd.f32 %v3797_v26, %v3670_v30  ;;  %3624 = vst.msk [vmem:[#allocation4 + $0xd8] sm:$0xff] %vm863_vm6, %v3592_v4  ;;  %v3674_v38 = vld [vmem:[#allocation4 + $0xa8] sm:$0xff] }
 0x23d   : > { %3908 = vst.msk [vmem:[#allocation4 + $0x98] sm:$0xff] %vm863_vm6, %v3876_v39  ;;  %3622 = vst.msk [vmem:[#allocation4 + $0xc8] sm:$0xff] %vm863_vm6, %v3590_v11 }
 0x23e   : > { %3906 = vst.msk [vmem:[#allocation4 + $0x88] sm:$0xff] %vm863_vm6, %v3874_v24  ;;  %v3933_v24 = vld [vmem:[#allocation4 + $0x20] sm:$0xff] }
 0x23f   : > { %v9608_v28 = vpop.f32.mrb[124].mxu0 }
 0x240   : > { %v9634_v56 = vpop.f32.mrb[116].mxu1  ;;  %v3595_v7 = vadd.f32 %v9608_v28, %v3389_v21  ;;  %v3550_v47 = vpop.f32.mrb[125].mxu0  ;;  %v3936_v21 = vld [vmem:[#allocation4 + $0x38] sm:$0xff] }
 0x241   : > { %v3879_v55 = vadd.f32 %v9634_v56, %v3675_v8  ;;  %v3810_v13 = vpop.f32.mrb[117].mxu1  ;;  %v3593_v60 = vadd.f32 %v3550_v47, %v3387_v49  ;;  %v9609_v10 = vpop.f32.mrb[126].mxu0  ;;  %v3679_v37 = vld [vmem:[#allocation4 + $0xd0] sm:$0xff] }
 0x242   : > { %v3877_v1 = vadd.f32 %v3810_v13, %v3673_v45  ;;  %v9635_v20 = vpop.f32.mrb[118].mxu1  ;;  %3627 = vst.msk [vmem:[#allocation4 + $0xf0] sm:$0xff] %vm863_vm6, %v3595_v7  ;;  %v3596_v16 = vadd.f32 %v9609_v10, %v3390_v6  ;;  %v3553_v43 = vpop.f32.mrb[127].mxu0  ;;  %v3677_v63 = vld [vmem:[#allocation4 + $0xc0] sm:$0xff]  ;;  %v11981_v13 = vld [vmem:[%s13890_s3] ss:$0 sm:$0xff] }
 0x243   : > { %3911 = vst.msk [vmem:[#allocation4 + $0xb0] sm:$0xff] %vm863_vm6, %v3879_v55  ;;  %v3880_v36 = vadd.f32 %v9635_v20, %v3676_v25  ;;  %v3813_v15 = vpop.f32.mrb[119].mxu1  ;;  %3625 = vst.msk [vmem:[#allocation4 + $0xe0] sm:$0xff] %vm863_vm6, %v3593_v60  ;;  %v3594_v53 = vadd.f32 %v3553_v43, %v3388_v42  ;;  %v3680_v22 = vld [vmem:[#allocation4 + $0xd8] sm:$0xff] }
 0x244   : > { %3909 = vst.msk [vmem:[#allocation4 + $0xa0] sm:$0xff] %vm863_vm6, %v3877_v1  ;;  %v3878_v23 = vadd.f32 %v3813_v15, %v3674_v38  ;;  %3628 = vst.msk [vmem:[#allocation4 + $0xf8] sm:$0xff] %vm863_vm6, %v3596_v16  ;;  %v3678_v2 = vld [vmem:[#allocation4 + $0xc8] sm:$0xff] }
 0x245   : > { %3912 = vst.msk [vmem:[#allocation4 + $0xb8] sm:$0xff] %vm863_vm6, %v3880_v36  ;;  %3626 = vst.msk [vmem:[#allocation4 + $0xe8] sm:$0xff] %vm863_vm6, %v3594_v53  ;;  %v3934_v1 = vld [vmem:[#allocation4 + $0x28] sm:$0xff] }
 0x246   : > { %3910 = vst.msk [vmem:[#allocation4 + $0xa8] sm:$0xff] %vm863_vm6, %v3878_v23 }
 0x247   : > { %v9648_v17 = vpop.f32.mrb[128].mxu0 }
 0x248   : > { %v9638_v9 = vpop.f32.mrb[120].mxu1  ;;  %v4135_v14 = vadd.f32 %v9648_v17, %v3931_v3  ;;  %v4006_v46 = vpop.f32.mrb[129].mxu0  ;;  %v3937_v17 = vld [vmem:[#allocation4 + $0x40] sm:$0xff] }
 0x249   : > { %v3883_v41 = vadd.f32 %v9638_v9, %v3679_v37  ;;  %v3826_v50 = vpop.f32.mrb[121].mxu1  ;;  %v4133_v27 = vadd.f32 %v4006_v46, %v3929_v62  ;;  %v9649_v32 = vpop.f32.mrb[130].mxu0  ;;  %v3683_v40 = vld [vmem:[#allocation4 + $0xf0] sm:$0xff] }
 0x24a   : > { %v3881_v59 = vadd.f32 %v3826_v50, %v3677_v63  ;;  %v9639_v12 = vpop.f32.mrb[122].mxu1  ;;  %4167 = vst.msk [vmem:[#allocation4 + $0x10] sm:$0xff] %vm863_vm6, %v4135_v14  ;;  %v4136_v5 = vadd.f32 %v9649_v32, %v3932_v61  ;;  %v4009_v30 = vpop.f32.mrb[131].mxu0  ;;  %v3681_v51 = vld [vmem:[#allocation4 + $0xe0] sm:$0xff]  ;;  %v3939_v9 = vld [vmem:[#allocation4 + $0x50] sm:$0xff] }
 0x24b   : > { %3915 = vst.msk [vmem:[#allocation4 + $0xd0] sm:$0xff] %vm863_vm6, %v3883_v41  ;;  %v3884_v48 = vadd.f32 %v9639_v12, %v3680_v22  ;;  %v3829_v57 = vpop.f32.mrb[123].mxu1  ;;  %4165 = vst.msk [vmem:[#allocation4] sm:$0xff] %vm863_vm6, %v4133_v27  ;;  %v4134_v31 = vadd.f32 %v4009_v30, %v3930_v35  ;;  %v3684_v58 = vld [vmem:[#allocation4 + $0xf8] sm:$0xff] }
 0x24c   : > { %3913 = vst.msk [vmem:[#allocation4 + $0xc0] sm:$0xff] %vm863_vm6, %v3881_v59  ;;  %v3882_v54 = vadd.f32 %v3829_v57, %v3678_v2  ;;  %4168 = vst.msk [vmem:[#allocation4 + $0x18] sm:$0xff] %vm863_vm6, %v4136_v5  ;;  %v3682_v44 = vld [vmem:[#allocation4 + $0xe8] sm:$0xff] }
 0x24d   : > { %3916 = vst.msk [vmem:[#allocation4 + $0xd8] sm:$0xff] %vm863_vm6, %v3884_v48  ;;  %4166 = vst.msk [vmem:[#allocation4 + $0x8] sm:$0xff] %vm863_vm6, %v4134_v31  ;;  %v3950_v33 = vld [vmem:[#allocation4 + $0xa8] sm:$0xff] }
 0x24e   : > { %3914 = vst.msk [vmem:[#allocation4 + $0xc8] sm:$0xff] %vm863_vm6, %v3882_v54 }
 0x24f   : > { %v9652_v39 = vpop.f32.mrb[132].mxu0 }
 0x250   : > { %v9642_v29 = vpop.f32.mrb[124].mxu1  ;;  %v4139_v0 = vadd.f32 %v9652_v39, %v3935_v34  ;;  %v4022_v11 = vpop.f32.mrb[133].mxu0  ;;  %v4814_v34 = vld [vmem:[#allocation3 + $0xc] sm:$0xf] }
 0x251   : > { %v3887_v26 = vadd.f32 %v9642_v29, %v3683_v40  ;;  %v3842_v4 = vpop.f32.mrb[125].mxu1  ;;  %v4199_v8 = vld [vmem:[#allocation4 + $0x10] sm:$0xff]  ;;  %v4137_v25 = vadd.f32 %v4022_v11, %v3933_v24  ;;  %v9653_v28 = vpop.f32.mrb[134].mxu0 }
 0x252   : > { %v3885_v45 = vadd.f32 %v3842_v4, %v3681_v51  ;;  %v9643_v56 = vpop.f32.mrb[126].mxu1  ;;  %v4238_v55 = vmul.f32 %v11975_v19, %v4199_v8  ;;  %v4197_v38 = vld [vmem:[#allocation4] sm:$0xff]  ;;  %4171 = vst.msk [vmem:[#allocation4 + $0x30] sm:$0xff] %vm863_vm6, %v4139_v0  ;;  %v4140_v47 = vadd.f32 %v9653_v28, %v3936_v21  ;;  %v4025_v20 = vpop.f32.mrb[135].mxu0 }
 0x253   : > { %3919 = vst.msk [vmem:[#allocation4 + $0xf0] sm:$0xff] %vm863_vm6, %v3887_v26  ;;  %v3888_v7 = vadd.f32 %v9643_v56, %v3684_v58  ;;  %v3845_v49 = vpop.f32.mrb[127].mxu1  ;;  %v4236_v60 = vmul.f32 %v11975_v19, %v4197_v38  ;;  %v4200_v6 = vld [vmem:[#allocation4 + $0x18] sm:$0xff]  ;;  %4169 = vst.msk [vmem:[#allocation4 + $0x20] sm:$0xff] %vm863_vm6, %v4137_v25  ;;  %v4138_v36 = vadd.f32 %v4025_v20, %v3934_v1 }
 0x254   : > { %3917 = vst.msk [vmem:[#allocation4 + $0xe0] sm:$0xff] %vm863_vm6, %v3885_v45  ;;  %v3886_v10 = vadd.f32 %v3845_v49, %v3682_v44  ;;  %v4239_v15 = vmul.f32 %v11975_v19, %v4200_v6  ;;  %v4198_v16 = vld [vmem:[#allocation4 + $0x8] sm:$0xff]  ;;  %4172 = vst.msk [vmem:[#allocation4 + $0x38] sm:$0xff] %vm863_vm6, %v4140_v47  ;;  %v4277_v23 = vadd.f32 %v11981_v13, %v4238_v55  ;;  %v4820_v56 = vld [vmem:[#allocation3 + $0x14] sm:$0x1] }
 0x255   : > { %3920 = vst.msk [vmem:[#allocation4 + $0xf8] sm:$0xff] %vm863_vm6, %v3888_v7  ;;  %v4275_v42 = vadd.f32 %v11981_v13, %v4236_v60  ;;  %v4237_v43 = vmul.f32 %v11975_v19, %v4198_v16  ;;  %4170 = vst.msk [vmem:[#allocation4 + $0x28] sm:$0xff] %vm863_vm6, %v4138_v36 }
 0x256   : > { %3918 = vst.msk [vmem:[#allocation4 + $0xe8] sm:$0xff] %vm863_vm6, %v3886_v10  ;;  %v4278_v53 = vadd.f32 %v11981_v13, %v4239_v15  ;;  %v4309_v59 = vmax.f32 %v4277_v23, 0.0 }
 0x257   : > { %v4307_v37 = vmax.f32 %v4275_v42, 0.0  ;;  %v4276_v63 = vadd.f32 %v11981_v13, %v4237_v43  ;;  %v9656_v22 = vpop.f32.mrb[136].mxu0 }
 0x258   : > { %v4143_v3 = vadd.f32 %v9656_v22, %v3939_v9  ;;  %v4038_v41 = vpop.f32.mrb[137].mxu0  ;;  %v4310_v12 = vmax.f32 %v4278_v53, 0.0  ;;  %v12010_v58 = vpack.c.bf16 %v4309_v59, %v4309_v59  ;;  %v12037_v53 = vsel %vm5175_vm0, %v11899_v52, 0 }
 0x259   : > { %v9034_v50 = vpack.c.bf16 %v4307_v37, %v4307_v37  ;;  %v4308_v2 = vmax.f32 %v4276_v63, 0.0  ;;  %v4203_v14 = vld [vmem:[#allocation4 + $0x30] sm:$0xff]  ;;  %v4141_v62 = vadd.f32 %v4038_v41, %v3937_v17  ;;  %v9657_v46 = vpop.f32.mrb[138].mxu0  ;;  %v3938_v17 = vld [vmem:[#allocation4 + $0x48] sm:$0xff] }
 0x25a   : > { %v4242_v27 = vmul.f32 %v11975_v19, %v4203_v14  ;;  %v4201_v61 = vld [vmem:[#allocation4 + $0x20] sm:$0xff]  ;;  %4175 = vst.msk [vmem:[#allocation4 + $0x50] sm:$0xff] %vm863_vm6, %v4143_v3  ;;  %v4041_v32 = vpop.f32.mrb[139].mxu0  ;;  %v12012_v39 = vpack.c.bf16 %v4310_v12, %v4310_v12  ;;  %v4509_v20 = vshrl.u32 %v12010_v58, 16  ;;  %v3940_v3 = vld [vmem:[#allocation4 + $0x58] sm:$0xff]  ;;  %v4512_v41 = vshll.u32 %v12010_v58, 16 }
 0x25b   : > { %v4492_v48 = vshrl.u32 %v9034_v50, 16  ;;  %v9035_v57 = vpack.c.bf16 %v4308_v2, %v4308_v2  ;;  %v4240_v5 = vmul.f32 %v11975_v19, %v4201_v61  ;;  %4173 = vst.msk [vmem:[#allocation4 + $0x40] sm:$0xff] %vm863_vm6, %v4141_v62  ;;  %v4495_v54 = vshll.u32 %v9034_v50, 16  ;;  %v4204_v51 = vld [vmem:[#allocation4 + $0x38] sm:$0xff] }
 0x25c   : > { %v4281_v35 = vadd.f32 %v11981_v13, %v4242_v27  ;;  %v4202_v11 = vld [vmem:[#allocation4 + $0x28] sm:$0xff]  ;;  %v4243_v21 = vmul.f32 %v11975_v19, %v4204_v51  ;;  %v4517_v60 = vshrl.u32 %v12012_v39, 16  ;;  %v4144_v2 = vadd.f32 %v9657_v46, %v3940_v3  ;;  %v3943_v46 = vld [vmem:[#allocation4 + $0x70] sm:$0xff] }
 0x25d   : > { %v4494_v30 = vrot.slane %v4492_v48, 7  ;;  %v4500_v31 = vshrl.u32 %v9035_v57, 16  ;;  %v4279_v40 = vadd.f32 %v11981_v13, %v4240_v5  ;;  %v4503_v0 = vshll.u32 %v9035_v57, 16 }
 0x25e   : > { %v4313_v26 = vmax.f32 %v4281_v35, 0.0  ;;  %v4282_v6 = vadd.f32 %v11981_v13, %v4243_v21  ;;  %v4241_v10 = vmul.f32 %v11975_v19, %v4202_v11  ;;  %v4142_v14 = vadd.f32 %v4041_v32, %v3938_v17  ;;  %4176 = vst.msk [vmem:[#allocation4 + $0x58] sm:$0xff] %vm863_vm6, %v4144_v2  ;;  %v3945_v21 = vld [vmem:[#allocation4 + $0x80] sm:$0xff] }
 0x25f   : > { %v4497_v4 = vor.u32 %v4495_v54, %v4494_v30  ;;  %v4502_v44 = vrot.slane %v4500_v31, 7  ;;  %v4311_v24 = vmax.f32 %v4279_v40, 0.0  ;;  %v9660_v8 = vpop.f32.mrb[140].mxu0  ;;  %v4498_v55 = vrot.slane %v4494_v30, 4  ;;  %v3941_v31 = vld [vmem:[#allocation4 + $0x60] sm:$0xff]  ;;  %v3944_v40 = vld [vmem:[#allocation4 + $0x78] sm:$0xff] }
 0x260   : > { %v12020_v25 = vpack.c.bf16 %v4313_v26, %v4313_v26  ;;  %v4054_v28 = vpop.f32.mrb[141].mxu0  ;;  %v4314_v63 = vmax.f32 %v4282_v6, 0.0  ;;  %v4280_v9 = vadd.f32 %v11981_v13, %v4241_v10  ;;  %v12045_v52 = vrot.slane %v4509_v20, 7  ;;  %4174 = vst.msk [vmem:[#allocation4 + $0x48] sm:$0xff] %vm863_vm6, %v4142_v14 }
 0x261   : > { %v4815_v38 = vsel %vm12006_vm4, %v4497_v4, %v4814_v34  ;;  %v4505_v7 = vor.u32 %v4503_v0, %v4502_v44  ;;  %v4507_v49 = vrot.slane %v4502_v44, 4  ;;  %v4207_v47 = vld [vmem:[#allocation4 + $0x50] sm:$0xff]  ;;  %v9661_v1 = vpop.f32.mrb[142].mxu0  ;;  %v12033_v23 = vpack.c.bf16 %v4311_v24, %v4311_v24  ;;  %v3942_v4 = vld [vmem:[#allocation4 + $0x68] sm:$0xff] }
 0x262   : > { %4816 = vst [vmem:[#allocation3 + $0xc] sm:$0xf] %v4815_v38  ;;  %v4205_v36 = vld [vmem:[#allocation4 + $0x40] sm:$0xff]  ;;  %v4057_v15 = vpop.f32.mrb[143].mxu0  ;;  %v4543_v37 = vshrl.u32 %v12020_v25, 16  ;;  %v4246_v22 = vmul.f32 %v11975_v19, %v4207_v47  ;;  %v12047_v62 = vrot.slane %v4517_v60, 7  ;;  %v12049_v59 = vpack.c.bf16 %v4314_v63, %v4314_v63 }
 0x263   : > { %v4506_v42 = vsel %vm10378_vm11, %v4498_v55, %v4505_v7  ;;  %v4821_v43 = vsel %vm12016_vm8, %v4507_v49, %v4820_v56  ;;  %v4244_v50 = vmul.f32 %v11975_v19, %v4205_v36  ;;  %v4312_v12 = vmax.f32 %v4280_v9, 0.0  ;;  %v3947_v56 = vld [vmem:[#allocation4 + $0x90] sm:$0xff]  ;;  %v3948_v47 = vld [vmem:[#allocation4 + $0x98] sm:$0xff] }
 0x264   : > { %4817 = vst.msk [vmem:[#allocation3 + $0x10] sm:$0xf] %vm4339_vm2, %v4506_v42  ;;  %4822 = vst [vmem:[#allocation3 + $0x14] sm:$0x1] %v4821_v43  ;;  %v4520_v27 = vshll.u32 %v12012_v39, 16  ;;  %v4526_v61 = vshrl.u32 %v12033_v23, 16  ;;  %v4285_v48 = vadd.f32 %v11981_v13, %v4246_v22  ;;  %v4147_v54 = vadd.f32 %v9660_v8, %v3943_v46 }
 0x265   : > { %v4283_v57 = vadd.f32 %v11981_v13, %v4244_v50  ;;  %v12057_v5 = vrot.slane %v4543_v37, 7  ;;  %v4551_v35 = vshrl.u32 %v12049_v59, 16  ;;  %v12060_v30 = vpack.c.bf16 %v4312_v12, %v4312_v12  ;;  %v3946_v43 = vld [vmem:[#allocation4 + $0x88] sm:$0xff]  ;;  %v8918_v37 = vld [vmem:[%s13891_s4 + $0xc] sm:$0xf]  ;;  %v3951_v12 = vld [vmem:[#allocation4 + $0xb0] sm:$0xff] }
 0x266   : > { %v4317_v58 = vmax.f32 %v4285_v48, 0.0  ;;  %v4145_v39 = vadd.f32 %v4054_v28, %v3941_v31  ;;  %v4148_v26 = vadd.f32 %v9661_v1, %v3944_v40  ;;  %v12063_v0 = vor.u32 %v4512_v41, %v12045_v52  ;;  %4179 = vst.msk [vmem:[#allocation4 + $0x70] sm:$0xff] %vm863_vm6, %v4147_v54  ;;  %v4208_v22 = vld [vmem:[#allocation4 + $0x58] sm:$0xff]  ;;  %9996 = vmatprep.subr.msk.bf16.mxu0 %vm5175_vm0, %v8918_v37 }
 0x267   : > { %v9664_v32 = vpop.f32.mrb[144].mxu0  ;;  %v4315_v34 = vmax.f32 %v4283_v57, 0.0  ;;  %v4515_v24 = vrot.slane %v12045_v52, 4  ;;  %v12067_v11 = vor.u32 %v4520_v27, %v12047_v62  ;;  %v4146_v8 = vadd.f32 %v4057_v15, %v3942_v4  ;;  %v4206_v3 = vld [vmem:[#allocation4 + $0x48] sm:$0xff] }
 0x268   : > { %v4070_v51 = vpop.f32.mrb[145].mxu0  ;;  %v4546_v38 = vshll.u32 %v12020_v25, 16  ;;  %v12071_v28 = vrot.slane %v4526_v61, 7  ;;  %4177 = vst.msk [vmem:[#allocation4 + $0x60] sm:$0xff] %vm863_vm6, %v4145_v39  ;;  %4180 = vst.msk [vmem:[#allocation4 + $0x78] sm:$0xff] %vm863_vm6, %v4148_v26  ;;  %v4151_v7 = vadd.f32 %v9664_v32, %v3947_v56  ;;  %v4529_v60 = vshll.u32 %v12033_v23, 16 }
 0x269   : > { %v9665_v44 = vpop.f32.mrb[146].mxu0  ;;  %v4149_v49 = vadd.f32 %v4070_v51, %v3945_v21  ;;  %v12079_v6 = vrot.slane %v4551_v35, 7  ;;  %4178 = vst.msk [vmem:[#allocation4 + $0x68] sm:$0xff] %vm863_vm6, %v4146_v8  ;;  %v4534_v36 = vshrl.u32 %v12060_v30, 16  ;;  %v12086_v15 = vpack.c.bf16 %v4317_v58, %v4317_v58  ;;  %v12092_v23 = vld [vmem:[#allocation3 + $0xc] sm:$0xf] }
 0x26a   : > { %v4073_v55 = vpop.f32.mrb[147].mxu0  ;;  %v4152_v25 = vadd.f32 %v9665_v44, %v3948_v47  ;;  %v12083_v10 = vor.u32 %v4546_v38, %v12057_v5  ;;  %v12088_v42 = vpack.c.bf16 %v4315_v34, %v4315_v34  ;;  %4183 = vst.msk [vmem:[#allocation4 + $0x90] sm:$0xff] %vm863_vm6, %v4151_v7  ;;  %v4554_v9 = vshll.u32 %v12049_v59, 16  ;;  %v4823_v32 = vld [vmem:[#allocation3 + $0x18] sm:$0xf] }
 0x26b   : > { %v12075_v1 = vld [vmem:[#allocation3 + $0x10] sm:$0xf]  ;;  %4181 = vst.msk [vmem:[#allocation4 + $0x80] sm:$0xff] %vm863_vm6, %v4149_v49  ;;  %v4150_v17 = vadd.f32 %v4073_v55, %v3946_v43  ;;  %v12106_v50 = vor.u32 %v4529_v60, %v12071_v28  ;;  %v4247_v14 = vmul.f32 %v11975_v19, %v4208_v22  ;;  %v4245_v59 = vmul.f32 %v11975_v19, %v4206_v3  ;;  %v3949_v56 = vld [vmem:[#allocation4 + $0xa0] sm:$0xff] }
 0x26c   : > { %4184 = vst.msk [vmem:[#allocation4 + $0x98] sm:$0xff] %vm863_vm6, %v4152_v25  ;;  %v12102_v41 = vcombine.low %v12092_v23, %v12075_v1  ;;  %v12112_v61 = vor.u32 %v4554_v9, %v12079_v6  ;;  %v4537_v57 = vshll.u32 %v12060_v30, 16  ;;  %v12119_v54 = vrot.slane %v4534_v36, 7 }
 0x26d   : > { %4182 = vst.msk [vmem:[#allocation4 + $0x88] sm:$0xff] %vm863_vm6, %v4150_v17  ;;  %v4577_v31 = vshrl.u32 %v12086_v15, 16  ;;  %v4580_v40 = vshll.u32 %v12086_v15, 16  ;;  %v4560_v51 = vshrl.u32 %v12088_v42, 16  ;;  %v4211_v58 = vld [vmem:[#allocation4 + $0x70] sm:$0xff]  ;;  %v4286_v34 = vadd.f32 %v11981_v13, %v4247_v14 }
 0x26e   : > { %14129 = vst [vmem:[#allocation38_spill] sm:$0xff] %v12102_v41  ;;  %9681 = vmatmul.mubr.msk.bf16.vlgmr.msra.gmra.mrb[128].mxu1 %vm863_vm6, %v12102_v41  ;;  %v4284_v39 = vadd.f32 %v11981_v13, %v4245_v59  ;;  %v4250_v26 = vmul.f32 %v11975_v19, %v4211_v58  ;;  %v4523_v8 = vsel %vm10378_vm11, %v4515_v24, %v12067_v11  ;;  %v8936_v17 = vld [vmem:[%s13891_s4 + $0x10] sm:$0xf]  ;;  %v4563_v58 = vshll.u32 %v12088_v42, 16  ;;  %v3952_v41 = vld [vmem:[#allocation4 + $0xb8] sm:$0xff] }
 0x26f   : > { %v9668_v27 = vpop.f32.mrb[148].mxu0  ;;  %9747 = vmatpush3.bf16.msra.mxu1 %v12037_v53  ;;  %v4209_v4 = vld [vmem:[#allocation4 + $0x60] sm:$0xff]  ;;  %v4212_v44 = vld [vmem:[#allocation4 + $0x78] sm:$0xff]  ;;  %v4824_v7 = vsel %vm12006_vm4, %v12063_v0, %v4823_v32  ;;  %4826 = vst.msk [vmem:[#allocation3 + $0x1c] sm:$0xf] %vm4339_vm2, %v4523_v8  ;;  %v4318_v47 = vmax.f32 %v4286_v34, 0.0  ;;  %v12161_v32 = vor.u32 %v4537_v57, %v12119_v54 }
 0x270   : > { %v4155_v46 = vadd.f32 %v9668_v27, %v3951_v12  ;;  %v4086_v35 = vpop.f32.mrb[149].mxu0  ;;  %v4248_v21 = vmul.f32 %v11975_v19, %v4209_v4  ;;  %v4251_v55 = vmul.f32 %v11975_v19, %v4212_v44  ;;  %v4210_v38 = vld [vmem:[#allocation4 + $0x68] sm:$0xff]  ;;  %v4316_v52 = vmax.f32 %v4284_v39, 0.0  ;;  %4825 = vst [vmem:[#allocation3 + $0x18] sm:$0xf] %v4824_v7  ;;  %9997 = vmatprep.subr.msk.bf16.mxu1 %vm5175_vm0, %v8936_v17 }
 0x271   : > { %v12125_v30 = vpop.f32.mrb[150].mxu0  ;;  %v4153_v49 = vadd.f32 %v4086_v35, %v3949_v56  ;;  %v4289_v60 = vadd.f32 %v11981_v13, %v4250_v26  ;;  %v4249_v24 = vmul.f32 %v11975_v19, %v4210_v38  ;;  %v4215_v11 = vld [vmem:[#allocation4 + $0x90] sm:$0xff]  ;;  %v9045_v37 = vpack.c.bf16 %v4318_v47, %v4318_v47 }
 0x272   : > { %4187 = vst.msk [vmem:[#allocation4 + $0xb0] sm:$0xff] %vm863_vm6, %v4155_v46  ;;  %v12136_v53 = vpop.f32.mrb[151].mxu0  ;;  %v4213_v25 = vld [vmem:[#allocation4 + $0x80] sm:$0xff]  ;;  %v4287_v36 = vadd.f32 %v11981_v13, %v4248_v21  ;;  %v4290_v15 = vadd.f32 %v11981_v13, %v4251_v55  ;;  %v4254_v43 = vmul.f32 %v11975_v19, %v4215_v11  ;;  %v9043_v9 = vpack.c.bf16 %v4316_v52, %v4316_v52 }
 0x273   : > { %v4252_v0 = vmul.f32 %v11975_v19, %v4213_v25  ;;  %4185 = vst.msk [vmem:[#allocation4 + $0xa0] sm:$0xff] %vm863_vm6, %v4153_v49  ;;  %v4321_v22 = vmax.f32 %v4289_v60, 0.0  ;;  %v4288_v3 = vadd.f32 %v11981_v13, %v4249_v24  ;;  %v12163_v35 = vrot.slane %v4577_v31, 7  ;;  %v4216_v31 = vld [vmem:[#allocation4 + $0x98] sm:$0xff] }
 0x274   : > { %v4319_v14 = vmax.f32 %v4287_v36, 0.0  ;;  %v4322_v59 = vmax.f32 %v4290_v15, 0.0  ;;  %v4293_v12 = vadd.f32 %v11981_v13, %v4254_v43  ;;  %v4585_v34 = vshrl.u32 %v9045_v37, 16 }
 0x275   : > { %v4291_v27 = vadd.f32 %v11981_v13, %v4252_v0  ;;  %v12168_v26 = vrot.slane %v4560_v51, 7  ;;  %v4568_v4 = vshrl.u32 %v9043_v9, 16  ;;  %v9048_v44 = vpack.c.bf16 %v4321_v22, %v4321_v22 }
 0x276   : > { %v9046_v8 = vpack.c.bf16 %v4319_v14, %v4319_v14  ;;  %v9049_v55 = vpack.c.bf16 %v4322_v59, %v4322_v59  ;;  %v4320_v38 = vmax.f32 %v4288_v3, 0.0  ;;  %v4325_v57 = vmax.f32 %v4293_v12, 0.0  ;;  %v12225_v20 = vld [vmem:[#allocation3 + $0x1c] sm:$0xf] }
 0x277   : > { %v12157_v46 = vpop.f32.mrb[152].mxu0  ;;  %v4323_v7 = vmax.f32 %v4291_v27, 0.0  ;;  %v12177_v51 = vor.u32 %v4580_v40, %v12163_v35  ;;  %v12179_v52 = vrot.slane %v4585_v34, 7  ;;  %v4611_v60 = vshrl.u32 %v9048_v44, 16 }
 0x278   : > { %v12166_v39 = vpop.f32.mrb[153].mxu0  ;;  %v4594_v24 = vshrl.u32 %v9046_v8, 16  ;;  %v12185_v36 = vor.u32 %v4563_v58, %v12168_v26  ;;  %v4588_v15 = vshll.u32 %v9045_v37, 16  ;;  %v12187_v43 = vrot.slane %v4568_v4, 7 }
 0x279   : > { %v12170_v56 = vpop.f32.mrb[154].mxu0  ;;  %14130 = vst [vmem:[#allocation28_spill] sm:$0xff] %v12179_v52  ;;  %v4619_v0 = vshrl.u32 %v9049_v55, 16  ;;  %v12189_v22 = vpack.c.bf16 %v4320_v38, %v4320_v38  ;;  %v12191_v3 = vpack.c.bf16 %v4325_v57, %v4325_v57  ;;  %v4255_v40 = vmul.f32 %v11975_v19, %v4216_v31  ;;  %v4214_v38 = vld [vmem:[#allocation4 + $0x88] sm:$0xff]  ;;  %v4219_v57 = vld [vmem:[#allocation4 + $0xb0] sm:$0xff] }
 0x27a   : > { %v12181_v11 = vpop.f32.mrb[155].mxu0  ;;  %14131 = vst [vmem:[#allocation30_spill] sm:$0xff] %v12187_v43  ;;  %v4571_v14 = vshll.u32 %v9043_v9, 16  ;;  %v4614_v59 = vshll.u32 %v9048_v44, 16  ;;  %v12195_v12 = vpack.c.bf16 %v4323_v7, %v4323_v7  ;;  %v12200_v58 = vor.u32 %v4588_v15, %v12179_v52  ;;  %v4217_v63 = vld [vmem:[#allocation4 + $0xa0] sm:$0xff] }
 0x27b   : > { %v12202_v37 = vrot.slane %v4611_v60, 7  ;;  %v12204_v34 = vrot.slane %v4594_v24, 7  ;;  %v4597_v4 = vshll.u32 %v9046_v8, 16  ;;  %v4294_v7 = vadd.f32 %v11981_v13, %v4255_v40 }
 0x27c   : > { %v12210_v9 = vor.u32 %v4571_v14, %v12187_v43  ;;  %v12216_v60 = vrot.slane %v4619_v0, 7  ;;  %v4622_v24 = vshll.u32 %v9049_v55, 16  ;;  %v4602_v8 = vshrl.u32 %v12189_v22, 16 }
 0x27d   : > { %v4645_v21 = vshrl.u32 %v12191_v3, 16  ;;  %v4628_v31 = vshrl.u32 %v12195_v12, 16  ;;  %v4326_v17 = vmax.f32 %v4294_v7, 0.0  ;;  %v4253_v14 = vmul.f32 %v11975_v19, %v4214_v38 }
 0x27e   : > { %14132 = vst [vmem:[#allocation35_spill] sm:$0xff] %v12216_v60  ;;  %v4258_v44 = vmul.f32 %v11975_v19, %v4219_v57  ;;  %v12228_v40 = vor.u32 %v4614_v59, %v12202_v37  ;;  %v12232_v0 = vor.u32 %v4597_v4, %v12204_v34  ;;  %v4605_v42 = vshll.u32 %v12189_v22, 16  ;;  %v12240_v57 = vld [vmem:[#allocation3 + $0x18] sm:$0xf]  ;;  %v4830_v22 = vld [vmem:[#allocation3 + $0x24] sm:$0xf] }
 0x27f   : > { %v12197_v27 = vpop.f32.mrb[156].mxu0  ;;  %v4648_v7 = vshll.u32 %v12191_v3, 16  ;;  %v12237_v49 = vpack.c.bf16 %v4326_v17, %v4326_v17  ;;  %v4292_v38 = vadd.f32 %v11981_v13, %v4253_v14  ;;  %v12243_v59 = vor.u32 %v4622_v24, %v12216_v60 }
 0x280   : > { %v12206_v48 = vpop.f32.mrb[157].mxu0  ;;  %v4631_v55 = vshll.u32 %v12195_v12, 16  ;;  %v4297_v4 = vadd.f32 %v11981_v13, %v4258_v44  ;;  %v12249_v47 = vcombine.low %v12240_v57, %v12225_v20  ;;  %v12251_v3 = vrot.slane %v4602_v8, 7 }
 0x281   : > { %v12214_v15 = vpop.f32.mrb[158].mxu0  ;;  %v12253_v17 = vrot.slane %v4645_v21, 7  ;;  %v12255_v14 = vrot.slane %v4628_v31, 7  ;;  %v4324_v2 = vmax.f32 %v4292_v38, 0.0  ;;  %v4256_v12 = vmul.f32 %v11975_v19, %v4217_v63 }
 0x282   : > { %v12220_v25 = vpop.f32.mrb[159].mxu0  ;;  %14133 = vst [vmem:[#allocation37_spill] sm:$0xff] %v12249_v47  ;;  %v4329_v24 = vmax.f32 %v4297_v4, 0.0  ;;  %9684 = vmatprep.mubr.msk.bf16.mxu1 %vm863_vm6, %v12249_v47  ;;  %v4156_v44 = vadd.f32 %v12125_v30, %v3952_v41  ;;  %v4154_v52 = vadd.f32 %v12136_v53, %v3950_v33  ;;  %v4653_v8 = vshrl.u32 %v12237_v49, 16  ;;  %v3955_v4 = vld [vmem:[#allocation4 + $0xd0] sm:$0xff] }
 0x283   : > { %v9051_v43 = vpack.c.bf16 %v4324_v2, %v4324_v2  ;;  %v14134_v21 = vrot.slane %v12071_v28, 4  ;;  %v4831_v38 = vsel %vm12006_vm4, %v12106_v50, %v4830_v22  ;;  %v4837_v47 = vld [vmem:[#allocation3 + $0x30] sm:$0xf]  ;;  %v4295_v41 = vadd.f32 %v11981_v13, %v4256_v12 }
 0x284   : > { %v12271_v63 = vpack.c.bf16 %v4329_v24, %v4329_v24  ;;  %4188 = vst.msk [vmem:[#allocation4 + $0xb8] sm:$0xff] %vm863_vm6, %v4156_v44  ;;  %4186 = vst.msk [vmem:[#allocation4 + $0xa8] sm:$0xff] %vm863_vm6, %v4154_v52  ;;  %v4159_v33 = vadd.f32 %v12157_v46, %v3955_v4  ;;  %v14135_v28 = vrot.slane %v12057_v5, 4  ;;  %v12285_v30 = vor.u32 %v4605_v42, %v12251_v3  ;;  %v4933_v4 = vld [vmem:[#allocation3 + $0x14] sm:$0x1] }
 0x285   : > { %v4540_v31 = vsel %vm10378_vm11, %v14134_v21, %v12161_v32  ;;  %4832 = vst [vmem:[#allocation3 + $0x24] sm:$0xf] %v4831_v38  ;;  %v4636_v32 = vshrl.u32 %v9051_v43, 16  ;;  %v12290_v52 = vor.u32 %v4648_v7, %v12253_v17  ;;  %v4327_v42 = vmax.f32 %v4295_v41, 0.0 }
 0x286   : > { %4833 = vst.msk [vmem:[#allocation3 + $0x28] sm:$0xf] %vm4339_vm2, %v4540_v31  ;;  %v4557_v50 = vsel %vm10378_vm11, %v14135_v28, %v12112_v61  ;;  %v4679_v5 = vshrl.u32 %v12271_v63, 16  ;;  %v4838_v61 = vsel %vm12006_vm4, %v12083_v10, %v4837_v47  ;;  %v14136_v22 = vshrl.u32 %v12092_v23, 16 }
 0x287   : > { %4840 = vst.msk [vmem:[#allocation3 + $0x34] sm:$0xf] %vm4339_vm2, %v4557_v50  ;;  %4839 = vst [vmem:[#allocation3 + $0x30] sm:$0xf] %v4838_v61  ;;  %v14137_v12 = vshll.u32 %v12092_v23, 16  ;;  %v5438_v7 = vshll.u32 %v12075_v1, 16  ;;  %v12304_v21 = vor.u32 %v4631_v55, %v12255_v14  ;;  %v12319_v2 = vpack.c.bf16 %v4327_v42, %v4327_v42 }
 0x288   : > { %4191 = vst.msk [vmem:[#allocation4 + $0xd0] sm:$0xff] %vm863_vm6, %v4159_v33  ;;  %v5431_v24 = vrot.slane %v14136_v22, 4  ;;  %v12307_v38 = vrot.slane %v4653_v8, 7  ;;  %v14139_v10 = vshrl.u32 %v12075_v1, 16  ;;  %v12311_v41 = vrot.slane %v4636_v32, 7 }
 0x289   : > { %v5434_v44 = vrot.slane %v14137_v12, 5  ;;  %v5453_v33 = vshrl.u32 %v12240_v57, 16  ;;  %v5456_v23 = vshll.u32 %v12240_v57, 16  ;;  %v5440_v28 = vrot.slane %v5438_v7, 5  ;;  %v3953_v12 = vld [vmem:[#allocation4 + $0xc0] sm:$0xff] }
 0x28a   : > { %14138 = vst [vmem:[#allocation7_spill] sm:$0xff] %v12307_v38  ;;  %v5444_v47 = vrot.slane %v14139_v10, 4  ;;  %14140 = vst [vmem:[#allocation8_spill] sm:$0xff] %v12311_v41  ;;  %v4656_v50 = vshll.u32 %v12237_v49, 16  ;;  %v4639_v61 = vshll.u32 %v9051_v43, 16  ;;  %v5466_v55 = vshrl.u32 %v12225_v20, 16 }
 0x28b   : > { %v5435_v22 = vor.u32 %v5434_v44, %v5431_v24  ;;  %v12317_v8 = vrot.slane %v4679_v5, 7  ;;  %v4220_v1 = vld [vmem:[#allocation4 + $0xb8] sm:$0xff]  ;;  %v4218_v10 = vld [vmem:[#allocation4 + $0xa8] sm:$0xff]  ;;  %v5448_v32 = vshll.u32 %v4933_v4, 16  ;;  %v4157_v53 = vadd.f32 %v12166_v39, %v3953_v12 }
 0x28c   : > { %v12323_v46 = vor.u32 %v4656_v50, %v12307_v38  ;;  %v4259_v57 = vmul.f32 %v11975_v19, %v4220_v1  ;;  %v4257_v49 = vmul.f32 %v11975_v19, %v4218_v10  ;;  %v12327_v43 = vld [vmem:[#allocation3 + $0x24] sm:$0xf]  ;;  %v5445_v42 = vor.u32 %v5444_v47, %v5440_v28 }
 0x28d   : > { %v12329_v24 = vld [vmem:[#allocation3 + $0x28] sm:$0xf]  ;;  %v12335_v7 = vor.u32 %v4639_v61, %v12311_v41  ;;  %v4682_v39 = vshll.u32 %v12271_v63, 16  ;;  %4189 = vst.msk [vmem:[#allocation4 + $0xc0] sm:$0xff] %vm863_vm6, %v4157_v53  ;;  %v5436_v44 = vrot.slane %v5435_v22, 4  ;;  %v4662_v63 = vshrl.u32 %v12319_v2, 16 }
 0x28e   : > { %v12331_v5 = vld [vmem:[#allocation3 + $0x34] sm:$0xf]  ;;  %v12340_v4 = vcombine.low %v12327_v43, %v12329_v24  ;;  %v4298_v1 = vadd.f32 %v11981_v13, %v4259_v57  ;;  %v4296_v47 = vadd.f32 %v11981_v13, %v4257_v49  ;;  %v12346_v10 = vld [vmem:[#allocation3 + $0x30] sm:$0xf]  ;;  %v4827_v61 = vld [vmem:[#allocation3 + $0x20] sm:$0x1] }
 0x28f   : > { %v4223_v50 = vld [vmem:[#allocation4 + $0xd0] sm:$0xff]  ;;  %v12349_v31 = vor.u32 %v4682_v39, %v12317_v8  ;;  %v12357_v12 = vcombine.low %v12346_v10, %v12331_v5  ;;  %v5446_v38 = vrot.slane %v5445_v42, 4  ;;  %v5450_v41 = vrot.slane %v5448_v32, 5 }
 0x290   : > { %14141 = vst [vmem:[#allocation17_spill] sm:$0xff] %v12340_v4  ;;  %9685 = vmatmul.mubr.msk.bf16.gmra.mrb[132].mxu1 %vm863_vm6, %v12340_v4  ;;  %v4262_v53 = vmul.f32 %v11975_v19, %v4223_v50  ;;  %v4330_v57 = vmax.f32 %v4298_v1, 0.0  ;;  %v4328_v49 = vmax.f32 %v4296_v47, 0.0  ;;  %v14144_v39 = vrot.slane %v12047_v62, 4 }
 0x291   : > { %14142 = vst [vmem:[#allocation21_spill] sm:$0xff] %v12349_v31  ;;  %14143 = vst [vmem:[#allocation32_spill] sm:$0xff] %v12357_v12  ;;  %9688 = vmatprep.mubr.msk.bf16.mxu1 %vm863_vm6, %v12357_v12  ;;  %v5455_v31 = vrot.slane %v5453_v33, 4  ;;  %v5458_v50 = vrot.slane %v5456_v23, 5  ;;  %v5441_v1 = vsel %vm10419_vm13, %v5436_v44, %v5440_v28  ;;  %v5451_v32 = vsel %vm10419_vm13, %v5446_v38, %v5450_v41 }
 0x292   : > { %v4301_v22 = vadd.f32 %v11981_v13, %v4262_v53  ;;  %v4828_v4 = vsel %vm12016_vm8, %v14144_v39, %v4827_v61  ;;  %v5462_v42 = vshll.u32 %v12225_v20, 16  ;;  %v12372_v47 = vrot.slane %v4662_v63, 7  ;;  %v3956_v63 = vld [vmem:[#allocation4 + $0xd8] sm:$0xff] }
 0x293   : > { %4829 = vst [vmem:[#allocation3 + $0x20] sm:$0x1] %v4828_v4  ;;  %v12374_v53 = vpack.c.bf16 %v4330_v57, %v4330_v57  ;;  %v12376_v62 = vpack.c.bf16 %v4328_v49, %v4328_v49  ;;  %v12378_v61 = vcombine.low %v5441_v1, %v5451_v32  ;;  %v4665_v33 = vshll.u32 %v12319_v2, 16  ;;  %v3954_v57 = vld [vmem:[#allocation4 + $0xc8] sm:$0xff] }
 0x294   : > { %v5477_v23 = vshrl.u32 %v12327_v43, 16  ;;  %v5480_v28 = vshll.u32 %v12327_v43, 16  ;;  %v4333_v44 = vmax.f32 %v4301_v22, 0.0  ;;  %v4221_v39 = vld [vmem:[#allocation4 + $0xc0] sm:$0xff]  ;;  %v5459_v38 = vor.u32 %v5458_v50, %v5455_v31  ;;  %v4834_v50 = vld [vmem:[#allocation3 + $0x2c] sm:$0x1] }
 0x295   : > { %14145 = vst [vmem:[#allocation10_spill] sm:$0xff] %v12378_v61  ;;  %9715 = vmatmul.mubr.msk.bf16.vlgmr.msra.gmra.mrb[160].mxu0 %vm863_vm6, %v12378_v61  ;;  %v4260_v20 = vmul.f32 %v11975_v19, %v4221_v39  ;;  %v5464_v41 = vrot.slane %v5462_v42, 5  ;;  %v5468_v4 = vrot.slane %v5466_v55, 4  ;;  %v5490_v49 = vshrl.u32 %v12329_v24, 16  ;;  %v4844_v55 = vld [vmem:[#allocation3 + $0x3c] sm:$0xf] }
 0x296   : > { %v4160_v1 = vadd.f32 %v12170_v56, %v3956_v63  ;;  %v4158_v43 = vadd.f32 %v12181_v11, %v3954_v57  ;;  %v12391_v22 = vor.u32 %v4665_v33, %v12372_v47  ;;  %v4687_v32 = vshrl.u32 %v12374_v53, 16  ;;  %v4851_v11 = vld [vmem:[#allocation3 + $0x48] sm:$0xf] }
 0x297   : > { %v4670_v39 = vshrl.u32 %v12376_v62, 16  ;;  %v4299_v31 = vadd.f32 %v11981_v13, %v4260_v20  ;;  %v12397_v60 = vpack.c.bf16 %v4333_v44, %v4333_v44  ;;  %v5504_v56 = vshll.u32 %v12346_v10, 16  ;;  %v3959_v42 = vld [vmem:[#allocation4 + $0xf0] sm:$0xff] }
 0x298   : > { %4192 = vst.msk [vmem:[#allocation4 + $0xd8] sm:$0xff] %vm863_vm6, %v4160_v1  ;;  %4190 = vst.msk [vmem:[#allocation4 + $0xc8] sm:$0xff] %vm863_vm6, %v4158_v43  ;;  %v5460_v57 = vrot.slane %v5459_v38, 4  ;;  %v5469_v20 = vor.u32 %v5468_v4, %v5464_v41  ;;  %v14146_v61 = vrot.slane %v12168_v26, 4  ;;  %v4845_v1 = vsel %vm12006_vm4, %v12185_v36, %v4844_v55  ;;  %v4841_v36 = vld [vmem:[#allocation3 + $0x38] sm:$0x1] }
 0x299   : > { %v4331_v33 = vmax.f32 %v4299_v31, 0.0  ;;  %v4163_v43 = vadd.f32 %v12197_v27, %v3959_v42  ;;  %v14147_v38 = vrot.slane %v12163_v35, 4  ;;  %v12421_v4 = vrot.slane %v4687_v32, 7  ;;  %4846 = vst [vmem:[#allocation3 + $0x3c] sm:$0xf] %v4845_v1 }
 0x29a   : > { %v12403_v63 = vld [vmem:[#allocation3 + $0x20] sm:$0x1]  ;;  %v4574_v44 = vsel %vm10378_vm11, %v14146_v61, %v12210_v9  ;;  %v12423_v9 = vrot.slane %v4670_v39, 7  ;;  %v5470_v31 = vrot.slane %v5469_v20, 4  ;;  %v4713_v55 = vshrl.u32 %v12397_v60, 16  ;;  %v3957_v20 = vld [vmem:[#allocation4 + $0xe0] sm:$0xff] }
 0x29b   : > { %v5472_v2 = vshll.u32 %v12403_v63, 16  ;;  %4847 = vst.msk [vmem:[#allocation3 + $0x40] sm:$0xf] %vm4339_vm2, %v4574_v44  ;;  %v4591_v26 = vsel %vm10378_vm11, %v14147_v38, %v12200_v58  ;;  %v12425_v61 = vpack.c.bf16 %v4331_v33, %v4331_v33  ;;  %v4852_v35 = vsel %vm12006_vm4, %v12177_v51, %v4851_v11 }
 0x29c   : > { %4854 = vst.msk [vmem:[#allocation3 + $0x4c] sm:$0xf] %vm4339_vm2, %v4591_v26  ;;  %v14148_v58 = vrot.slane %v12119_v54, 4  ;;  %v5465_v42 = vsel %vm10419_vm13, %v5460_v57, %v5464_v41  ;;  %4853 = vst [vmem:[#allocation3 + $0x48] sm:$0xf] %v4852_v35  ;;  %v5479_v33 = vrot.slane %v5477_v23, 4  ;;  %v4161_v54 = vadd.f32 %v12206_v48, %v3957_v20 }
 0x29d   : > { %v5474_v27 = vrot.slane %v5472_v2, 5  ;;  %4195 = vst.msk [vmem:[#allocation4 + $0xf0] sm:$0xff] %vm863_vm6, %v4163_v43  ;;  %v4696_v39 = vshrl.u32 %v12425_v61, 16  ;;  %v5486_v2 = vshll.u32 %v12329_v24, 16  ;;  %v5482_v51 = vrot.slane %v5480_v28, 5 }
 0x29e   : > { %v4835_v32 = vsel %vm12016_vm8, %v14148_v58, %v4834_v50  ;;  %v14149_v11 = vrot.slane %v12079_v6, 4  ;;  %v4690_v1 = vshll.u32 %v12374_v53, 16  ;;  %v5492_v24 = vrot.slane %v5490_v49, 4  ;;  %4193 = vst.msk [vmem:[#allocation4 + $0xe0] sm:$0xff] %vm863_vm6, %v4161_v54 }
 0x29f   : > { %4836 = vst [vmem:[#allocation3 + $0x2c] sm:$0x1] %v4835_v32  ;;  %v5475_v44 = vsel %vm10419_vm13, %v5470_v31, %v5474_v27  ;;  %v4224_v57 = vld [vmem:[#allocation4 + $0xd8] sm:$0xff]  ;;  %v4222_v23 = vld [vmem:[#allocation4 + $0xc8] sm:$0xff]  ;;  %v12451_v43 = vrot.slane %v5486_v2, 5  ;;  %v4673_v38 = vshll.u32 %v12376_v62, 16  ;;  %v5483_v58 = vor.u32 %v5482_v51, %v5479_v33 }
 0x2a0   : > { %v4842_v50 = vsel %vm12016_vm8, %v14149_v11, %v4841_v36  ;;  %v12449_v41 = vcombine.low %v5465_v42, %v5475_v44  ;;  %v12454_v28 = vrot.slane %v4713_v55, 7  ;;  %v4263_v48 = vmul.f32 %v11975_v19, %v4224_v57  ;;  %v12473_v27 = vld [vmem:[#allocation3 + $0x3c] sm:$0xf] }
 0x2a1   : > { %4843 = vst [vmem:[#allocation3 + $0x38] sm:$0x1] %v4842_v50  ;;  %v4261_v6 = vmul.f32 %v11975_v19, %v4222_v23  ;;  %v12460_v53 = vor.u32 %v4690_v1, %v12421_v4  ;;  %v4716_v49 = vshll.u32 %v12397_v60, 16  ;;  %v12469_v36 = vrot.slane %v4696_v39, 7  ;;  %14151 = vst [vmem:[#allocation14_spill] sm:$0xff] %v12473_v27  ;;  %v3960_v50 = vld [vmem:[#allocation4 + $0xf8] sm:$0xff] }
 0x2a2   : > { %14150 = vst [vmem:[#allocation11_spill] sm:$0xff] %v12449_v41  ;;  %9718 = vmatprep.mubr.msk.bf16.mxu0 %vm863_vm6, %v12449_v41  ;;  %v12467_v62 = vld [vmem:[#allocation3 + $0x40] sm:$0xf]  ;;  %v4302_v19 = vadd.f32 %v11981_v13, %v4263_v48  ;;  %v5493_v42 = vor.u32 %v5492_v24, %v12451_v43  ;;  %v14153_v2 = vshrl.u32 %v12346_v10, 16  ;;  %v5506_v20 = vrot.slane %v5504_v56, 5 }
 0x2a3   : > { %v4300_v55 = vadd.f32 %v11981_v13, %v4261_v6  ;;  %v12475_v35 = vld [vmem:[#allocation3 + $0x4c] sm:$0xf]  ;;  %v12479_v32 = vcombine.low %v12473_v27, %v12467_v62  ;;  %v12487_v13 = vor.u32 %v4673_v38, %v12423_v9  ;;  %v12490_v44 = vor.u32 %v4716_v49, %v12454_v28  ;;  %v12493_v54 = vld [vmem:[#allocation3 + $0x48] sm:$0xf] }
 0x2a4   : > { %v4227_v60 = vld [vmem:[#allocation4 + $0xf0] sm:$0xff]  ;;  %v5503_v39 = vrot.slane %v14153_v2, 4  ;;  %v4699_v33 = vshll.u32 %v12425_v61, 16  ;;  %v4334_v51 = vmax.f32 %v4302_v19, 0.0  ;;  %v12508_v61 = vcombine.low %v12493_v54, %v12475_v35 }
 0x2a5   : > { %14152 = vst [vmem:[#allocation16_spill] sm:$0xff] %v12479_v32  ;;  %v4332_v1 = vmax.f32 %v4300_v55, 0.0  ;;  %9689 = vmatmul.mubr.msk.bf16.gmra.mrb[136].mxu1 %vm863_vm6, %v12479_v32  ;;  %v12503_v10 = vld [vmem:[%s13889_s2] ss:$0 sm:$0xff]  ;;  %v5484_v24 = vrot.slane %v5483_v58, 4  ;;  %v5494_v6 = vrot.slane %v5493_v42, 4  ;;  %v4164_v41 = vadd.f32 %v12214_v15, %v3960_v50 }
 0x2a6   : > { %v12495_v11 = vld [vmem:[#allocation3 + $0x2c] sm:$0x1]  ;;  %v4266_v56 = vmul.f32 %v12503_v10, %v4227_v60  ;;  %14154 = vst [vmem:[#allocation20_spill] sm:$0xff] %v12508_v61  ;;  %v12511_v57 = vor.u32 %v4699_v33, %v12469_v36  ;;  %9692 = vmatprep.mubr.msk.bf16.mxu1 %vm863_vm6, %v12508_v61  ;;  %v4225_v49 = vld [vmem:[#allocation4 + $0xe0] sm:$0xff]  ;;  %v5507_v19 = vor.u32 %v5506_v20, %v5503_v39  ;;  %v5510_v55 = vshll.u32 %v12331_v5, 16 }
 0x2a7   : > { %v5496_v38 = vshll.u32 %v12495_v11, 16  ;;  %v12519_v60 = vpack.c.bf16 %v4334_v51, %v4334_v51  ;;  %v5525_v2 = vshrl.u32 %v12473_v27, 16  ;;  %v5528_v33 = vshll.u32 %v12473_v27, 16  ;;  %v12531_v42 = vld [vmem:[%s13890_s3] ss:$0 sm:$0xff]  ;;  %4196 = vst.msk [vmem:[#allocation4 + $0xf8] sm:$0xff] %vm863_vm6, %v4164_v41 }
 0x2a8   : > { %v12524_v26 = vld [vmem:[#allocation3 + $0x38] sm:$0x1]  ;;  %v12526_v31 = vpack.c.bf16 %v4332_v1, %v4332_v1  ;;  %v12534_v39 = vadd.f32 %v12531_v42, %v4266_v56  ;;  %v4264_v51 = vmul.f32 %v12503_v10, %v4225_v49  ;;  %v5489_v23 = vsel %vm10419_vm13, %v5484_v24, %v12451_v43  ;;  %v4858_v32 = vld [vmem:[#allocation3 + $0x54] sm:$0xf]  ;;  %v4865_v15 = vld [vmem:[#allocation3 + $0x60] sm:$0xf] }
 0x2a9   : > { %14155 = vst [vmem:[#allocation23_spill] sm:$0xff] %v12524_v26  ;;  %v5498_v20 = vrot.slane %v5496_v38, 5  ;;  %v5512_v58 = vrot.slane %v5510_v55, 5  ;;  %v14156_v1 = vshrl.u32 %v12331_v5, 16  ;;  %v5549_v61 = vshrl.u32 %v12493_v54, 16 }
 0x2aa   : > { %v4303_v38 = vadd.f32 %v12531_v42, %v4264_v51  ;;  %v5520_v49 = vshll.u32 %v12524_v26, 16  ;;  %v4721_v12 = vshrl.u32 %v12519_v60, 16  ;;  %v4724_v43 = vshll.u32 %v12519_v60, 16  ;;  %v3958_v51 = vld [vmem:[#allocation4 + $0xe8] sm:$0xff] }
 0x2ab   : > { %v5516_v48 = vrot.slane %v14156_v1, 4  ;;  %v5499_v56 = vsel %vm10419_vm13, %v5494_v6, %v5498_v20  ;;  %v5552_v24 = vshll.u32 %v12493_v54, 16  ;;  %v5508_v5 = vrot.slane %v5507_v19, 4  ;;  %v4848_v1 = vld [vmem:[#allocation3 + $0x44] sm:$0x1] }
 0x2ac   : > { %v4704_v50 = vshrl.u32 %v12526_v31, 16  ;;  %v4337_v55 = vmax.f32 %v12534_v39, 0.0  ;;  %v12554_v6 = vcombine.low %v5489_v23, %v5499_v56  ;;  %v4335_v20 = vmax.f32 %v4303_v38, 0.0 }
 0x2ad   : > { %v5517_v27 = vor.u32 %v5516_v48, %v5512_v58  ;;  %v4162_v26 = vadd.f32 %v12220_v25, %v3958_v51  ;;  %v14158_v60 = vrot.slane %v12204_v34, 4  ;;  %v4859_v41 = vsel %vm12006_vm4, %v12232_v0, %v4858_v32  ;;  %v14160_v0 = vld [vmem:[#allocation30_spill] sm:$0xff]  ;;  %v14225_v16 = vld [vmem:[#allocation20_spill] sm:$0xff] }
 0x2ae   : > { %14157 = vst [vmem:[#allocation27_spill] sm:$0xff] %v12554_v6  ;;  %9719 = vmatmul.mubr.msk.bf16.gmra.mrb[164].mxu0 %vm863_vm6, %v12554_v6  ;;  %v9062_v23 = vpack.c.bf16 %v4335_v20, %v4335_v20  ;;  %v5522_v39 = vrot.slane %v5520_v49, 5  ;;  %4860 = vst [vmem:[#allocation3 + $0x54] sm:$0xf] %v4859_v41  ;;  %v14159_v25 = vrot.slane %v12202_v37, 4  ;;  %v14161_v32 = vrot.slane %v14160_v0, 4 }
 0x2af   : > { %v4608_v19 = vsel %vm10378_vm11, %v14158_v60, %v12285_v30  ;;  %v4866_v30 = vsel %vm12006_vm4, %v12228_v40, %v4865_v15  ;;  %v5518_v48 = vrot.slane %v5517_v27, 4  ;;  %4194 = vst.msk [vmem:[#allocation4 + $0xe8] sm:$0xff] %vm863_vm6, %v4162_v26  ;;  %v5527_v38 = vrot.slane %v5525_v2, 4  ;;  %v4855_v49 = vld [vmem:[#allocation3 + $0x50] sm:$0x1] }
 0x2b0   : > { %4861 = vst.msk [vmem:[#allocation3 + $0x58] sm:$0xf] %vm4339_vm2, %v4608_v19  ;;  %v4625_v34 = vsel %vm10378_vm11, %v14159_v25, %v12243_v59  ;;  %4867 = vst [vmem:[#allocation3 + $0x60] sm:$0xf] %v4866_v30  ;;  %v4849_v56 = vsel %vm12016_vm8, %v14161_v32, %v4848_v1  ;;  %v5530_v37 = vrot.slane %v5528_v33, 5  ;;  %v12582_v20 = vrot.slane %v4721_v12, 7 }
 0x2b1   : > { %4868 = vst.msk [vmem:[#allocation3 + $0x64] sm:$0xf] %vm4339_vm2, %v4625_v34  ;;  %v12584_v59 = vrot.slane %v4704_v50, 7  ;;  %v4730_v51 = vshrl.u32 %v9062_v23, 16  ;;  %v5513_v40 = vsel %vm10419_vm13, %v5508_v5, %v5512_v58  ;;  %4850 = vst [vmem:[#allocation3 + $0x44] sm:$0x1] %v4849_v56  ;;  %v5523_v26 = vsel %vm10419_vm13, %v5518_v48, %v5522_v39 }
 0x2b2   : > { %v5531_v27 = vor.u32 %v5530_v37, %v5527_v38  ;;  %v5534_v15 = vshll.u32 %v12467_v62, 16  ;;  %v14162_v1 = vshrl.u32 %v12467_v62, 16  ;;  %v4707_v33 = vshll.u32 %v12526_v31, 16  ;;  %v4228_v60 = vld [vmem:[#allocation4 + $0xf8] sm:$0xff]  ;;  %v14164_v19 = vld [vmem:[#allocation28_spill] sm:$0xff] }
 0x2b3   : > { %v12594_v12 = vrot.slane %v4730_v51, 7  ;;  %v12596_v50 = vcombine.low %v5513_v40, %v5523_v26  ;;  %v14165_v41 = vrot.slane %v14164_v19, 4  ;;  %v4267_v5 = vmul.f32 %v12503_v10, %v4228_v60  ;;  %v4872_v26 = vld [vmem:[#allocation3 + $0x6c] sm:$0xf]  ;;  %v4862_v32 = vld [vmem:[#allocation3 + $0x5c] sm:$0x1] }
 0x2b4   : > { %v5540_v2 = vrot.slane %v14162_v1, 4  ;;  %v12603_v39 = vrot.slane %v5534_v15, 5  ;;  %v5551_v25 = vrot.slane %v5549_v61, 4  ;;  %v5554_v34 = vrot.slane %v5552_v24, 5  ;;  %v4879_v24 = vld [vmem:[#allocation3 + $0x78] sm:$0xf] }
 0x2b5   : > { %14163 = vst [vmem:[#allocation31_spill] sm:$0xff] %v12596_v50  ;;  %v4856_v58 = vsel %vm12016_vm8, %v14165_v41, %v4855_v49  ;;  %v12606_v30 = vor.u32 %v4724_v43, %v12582_v20  ;;  %v12608_v31 = vpack.c.bf16 %v4337_v55, %v4337_v55  ;;  %v4733_v48 = vshll.u32 %v9062_v23, 16  ;;  %9722 = vmatprep.mubr.msk.bf16.mxu0 %vm863_vm6, %v12596_v50  ;;  %v12616_v38 = vld [vmem:[#allocation3 + $0x54] sm:$0xf] }
 0x2b6   : > { %4857 = vst [vmem:[#allocation3 + $0x50] sm:$0x1] %v4856_v58  ;;  %v5532_v0 = vrot.slane %v5531_v27, 4  ;;  %v12614_v56 = vor.u32 %v4707_v33, %v12584_v59  ;;  %14166 = vst [vmem:[#allocation36_spill] sm:$0xff] %v12616_v38  ;;  %v5541_v61 = vor.u32 %v5540_v2, %v12603_v39  ;;  %v5558_v43 = vshll.u32 %v12475_v35, 16  ;;  %v4226_v51 = vld [vmem:[#allocation4 + $0xe8] sm:$0xff] }
 0x2b7   : > { %v12618_v37 = vld [vmem:[#allocation3 + $0x58] sm:$0xf]  ;;  %v12624_v23 = vor.u32 %v4733_v48, %v12594_v12  ;;  %v12632_v27 = vadd.f32 %v12531_v42, %v4267_v5  ;;  %v4265_v15 = vmul.f32 %v12503_v10, %v4226_v51  ;;  %v12635_v1 = vld [vmem:[#allocation3 + $0x60] sm:$0xf]  ;;  %v5555_v33 = vor.u32 %v5554_v34, %v5551_v25 }
 0x2b8   : > { %v12629_v40 = vcombine.low %v12616_v38, %v12618_v37  ;;  %14168 = vst [vmem:[#allocation9_spill] sm:$0xff] %v12635_v1  ;;  %v12637_v2 = vld [vmem:[#allocation3 + $0x64] sm:$0xf]  ;;  %v14169_v60 = vshrl.u32 %v12475_v35, 16  ;;  %v5573_v41 = vshrl.u32 %v12616_v38, 16  ;;  %v5576_v58 = vshll.u32 %v12616_v38, 16 }
 0x2b9   : > { %v12647_v5 = vcombine.low %v12635_v1, %v12637_v2  ;;  %v12649_v10 = vld [vmem:[#allocation3 + $0x44] sm:$0x1]  ;;  %v5537_v25 = vsel %vm10419_vm13, %v5532_v0, %v12603_v39  ;;  %v4304_v34 = vadd.f32 %v12531_v42, %v4265_v15  ;;  %v5542_v48 = vrot.slane %v5541_v61, 4 }
 0x2ba   : > { %14167 = vst [vmem:[#allocation39_spill] sm:$0xff] %v12629_v40  ;;  %v5564_v19 = vrot.slane %v14169_v60, 4  ;;  %9693 = vmatmul.mubr.msk.bf16.gmra.mrb[140].mxu1 %vm863_vm6, %v12629_v40  ;;  %v5544_v51 = vshll.u32 %v12649_v10, 16  ;;  %v5560_v60 = vrot.slane %v5558_v43, 5  ;;  %v14171_v49 = vrot.slane %v12255_v14, 4 }
 0x2bb   : > { %14170 = vst [vmem:[#allocation12_spill] sm:$0xff] %v12647_v5  ;;  %9696 = vmatprep.mubr.msk.bf16.mxu1 %vm863_vm6, %v12647_v5  ;;  %v4873_v42 = vsel %vm12006_vm4, %v12304_v21, %v4872_v26  ;;  %v14172_v39 = vrot.slane %v12253_v17, 4  ;;  %v4880_v61 = vsel %vm12006_vm4, %v12290_v52, %v4879_v24  ;;  %v4336_v43 = vmax.f32 %v4304_v34, 0.0 }
 0x2bc   : > { %v4642_v50 = vsel %vm10378_vm11, %v14171_v49, %v12335_v7  ;;  %v5586_v14 = vshrl.u32 %v12618_v37, 16  ;;  %v5546_v15 = vrot.slane %v5544_v51, 5  ;;  %v5556_v6 = vrot.slane %v5555_v33, 4  ;;  %4874 = vst [vmem:[#allocation3 + $0x6c] sm:$0xf] %v4873_v42 }
 0x2bd   : > { %v12658_v55 = vld [vmem:[#allocation3 + $0x50] sm:$0x1]  ;;  %v4659_v0 = vsel %vm10378_vm11, %v14172_v39, %v12323_v46  ;;  %4875 = vst.msk [vmem:[#allocation3 + $0x70] sm:$0xf] %vm4339_vm2, %v4642_v50  ;;  %4881 = vst [vmem:[#allocation3 + $0x78] sm:$0xf] %v4880_v61  ;;  %v5565_v21 = vor.u32 %v5564_v19, %v5560_v60  ;;  %v9063_v24 = vpack.c.bf16 %v4336_v43, %v4336_v43 }
 0x2be   : > { %4882 = vst.msk [vmem:[#allocation3 + $0x7c] sm:$0xf] %vm4339_vm2, %v4659_v0  ;;  %v5568_v46 = vshll.u32 %v12658_v55, 16  ;;  %v14173_v7 = vrot.slane %v12251_v3, 4  ;;  %v5597_v49 = vshrl.u32 %v12635_v1, 16  ;;  %v5547_v26 = vsel %vm10419_vm13, %v5542_v48, %v5546_v15 }
 0x2bf   : > { %v5575_v50 = vrot.slane %v5573_v41, 4  ;;  %v4869_v33 = vld [vmem:[#allocation3 + $0x68] sm:$0x1]  ;;  %v12688_v34 = vcombine.low %v5537_v25, %v5547_v26  ;;  %v5566_v51 = vrot.slane %v5565_v21, 4  ;;  %v5578_v42 = vrot.slane %v5576_v58, 5 }
 0x2c0   : > { %v4863_v52 = vsel %vm12016_vm8, %v14173_v7, %v4862_v32  ;;  %v5570_v19 = vrot.slane %v5568_v46, 5  ;;  %v4893_v39 = vld [vmem:[#allocation3 + $0x90] sm:$0xf]  ;;  %v4738_v0 = vshrl.u32 %v9063_v24, 16  ;;  %v5600_v3 = vshll.u32 %v12635_v1, 16  ;;  %v14176_v46 = vld [vmem:[#allocation35_spill] sm:$0xff] }
 0x2c1   : > { %4864 = vst [vmem:[#allocation3 + $0x5c] sm:$0x1] %v4863_v52  ;;  %14174 = vst [vmem:[#allocation13_spill] sm:$0xff] %v12688_v34  ;;  %v5610_v32 = vshrl.u32 %v12637_v2, 16  ;;  %v5561_v61 = vsel %vm10419_vm13, %v5556_v6, %v5560_v60  ;;  %v4886_v43 = vld [vmem:[#allocation3 + $0x84] sm:$0xf]  ;;  %9723 = vmatmul.mubr.msk.bf16.gmra.mrb[168].mxu0 %vm863_vm6, %v12688_v34  ;;  %v5579_v25 = vor.u32 %v5578_v42, %v5575_v50 }
 0x2c2   : > { %v4741_v7 = vshll.u32 %v9063_v24, 16  ;;  %v5571_v41 = vsel %vm10419_vm13, %v5566_v51, %v5570_v19  ;;  %v5582_v58 = vshll.u32 %v12618_v37, 16  ;;  %v12699_v48 = vrot.slane %v4738_v0, 7  ;;  %v14181_v42 = vld [vmem:[#allocation21_spill] sm:$0xff] }
 0x2c3   : > { %v12701_v15 = vcombine.low %v5561_v61, %v5571_v41  ;;  %v5588_v21 = vrot.slane %v5586_v14, 4  ;;  %v14177_v52 = vrot.slane %v14176_v46, 4  ;;  %v12707_v60 = vld [vmem:[#allocation3 + $0x6c] sm:$0xf]  ;;  %v14179_v50 = vrot.slane %v12372_v47, 4 }
 0x2c4   : > { %v12709_v24 = vld [vmem:[#allocation3 + $0x70] sm:$0xf]  ;;  %v12711_v26 = vld [vmem:[#allocation3 + $0x78] sm:$0xf]  ;;  %v4887_v14 = vsel %vm12006_vm4, %v12391_v22, %v4886_v43  ;;  %v4894_v0 = vsel %vm12006_vm4, %v14181_v42, %v4893_v39  ;;  %v12730_v61 = vor.u32 %v4741_v7, %v12699_v48  ;;  %v5621_v22 = vshrl.u32 %v12707_v60, 16 }
 0x2c5   : > { %14175 = vst [vmem:[#allocation18_spill] sm:$0xff] %v12701_v15  ;;  %v4870_v6 = vsel %vm12016_vm8, %v14177_v52, %v4869_v33  ;;  %14178 = vst [vmem:[#allocation19_spill] sm:$0xff] %v12711_v26  ;;  %v4676_v51 = vsel %vm10378_vm11, %v14179_v50, %v12487_v13  ;;  %v14180_v33 = vrot.slane %v12317_v8, 4  ;;  %9726 = vmatprep.mubr.msk.bf16.mxu0 %vm863_vm6, %v12701_v15  ;;  %v12739_v8 = vld [vmem:[#allocation3 + $0x7c] sm:$0xf]  ;;  %v5599_v13 = vrot.slane %v5597_v49, 4 }
 0x2c6   : > { %4871 = vst [vmem:[#allocation3 + $0x68] sm:$0x1] %v4870_v6  ;;  %v12736_v47 = vcombine.low %v12707_v60, %v12709_v24  ;;  %4888 = vst [vmem:[#allocation3 + $0x84] sm:$0xf] %v4887_v14  ;;  %v5624_v39 = vshll.u32 %v12707_v60, 16  ;;  %v5634_v43 = vshrl.u32 %v12709_v24, 16  ;;  %v12747_v7 = vcombine.low %v12711_v26, %v12739_v8 }
 0x2c7   : > { %v4693_v19 = vsel %vm10378_vm11, %v14180_v33, %v12460_v53  ;;  %4889 = vst.msk [vmem:[#allocation3 + $0x88] sm:$0xf] %vm4339_vm2, %v4676_v51  ;;  %4895 = vst [vmem:[#allocation3 + $0x90] sm:$0xf] %v4894_v0  ;;  %v4876_v53 = vld [vmem:[#allocation3 + $0x74] sm:$0x1] }
 0x2c8   : > { %14182 = vst [vmem:[#allocation24_spill] sm:$0xff] %v12736_v47  ;;  %4896 = vst.msk [vmem:[#allocation3 + $0x94] sm:$0xf] %vm4339_vm2, %v4693_v19  ;;  %v5645_v41 = vshrl.u32 %v12711_v26, 16  ;;  %v12750_v46 = vld [vmem:[#allocation3 + $0x5c] sm:$0x1]  ;;  %9697 = vmatmul.mubr.msk.bf16.gmra.mrb[144].mxu1 %vm863_vm6, %v12736_v47 }
 0x2c9   : > { %14183 = vst [vmem:[#allocation25_spill] sm:$0xff] %v12747_v7  ;;  %v5648_v49 = vshll.u32 %v12711_v26, 16  ;;  %v5658_v52 = vshrl.u32 %v12739_v8, 16  ;;  %v5580_v6 = vrot.slane %v5579_v25, 4  ;;  %v5584_v50 = vrot.slane %v5582_v58, 5  ;;  %9700 = vmatprep.mubr.msk.bf16.mxu1 %vm863_vm6, %v12747_v7  ;;  %v14184_v15 = vld [vmem:[#allocation8_spill] sm:$0xff] }
 0x2ca   : > { %v5592_v51 = vshll.u32 %v12750_v46, 16  ;;  %v5602_v14 = vrot.slane %v5600_v3, 5  ;;  %v5606_v33 = vshll.u32 %v12637_v2, 16  ;;  %v5612_v19 = vrot.slane %v5610_v32, 4  ;;  %v4883_v42 = vld [vmem:[#allocation3 + $0x80] sm:$0x1] }
 0x2cb   : > { %v5585_v0 = vsel %vm10419_vm13, %v5580_v6, %v5584_v50  ;;  %v5589_v17 = vor.u32 %v5588_v21, %v5584_v50  ;;  %v14185_v34 = vrot.slane %v14184_v15, 4  ;;  %v5623_v58 = vrot.slane %v5621_v22, 4  ;;  %v14187_v26 = vld [vmem:[#allocation7_spill] sm:$0xff] }
 0x2cc   : > { %v5594_v47 = vrot.slane %v5592_v51, 5  ;;  %v5603_v5 = vor.u32 %v5602_v14, %v5599_v13  ;;  %v5608_v7 = vrot.slane %v5606_v33, 5  ;;  %v5626_v40 = vrot.slane %v5624_v39, 5 }
 0x2cd   : > { %v4877_v25 = vsel %vm12016_vm8, %v14185_v34, %v4876_v53  ;;  %v5590_v3 = vrot.slane %v5589_v17, 4  ;;  %v12766_v1 = vld [vmem:[#allocation3 + $0x68] sm:$0x1]  ;;  %v5630_v32 = vshll.u32 %v12709_v24, 16  ;;  %v5636_v38 = vrot.slane %v5634_v43, 4 }
 0x2ce   : > { %4878 = vst [vmem:[#allocation3 + $0x74] sm:$0x1] %v4877_v25  ;;  %14186 = vst [vmem:[#allocation33_spill] sm:$0xff] %v12766_v1  ;;  %v14188_v6 = vrot.slane %v14187_v26, 4  ;;  %v5604_v21 = vrot.slane %v5603_v5, 4  ;;  %v5613_v50 = vor.u32 %v5612_v19, %v5608_v7  ;;  %v5616_v34 = vshll.u32 %v12766_v1, 16 }
 0x2cf   : > { %v12774_v22 = vld [vmem:[#allocation3 + $0x84] sm:$0xf]  ;;  %v12776_v13 = vld [vmem:[#allocation3 + $0x88] sm:$0xf]  ;;  %v5627_v53 = vor.u32 %v5626_v40, %v5623_v58  ;;  %v5595_v17 = vsel %vm10419_vm13, %v5590_v3, %v5594_v47  ;;  %v12786_v43 = vld [vmem:[#allocation3 + $0x90] sm:$0xf] }
 0x2d0   : > { %v4884_v15 = vsel %vm12016_vm8, %v14188_v6, %v4883_v42  ;;  %v12782_v39 = vcombine.low %v12774_v22, %v12776_v13  ;;  %v5669_v26 = vshrl.u32 %v12774_v22, 16  ;;  %v5672_v5 = vshll.u32 %v12774_v22, 16  ;;  %v12788_v51 = vld [vmem:[#allocation3 + $0x94] sm:$0xf]  ;;  %v4890_v1 = vld [vmem:[#allocation3 + $0x8c] sm:$0x1] }
 0x2d1   : > { %4885 = vst [vmem:[#allocation3 + $0x80] sm:$0x1] %v4884_v15  ;;  %v12790_v14 = vcombine.low %v5585_v0, %v5595_v17  ;;  %v5609_v40 = vsel %vm10419_vm13, %v5604_v21, %v5608_v7  ;;  %v5614_v33 = vrot.slane %v5613_v50, 4  ;;  %v5618_v19 = vrot.slane %v5616_v34, 5  ;;  %v4900_v15 = vld [vmem:[#allocation3 + $0x9c] sm:$0xf] }
 0x2d2   : > { %14189 = vst [vmem:[#allocation34_spill] sm:$0xff] %v12782_v39  ;;  %9701 = vmatmul.mubr.msk.bf16.gmra.mrb[148].mxu1 %vm863_vm6, %v12782_v39  ;;  %v5682_v47 = vshrl.u32 %v12776_v13, 16  ;;  %v12799_v42 = vcombine.low %v12786_v43, %v12788_v51  ;;  %v5693_v25 = vshrl.u32 %v12786_v43, 16  ;;  %v5696_v58 = vshll.u32 %v12786_v43, 16  ;;  %v14228_v45 = vld [vmem:[#allocation24_spill] sm:$0xff] }
 0x2d3   : > { %14190 = vst [vmem:[#allocation40_spill] sm:$0xff] %v12790_v14  ;;  %9727 = vmatmul.mubr.msk.bf16.gmra.mrb[172].mxu0 %vm863_vm6, %v12790_v14  ;;  %v5619_v7 = vsel %vm10419_vm13, %v5614_v33, %v5618_v19  ;;  %v5706_v0 = vshrl.u32 %v12788_v51, 16  ;;  %v5628_v3 = vrot.slane %v5627_v53, 4  ;;  %v5632_v6 = vrot.slane %v5630_v32, 5  ;;  %v4907_v32 = vld [vmem:[#allocation3 + $0xa8] sm:$0xf] }
 0x2d4   : > { %14191 = vst [vmem:[#allocation41_spill] sm:$0xff] %v12799_v42  ;;  %v12808_v21 = vcombine.low %v5609_v40, %v5619_v7  ;;  %9704 = vmatprep.mubr.msk.bf16.mxu1 %vm863_vm6, %v12799_v42  ;;  %v5647_v34 = vrot.slane %v5645_v41, 4  ;;  %v5650_v17 = vrot.slane %v5648_v49, 5  ;;  %v5654_v39 = vshll.u32 %v12739_v8, 16 }
 0x2d5   : > { %v12812_v50 = vld [vmem:[#allocation3 + $0x74] sm:$0x1]  ;;  %v5633_v14 = vsel %vm10419_vm13, %v5628_v3, %v5632_v6  ;;  %v5637_v33 = vor.u32 %v5636_v38, %v5632_v6  ;;  %v5660_v53 = vrot.slane %v5658_v52, 4  ;;  %v14193_v41 = vrot.slane %v12469_v36, 4 }
 0x2d6   : > { %14192 = vst [vmem:[#allocation42_spill] sm:$0xff] %v12808_v21  ;;  %v5640_v19 = vshll.u32 %v12812_v50, 16  ;;  %9730 = vmatprep.mubr.msk.bf16.mxu0 %vm863_vm6, %v12808_v21  ;;  %v5651_v7 = vor.u32 %v5650_v17, %v5647_v34  ;;  %v5656_v42 = vrot.slane %v5654_v39, 5  ;;  %v4901_v38 = vsel %vm12006_vm4, %v12511_v57, %v4900_v15  ;;  %v4918_v21 = vld [vmem:[#allocation3 + $0xbc] sm:$0x1] }
 0x2d7   : > { %v4710_v49 = vsel %vm10378_vm11, %v14193_v41, %v12614_v56  ;;  %v5638_v52 = vrot.slane %v5637_v33, 4  ;;  %4902 = vst [vmem:[#allocation3 + $0x9c] sm:$0xf] %v4901_v38  ;;  %v14194_v39 = vrot.slane %v12454_v28, 4  ;;  %v4908_v56 = vsel %vm12006_vm4, %v12490_v44, %v4907_v32  ;;  %v4897_v33 = vld [vmem:[#allocation3 + $0x98] sm:$0x1] }
 0x2d8   : > { %v12820_v40 = vld [vmem:[#allocation3 + $0x80] sm:$0x1]  ;;  %v5642_v3 = vrot.slane %v5640_v19, 5  ;;  %4903 = vst.msk [vmem:[#allocation3 + $0xa0] sm:$0xf] %vm4339_vm2, %v4710_v49  ;;  %v5652_v34 = vrot.slane %v5651_v7, 4  ;;  %v5661_v17 = vor.u32 %v5660_v53, %v5656_v42 }
 0x2d9   : > { %v5664_v6 = vshll.u32 %v12820_v40, 16  ;;  %v4727_v36 = vsel %vm10378_vm11, %v14194_v39, %v12606_v30  ;;  %v14195_v57 = vrot.slane %v12423_v9, 4  ;;  %4909 = vst [vmem:[#allocation3 + $0xa8] sm:$0xf] %v4908_v56  ;;  %v5671_v30 = vrot.slane %v5669_v26, 4 }
 0x2da   : > { %4910 = vst.msk [vmem:[#allocation3 + $0xac] sm:$0xf] %vm4339_vm2, %v4727_v36  ;;  %v5643_v28 = vsel %vm10419_vm13, %v5638_v52, %v5642_v3  ;;  %v5674_v53 = vrot.slane %v5672_v5, 5  ;;  %v5657_v44 = vsel %vm10419_vm13, %v5652_v34, %v5656_v42  ;;  %v5662_v32 = vrot.slane %v5661_v17, 4  ;;  %v4914_v36 = vld [vmem:[#allocation3 + $0xb4] sm:$0xf] }
 0x2db   : > { %v4891_v15 = vsel %vm12016_vm8, %v14195_v57, %v4890_v1  ;;  %v5666_v19 = vrot.slane %v5664_v6, 5  ;;  %v12847_v7 = vcombine.low %v5633_v14, %v5643_v28  ;;  %v5678_v9 = vshll.u32 %v12776_v13, 16  ;;  %v10057_v6 = vld [vmem:[%s13891_s4 + $0xc] sm:$0xf]  ;;  %v4904_v34 = vld [vmem:[#allocation3 + $0xa4] sm:$0x1] }
 0x2dc   : > { %4892 = vst [vmem:[#allocation3 + $0x8c] sm:$0x1] %v4891_v15  ;;  %v5675_v41 = vor.u32 %v5674_v53, %v5671_v30  ;;  %v5684_v49 = vrot.slane %v5682_v47, 4  ;;  %v14197_v1 = vrot.slane %v12421_v4, 4  ;;  %v5695_v52 = vrot.slane %v5693_v25, 4 }
 0x2dd   : > { %14196 = vst [vmem:[#allocation43_spill] sm:$0xff] %v12847_v7  ;;  %9731 = vmatmul.mubr.msk.bf16.gmra.mrb[176].mxu0 %vm863_vm6, %v12847_v7  ;;  %v5667_v26 = vsel %vm10419_vm13, %v5662_v32, %v5666_v19  ;;  %v5680_v5 = vrot.slane %v5678_v9, 5  ;;  %v5698_v14 = vrot.slane %v5696_v58, 5  ;;  %v5702_v42 = vshll.u32 %v12788_v51, 16  ;;  %v12864_v47 = vld [vmem:[%s13891_s4 + $0x14] sm:$0xf] }
 0x2de   : > { %v4898_v38 = vsel %vm12016_vm8, %v14197_v1, %v4897_v33  ;;  %v12866_v4 = vcombine.low %v5657_v44, %v5667_v26  ;;  %v5676_v3 = vrot.slane %v5675_v41, 4  ;;  %v5708_v25 = vrot.slane %v5706_v0, 4  ;;  %v12872_v58 = vld [vmem:[#allocation3 + $0x9c] sm:$0xf] }
 0x2df   : > { %4899 = vst [vmem:[#allocation3 + $0x98] sm:$0x1] %v4898_v38  ;;  %v6675_v39 = vsel %vm5175_vm0, %v10057_v6, 0  ;;  %v12874_v17 = vld [vmem:[#allocation3 + $0xa0] sm:$0xf]  ;;  %v5685_v56 = vor.u32 %v5684_v49, %v5680_v5  ;;  %v5699_v57 = vor.u32 %v5698_v14, %v5695_v52  ;;  %v5704_v15 = vrot.slane %v5702_v42, 5 }
 0x2e0   : > { %14198 = vst [vmem:[#allocation29_spill] sm:$0xff] %v12866_v4  ;;  %9781 = vmatpush3.bf16.msra.mxu0 %v6675_v39  ;;  %v14199_v33 = vrot.slane %v12594_v12, 4  ;;  %9734 = vmatprep.mubr.msk.bf16.mxu0 %vm863_vm6, %v12866_v4  ;;  %v12886_v19 = vcombine.low %v12872_v58, %v12874_v17  ;;  %v5717_v30 = vshrl.u32 %v12872_v58, 16  ;;  %v5720_v53 = vshll.u32 %v12872_v58, 16  ;;  %v4911_v14 = vld [vmem:[#allocation3 + $0xb0] sm:$0x1] }
 0x2e1   : > { %v12890_v44 = vld [vmem:[#allocation3 + $0xac] sm:$0xf]  ;;  %9998 = vmatprep.subr.msk.bf16.mxu0 %vm5175_vm0, %v12864_v47  ;;  %v5730_v12 = vshrl.u32 %v12874_v17, 16  ;;  %v5681_v41 = vsel %vm10419_vm13, %v5676_v3, %v5680_v5  ;;  %v5709_v49 = vor.u32 %v5708_v25, %v5704_v15  ;;  %v5686_v52 = vrot.slane %v5685_v56, 4 }
 0x2e2   : > { %v4744_v0 = vsel %vm10378_vm11, %v14199_v33, %v12730_v61  ;;  %v12896_v61 = vld [vmem:[#allocation3 + $0xa8] sm:$0xf]  ;;  %v5754_v32 = vshrl.u32 %v12890_v44, 16  ;;  %9705 = vmatmul.mubr.msk.bf16.gmra.mrb[152].mxu1 %vm863_vm6, %v12886_v19  ;;  %v5700_v6 = vrot.slane %v5699_v57, 4  ;;  %v4915_v5 = vsel %vm12006_vm4, %v12624_v23, %v4914_v36 }
 0x2e3   : > { %4917 = vst.msk [vmem:[#allocation3 + $0xb8] sm:$0xf] %vm4339_vm2, %v4744_v0  ;;  %v12899_v9 = vld [vmem:[#allocation3 + $0x8c] sm:$0x1]  ;;  %v12907_v1 = vcombine.low %v12896_v61, %v12890_v44  ;;  %v5741_v38 = vshrl.u32 %v12896_v61, 16  ;;  %v5744_v42 = vshll.u32 %v12896_v61, 16 }
 0x2e4   : > { %v5688_v26 = vshll.u32 %v12899_v9, 16  ;;  %v14201_v3 = vrot.slane %v12584_v59, 4  ;;  %4916 = vst [vmem:[#allocation3 + $0xb4] sm:$0xf] %v4915_v5  ;;  %v5719_v33 = vrot.slane %v5717_v30, 4  ;;  %v5722_v0 = vrot.slane %v5720_v53, 5 }
 0x2e5   : > { %14200 = vst [vmem:[#allocation26_spill] sm:$0xff] %v12907_v1  ;;  %9708 = vmatprep.mubr.msk.bf16.mxu1 %vm863_vm6, %v12907_v1  ;;  %v5726_v57 = vshll.u32 %v12874_v17, 16  ;;  %v5710_v28 = vrot.slane %v5709_v49, 4  ;;  %v5732_v36 = vrot.slane %v5730_v12, 4  ;;  %v14202_v59 = vrot.slane %v12582_v20, 4 }
 0x2e6   : > { %v4905_v25 = vsel %vm12016_vm8, %v14201_v3, %v4904_v34  ;;  %v5690_v39 = vrot.slane %v5688_v26, 5  ;;  %v12921_v56 = vld [vmem:[#allocation3 + $0x98] sm:$0x1]  ;;  %v5723_v3 = vor.u32 %v5722_v0, %v5719_v33  ;;  %v5743_v5 = vrot.slane %v5741_v38, 4 }
 0x2e7   : > { %4906 = vst [vmem:[#allocation3 + $0xa4] sm:$0x1] %v4905_v25  ;;  %v5712_v23 = vshll.u32 %v12921_v56, 16  ;;  %v4912_v34 = vsel %vm12016_vm8, %v14202_v59, %v4911_v14  ;;  %v5728_v4 = vrot.slane %v5726_v57, 5  ;;  %v5746_v49 = vrot.slane %v5744_v42, 5 }
 0x2e8   : > { %v5691_v26 = vsel %vm10419_vm13, %v5686_v52, %v5690_v39  ;;  %4913 = vst [vmem:[#allocation3 + $0xb0] sm:$0x1] %v4912_v34  ;;  %v5750_v12 = vshll.u32 %v12890_v44, 16  ;;  %v5705_v20 = vsel %vm10419_vm13, %v5700_v6, %v5704_v15  ;;  %v5724_v7 = vrot.slane %v5723_v3, 4  ;;  %v10058_v39 = vld [vmem:[#allocation3] sm:$0xf] }
 0x2e9   : > { %v12931_v30 = vcombine.low %v5681_v41, %v5691_v26  ;;  %v5714_v53 = vrot.slane %v5712_v23, 5  ;;  %v5733_v14 = vor.u32 %v5732_v36, %v5728_v4  ;;  %v5756_v59 = vrot.slane %v5754_v32, 4  ;;  %v10059_v6 = vld [vmem:[#allocation3 + $0x4] sm:$0xf] }
 0x2ea   : > { %v12933_v25 = vld [vmem:[#allocation3 + $0xb8] sm:$0xf]  ;;  %v5747_v38 = vor.u32 %v5746_v49, %v5743_v5  ;;  %v5752_v52 = vrot.slane %v5750_v12, 5  ;;  %v8869_v33 = vrot.slane %v10058_v39, 9  ;;  %v5729_v15 = vsel %vm10419_vm13, %v5724_v7, %v5728_v4 }
 0x2eb   : > { %14203 = vst [vmem:[#allocation22_spill] sm:$0xff] %v12931_v30  ;;  %9735 = vmatmul.mubr.msk.bf16.gmra.mrb[180].mxu0 %vm863_vm6, %v12931_v30  ;;  %v5715_v41 = vsel %vm10419_vm13, %v5710_v28, %v5714_v53  ;;  %v5778_v0 = vshrl.u32 %v12933_v25, 16  ;;  %v6164_v32 = vrot.slane %v10059_v6, 5  ;;  %v12947_v57 = vld [vmem:[#allocation3 + $0xb4] sm:$0xf]  ;;  %v14205_v3 = vrot.slane %v12699_v48, 4 }
 0x2ec   : > { %v12942_v42 = vcombine.low %v5705_v20, %v5715_v41  ;;  %v5748_v36 = vrot.slane %v5747_v38, 4  ;;  %v5757_v34 = vor.u32 %v5756_v59, %v5752_v52  ;;  %v10060_v28 = vld [vmem:[#allocation3 + $0x8] sm:$0x1]  ;;  %v12959_v7 = vcombine.low %v12947_v57, %v12933_v25  ;;  %v10061_v6 = vld [vmem:[#allocation3 + $0x10] sm:$0xf] }
 0x2ed   : > { %v6167_v26 = vrot.slane %v10060_v28, 5  ;;  %v4919_v5 = vsel %vm12016_vm8, %v14205_v3, %v4918_v21  ;;  %v5765_v4 = vshrl.u32 %v12947_v57, 16  ;;  %v5734_v53 = vrot.slane %v5733_v14, 4  ;;  %v10063_v30 = vld [vmem:[#allocation3 + $0x14] sm:$0x1] }
 0x2ee   : > { %14204 = vst [vmem:[#allocation6_spill] sm:$0xff] %v12942_v42  ;;  %v12949_v23 = vld [vmem:[#allocation3 + $0xa4] sm:$0x1]  ;;  %9738 = vmatprep.mubr.msk.bf16.mxu0 %vm863_vm6, %v12942_v42  ;;  %14206 = vst [vmem:[#allocation30_spill] sm:$0xff] %v12959_v7  ;;  %v5768_v12 = vshll.u32 %v12947_v57, 16  ;;  %v5753_v48 = vsel %vm10419_vm13, %v5748_v36, %v5752_v52  ;;  %v6165_v59 = vsel %vm10625_vm3, %v8869_v33, %v6164_v32  ;;  %v6166_v41 = vrot.slane %v6164_v32, 4 }
 0x2ef   : > { %v5736_v49 = vshll.u32 %v12949_v23, 16  ;;  %4920 = vst [vmem:[#allocation3 + $0xbc] sm:$0x1] %v4919_v5  ;;  %v12964_v20 = vld [vmem:[#allocation3 + $0xb0] sm:$0x1]  ;;  %9709 = vmatmul.mubr.msk.bf16.gmra.mrb[156].mxu1 %vm863_vm6, %v12959_v7  ;;  %v5758_v39 = vrot.slane %v5757_v34, 4 }
 0x2f0   : > { %v5760_v14 = vshll.u32 %v12964_v20, 16  ;;  %v6171_v28 = vrot.slane %v10061_v6, 5  ;;  %v6168_v3 = vsel %vm10625_vm3, %v6166_v41, %v6167_v26  ;;  %v10062_v5 = vld [vmem:[#allocation3 + $0xc] sm:$0xf]  ;;  %v6174_v52 = vrot.slane %v10063_v30, 5 }
 0x2f1   : > { %v5738_v38 = vrot.slane %v5736_v49, 5  ;;  %v8870_v42 = vrot.slane %v10062_v5, 9  ;;  %v5767_v36 = vrot.slane %v5765_v4, 4  ;;  %v8886_v1 = vcombine.low %v6165_v59, %v6168_v3  ;;  %v10064_v34 = vld [vmem:[%s13891_s4 + $0x10] sm:$0xf] }
 0x2f2   : > { %v5762_v32 = vrot.slane %v5760_v14, 5  ;;  %v6967_v49 = vsel %vm5175_vm0, %v10064_v34, 0  ;;  %v6173_v7 = vrot.slane %v6171_v28, 4  ;;  %v5770_v26 = vrot.slane %v5768_v12, 5  ;;  %v10065_v59 = vld [vmem:[#allocation3 + $0x1c] sm:$0xf] }
 0x2f3   : > { %v5739_v33 = vsel %vm10419_vm13, %v5734_v53, %v5738_v38  ;;  %v5774_v41 = vshll.u32 %v12933_v25, 16  ;;  %9748 = vmatprep.mubr.msk.bf16.mxu1 %vm863_vm6, %v8886_v1  ;;  %v6172_v4 = vsel %vm10625_vm3, %v8870_v42, %v6171_v28  ;;  %v5780_v53 = vrot.slane %v5778_v0, 4  ;;  %v10066_v42 = vld [vmem:[#allocation3 + $0x18] sm:$0xf] }
 0x2f4   : > { %v12981_v6 = vcombine.low %v5729_v15, %v5739_v33  ;;  %v5763_v30 = vsel %vm10419_vm13, %v5758_v39, %v5762_v32  ;;  %v6178_v38 = vrot.slane %v10065_v59, 5  ;;  %v6175_v12 = vsel %vm10625_vm3, %v6173_v7, %v6174_v52  ;;  %v13006_v7 = vld [vmem:[%s13891_s4 + $0x18] sm:$0xf]  ;;  %v10068_v59 = vld [vmem:[#allocation3 + $0x34] sm:$0xf] }
 0x2f5   : > { %v12991_v15 = vcombine.low %v5753_v48, %v5763_v30  ;;  %v5771_v3 = vor.u32 %v5770_v26, %v5767_v36  ;;  %v5776_v39 = vrot.slane %v5774_v41, 5  ;;  %v12997_v5 = vcombine.low %v6172_v4, %v6175_v12  ;;  %v10067_v41 = vld [vmem:[#allocation3 + $0x28] sm:$0xf] }
 0x2f6   : > { %9739 = vmatmul.mubr.msk.bf16.gmra.mrb[184].mxu0 %vm863_vm6, %v12981_v6  ;;  %v12995_v14 = vld [vmem:[#allocation3 + $0xbc] sm:$0x1]  ;;  %v8871_v0 = vrot.slane %v10066_v42, 9  ;;  %v6180_v28 = vrot.slane %v6178_v38, 4  ;;  %v6181_v32 = vrot.slane %v12403_v63, 5  ;;  %v4747_v52 = vshrl.u32 %v12608_v31, 16 }
 0x2f7   : > { %14208 = vst [vmem:[#allocation28_spill] sm:$0xff] %v12991_v15  ;;  %v5784_v1 = vshll.u32 %v12995_v14, 16  ;;  %9742 = vmatprep.mubr.msk.bf16.mxu0 %vm863_vm6, %v12991_v15  ;;  %v5772_v33 = vrot.slane %v5771_v3, 4  ;;  %v5781_v48 = vor.u32 %v5780_v53, %v5776_v39  ;;  %v14209_v36 = vmax.f32 %v12632_v27, 0.0  ;;  %9749 = vmatmul.mubr.msk.bf16.vlgmr.msra.gmra.mrb[160].mxu1 %vm863_vm6, %v12997_v5  ;;  %v10069_v3 = vld [vmem:[#allocation3 + $0x24] sm:$0xf] }
 0x2f8   : > { %v6179_v26 = vsel %vm10625_vm3, %v8871_v0, %v6178_v38  ;;  %v6185_v63 = vrot.slane %v10067_v41, 5  ;;  %9815 = vmatpush3.bf16.msra.mxu1 %v6967_v49  ;;  %v6182_v53 = vsel %vm10625_vm3, %v6180_v28, %v6181_v32  ;;  %v6192_v12 = vrot.slane %v10068_v59, 5  ;;  %v14210_v0 = vld [vmem:[#allocation23_spill] sm:$0xff]  ;;  %v10070_v32 = vld [vmem:[#allocation3 + $0x30] sm:$0xf] }
 0x2f9   : > { %v13012_v34 = vpack.c.bf16 %v14209_v36, %v14209_v36  ;;  %v5782_v30 = vrot.slane %v5781_v48, 4  ;;  %v5786_v4 = vrot.slane %v5784_v1, 5  ;;  %v13020_v27 = vcombine.low %v6179_v26, %v6182_v53  ;;  %9999 = vmatprep.subr.msk.bf16.mxu1 %vm5175_vm0, %v13006_v7 }
 0x2fa   : > { %v8872_v42 = vrot.slane %v10069_v3, 9  ;;  %v6187_v36 = vrot.slane %v6185_v63, 4  ;;  %v6188_v15 = vrot.slane %v12495_v11, 5  ;;  %v5777_v49 = vsel %vm10419_vm13, %v5772_v33, %v5776_v39  ;;  %v14211_v3 = vld [vmem:[#allocation38_spill] sm:$0xff] }
 0x2fb   : > { %v5787_v38 = vsel %vm10419_vm13, %v5782_v30, %v5786_v4  ;;  %v6194_v1 = vrot.slane %v6192_v12, 4  ;;  %v6195_v28 = vrot.slane %v14210_v0, 5  ;;  %9752 = vmatprep.mubr.msk.bf16.mxu1 %vm863_vm6, %v13020_v27  ;;  %v8873_v26 = vrot.slane %v10070_v32, 9 }
 0x2fc   : > { %v13030_v48 = vcombine.low %v5777_v49, %v5787_v38  ;;  %v6189_v11 = vsel %vm10625_vm3, %v6187_v36, %v6188_v15  ;;  %v6199_v41 = vrot.slane %v12467_v62, 5  ;;  %v4755_v39 = vshrl.u32 %v13012_v34, 16  ;;  %v14212_v49 = vld [vmem:[#allocation14_spill] sm:$0xff] }
 0x2fd   : > { %v6186_v33 = vsel %vm10625_vm3, %v8872_v42, %v6185_v63  ;;  %v6196_v30 = vsel %vm10625_vm3, %v6194_v1, %v6195_v28  ;;  %v6206_v4 = vrot.slane %v12475_v35, 5  ;;  %v6193_v15 = vsel %vm10625_vm3, %v8873_v26, %v6192_v12 }
 0x2fe   : > { %9743 = vmatmul.mubr.msk.bf16.gmra.mrb[188].mxu0 %vm863_vm6, %v13030_v48  ;;  %v13045_v53 = vcombine.low %v6186_v33, %v6189_v11  ;;  %v6201_v59 = vrot.slane %v6199_v41, 4  ;;  %v6202_v62 = vrot.slane %v12649_v10, 5  ;;  %v13052_v63 = vcombine.low %v6193_v15, %v6196_v30 }
 0x2ff   : > { %9782 = vmatprep.mubr.msk.bf16.mxu0 %vm863_vm6, %v14211_v3  ;;  %v6208_v42 = vrot.slane %v6206_v4, 4  ;;  %v6209_v36 = vrot.slane %v12658_v55, 5  ;;  %v6213_v35 = vrot.slane %v12618_v37, 5  ;;  %v8874_v38 = vrot.slane %v14212_v49, 9  ;;  %v14214_v3 = vld [vmem:[#allocation37_spill] sm:$0xff] }
 0x300   : > { %9753 = vmatmul.mubr.msk.bf16.gmra.mrb[164].mxu1 %vm863_vm6, %v13045_v53  ;;  %v6203_v12 = vsel %vm10625_vm3, %v6201_v59, %v6202_v62  ;;  %v8875_v10 = vrot.slane %v12493_v54, 9  ;;  %v6220_v1 = vrot.slane %v12637_v2, 5  ;;  %v13063_v0 = vrot.slane %v4747_v52, 7 }
 0x301   : > { %v4758_v28 = vshll.u32 %v13012_v34, 16  ;;  %9756 = vmatprep.mubr.msk.bf16.mxu1 %vm863_vm6, %v13052_v63  ;;  %v6210_v37 = vsel %vm10625_vm3, %v6208_v42, %v6209_v36  ;;  %v13070_v55 = vrot.slane %v4755_v39, 7  ;;  %v6200_v11 = vsel %vm10625_vm3, %v8874_v38, %v6199_v41  ;;  %v14213_v39 = vld [vmem:[#allocation19_spill] sm:$0xff] }
 0x302   : > { %v6207_v54 = vsel %vm10625_vm3, %v8875_v10, %v6206_v4  ;;  %v6216_v2 = vrot.slane %v12750_v46, 5  ;;  %v13077_v52 = vcombine.low %v6200_v11, %v6203_v12  ;;  %v6215_v32 = vrot.slane %v6213_v35, 4 }
 0x303   : > { %v8878_v34 = vrot.slane %v12707_v60, 9  ;;  %v6227_v26 = vrot.slane %v12709_v24, 5  ;;  %v13081_v33 = vcombine.low %v6207_v54, %v6210_v37  ;;  %v6222_v30 = vrot.slane %v6220_v1, 4 }
 0x304   : > { %v8879_v15 = vrot.slane %v14213_v39, 9  ;;  %v6234_v59 = vrot.slane %v12739_v8, 5  ;;  %v6230_v46 = vrot.slane %v12812_v50, 5  ;;  %v6237_v62 = vrot.slane %v12820_v40, 5  ;;  %v14215_v8 = vld [vmem:[#allocation17_spill] sm:$0xff] }
 0x305   : > { %v6228_v41 = vsel %vm10625_vm3, %v8878_v34, %v6227_v26  ;;  %v6229_v4 = vrot.slane %v6227_v26, 4  ;;  %v8880_v42 = vrot.slane %v12774_v22, 9  ;;  %v6241_v36 = vrot.slane %v12776_v13, 5  ;;  %v14218_v34 = vld [vmem:[#allocation33_spill] sm:$0xff] }
 0x306   : > { %9783 = vmatmul.mubr.msk.bf16.vlgmr.msra.gmra.mrb[192].mxu0 %vm863_vm6, %v14214_v3  ;;  %v6235_v60 = vsel %vm10625_vm3, %v8879_v15, %v6234_v59  ;;  %v6236_v24 = vrot.slane %v6234_v59, 4  ;;  %v6244_v50 = vrot.slane %v12899_v9, 5  ;;  %v8881_v40 = vrot.slane %v12786_v43, 9  ;;  %v14219_v15 = vld [vmem:[#allocation36_spill] sm:$0xff] }
 0x307   : > { %9786 = vmatprep.mubr.msk.bf16.mxu0 %vm863_vm6, %v14215_v8  ;;  %v6231_v49 = vsel %vm10625_vm3, %v6229_v4, %v6230_v46  ;;  %v6248_v38 = vrot.slane %v12788_v51, 5  ;;  %v6242_v13 = vsel %vm10625_vm3, %v8880_v42, %v6241_v36  ;;  %v6243_v10 = vrot.slane %v6241_v36, 4 }
 0x308   : > { %9757 = vmatmul.mubr.msk.bf16.gmra.mrb[168].mxu1 %vm863_vm6, %v13077_v52  ;;  %v13104_v12 = vcombine.low %v6228_v41, %v6231_v49  ;;  %v6238_v22 = vsel %vm10625_vm3, %v6236_v24, %v6237_v62  ;;  %v6251_v37 = vrot.slane %v12921_v56, 5  ;;  %v4750_v11 = vshll.u32 %v12608_v31, 16  ;;  %v14221_v31 = vld [vmem:[#allocation9_spill] sm:$0xff]  ;;  %v4921_v24 = vld [vmem:[#allocation3 + $0xc0] sm:$0xf] }
 0x309   : > { %9760 = vmatprep.mubr.msk.bf16.mxu1 %vm863_vm6, %v13081_v33  ;;  %v13112_v9 = vcombine.low %v6235_v60, %v6238_v22  ;;  %v6249_v43 = vsel %vm10625_vm3, %v8881_v40, %v6248_v38  ;;  %v6250_v51 = vrot.slane %v6248_v38, 4  ;;  %v4760_v54 = vor.u32 %v4758_v28, %v13070_v55  ;;  %v13144_v49 = vld [vmem:[%s13891_s4 + $0x1c] sm:$0xf]  ;;  %v14223_v40 = vld [vmem:[#allocation16_spill] sm:$0xff] }
 0x30a   : > { %14216 = vst [vmem:[#allocation35_spill] sm:$0xff] %v13104_v12  ;;  %v6223_v26 = vrot.slane %v14218_v34, 5  ;;  %v6245_v39 = vsel %vm10625_vm3, %v6243_v10, %v6244_v50  ;;  %v8876_v59 = vrot.slane %v14219_v15, 9  ;;  %v6217_v41 = vsel %vm10625_vm3, %v6215_v32, %v6216_v2  ;;  %v14222_v50 = vld [vmem:[#allocation32_spill] sm:$0xff]  ;;  %v14226_v22 = vld [vmem:[#allocation39_spill] sm:$0xff]  ;;  %v14229_v15 = vld [vmem:[#allocation25_spill] sm:$0xff] }
 0x30b   : > { %14217 = vst [vmem:[#allocation21_spill] sm:$0xff] %v13112_v9  ;;  %v13125_v4 = vcombine.low %v6242_v13, %v6245_v39  ;;  %v6252_v46 = vsel %vm10625_vm3, %v6250_v51, %v6251_v37  ;;  %v4752_v56 = vor.u32 %v4750_v11, %v13063_v0  ;;  %v8877_v62 = vrot.slane %v14221_v31, 9  ;;  %v14227_v10 = vld [vmem:[#allocation12_spill] sm:$0xff]  ;;  %v14231_v31 = vld [vmem:[#allocation41_spill] sm:$0xff] }
 0x30c   : > { %v6224_v28 = vsel %vm10625_vm3, %v6222_v30, %v6223_v26  ;;  %v13133_v60 = vcombine.low %v6249_v43, %v6252_v46  ;;  %v4753_v42 = vrot.slane %v13063_v0, 4  ;;  %v4762_v36 = vrot.slane %v13070_v55, 4  ;;  %v4925_v55 = vld [vmem:[#allocation3 + $0xc8] sm:$0x1] }
 0x30d   : > { %14220 = vst [vmem:[#allocation8_spill] sm:$0xff] %v13125_v4  ;;  %v6214_v2 = vsel %vm10625_vm3, %v8876_v59, %v6213_v35  ;;  %v7243_v32 = vsel %vm5175_vm0, %v12864_v47, 0  ;;  %v6221_v0 = vsel %vm10625_vm3, %v8877_v62, %v6220_v1  ;;  %v4922_v38 = vsel %vm12006_vm4, %v4752_v56, %v4921_v24  ;;  %v14234_v24 = vld [vmem:[#allocation30_spill] sm:$0xff] }
 0x30e   : > { %9787 = vmatmul.mubr.msk.bf16.gmra.mrb[196].mxu0 %vm863_vm6, %v14222_v50  ;;  %v13148_v30 = vcombine.low %v6214_v2, %v6217_v41  ;;  %v13154_v35 = vcombine.low %v6221_v0, %v6224_v28  ;;  %v4761_v47 = vsel %vm10378_vm11, %v4753_v42, %v4760_v54  ;;  %4923 = vst [vmem:[#allocation3 + $0xc0] sm:$0xf] %v4922_v38  ;;  %v6255_v29 = vrot.slane %v12874_v17, 5  ;;  %v13237_v42 = vld [vmem:[%s13891_s4 + $0x20] sm:$0xf] }
 0x30f   : > { %9790 = vmatprep.mubr.msk.bf16.mxu0 %vm863_vm6, %v14223_v40  ;;  %9849 = vmatpush3.bf16.msra.mxu0 %v7243_v32  ;;  %4924 = vst.msk [vmem:[#allocation3 + $0xc4] sm:$0xf] %vm4339_vm2, %v4761_v47  ;;  %v4926_v1 = vsel %vm12016_vm8, %v4762_v36, %v4925_v55  ;;  %v6262_v13 = vrot.slane %v12890_v44, 5  ;;  %v6258_v37 = vrot.slane %v12949_v23, 5  ;;  %v6265_v17 = vrot.slane %v12964_v20, 5  ;;  %v14230_v20 = vld [vmem:[#allocation34_spill] sm:$0xff] }
 0x310   : > { %14224 = vst [vmem:[#allocation7_spill] sm:$0xff] %v13154_v35  ;;  %9761 = vmatmul.mubr.msk.bf16.gmra.mrb[172].mxu1 %vm863_vm6, %v13148_v30  ;;  %10000 = vmatprep.subr.msk.bf16.mxu0 %vm5175_vm0, %v13144_v49  ;;  %4927 = vst [vmem:[#allocation3 + $0xc8] sm:$0x1] %v4926_v1  ;;  %v6257_v43 = vrot.slane %v6255_v29, 4  ;;  %v8882_v44 = vrot.slane %v12872_v58, 9  ;;  %v6269_v54 = vrot.slane %v12933_v25, 5 }
 0x311   : > { %9764 = vmatprep.mubr.msk.bf16.mxu1 %vm863_vm6, %v13154_v35  ;;  %v6264_v51 = vrot.slane %v6262_v13, 4  ;;  %v8883_v34 = vrot.slane %v12896_v61, 9  ;;  %v6272_v59 = vrot.slane %v12995_v14, 5  ;;  %v8884_v41 = vrot.slane %v12947_v57, 9  ;;  %v14232_v14 = vld [vmem:[#allocation10_spill] sm:$0xff]  ;;  %v14235_v36 = vld [vmem:[#allocation11_spill] sm:$0xff] }
 0x312   : > { %v6259_v11 = vsel %vm10625_vm3, %v6257_v43, %v6258_v37  ;;  %v6256_v39 = vsel %vm10625_vm3, %v8882_v44, %v6255_v29  ;;  %v6271_v61 = vrot.slane %v6269_v54, 4  ;;  %v14233_v57 = vld [vmem:[#allocation26_spill] sm:$0xff]  ;;  %v7513_v28 = vsel %vm5175_vm0, %v13006_v7, 0  ;;  %v14236_v32 = vld [vmem:[#allocation27_spill] sm:$0xff]  ;;  %v14238_v47 = vld [vmem:[#allocation13_spill] sm:$0xff] }
 0x313   : > { %v6266_v26 = vsel %vm10625_vm3, %v6264_v51, %v6265_v17  ;;  %v13200_v23 = vcombine.low %v6256_v39, %v6259_v11  ;;  %v6263_v58 = vsel %vm10625_vm3, %v8883_v34, %v6262_v13  ;;  %v6270_v56 = vsel %vm10625_vm3, %v8884_v41, %v6269_v54  ;;  %v14237_v55 = vld [vmem:[#allocation31_spill] sm:$0xff]  ;;  %v5016_v38 = vld [vmem:[#allocation5 + $0x10] sm:$0xff]  ;;  %v5014_v1 = vld [vmem:[#allocation5] sm:$0xff] }
 0x314   : > { %v13206_v25 = vcombine.low %v6263_v58, %v6266_v26  ;;  %v6273_v46 = vsel %vm10625_vm3, %v6271_v61, %v6272_v59  ;;  %v7805_v29 = vsel %vm5175_vm0, %v13144_v49, 0  ;;  %v5017_v43 = vld [vmem:[#allocation5 + $0x18] sm:$0xff]  ;;  %v5015_v17 = vld [vmem:[#allocation5 + $0x8] sm:$0xff]  ;;  %v14239_v34 = vld [vmem:[#allocation18_spill] sm:$0xff] }
 0x315   : > { %v13220_v62 = vcombine.low %v6270_v56, %v6273_v46  ;;  %v13247_v7 = vld [vmem:[#allocation3 + $0xc0] sm:$0xf]  ;;  %v14240_v26 = vld [vmem:[#allocation40_spill] sm:$0xff]  ;;  %v14241_v39 = vld [vmem:[#allocation42_spill] sm:$0xff] }
 0x316   : > { %9791 = vmatmul.mubr.msk.bf16.gmra.mrb[200].mxu0 %vm863_vm6, %v14225_v16  ;;  %v13241_v2 = vld [vmem:[#allocation3 + $0xc4] sm:$0xf]  ;;  %v14243_v61 = vld [vmem:[#allocation29_spill] sm:$0xff]  ;;  %v14244_v59 = vld [vmem:[#allocation22_spill] sm:$0xff]  ;;  %v6903_v56 = vshrl.u32 %v13247_v7, 16 }
 0x317   : > { %9794 = vmatprep.mubr.msk.bf16.mxu0 %vm863_vm6, %v14226_v22  ;;  %v13251_v0 = vcombine.low %v13247_v7, %v13241_v2  ;;  %v14242_v58 = vld [vmem:[#allocation43_spill] sm:$0xff]  ;;  %v6916_v41 = vshrl.u32 %v13241_v2, 16  ;;  %v6912_v46 = vshll.u32 %v13241_v2, 16 }
 0x318   : > { %9765 = vmatmul.mubr.msk.bf16.gmra.mrb[176].mxu1 %vm863_vm6, %v13104_v12 }
 0x319   : > { %9768 = vmatprep.mubr.msk.bf16.mxu1 %vm863_vm6, %v13112_v9 }
 0x31e   : > { %9795 = vmatmul.mubr.msk.bf16.gmra.mrb[204].mxu0 %vm863_vm6, %v14227_v10 }
 0x31f   : > { %9798 = vmatprep.mubr.msk.bf16.mxu0 %vm863_vm6, %v14228_v45 }
 0x320   : > { %9769 = vmatmul.mubr.msk.bf16.gmra.mrb[180].mxu1 %vm863_vm6, %v13125_v4 }
 0x321   : > { %9772 = vmatprep.mubr.msk.bf16.mxu1 %vm863_vm6, %v13133_v60 }
 0x326   : > { %9799 = vmatmul.mubr.msk.bf16.gmra.mrb[208].mxu0 %vm863_vm6, %v14229_v15 }
 0x327   : > { %9802 = vmatprep.mubr.msk.bf16.mxu0 %vm863_vm6, %v14230_v20 }
 0x328   : > { %9773 = vmatmul.mubr.msk.bf16.gmra.mrb[184].mxu1 %vm863_vm6, %v13200_v23 }
 0x329   : > { %9776 = vmatprep.mubr.msk.bf16.mxu1 %vm863_vm6, %v13206_v25 }
 0x32e   : > { %9803 = vmatmul.mubr.msk.bf16.gmra.mrb[212].mxu0 %vm863_vm6, %v14231_v31 }
 0x32f   : > { %9806 = vmatprep.mubr.msk.bf16.mxu0 %vm863_vm6, %v12886_v19 }
 0x330   : > { %9777 = vmatmul.mubr.msk.bf16.gmra.mrb[188].mxu1 %vm863_vm6, %v13220_v62 }
 0x331   : > { %9816 = vmatprep.mubr.msk.bf16.mxu1 %vm863_vm6, %v14232_v14  ;;  %v6906_v14 = vshll.u32 %v13247_v7, 16 }
 0x336   : > { %9807 = vmatmul.mubr.msk.bf16.gmra.mrb[216].mxu0 %vm863_vm6, %v14233_v57 }
 0x337   : > { %9810 = vmatprep.mubr.msk.bf16.mxu0 %vm863_vm6, %v14234_v24 }
 0x338   : > { %9817 = vmatmul.mubr.msk.bf16.vlgmr.msra.gmra.mrb[192].mxu1 %vm863_vm6, %v14235_v36 }
 0x339   : > { %9883 = vmatpush3.bf16.msra.mxu1 %v7513_v28  ;;  %9820 = vmatprep.mubr.msk.bf16.mxu1 %vm863_vm6, %v14236_v32  ;;  %v6914_v28 = vrot.slane %v6912_v46, 5 }
 0x33a   : > { %10001 = vmatprep.subr.msk.bf16.mxu1 %vm5175_vm0, %v13237_v42 }
 0x33e   : > { %9811 = vmatmul.mubr.msk.bf16.gmra.mrb[220].mxu0 %vm863_vm6, %v13251_v0 }
 0x33f   : > { %9850 = vmatprep.mubr.msk.bf16.mxu0 %vm863_vm6, %v12997_v5 }
 0x340   : > { %9821 = vmatmul.mubr.msk.bf16.gmra.mrb[196].mxu1 %vm863_vm6, %v14237_v55 }
 0x341   : > { %9824 = vmatprep.mubr.msk.bf16.mxu1 %vm863_vm6, %v14238_v47  ;;  %v9682_v13 = vpop.f32.mrb[128].mxu1 }
 0x342   : > { %v5342_v51 = vadd.f32 %v9682_v13, %v5016_v38  ;;  %v5213_v37 = vpop.f32.mrb[129].mxu1  ;;  %v6918_v38 = vrot.slane %v6916_v41, 4  ;;  %v6908_v13 = vrot.slane %v6906_v14, 5 }
 0x343   : > { %v5340_v5 = vadd.f32 %v5213_v37, %v5014_v1  ;;  %v9683_v44 = vpop.f32.mrb[130].mxu1  ;;  %v14245_v1 = vld [vmem:[#allocation6_spill] sm:$0xff] }
 0x344   : > { %5374 = vst.msk [vmem:[#allocation5 + $0x10] sm:$0xff] %vm863_vm6, %v5342_v51  ;;  %v5343_v11 = vadd.f32 %v9683_v44, %v5017_v43  ;;  %v5216_v54 = vpop.f32.mrb[131].mxu1  ;;  %v4978_v43 = vld [vmem:[#allocation3 + $0xc8] sm:$0x1]  ;;  %v6919_v51 = vor.u32 %v6918_v38, %v6914_v28 }
 0x345   : > { %5372 = vst.msk [vmem:[#allocation5] sm:$0xff] %vm863_vm6, %v5340_v5  ;;  %v5341_v49 = vadd.f32 %v5216_v54, %v5015_v17  ;;  %v6922_v17 = vshll.u32 %v4978_v43, 16  ;;  %v5020_v44 = vld [vmem:[#allocation5 + $0x30] sm:$0xff]  ;;  %v5018_v54 = vld [vmem:[#allocation5 + $0x20] sm:$0xff] }
 0x346   : > { %9851 = vmatmul.mubr.msk.bf16.vlgmr.msra.gmra.mrb[224].mxu0 %vm863_vm6, %v13020_v27  ;;  %5375 = vst.msk [vmem:[#allocation5 + $0x18] sm:$0xff] %vm863_vm6, %v5343_v11  ;;  %v6920_v5 = vrot.slane %v6919_v51, 4  ;;  %v14246_v11 = vld [vmem:[#allocation28_spill] sm:$0xff] }
 0x347   : > { %9854 = vmatprep.mubr.msk.bf16.mxu0 %vm863_vm6, %v13045_v53  ;;  %9917 = vmatpush3.bf16.msra.mxu0 %v7805_v29  ;;  %5373 = vst.msk [vmem:[#allocation5 + $0x8] sm:$0xff] %vm863_vm6, %v5341_v49  ;;  %v6905_v29 = vrot.slane %v6903_v56, 4  ;;  %v6924_v41 = vrot.slane %v6922_v17, 5  ;;  %v5021_v56 = vld [vmem:[#allocation5 + $0x38] sm:$0xff] }
 0x348   : > { %9825 = vmatmul.mubr.msk.bf16.gmra.mrb[200].mxu1 %vm863_vm6, %v14239_v34 }
 0x349   : > { %9828 = vmatprep.mubr.msk.bf16.mxu1 %vm863_vm6, %v14240_v26  ;;  %v6909_v37 = vor.u32 %v6908_v13, %v6905_v29  ;;  %v5019_v29 = vld [vmem:[#allocation5 + $0x28] sm:$0xff]  ;;  %v6925_v13 = vsel %vm10419_vm13, %v6920_v5, %v6924_v41 }
 0x34b   : > { %v6910_v49 = vrot.slane %v6909_v37, 4  ;;  %v5790_v37 = vld [vmem:[#allocation5 + $0x10] sm:$0xff] }
 0x34c   : > { %v5788_v5 = vld [vmem:[#allocation5] sm:$0xff] }
 0x34d   : > { %v5791_v41 = vld [vmem:[#allocation5 + $0x18] sm:$0xff] }
 0x34e   : > { %9855 = vmatmul.mubr.msk.bf16.gmra.mrb[228].mxu0 %vm863_vm6, %v13052_v63 }
 0x34f   : > { %9858 = vmatprep.mubr.msk.bf16.mxu0 %vm863_vm6, %v13077_v52 }
 0x350   : > { %9829 = vmatmul.mubr.msk.bf16.gmra.mrb[204].mxu1 %vm863_vm6, %v14241_v39 }
 0x351   : > { %9832 = vmatprep.mubr.msk.bf16.mxu1 %vm863_vm6, %v14242_v58 }
 0x356   : > { %9859 = vmatmul.mubr.msk.bf16.gmra.mrb[232].mxu0 %vm863_vm6, %v13081_v33 }
 0x357   : > { %9862 = vmatprep.mubr.msk.bf16.mxu0 %vm863_vm6, %v13148_v30 }
 0x358   : > { %9833 = vmatmul.mubr.msk.bf16.gmra.mrb[208].mxu1 %vm863_vm6, %v14243_v61 }
 0x359   : > { %9836 = vmatprep.mubr.msk.bf16.mxu1 %vm863_vm6, %v14244_v59 }
 0x35e   : > { %9863 = vmatmul.mubr.msk.bf16.gmra.mrb[236].mxu0 %vm863_vm6, %v13154_v35  ;;  %v6915_v35 = vsel %vm10419_vm13, %v6910_v49, %v6914_v28  ;;  %v5789_v28 = vld [vmem:[#allocation5 + $0x8] sm:$0xff] }
 0x35f   : > { %9866 = vmatprep.mubr.msk.bf16.mxu0 %vm863_vm6, %v13104_v12 }
 0x360   : > { %9837 = vmatmul.mubr.msk.bf16.gmra.mrb[212].mxu1 %vm863_vm6, %v14245_v1 }
 0x361   : > { %9840 = vmatprep.mubr.msk.bf16.mxu1 %vm863_vm6, %v12981_v6 }
 0x363   : > { %v9686_v46 = vpop.f32.mrb[132].mxu1 }
 0x364   : > { %v5346_v14 = vadd.f32 %v9686_v46, %v5020_v44  ;;  %v5229_v38 = vpop.f32.mrb[133].mxu1  ;;  %v13319_v44 = vcombine.low %v6915_v35, %v6925_v13  ;;  %v7197_v35 = vrot.slane %v13241_v2, 5  ;;  %v7200_v2 = vrot.slane %v4978_v43, 5  ;;  %v5022_v43 = vld [vmem:[#allocation5 + $0x40] sm:$0xff] }
 0x365   : > { %v9687_v51 = vpop.f32.mrb[134].mxu1 }
 0x366   : > { %9867 = vmatmul.mubr.msk.bf16.gmra.mrb[240].mxu0 %vm863_vm6, %v13112_v9  ;;  %5378 = vst.msk [vmem:[#allocation5 + $0x30] sm:$0xff] %vm863_vm6, %v5346_v14  ;;  %v5347_v9 = vadd.f32 %v9687_v51, %v5021_v56  ;;  %v5232_v12 = vpop.f32.mrb[135].mxu1 }
 0x367   : > { %9870 = vmatprep.mubr.msk.bf16.mxu0 %vm863_vm6, %v13125_v4  ;;  %v5344_v4 = vadd.f32 %v5229_v38, %v5018_v54  ;;  %v5345_v17 = vadd.f32 %v5232_v12, %v5019_v29  ;;  %v7199_v38 = vrot.slane %v7197_v35, 4  ;;  %v8954_v29 = vrot.slane %v13247_v7, 9  ;;  %v5025_v7 = vld [vmem:[#allocation5 + $0x58] sm:$0xff] }
 0x368   : > { %9841 = vmatmul.mubr.msk.bf16.gmra.mrb[216].mxu1 %vm863_vm6, %v14246_v11  ;;  %5379 = vst.msk [vmem:[#allocation5 + $0x38] sm:$0xff] %vm863_vm6, %v5347_v9  ;;  %v9716_v54 = vpop.f32.mrb[160].mxu0 }
 0x369   : > { %9844 = vmatprep.mubr.msk.bf16.mxu1 %vm863_vm6, %v13030_v48  ;;  %5376 = vst.msk [vmem:[#allocation5 + $0x20] sm:$0xff] %vm863_vm6, %v5344_v4  ;;  %5377 = vst.msk [vmem:[#allocation5 + $0x28] sm:$0xff] %vm863_vm6, %v5345_v17  ;;  %v6084_v4 = vadd.f32 %v9716_v54, %v5790_v37  ;;  %v5955_v12 = vpop.f32.mrb[161].mxu0  ;;  %v7201_v13 = vsel %vm10625_vm3, %v7199_v38, %v7200_v2  ;;  %v7198_v51 = vsel %vm10625_vm3, %v8954_v29, %v7197_v35  ;;  %v5024_v37 = vld [vmem:[#allocation5 + $0x50] sm:$0xff]  ;;  %v5029_v2 = vld [vmem:[#allocation5 + $0x78] sm:$0xff] }
 0x36a   : > { %v6082_v9 = vadd.f32 %v5955_v12, %v5788_v5  ;;  %v9717_v49 = vpop.f32.mrb[162].mxu0  ;;  %v5023_v5 = vld [vmem:[#allocation5 + $0x48] sm:$0xff] }
 0x36b   : > { %6116 = vst.msk [vmem:[#allocation5 + $0x10] sm:$0xff] %vm863_vm6, %v6084_v4  ;;  %v6085_v46 = vadd.f32 %v9717_v49, %v5791_v41  ;;  %v5958_v56 = vpop.f32.mrb[163].mxu0 }
 0x36c   : > { %6114 = vst.msk [vmem:[#allocation5] sm:$0xff] %vm863_vm6, %v6082_v9  ;;  %v6083_v14 = vadd.f32 %v5958_v56, %v5789_v28 }
 0x36d   : > { %6117 = vst.msk [vmem:[#allocation5 + $0x18] sm:$0xff] %vm863_vm6, %v6085_v46 }
 0x36e   : > { %9871 = vmatmul.mubr.msk.bf16.gmra.mrb[244].mxu0 %vm863_vm6, %v13133_v60  ;;  %6115 = vst.msk [vmem:[#allocation5 + $0x8] sm:$0xff] %vm863_vm6, %v6083_v14 }
 0x36f   : > { %9874 = vmatprep.mubr.msk.bf16.mxu0 %vm863_vm6, %v13200_v23  ;;  %v5795_v35 = vld [vmem:[#allocation5 + $0x38] sm:$0xff] }
 0x370   : > { %9845 = vmatmul.mubr.msk.bf16.gmra.mrb[220].mxu1 %vm863_vm6, %v13319_v44  ;;  %v5793_v46 = vld [vmem:[#allocation5 + $0x28] sm:$0xff] }
 0x371   : > { %9884 = vmatprep.mubr.msk.bf16.mxu1 %vm863_vm6, %v14214_v3  ;;  %v8081_v3 = vsel %vm5175_vm0, %v13237_v42, 0  ;;  %v13349_v42 = vcombine.low %v7198_v51, %v7201_v13 }
 0x376   : > { %9875 = vmatmul.mubr.msk.bf16.gmra.mrb[248].mxu0 %vm863_vm6, %v13206_v25 }
 0x377   : > { %9878 = vmatprep.mubr.msk.bf16.mxu0 %vm863_vm6, %v13220_v62 }
 0x378   : > { %9885 = vmatmul.mubr.msk.bf16.vlgmr.msra.gmra.mrb[224].mxu1 %vm863_vm6, %v14215_v8  ;;  %v9690_v8 = vpop.f32.mrb[136].mxu1 }
 0x379   : > { %9951 = vmatpush3.bf16.msra.mxu1 %v8081_v3  ;;  %9888 = vmatprep.mubr.msk.bf16.mxu1 %vm863_vm6, %v14222_v50  ;;  %v5350_v17 = vadd.f32 %v9690_v8, %v5024_v37  ;;  %v5245_v50 = vpop.f32.mrb[137].mxu1 }
 0x37a   : > { %v5348_v54 = vadd.f32 %v5245_v50, %v5022_v43  ;;  %v9691_v41 = vpop.f32.mrb[138].mxu1 }
 0x37b   : > { %5382 = vst.msk [vmem:[#allocation5 + $0x50] sm:$0xff] %vm863_vm6, %v5350_v17  ;;  %v5351_v4 = vadd.f32 %v9691_v41, %v5025_v7  ;;  %v5248_v12 = vpop.f32.mrb[139].mxu1 }
 0x37c   : > { %5380 = vst.msk [vmem:[#allocation5 + $0x40] sm:$0xff] %vm863_vm6, %v5348_v54 }
 0x37d   : > { %5383 = vst.msk [vmem:[#allocation5 + $0x58] sm:$0xff] %vm863_vm6, %v5351_v4  ;;  %v5032_v4 = vld [vmem:[#allocation5 + $0x90] sm:$0xff] }
 0x37e   : > { %9879 = vmatmul.mubr.msk.bf16.gmra.mrb[252].mxu0 %vm863_vm6, %v13349_v42 }
 0x37f   : > { %9918 = vmatprep.mubr.msk.bf16.mxu0 %vm863_vm6, %v14235_v36  ;;  %v5349_v36 = vadd.f32 %v5248_v12, %v5023_v5  ;;  %v5030_v12 = vld [vmem:[#allocation5 + $0x80] sm:$0xff] }
 0x380   : > { %9889 = vmatmul.mubr.msk.bf16.gmra.mrb[228].mxu1 %vm863_vm6, %v14223_v40  ;;  %v5794_v40 = vld [vmem:[#allocation5 + $0x30] sm:$0xff] }
 0x381   : > { %9892 = vmatprep.mubr.msk.bf16.mxu1 %vm863_vm6, %v14225_v16  ;;  %5381 = vst.msk [vmem:[#allocation5 + $0x48] sm:$0xff] %vm863_vm6, %v5349_v36  ;;  %v5792_v16 = vld [vmem:[#allocation5 + $0x20] sm:$0xff]  ;;  %v9720_v28 = vpop.f32.mrb[164].mxu0 }
 0x382   : > { %v6088_v9 = vadd.f32 %v9720_v28, %v5794_v40  ;;  %v5971_v49 = vpop.f32.mrb[165].mxu0  ;;  %v5033_v40 = vld [vmem:[#allocation5 + $0x98] sm:$0xff]  ;;  %v5031_v28 = vld [vmem:[#allocation5 + $0x88] sm:$0xff] }
 0x383   : > { %v6086_v56 = vadd.f32 %v5971_v49, %v5792_v16  ;;  %v9721_v14 = vpop.f32.mrb[166].mxu0 }
 0x384   : > { %6120 = vst.msk [vmem:[#allocation5 + $0x30] sm:$0xff] %vm863_vm6, %v6088_v9  ;;  %v5974_v38 = vpop.f32.mrb[167].mxu0  ;;  %v5799_v7 = vld [vmem:[#allocation5 + $0x58] sm:$0xff] }
 0x385   : > { %6118 = vst.msk [vmem:[#allocation5 + $0x20] sm:$0xff] %vm863_vm6, %v6086_v56  ;;  %v13411_v56 = vld [vmem:[#allocation3 + $0xd0] sm:$0xf] }
 0x386   : > { %9919 = vmatmul.mubr.msk.bf16.vlgmr.msra.gmra.mrb[0].mxu0 %vm863_vm6, %v14236_v32  ;;  %v6089_v32 = vadd.f32 %v9721_v14, %v5795_v35 }
 0x387   : > { %9922 = vmatprep.mubr.msk.bf16.mxu0 %vm863_vm6, %v14237_v55  ;;  %v6087_v55 = vadd.f32 %v5974_v38, %v5793_v46  ;;  %v13408_v46 = vld [vmem:[#allocation3 + $0xcc] sm:$0xf] }
 0x388   : > { %9893 = vmatmul.mubr.msk.bf16.gmra.mrb[232].mxu1 %vm863_vm6, %v14226_v22  ;;  %6121 = vst.msk [vmem:[#allocation5 + $0x38] sm:$0xff] %vm863_vm6, %v6089_v32  ;;  %v5028_v22 = vld [vmem:[#allocation5 + $0x70] sm:$0xff]  ;;  %v7744_v14 = vshll.u32 %v13408_v46, 16 }
 0x389   : > { %9896 = vmatprep.mubr.msk.bf16.mxu1 %vm863_vm6, %v14227_v10  ;;  %6119 = vst.msk [vmem:[#allocation5 + $0x28] sm:$0xff] %vm863_vm6, %v6087_v55  ;;  %v5026_v10 = vld [vmem:[#allocation5 + $0x60] sm:$0xff]  ;;  %v5036_v32 = vld [vmem:[#allocation5 + $0xb0] sm:$0xff]  ;;  %v7750_v55 = vshll.u32 %v13411_v56, 16 }
 0x38d   : > { %v9694_v3 = vpop.f32.mrb[140].mxu1 }
 0x38e   : > { %9923 = vmatmul.mubr.msk.bf16.gmra.mrb[4].mxu0 %vm863_vm6, %v14238_v47  ;;  %v5354_v29 = vadd.f32 %v9694_v3, %v5028_v22  ;;  %v5261_v13 = vpop.f32.mrb[141].mxu1  ;;  %v5027_v47 = vld [vmem:[#allocation5 + $0x68] sm:$0xff]  ;;  %v7754_v22 = vshrl.u32 %v13411_v56, 16 }
 0x38f   : > { %9926 = vmatprep.mubr.msk.bf16.mxu0 %vm863_vm6, %v14239_v34  ;;  %v5352_v51 = vadd.f32 %v5261_v13, %v5026_v10  ;;  %v9695_v37 = vpop.f32.mrb[142].mxu1  ;;  %v5034_v10 = vld [vmem:[#allocation5 + $0xa0] sm:$0xff] }
 0x390   : > { %9897 = vmatmul.mubr.msk.bf16.gmra.mrb[236].mxu1 %vm863_vm6, %v14228_v45  ;;  %5386 = vst.msk [vmem:[#allocation5 + $0x70] sm:$0xff] %vm863_vm6, %v5354_v29  ;;  %v5355_v34 = vadd.f32 %v9695_v37, %v5029_v2  ;;  %v5264_v43 = vpop.f32.mrb[143].mxu1  ;;  %v5037_v2 = vld [vmem:[#allocation5 + $0xb8] sm:$0xff] }
 0x391   : > { %9900 = vmatprep.mubr.msk.bf16.mxu1 %vm863_vm6, %v14229_v15  ;;  %5384 = vst.msk [vmem:[#allocation5 + $0x60] sm:$0xff] %vm863_vm6, %v5352_v51  ;;  %v5353_v45 = vadd.f32 %v5264_v43, %v5027_v47  ;;  %v5798_v15 = vld [vmem:[#allocation5 + $0x50] sm:$0xff] }
 0x392   : > { %5387 = vst.msk [vmem:[#allocation5 + $0x78] sm:$0xff] %vm863_vm6, %v5355_v34 }
 0x393   : > { %5385 = vst.msk [vmem:[#allocation5 + $0x68] sm:$0xff] %vm863_vm6, %v5353_v45 }
 0x394   : > { %v9724_v8 = vpop.f32.mrb[168].mxu0 }
 0x395   : > { %v6092_v17 = vadd.f32 %v9724_v8, %v5798_v15  ;;  %v5987_v50 = vpop.f32.mrb[169].mxu0  ;;  %v7746_v15 = vrot.slane %v7744_v14, 5 }
 0x396   : > { %9927 = vmatmul.mubr.msk.bf16.gmra.mrb[8].mxu0 %vm863_vm6, %v14240_v26  ;;  %v5796_v26 = vld [vmem:[#allocation5 + $0x40] sm:$0xff]  ;;  %v9725_v54 = vpop.f32.mrb[170].mxu0 }
 0x397   : > { %9930 = vmatprep.mubr.msk.bf16.mxu0 %vm863_vm6, %v14241_v39  ;;  %v5797_v39 = vld [vmem:[#allocation5 + $0x48] sm:$0xff]  ;;  %v6090_v5 = vadd.f32 %v5987_v50, %v5796_v26  ;;  %6124 = vst.msk [vmem:[#allocation5 + $0x50] sm:$0xff] %vm863_vm6, %v6092_v17  ;;  %v5990_v41 = vpop.f32.mrb[171].mxu0  ;;  %v5802_v38 = vld [vmem:[#allocation5 + $0x70] sm:$0xff]  ;;  %v7752_v17 = vrot.slane %v7750_v55, 5  ;;  %v7756_v50 = vrot.slane %v7754_v22, 4 }
 0x398   : > { %9901 = vmatmul.mubr.msk.bf16.gmra.mrb[240].mxu1 %vm863_vm6, %v14230_v20  ;;  %v6093_v20 = vadd.f32 %v9725_v54, %v5799_v7  ;;  %v5040_v55 = vld [vmem:[#allocation5 + $0xd0] sm:$0xff]  ;;  %v5038_v22 = vld [vmem:[#allocation5 + $0xc0] sm:$0xff] }
 0x399   : > { %9904 = vmatprep.mubr.msk.bf16.mxu1 %vm863_vm6, %v14231_v31  ;;  %6122 = vst.msk [vmem:[#allocation5 + $0x40] sm:$0xff] %vm863_vm6, %v6090_v5  ;;  %v6091_v31 = vadd.f32 %v5990_v41, %v5797_v39  ;;  %v5803_v13 = vld [vmem:[#allocation5 + $0x78] sm:$0xff]  ;;  %v8974_v41 = vcombine.low %v13408_v46, %v13411_v56 }
 0x39a   : > { %6125 = vst.msk [vmem:[#allocation5 + $0x58] sm:$0xff] %vm863_vm6, %v6093_v20  ;;  %v5801_v43 = vld [vmem:[#allocation5 + $0x68] sm:$0xff]  ;;  %v13429_v20 = vld [vmem:[#allocation3 + $0xd4] sm:$0x1] }
 0x39b   : > { %v9698_v36 = vpop.f32.mrb[144].mxu1  ;;  %6123 = vst.msk [vmem:[#allocation5 + $0x48] sm:$0xff] %vm863_vm6, %v6091_v31 }
 0x39c   : > { %v5277_v16 = vpop.f32.mrb[145].mxu1 }
 0x39d   : > { %v9699_v35 = vpop.f32.mrb[146].mxu1 }
 0x39e   : > { %9931 = vmatmul.mubr.msk.bf16.gmra.mrb[12].mxu0 %vm863_vm6, %v14242_v58  ;;  %v5358_v58 = vadd.f32 %v9698_v36, %v5032_v4  ;;  %v5359_v9 = vadd.f32 %v9699_v35, %v5033_v40  ;;  %v5280_v49 = vpop.f32.mrb[147].mxu1  ;;  %v7757_v36 = vor.u32 %v7756_v50, %v7752_v17  ;;  %v7760_v40 = vshll.u32 %v13429_v20, 16  ;;  %v5044_v50 = vld [vmem:[#allocation5 + $0xf0] sm:$0xff] }
 0x39f   : > { %9934 = vmatprep.mubr.msk.bf16.mxu0 %vm863_vm6, %v14243_v61  ;;  %v5356_v61 = vadd.f32 %v5277_v16, %v5030_v12 }
 0x3a0   : > { %9905 = vmatmul.mubr.msk.bf16.gmra.mrb[244].mxu1 %vm863_vm6, %v12886_v19  ;;  %5390 = vst.msk [vmem:[#allocation5 + $0x90] sm:$0xff] %vm863_vm6, %v5358_v58  ;;  %v5357_v19 = vadd.f32 %v5280_v49, %v5031_v28  ;;  %5391 = vst.msk [vmem:[#allocation5 + $0x98] sm:$0xff] %vm863_vm6, %v5359_v9  ;;  %v7758_v35 = vrot.slane %v7757_v36, 4  ;;  %v7762_v9 = vrot.slane %v7760_v40, 5 }
 0x3a1   : > { %9908 = vmatprep.mubr.msk.bf16.mxu1 %vm863_vm6, %v14233_v57  ;;  %5388 = vst.msk [vmem:[#allocation5 + $0x80] sm:$0xff] %vm863_vm6, %v5356_v61  ;;  %v7741_v57 = vshrl.u32 %v13408_v46, 16 }
 0x3a2   : > { %5389 = vst.msk [vmem:[#allocation5 + $0x88] sm:$0xff] %vm863_vm6, %v5357_v19 }
 0x3a3   : > { %v7743_v45 = vrot.slane %v7741_v57, 4 }
 0x3a5   : > { %v9702_v3 = vpop.f32.mrb[148].mxu1  ;;  %v7747_v12 = vor.u32 %v7746_v15, %v7743_v45 }
 0x3a6   : > { %9935 = vmatmul.mubr.msk.bf16.gmra.mrb[16].mxu0 %vm863_vm6, %v14244_v59  ;;  %v5800_v59 = vld [vmem:[#allocation5 + $0x60] sm:$0xff]  ;;  %v9728_v29 = vpop.f32.mrb[172].mxu0  ;;  %v5362_v47 = vadd.f32 %v9702_v3, %v5036_v32  ;;  %v5293_v51 = vpop.f32.mrb[149].mxu1 }
 0x3a7   : > { %9938 = vmatprep.mubr.msk.bf16.mxu0 %vm863_vm6, %v14245_v1  ;;  %v5035_v1 = vld [vmem:[#allocation5 + $0xa8] sm:$0xff]  ;;  %v6096_v37 = vadd.f32 %v9728_v29, %v5802_v38  ;;  %v6003_v34 = vpop.f32.mrb[173].mxu0  ;;  %v5360_v26 = vadd.f32 %v5293_v51, %v5034_v10  ;;  %v9703_v8 = vpop.f32.mrb[150].mxu1  ;;  %v5806_v58 = vld [vmem:[#allocation5 + $0x90] sm:$0xff]  ;;  %v5807_v28 = vld [vmem:[#allocation5 + $0x98] sm:$0xff]  ;;  %v7748_v61 = vrot.slane %v7747_v12, 4 }
 0x3a8   : > { %9909 = vmatmul.mubr.msk.bf16.gmra.mrb[248].mxu1 %vm863_vm6, %v14234_v24  ;;  %v6094_v7 = vadd.f32 %v6003_v34, %v5800_v59  ;;  %v9729_v24 = vpop.f32.mrb[174].mxu0  ;;  %5394 = vst.msk [vmem:[#allocation5 + $0xb0] sm:$0xff] %vm863_vm6, %v5362_v47  ;;  %v5363_v39 = vadd.f32 %v9703_v8, %v5037_v2  ;;  %v7763_v59 = vsel %vm10419_vm13, %v7758_v35, %v7762_v9  ;;  %v5041_v2 = vld [vmem:[#allocation5 + $0xd8] sm:$0xff] }
 0x3a9   : > { %9912 = vmatprep.mubr.msk.bf16.mxu1 %vm863_vm6, %v13251_v0  ;;  %v5296_v0 = vpop.f32.mrb[151].mxu1  ;;  %6128 = vst.msk [vmem:[#allocation5 + $0x70] sm:$0xff] %vm863_vm6, %v6096_v37  ;;  %v6097_v5 = vadd.f32 %v9729_v24, %v5803_v13  ;;  %v6006_v54 = vpop.f32.mrb[175].mxu0  ;;  %5392 = vst.msk [vmem:[#allocation5 + $0xa0] sm:$0xff] %vm863_vm6, %v5360_v26  ;;  %v5805_v19 = vld [vmem:[#allocation5 + $0x88] sm:$0xff]  ;;  %v7753_v10 = vsel %vm10419_vm13, %v7748_v61, %v7752_v17 }
 0x3aa   : > { %v5361_v4 = vadd.f32 %v5296_v0, %v5035_v1  ;;  %6126 = vst.msk [vmem:[#allocation5 + $0x60] sm:$0xff] %vm863_vm6, %v6094_v7  ;;  %v6095_v31 = vadd.f32 %v6006_v54, %v5801_v43  ;;  %5395 = vst.msk [vmem:[#allocation5 + $0xb8] sm:$0xff] %vm863_vm6, %v5363_v39  ;;  %v5039_v13 = vld [vmem:[#allocation5 + $0xc8] sm:$0xff]  ;;  %v8992_v51 = vcombine.low %v7753_v10, %v7763_v59  ;;  %v5042_v0 = vld [vmem:[#allocation5 + $0xe0] sm:$0xff] }
 0x3ab   : > { %6129 = vst.msk [vmem:[#allocation5 + $0x78] sm:$0xff] %vm863_vm6, %v6097_v5  ;;  %v5045_v54 = vld [vmem:[#allocation5 + $0xf8] sm:$0xff] }
 0x3ac   : > { %5393 = vst.msk [vmem:[#allocation5 + $0xa8] sm:$0xff] %vm863_vm6, %v5361_v4  ;;  %6127 = vst.msk [vmem:[#allocation5 + $0x68] sm:$0xff] %vm863_vm6, %v6095_v31  ;;  %v5043_v4 = vld [vmem:[#allocation5 + $0xe8] sm:$0xff]  ;;  %v6277_v59 = vld [vmem:[#allocation5 + $0x18] sm:$0xff] }
 0x3ae   : > { %9939 = vmatmul.mubr.msk.bf16.gmra.mrb[20].mxu0 %vm863_vm6, %v12981_v6  ;;  %v5804_v6 = vld [vmem:[#allocation5 + $0x80] sm:$0xff] }
 0x3af   : > { %9942 = vmatprep.mubr.msk.bf16.mxu0 %vm863_vm6, %v14246_v11  ;;  %v5810_v34 = vld [vmem:[#allocation5 + $0xb0] sm:$0xff] }
 0x3b0   : > { %9913 = vmatmul.mubr.msk.bf16.gmra.mrb[252].mxu1 %vm863_vm6, %v8974_v41  ;;  %v9732_v16 = vpop.f32.mrb[176].mxu0 }
 0x3b1   : > { %9952 = vmatprep.mubr.msk.bf16.mxu1 %vm863_vm6, %v13020_v27  ;;  %v6100_v49 = vadd.f32 %v9732_v16, %v5806_v58  ;;  %v6019_v11 = vpop.f32.mrb[177].mxu0 }
 0x3b2   : > { %v6098_v57 = vadd.f32 %v6019_v11, %v5804_v6  ;;  %v9733_v14 = vpop.f32.mrb[178].mxu0 }
 0x3b3   : > { %6132 = vst.msk [vmem:[#allocation5 + $0x90] sm:$0xff] %vm863_vm6, %v6100_v49  ;;  %v6101_v32 = vadd.f32 %v9733_v14, %v5807_v28  ;;  %v6022_v38 = vpop.f32.mrb[179].mxu0  ;;  %v5809_v26 = vld [vmem:[#allocation5 + $0xa8] sm:$0xff] }
 0x3b4   : > { %6130 = vst.msk [vmem:[#allocation5 + $0x80] sm:$0xff] %vm863_vm6, %v6098_v57  ;;  %v6099_v27 = vadd.f32 %v6022_v38, %v5805_v19  ;;  %v14247_v49 = vld [vmem:[#allocation7_spill] sm:$0xff] }
 0x3b5   : > { %6133 = vst.msk [vmem:[#allocation5 + $0x98] sm:$0xff] %vm863_vm6, %v6101_v32  ;;  %v9706_v3 = vpop.f32.mrb[152].mxu1  ;;  %v6276_v32 = vld [vmem:[#allocation5 + $0x10] sm:$0xff] }
 0x3b6   : > { %9943 = vmatmul.mubr.msk.bf16.gmra.mrb[24].mxu0 %vm863_vm6, %v13030_v48  ;;  %6131 = vst.msk [vmem:[#allocation5 + $0x88] sm:$0xff] %vm863_vm6, %v6099_v27  ;;  %v5366_v48 = vadd.f32 %v9706_v3, %v5040_v55  ;;  %v5309_v29 = vpop.f32.mrb[153].mxu1  ;;  %v6274_v27 = vld [vmem:[#allocation5] sm:$0xff] }
 0x3b7   : > { %9946 = vmatprep.mubr.msk.bf16.mxu0 %vm863_vm6, %v13319_v44  ;;  %v5364_v18 = vadd.f32 %v5309_v29, %v5038_v22  ;;  %v9707_v47 = vpop.f32.mrb[154].mxu1 }
 0x3b8   : > { %9953 = vmatmul.mubr.msk.bf16.vlgmr.msra.gmra.mrb[0].mxu1 %vm863_vm6, %v13045_v53  ;;  %5398 = vst.msk [vmem:[#allocation5 + $0xd0] sm:$0xff] %vm863_vm6, %v5366_v48  ;;  %v5367_v44 = vadd.f32 %v9707_v47, %v5041_v2  ;;  %v5312_v1 = vpop.f32.mrb[155].mxu1  ;;  %v5808_v53 = vld [vmem:[#allocation5 + $0xa0] sm:$0xff]  ;;  %v6275_v48 = vld [vmem:[#allocation5 + $0x8] sm:$0xff] }
 0x3b9   : > { %9956 = vmatprep.mubr.msk.bf16.mxu1 %vm863_vm6, %v13052_v63  ;;  %5396 = vst.msk [vmem:[#allocation5 + $0xc0] sm:$0xff] %vm863_vm6, %v5364_v18  ;;  %v5365_v37 = vadd.f32 %v5312_v1, %v5039_v13  ;;  %v5811_v63 = vld [vmem:[#allocation5 + $0xb8] sm:$0xff] }
 0x3ba   : > { %5399 = vst.msk [vmem:[#allocation5 + $0xd8] sm:$0xff] %vm863_vm6, %v5367_v44 }
 0x3bb   : > { %5397 = vst.msk [vmem:[#allocation5 + $0xc8] sm:$0xff] %vm863_vm6, %v5365_v37  ;;  %v14249_v37 = vld [vmem:[#allocation21_spill] sm:$0xff] }
 0x3be   : > { %9947 = vmatmul.mubr.msk.bf16.gmra.mrb[28].mxu0 %vm863_vm6, %v8992_v51  ;;  %v9736_v43 = vpop.f32.mrb[180].mxu0  ;;  %v14248_v51 = vld [vmem:[#allocation35_spill] sm:$0xff] }
 0x3bf   : > { %v6104_v45 = vadd.f32 %v9736_v43, %v5810_v34  ;;  %v6035_v15 = vpop.f32.mrb[181].mxu0  ;;  %v5814_v36 = vld [vmem:[#allocation5 + $0xd0] sm:$0xff] }
 0x3c0   : > { %v6102_v8 = vadd.f32 %v6035_v15, %v5808_v53  ;;  %v9737_v7 = vpop.f32.mrb[182].mxu0  ;;  %9957 = vmatmul.mubr.msk.bf16.gmra.mrb[4].mxu1 %vm863_vm6, %v13077_v52  ;;  %v5812_v58 = vld [vmem:[#allocation5 + $0xc0] sm:$0xff]  ;;  %v6280_v15 = vld [vmem:[#allocation5 + $0x30] sm:$0xff] }
 0x3c1   : > { %6136 = vst.msk [vmem:[#allocation5 + $0xb0] sm:$0xff] %vm863_vm6, %v6104_v45  ;;  %v6105_v24 = vadd.f32 %v9737_v7, %v5811_v63  ;;  %v6038_v17 = vpop.f32.mrb[183].mxu0  ;;  %9960 = vmatprep.mubr.msk.bf16.mxu1 %vm863_vm6, %v13081_v33  ;;  %v5815_v28 = vld [vmem:[#allocation5 + $0xd8] sm:$0xff] }
 0x3c2   : > { %6134 = vst.msk [vmem:[#allocation5 + $0xa0] sm:$0xff] %vm863_vm6, %v6102_v8  ;;  %v6103_v39 = vadd.f32 %v6038_v17, %v5809_v26  ;;  %v9710_v5 = vpop.f32.mrb[156].mxu1  ;;  %v5813_v9 = vld [vmem:[#allocation5 + $0xc8] sm:$0xff]  ;;  %v6278_v17 = vld [vmem:[#allocation5 + $0x20] sm:$0xff] }
 0x3c3   : > { %6137 = vst.msk [vmem:[#allocation5 + $0xb8] sm:$0xff] %vm863_vm6, %v6105_v24  ;;  %v5370_v41 = vadd.f32 %v9710_v5, %v5044_v50  ;;  %v5325_v52 = vpop.f32.mrb[157].mxu1  ;;  %v6281_v5 = vld [vmem:[#allocation5 + $0x38] sm:$0xff] }
 0x3c4   : > { %6135 = vst.msk [vmem:[#allocation5 + $0xa8] sm:$0xff] %vm863_vm6, %v6103_v39  ;;  %v5368_v31 = vadd.f32 %v5325_v52, %v5042_v0  ;;  %v9711_v12 = vpop.f32.mrb[158].mxu1  ;;  %v6279_v52 = vld [vmem:[#allocation5 + $0x28] sm:$0xff] }
 0x3c5   : > { %5402 = vst.msk [vmem:[#allocation5 + $0xf0] sm:$0xff] %vm863_vm6, %v5370_v41  ;;  %v5371_v33 = vadd.f32 %v9711_v12, %v5045_v54  ;;  %v5328_v40 = vpop.f32.mrb[159].mxu1 }
 0x3c6   : > { %5400 = vst.msk [vmem:[#allocation5 + $0xe0] sm:$0xff] %vm863_vm6, %v5368_v31  ;;  %v5369_v6 = vadd.f32 %v5328_v40, %v5043_v4 }
 0x3c7   : > { %5403 = vst.msk [vmem:[#allocation5 + $0xf8] sm:$0xff] %vm863_vm6, %v5371_v33  ;;  %v14250_v33 = vld [vmem:[#allocation8_spill] sm:$0xff] }
 0x3c8   : > { %9961 = vmatmul.mubr.msk.bf16.gmra.mrb[8].mxu1 %vm863_vm6, %v13148_v30  ;;  %5401 = vst.msk [vmem:[#allocation5 + $0xe8] sm:$0xff] %vm863_vm6, %v5369_v6 }
 0x3c9   : > { %v9740_v16 = vpop.f32.mrb[184].mxu0  ;;  %9964 = vmatprep.mubr.msk.bf16.mxu1 %vm863_vm6, %v14247_v49 }
 0x3ca   : > { %v6108_v61 = vadd.f32 %v9740_v16, %v5814_v36  ;;  %v6051_v35 = vpop.f32.mrb[185].mxu0  ;;  %v9750_v38 = vpop.f32.mrb[160].mxu1 }
 0x3cb   : > { %v6106_v11 = vadd.f32 %v6051_v35, %v5812_v58  ;;  %v9741_v19 = vpop.f32.mrb[186].mxu0  ;;  %v6570_v30 = vadd.f32 %v9750_v38, %v6276_v32  ;;  %v6441_v22 = vpop.f32.mrb[161].mxu1 }
 0x3cc   : > { %6140 = vst.msk [vmem:[#allocation5 + $0xd0] sm:$0xff] %vm863_vm6, %v6108_v61  ;;  %v6109_v57 = vadd.f32 %v9741_v19, %v5815_v28  ;;  %v6054_v14 = vpop.f32.mrb[187].mxu0  ;;  %v6568_v10 = vadd.f32 %v6441_v22, %v6274_v27  ;;  %v9751_v3 = vpop.f32.mrb[162].mxu1  ;;  %v5818_v13 = vld [vmem:[#allocation5 + $0xf0] sm:$0xff]  ;;  %v6283_v22 = vld [vmem:[#allocation5 + $0x48] sm:$0xff] }
 0x3cd   : > { %6138 = vst.msk [vmem:[#allocation5 + $0xc0] sm:$0xff] %vm863_vm6, %v6106_v11  ;;  %v6107_v55 = vadd.f32 %v6054_v14, %v5813_v9  ;;  %6602 = vst.msk [vmem:[#allocation5 + $0x10] sm:$0xff] %vm863_vm6, %v6570_v30  ;;  %v6571_v2 = vadd.f32 %v9751_v3, %v6277_v59  ;;  %v6444_v29 = vpop.f32.mrb[163].mxu1  ;;  %v5816_v47 = vld [vmem:[#allocation5 + $0xe0] sm:$0xff]  ;;  %v6284_v9 = vld [vmem:[#allocation5 + $0x50] sm:$0xff] }
 0x3ce   : > { %6141 = vst.msk [vmem:[#allocation5 + $0xd8] sm:$0xff] %vm863_vm6, %v6109_v57  ;;  %6600 = vst.msk [vmem:[#allocation5] sm:$0xff] %vm863_vm6, %v6568_v10  ;;  %v6569_v18 = vadd.f32 %v6444_v29, %v6275_v48  ;;  %v5819_v1 = vld [vmem:[#allocation5 + $0xf8] sm:$0xff]  ;;  %v6282_v14 = vld [vmem:[#allocation5 + $0x40] sm:$0xff]  ;;  %v8035_v48 = vrot.slane %v13411_v56, 5 }
 0x3cf   : > { %6139 = vst.msk [vmem:[#allocation5 + $0xc8] sm:$0xff] %vm863_vm6, %v6107_v55  ;;  %6603 = vst.msk [vmem:[#allocation5 + $0x18] sm:$0xff] %vm863_vm6, %v6571_v2  ;;  %v5817_v43 = vld [vmem:[#allocation5 + $0xe8] sm:$0xff]  ;;  %v6285_v30 = vld [vmem:[#allocation5 + $0x58] sm:$0xff] }
 0x3d0   : > { %9965 = vmatmul.mubr.msk.bf16.gmra.mrb[12].mxu1 %vm863_vm6, %v14248_v51  ;;  %6601 = vst.msk [vmem:[#allocation5 + $0x8] sm:$0xff] %vm863_vm6, %v6569_v18 }
 0x3d1   : > { %v9744_v44 = vpop.f32.mrb[188].mxu0  ;;  %9968 = vmatprep.mubr.msk.bf16.mxu1 %vm863_vm6, %v14249_v37  ;;  %v6288_v37 = vld [vmem:[#allocation5 + $0x70] sm:$0xff] }
 0x3d2   : > { %v6112_v34 = vadd.f32 %v9744_v44, %v5818_v13  ;;  %v6067_v53 = vpop.f32.mrb[189].mxu0 }
 0x3d3   : > { %v6110_v63 = vadd.f32 %v6067_v53, %v5816_v47  ;;  %v9745_v45 = vpop.f32.mrb[190].mxu0  ;;  %v9754_v26 = vpop.f32.mrb[164].mxu1  ;;  %v9009_v53 = vrot.slane %v13408_v46, 9 }
 0x3d4   : > { %6144 = vst.msk [vmem:[#allocation5 + $0xf0] sm:$0xff] %vm863_vm6, %v6112_v34  ;;  %v6113_v8 = vadd.f32 %v9745_v45, %v5819_v1  ;;  %v6070_v7 = vpop.f32.mrb[191].mxu0  ;;  %v6574_v24 = vadd.f32 %v9754_v26, %v6280_v15  ;;  %v6457_v50 = vpop.f32.mrb[165].mxu1  ;;  %v6634_v31 = vld [vmem:[#allocation5 + $0x10] sm:$0xff]  ;;  %v8037_v15 = vrot.slane %v8035_v48, 4  ;;  %v8038_v26 = vrot.slane %v13429_v20, 5 }
 0x3d5   : > { %6142 = vst.msk [vmem:[#allocation5 + $0xe0] sm:$0xff] %vm863_vm6, %v6110_v63  ;;  %v6111_v39 = vadd.f32 %v6070_v7, %v5817_v43  ;;  %v6572_v0 = vadd.f32 %v6457_v50, %v6278_v17  ;;  %v9755_v54 = vpop.f32.mrb[166].mxu1  ;;  %v6632_v36 = vld [vmem:[#allocation5] sm:$0xff]  ;;  %v6289_v7 = vld [vmem:[#allocation5 + $0x78] sm:$0xff]  ;;  %v6287_v17 = vld [vmem:[#allocation5 + $0x68] sm:$0xff] }
 0x3d6   : > { %6145 = vst.msk [vmem:[#allocation5 + $0xf8] sm:$0xff] %vm863_vm6, %v6113_v8  ;;  %6606 = vst.msk [vmem:[#allocation5 + $0x30] sm:$0xff] %vm863_vm6, %v6574_v24  ;;  %v6575_v41 = vadd.f32 %v9755_v54, %v6281_v5  ;;  %v6460_v4 = vpop.f32.mrb[167].mxu1  ;;  %v6635_v58 = vld [vmem:[#allocation5 + $0x18] sm:$0xff]  ;;  %v6286_v63 = vld [vmem:[#allocation5 + $0x60] sm:$0xff]  ;;  %v8036_v5 = vsel %vm10625_vm3, %v9009_v53, %v8035_v48  ;;  %v8039_v54 = vsel %vm10625_vm3, %v8037_v15, %v8038_v26 }
 0x3d7   : > { %6143 = vst.msk [vmem:[#allocation5 + $0xe8] sm:$0xff] %vm863_vm6, %v6111_v39  ;;  %6604 = vst.msk [vmem:[#allocation5 + $0x20] sm:$0xff] %vm863_vm6, %v6572_v0  ;;  %v6573_v12 = vadd.f32 %v6460_v4, %v6279_v52  ;;  %v6633_v28 = vld [vmem:[#allocation5 + $0x8] sm:$0xff] }
 0x3d8   : > { %6607 = vst.msk [vmem:[#allocation5 + $0x38] sm:$0xff] %vm863_vm6, %v6575_v41  ;;  %9969 = vmatmul.mubr.msk.bf16.gmra.mrb[16].mxu1 %vm863_vm6, %v14250_v33  ;;  %v6295_v53 = vld [vmem:[#allocation5 + $0xa8] sm:$0xff] }
 0x3d9   : > { %v9784_v40 = vpop.f32.mrb[192].mxu0  ;;  %6605 = vst.msk [vmem:[#allocation5 + $0x28] sm:$0xff] %vm863_vm6, %v6573_v12  ;;  %9972 = vmatprep.mubr.msk.bf16.mxu1 %vm863_vm6, %v13133_v60 }
 0x3da   : > { %v6840_v6 = vadd.f32 %v9784_v40, %v6634_v31  ;;  %v6711_v16 = vpop.f32.mrb[193].mxu0  ;;  %v6292_v40 = vld [vmem:[#allocation5 + $0x90] sm:$0xff] }
 0x3db   : > { %v6838_v61 = vadd.f32 %v6711_v16, %v6632_v36  ;;  %v9785_v35 = vpop.f32.mrb[194].mxu0  ;;  %v9758_v49 = vpop.f32.mrb[168].mxu1 }
 0x3dc   : > { %6872 = vst.msk [vmem:[#allocation5 + $0x10] sm:$0xff] %vm863_vm6, %v6840_v6  ;;  %v6841_v11 = vadd.f32 %v9785_v35, %v6635_v58  ;;  %v6714_v19 = vpop.f32.mrb[195].mxu0  ;;  %v6578_v57 = vadd.f32 %v9758_v49, %v6284_v9  ;;  %v6473_v32 = vpop.f32.mrb[169].mxu1  ;;  %v9011_v58 = vcombine.low %v8036_v5, %v8039_v54 }
 0x3dd   : > { %6870 = vst.msk [vmem:[#allocation5] sm:$0xff] %vm863_vm6, %v6838_v61  ;;  %v6839_v38 = vadd.f32 %v6714_v19, %v6633_v28  ;;  %v6576_v55 = vadd.f32 %v6473_v32, %v6282_v14  ;;  %v9759_v60 = vpop.f32.mrb[170].mxu1  ;;  %v6638_v59 = vld [vmem:[#allocation5 + $0x30] sm:$0xff]  ;;  %v6290_v28 = vld [vmem:[#allocation5 + $0x80] sm:$0xff]  ;;  %v6291_v19 = vld [vmem:[#allocation5 + $0x88] sm:$0xff] }
 0x3de   : > { %6873 = vst.msk [vmem:[#allocation5 + $0x18] sm:$0xff] %vm863_vm6, %v6841_v11  ;;  %6610 = vst.msk [vmem:[#allocation5 + $0x50] sm:$0xff] %vm863_vm6, %v6578_v57  ;;  %v6579_v27 = vadd.f32 %v9759_v60, %v6285_v30  ;;  %v6476_v10 = vpop.f32.mrb[171].mxu1  ;;  %v6636_v2 = vld [vmem:[#allocation5 + $0x20] sm:$0xff] }
 0x3df   : > { %6871 = vst.msk [vmem:[#allocation5 + $0x8] sm:$0xff] %vm863_vm6, %v6839_v38  ;;  %6608 = vst.msk [vmem:[#allocation5 + $0x40] sm:$0xff] %vm863_vm6, %v6576_v55  ;;  %v6577_v3 = vadd.f32 %v6476_v10, %v6283_v22  ;;  %v6639_v13 = vld [vmem:[#allocation5 + $0x38] sm:$0xff] }
 0x3e0   : > { %6611 = vst.msk [vmem:[#allocation5 + $0x58] sm:$0xff] %vm863_vm6, %v6579_v27  ;;  %9973 = vmatmul.mubr.msk.bf16.gmra.mrb[20].mxu1 %vm863_vm6, %v13200_v23  ;;  %v6637_v51 = vld [vmem:[#allocation5 + $0x28] sm:$0xff] }
 0x3e1   : > { %v9788_v29 = vpop.f32.mrb[196].mxu0  ;;  %6609 = vst.msk [vmem:[#allocation5 + $0x48] sm:$0xff] %vm863_vm6, %v6577_v3  ;;  %9976 = vmatprep.mubr.msk.bf16.mxu1 %vm863_vm6, %v13206_v25  ;;  %v6296_v3 = vld [vmem:[#allocation5 + $0xb0] sm:$0xff] }
 0x3e2   : > { %v6844_v18 = vadd.f32 %v9788_v29, %v6638_v59  ;;  %v6727_v47 = vpop.f32.mrb[197].mxu0 }
 0x3e3   : > { %v6842_v44 = vadd.f32 %v6727_v47, %v6636_v2  ;;  %v9789_v1 = vpop.f32.mrb[198].mxu0  ;;  %v9762_v34 = vpop.f32.mrb[172].mxu1 }
 0x3e4   : > { %6876 = vst.msk [vmem:[#allocation5 + $0x30] sm:$0xff] %vm863_vm6, %v6844_v18  ;;  %v6845_v23 = vadd.f32 %v9789_v1, %v6639_v13  ;;  %v6730_v56 = vpop.f32.mrb[199].mxu0  ;;  %v6582_v43 = vadd.f32 %v9762_v34, %v6288_v37  ;;  %v6489_v45 = vpop.f32.mrb[173].mxu1  ;;  %v6294_v18 = vld [vmem:[#allocation5 + $0xa0] sm:$0xff]  ;;  %v6297_v1 = vld [vmem:[#allocation5 + $0xb8] sm:$0xff] }
 0x3e5   : > { %6874 = vst.msk [vmem:[#allocation5 + $0x20] sm:$0xff] %vm863_vm6, %v6842_v44  ;;  %v6843_v25 = vadd.f32 %v6730_v56, %v6637_v51  ;;  %v6580_v8 = vadd.f32 %v6489_v45, %v6286_v63  ;;  %v9763_v24 = vpop.f32.mrb[174].mxu1  ;;  %v6642_v39 = vld [vmem:[#allocation5 + $0x50] sm:$0xff] }
 0x3e6   : > { %6877 = vst.msk [vmem:[#allocation5 + $0x38] sm:$0xff] %vm863_vm6, %v6845_v23  ;;  %6614 = vst.msk [vmem:[#allocation5 + $0x70] sm:$0xff] %vm863_vm6, %v6582_v43  ;;  %v6583_v46 = vadd.f32 %v9763_v24, %v6289_v7  ;;  %v6492_v50 = vpop.f32.mrb[175].mxu1  ;;  %v6640_v20 = vld [vmem:[#allocation5 + $0x40] sm:$0xff] }
 0x3e7   : > { %6875 = vst.msk [vmem:[#allocation5 + $0x28] sm:$0xff] %vm863_vm6, %v6843_v25  ;;  %6612 = vst.msk [vmem:[#allocation5 + $0x60] sm:$0xff] %vm863_vm6, %v6580_v8  ;;  %v6581_v0 = vadd.f32 %v6492_v50, %v6287_v17  ;;  %v6643_v52 = vld [vmem:[#allocation5 + $0x58] sm:$0xff] }
 0x3e8   : > { %6615 = vst.msk [vmem:[#allocation5 + $0x78] sm:$0xff] %vm863_vm6, %v6583_v46  ;;  %9977 = vmatmul.mubr.msk.bf16.gmra.mrb[24].mxu1 %vm863_vm6, %v13220_v62  ;;  %v6641_v12 = vld [vmem:[#allocation5 + $0x48] sm:$0xff]  ;;  %v6300_v46 = vld [vmem:[#allocation5 + $0xd0] sm:$0xff] }
 0x3e9   : > { %v9792_v41 = vpop.f32.mrb[200].mxu0  ;;  %6613 = vst.msk [vmem:[#allocation5 + $0x68] sm:$0xff] %vm863_vm6, %v6581_v0  ;;  %9980 = vmatprep.mubr.msk.bf16.mxu1 %vm863_vm6, %v13349_v42  ;;  %v6293_v42 = vld [vmem:[#allocation5 + $0x98] sm:$0xff] }
 0x3ea   : > { %v6848_v4 = vadd.f32 %v9792_v41, %v6642_v39  ;;  %v6743_v31 = vpop.f32.mrb[201].mxu0 }
 0x3eb   : > { %v6846_v36 = vadd.f32 %v6743_v31, %v6640_v20  ;;  %v9793_v33 = vpop.f32.mrb[202].mxu0  ;;  %v9766_v62 = vpop.f32.mrb[176].mxu1  ;;  %v6298_v20 = vld [vmem:[#allocation5 + $0xc0] sm:$0xff] }
 0x3ec   : > { %6880 = vst.msk [vmem:[#allocation5 + $0x50] sm:$0xff] %vm863_vm6, %v6848_v4  ;;  %v6849_v6 = vadd.f32 %v9793_v33, %v6643_v52  ;;  %v6746_v21 = vpop.f32.mrb[203].mxu0  ;;  %v6586_v16 = vadd.f32 %v9766_v62, %v6292_v40  ;;  %v6505_v61 = vpop.f32.mrb[177].mxu1  ;;  %v6301_v52 = vld [vmem:[#allocation5 + $0xd8] sm:$0xff] }
 0x3ed   : > { %6878 = vst.msk [vmem:[#allocation5 + $0x40] sm:$0xff] %vm863_vm6, %v6846_v36  ;;  %v6847_v35 = vadd.f32 %v6746_v21, %v6641_v12  ;;  %v6584_v9 = vadd.f32 %v6505_v61, %v6290_v28  ;;  %v9767_v49 = vpop.f32.mrb[178].mxu1  ;;  %v6646_v14 = vld [vmem:[#allocation5 + $0x70] sm:$0xff]  ;;  %v6299_v12 = vld [vmem:[#allocation5 + $0xc8] sm:$0xff] }
 0x3ee   : > { %6881 = vst.msk [vmem:[#allocation5 + $0x58] sm:$0xff] %vm863_vm6, %v6849_v6  ;;  %6618 = vst.msk [vmem:[#allocation5 + $0x90] sm:$0xff] %vm863_vm6, %v6586_v16  ;;  %v6587_v11 = vadd.f32 %v9767_v49, %v6293_v42  ;;  %v6508_v57 = vpop.f32.mrb[179].mxu1  ;;  %v6644_v38 = vld [vmem:[#allocation5 + $0x60] sm:$0xff] }
 0x3ef   : > { %6879 = vst.msk [vmem:[#allocation5 + $0x48] sm:$0xff] %vm863_vm6, %v6847_v35  ;;  %6616 = vst.msk [vmem:[#allocation5 + $0x80] sm:$0xff] %vm863_vm6, %v6584_v9  ;;  %v6585_v32 = vadd.f32 %v6508_v57, %v6291_v19  ;;  %v6647_v30 = vld [vmem:[#allocation5 + $0x78] sm:$0xff]  ;;  %v6304_v9 = vld [vmem:[#allocation5 + $0xf0] sm:$0xff] }
 0x3f0   : > { %6619 = vst.msk [vmem:[#allocation5 + $0x98] sm:$0xff] %vm863_vm6, %v6587_v11  ;;  %9981 = vmatmul.mubr.msk.bf16.gmra.mrb[28].mxu1 %vm863_vm6, %v9011_v58  ;;  %v6645_v22 = vld [vmem:[#allocation5 + $0x68] sm:$0xff]  ;;  %v6302_v57 = vld [vmem:[#allocation5 + $0xe0] sm:$0xff] }
 0x3f1   : > { %v9796_v55 = vpop.f32.mrb[204].mxu0  ;;  %6617 = vst.msk [vmem:[#allocation5 + $0x88] sm:$0xff] %vm863_vm6, %v6585_v32 }
 0x3f2   : > { %v6852_v60 = vadd.f32 %v9796_v55, %v6646_v14  ;;  %v6759_v27 = vpop.f32.mrb[205].mxu0  ;;  %v6305_v55 = vld [vmem:[#allocation5 + $0xf8] sm:$0xff] }
 0x3f3   : > { %v6850_v10 = vadd.f32 %v6759_v27, %v6644_v38  ;;  %v9797_v59 = vpop.f32.mrb[206].mxu0  ;;  %v9770_v2 = vpop.f32.mrb[180].mxu1  ;;  %v6303_v27 = vld [vmem:[#allocation5 + $0xe8] sm:$0xff] }
 0x3f4   : > { %6884 = vst.msk [vmem:[#allocation5 + $0x70] sm:$0xff] %vm863_vm6, %v6852_v60  ;;  %v6853_v48 = vadd.f32 %v9797_v59, %v6647_v30  ;;  %v6762_v29 = vpop.f32.mrb[207].mxu0  ;;  %v6590_v13 = vadd.f32 %v9770_v2, %v6296_v3  ;;  %v6521_v47 = vpop.f32.mrb[181].mxu1 }
 0x3f5   : > { %6882 = vst.msk [vmem:[#allocation5 + $0x60] sm:$0xff] %vm863_vm6, %v6850_v10  ;;  %v6851_v51 = vadd.f32 %v6762_v29, %v6645_v22  ;;  %v6588_v44 = vadd.f32 %v6521_v47, %v6294_v18  ;;  %v9771_v37 = vpop.f32.mrb[182].mxu1  ;;  %v6650_v56 = vld [vmem:[#allocation5 + $0x90] sm:$0xff] }
 0x3f6   : > { %6885 = vst.msk [vmem:[#allocation5 + $0x78] sm:$0xff] %vm863_vm6, %v6853_v48  ;;  %6622 = vst.msk [vmem:[#allocation5 + $0xb0] sm:$0xff] %vm863_vm6, %v6590_v13  ;;  %v6591_v34 = vadd.f32 %v9771_v37, %v6297_v1  ;;  %v6524_v23 = vpop.f32.mrb[183].mxu1  ;;  %v6648_v63 = vld [vmem:[#allocation5 + $0x80] sm:$0xff] }
 0x3f7   : > { %6883 = vst.msk [vmem:[#allocation5 + $0x68] sm:$0xff] %vm863_vm6, %v6851_v51  ;;  %6620 = vst.msk [vmem:[#allocation5 + $0xa0] sm:$0xff] %vm863_vm6, %v6588_v44  ;;  %v6589_v43 = vadd.f32 %v6524_v23, %v6295_v53  ;;  %v6651_v15 = vld [vmem:[#allocation5 + $0x98] sm:$0xff]  ;;  %v6928_v44 = vld [vmem:[#allocation5 + $0x10] sm:$0xff] }
 0x3f8   : > { %6623 = vst.msk [vmem:[#allocation5 + $0xb8] sm:$0xff] %vm863_vm6, %v6591_v34  ;;  %v6649_v8 = vld [vmem:[#allocation5 + $0x88] sm:$0xff]  ;;  %v6926_v23 = vld [vmem:[#allocation5] sm:$0xff] }
 0x3f9   : > { %v9800_v45 = vpop.f32.mrb[208].mxu0  ;;  %6621 = vst.msk [vmem:[#allocation5 + $0xa8] sm:$0xff] %vm863_vm6, %v6589_v43 }
 0x3fa   : > { %v6856_v26 = vadd.f32 %v9800_v45, %v6650_v56  ;;  %v6775_v25 = vpop.f32.mrb[209].mxu0  ;;  %v6929_v45 = vld [vmem:[#allocation5 + $0x18] sm:$0xff] }
 0x3fb   : > { %v6854_v7 = vadd.f32 %v6775_v25, %v6648_v63  ;;  %v9801_v24 = vpop.f32.mrb[210].mxu0  ;;  %v9774_v17 = vpop.f32.mrb[184].mxu1  ;;  %v6927_v25 = vld [vmem:[#allocation5 + $0x8] sm:$0xff] }
 0x3fc   : > { %6888 = vst.msk [vmem:[#allocation5 + $0x90] sm:$0xff] %vm863_vm6, %v6856_v26  ;;  %v6857_v50 = vadd.f32 %v9801_v24, %v6651_v15  ;;  %v6778_v39 = vpop.f32.mrb[211].mxu0  ;;  %v6594_v0 = vadd.f32 %v9774_v17, %v6300_v46  ;;  %v6537_v5 = vpop.f32.mrb[185].mxu1 }
 0x3fd   : > { %6886 = vst.msk [vmem:[#allocation5 + $0x80] sm:$0xff] %vm863_vm6, %v6854_v7  ;;  %v6855_v54 = vadd.f32 %v6778_v39, %v6649_v8  ;;  %v6592_v41 = vadd.f32 %v6537_v5, %v6298_v20  ;;  %v9775_v4 = vpop.f32.mrb[186].mxu1  ;;  %v6654_v33 = vld [vmem:[#allocation5 + $0xb0] sm:$0xff] }
 0x3fe   : > { %6889 = vst.msk [vmem:[#allocation5 + $0x98] sm:$0xff] %vm863_vm6, %v6857_v50  ;;  %6626 = vst.msk [vmem:[#allocation5 + $0xd0] sm:$0xff] %vm863_vm6, %v6594_v0  ;;  %v6595_v31 = vadd.f32 %v9775_v4, %v6301_v52  ;;  %v6540_v36 = vpop.f32.mrb[187].mxu1  ;;  %v6652_v62 = vld [vmem:[#allocation5 + $0xa0] sm:$0xff] }
 0x3ff   : > { %6887 = vst.msk [vmem:[#allocation5 + $0x88] sm:$0xff] %vm863_vm6, %v6855_v54  ;;  %6624 = vst.msk [vmem:[#allocation5 + $0xc0] sm:$0xff] %vm863_vm6, %v6592_v41  ;;  %v6593_v40 = vadd.f32 %v6540_v36, %v6299_v12  ;;  %v6655_v6 = vld [vmem:[#allocation5 + $0xb8] sm:$0xff]  ;;  %v6932_v41 = vld [vmem:[#allocation5 + $0x30] sm:$0xff] }
 0x400   : > { %6627 = vst.msk [vmem:[#allocation5 + $0xd8] sm:$0xff] %vm863_vm6, %v6595_v31  ;;  %v6653_v28 = vld [vmem:[#allocation5 + $0xa8] sm:$0xff]  ;;  %v6930_v36 = vld [vmem:[#allocation5 + $0x20] sm:$0xff] }
 0x401   : > { %v9804_v58 = vpop.f32.mrb[212].mxu0  ;;  %6625 = vst.msk [vmem:[#allocation5 + $0xc8] sm:$0xff] %vm863_vm6, %v6593_v40 }
 0x402   : > { %v6860_v21 = vadd.f32 %v9804_v58, %v6654_v33  ;;  %v6791_v16 = vpop.f32.mrb[213].mxu0  ;;  %v6933_v58 = vld [vmem:[#allocation5 + $0x38] sm:$0xff] }
 0x403   : > { %v6858_v61 = vadd.f32 %v6791_v16, %v6652_v62  ;;  %v9805_v35 = vpop.f32.mrb[214].mxu0  ;;  %v9778_v42 = vpop.f32.mrb[188].mxu1  ;;  %v6931_v16 = vld [vmem:[#allocation5 + $0x28] sm:$0xff] }
 0x404   : > { %6892 = vst.msk [vmem:[#allocation5 + $0xb0] sm:$0xff] %vm863_vm6, %v6860_v21  ;;  %v6861_v49 = vadd.f32 %v9805_v35, %v6655_v6  ;;  %v6794_v11 = vpop.f32.mrb[215].mxu0  ;;  %v6598_v19 = vadd.f32 %v9778_v42, %v6304_v9  ;;  %v6553_v14 = vpop.f32.mrb[189].mxu1 }
 0x405   : > { %6890 = vst.msk [vmem:[#allocation5 + $0xa0] sm:$0xff] %vm863_vm6, %v6858_v61  ;;  %v6859_v32 = vadd.f32 %v6794_v11, %v6653_v28  ;;  %v6596_v38 = vadd.f32 %v6553_v14, %v6302_v57  ;;  %v9779_v30 = vpop.f32.mrb[190].mxu1  ;;  %v6658_v10 = vld [vmem:[#allocation5 + $0xd0] sm:$0xff] }
 0x406   : > { %6893 = vst.msk [vmem:[#allocation5 + $0xb8] sm:$0xff] %vm863_vm6, %v6861_v49  ;;  %6630 = vst.msk [vmem:[#allocation5 + $0xf0] sm:$0xff] %vm863_vm6, %v6598_v19  ;;  %v6599_v60 = vadd.f32 %v9779_v30, %v6305_v55  ;;  %v6556_v22 = vpop.f32.mrb[191].mxu1  ;;  %v6656_v3 = vld [vmem:[#allocation5 + $0xc0] sm:$0xff] }
 0x407   : > { %6891 = vst.msk [vmem:[#allocation5 + $0xa8] sm:$0xff] %vm863_vm6, %v6859_v32  ;;  %6628 = vst.msk [vmem:[#allocation5 + $0xe0] sm:$0xff] %vm863_vm6, %v6596_v38  ;;  %v6597_v59 = vadd.f32 %v6556_v22, %v6303_v27  ;;  %v6659_v48 = vld [vmem:[#allocation5 + $0xd8] sm:$0xff]  ;;  %v6936_v38 = vld [vmem:[#allocation5 + $0x50] sm:$0xff] }
 0x408   : > { %6631 = vst.msk [vmem:[#allocation5 + $0xf8] sm:$0xff] %vm863_vm6, %v6599_v60  ;;  %v6657_v18 = vld [vmem:[#allocation5 + $0xc8] sm:$0xff]  ;;  %v6934_v22 = vld [vmem:[#allocation5 + $0x40] sm:$0xff] }
 0x409   : > { %v9808_v2 = vpop.f32.mrb[216].mxu0  ;;  %6629 = vst.msk [vmem:[#allocation5 + $0xe8] sm:$0xff] %vm863_vm6, %v6597_v59 }
 0x40a   : > { %v6864_v29 = vadd.f32 %v9808_v2, %v6658_v10  ;;  %v6807_v13 = vpop.f32.mrb[217].mxu0  ;;  %v6937_v2 = vld [vmem:[#allocation5 + $0x58] sm:$0xff] }
 0x40b   : > { %v6862_v47 = vadd.f32 %v6807_v13, %v6656_v3  ;;  %v9809_v51 = vpop.f32.mrb[218].mxu0  ;;  %v9818_v1 = vpop.f32.mrb[192].mxu1  ;;  %v6935_v13 = vld [vmem:[#allocation5 + $0x48] sm:$0xff] }
 0x40c   : > { %6896 = vst.msk [vmem:[#allocation5 + $0xd0] sm:$0xff] %vm863_vm6, %v6864_v29  ;;  %v6865_v37 = vadd.f32 %v9809_v51, %v6659_v48  ;;  %v6810_v34 = vpop.f32.mrb[219].mxu0  ;;  %v7132_v53 = vadd.f32 %v9818_v1, %v6928_v44  ;;  %v7003_v56 = vpop.f32.mrb[193].mxu1 }
 0x40d   : > { %6894 = vst.msk [vmem:[#allocation5 + $0xc0] sm:$0xff] %vm863_vm6, %v6862_v47  ;;  %v6863_v43 = vadd.f32 %v6810_v34, %v6657_v18  ;;  %v7130_v63 = vadd.f32 %v7003_v56, %v6926_v23  ;;  %v9819_v15 = vpop.f32.mrb[194].mxu1  ;;  %v6662_v7 = vld [vmem:[#allocation5 + $0xf0] sm:$0xff] }
 0x40e   : > { %6897 = vst.msk [vmem:[#allocation5 + $0xd8] sm:$0xff] %vm863_vm6, %v6865_v37  ;;  %7164 = vst.msk [vmem:[#allocation5 + $0x10] sm:$0xff] %vm863_vm6, %v7132_v53  ;;  %v7133_v26 = vadd.f32 %v9819_v15, %v6929_v45  ;;  %v7006_v8 = vpop.f32.mrb[195].mxu1  ;;  %v6660_v46 = vld [vmem:[#allocation5 + $0xe0] sm:$0xff] }
 0x40f   : > { %6895 = vst.msk [vmem:[#allocation5 + $0xc8] sm:$0xff] %vm863_vm6, %v6863_v43  ;;  %7162 = vst.msk [vmem:[#allocation5] sm:$0xff] %vm863_vm6, %v7130_v63  ;;  %v7131_v24 = vadd.f32 %v7006_v8, %v6927_v25  ;;  %v6663_v50 = vld [vmem:[#allocation5 + $0xf8] sm:$0xff]  ;;  %v6940_v63 = vld [vmem:[#allocation5 + $0x70] sm:$0xff] }
 0x410   : > { %7165 = vst.msk [vmem:[#allocation5 + $0x18] sm:$0xff] %vm863_vm6, %v7133_v26  ;;  %v6661_v20 = vld [vmem:[#allocation5 + $0xe8] sm:$0xff]  ;;  %v6938_v8 = vld [vmem:[#allocation5 + $0x60] sm:$0xff] }
 0x411   : > { %v9812_v17 = vpop.f32.mrb[220].mxu0  ;;  %7163 = vst.msk [vmem:[#allocation5 + $0x8] sm:$0xff] %vm863_vm6, %v7131_v24 }
 0x412   : > { %v6868_v39 = vadd.f32 %v9812_v17, %v6662_v7  ;;  %v6823_v0 = vpop.f32.mrb[221].mxu0  ;;  %v6941_v17 = vld [vmem:[#allocation5 + $0x78] sm:$0xff] }
 0x413   : > { %v6866_v5 = vadd.f32 %v6823_v0, %v6660_v46  ;;  %v9813_v54 = vpop.f32.mrb[222].mxu0  ;;  %v9822_v52 = vpop.f32.mrb[196].mxu1  ;;  %v6939_v0 = vld [vmem:[#allocation5 + $0x68] sm:$0xff] }
 0x414   : > { %6900 = vst.msk [vmem:[#allocation5 + $0xf0] sm:$0xff] %vm863_vm6, %v6868_v39  ;;  %v6869_v4 = vadd.f32 %v9813_v54, %v6663_v50  ;;  %v6826_v31 = vpop.f32.mrb[223].mxu0  ;;  %v7136_v12 = vadd.f32 %v9822_v52, %v6932_v41  ;;  %v7019_v33 = vpop.f32.mrb[197].mxu1 }
 0x415   : > { %6898 = vst.msk [vmem:[#allocation5 + $0xe0] sm:$0xff] %vm863_vm6, %v6866_v5  ;;  %v6867_v40 = vadd.f32 %v6826_v31, %v6661_v20  ;;  %v7134_v62 = vadd.f32 %v7019_v33, %v6930_v36  ;;  %v9823_v6 = vpop.f32.mrb[198].mxu1  ;;  %v7204_v61 = vld [vmem:[#allocation5 + $0x10] sm:$0xff] }
 0x416   : > { %6901 = vst.msk [vmem:[#allocation5 + $0xf8] sm:$0xff] %vm863_vm6, %v6869_v4  ;;  %7168 = vst.msk [vmem:[#allocation5 + $0x30] sm:$0xff] %vm863_vm6, %v7136_v12  ;;  %v7137_v21 = vadd.f32 %v9823_v6, %v6933_v58  ;;  %v7022_v28 = vpop.f32.mrb[199].mxu1  ;;  %v7202_v9 = vld [vmem:[#allocation5] sm:$0xff] }
 0x417   : > { %6899 = vst.msk [vmem:[#allocation5 + $0xe8] sm:$0xff] %vm863_vm6, %v6867_v40  ;;  %7166 = vst.msk [vmem:[#allocation5 + $0x20] sm:$0xff] %vm863_vm6, %v7134_v62  ;;  %v7135_v35 = vadd.f32 %v7022_v28, %v6931_v16  ;;  %v7205_v49 = vld [vmem:[#allocation5 + $0x18] sm:$0xff]  ;;  %v6944_v62 = vld [vmem:[#allocation5 + $0x90] sm:$0xff] }
 0x418   : > { %7169 = vst.msk [vmem:[#allocation5 + $0x38] sm:$0xff] %vm863_vm6, %v7137_v21  ;;  %v7203_v57 = vld [vmem:[#allocation5 + $0x8] sm:$0xff]  ;;  %v6942_v28 = vld [vmem:[#allocation5 + $0x80] sm:$0xff] }
 0x419   : > { %v9852_v42 = vpop.f32.mrb[224].mxu0  ;;  %7167 = vst.msk [vmem:[#allocation5 + $0x28] sm:$0xff] %vm863_vm6, %v7135_v35 }
 0x41a   : > { %v7408_v11 = vadd.f32 %v9852_v42, %v7204_v61  ;;  %v7279_v19 = vpop.f32.mrb[225].mxu0  ;;  %v6945_v42 = vld [vmem:[#allocation5 + $0x98] sm:$0xff] }
 0x41b   : > { %v7406_v14 = vadd.f32 %v7279_v19, %v7202_v9  ;;  %v9853_v32 = vpop.f32.mrb[226].mxu0  ;;  %v9826_v55 = vpop.f32.mrb[200].mxu1  ;;  %v6943_v19 = vld [vmem:[#allocation5 + $0x88] sm:$0xff] }
 0x41c   : > { %7440 = vst.msk [vmem:[#allocation5 + $0x10] sm:$0xff] %vm863_vm6, %v7408_v11  ;;  %v7409_v30 = vadd.f32 %v9853_v32, %v7205_v49  ;;  %v7282_v60 = vpop.f32.mrb[227].mxu0  ;;  %v7140_v27 = vadd.f32 %v9826_v55, %v6936_v38  ;;  %v7035_v10 = vpop.f32.mrb[201].mxu1 }
 0x41d   : > { %7438 = vst.msk [vmem:[#allocation5] sm:$0xff] %vm863_vm6, %v7406_v14  ;;  %v7407_v59 = vadd.f32 %v7282_v60, %v7203_v57  ;;  %v7138_v3 = vadd.f32 %v7035_v10, %v6934_v22  ;;  %v9827_v48 = vpop.f32.mrb[202].mxu1  ;;  %v7208_v47 = vld [vmem:[#allocation5 + $0x30] sm:$0xff] }
 0x41e   : > { %7441 = vst.msk [vmem:[#allocation5 + $0x18] sm:$0xff] %vm863_vm6, %v7409_v30  ;;  %7172 = vst.msk [vmem:[#allocation5 + $0x50] sm:$0xff] %vm863_vm6, %v7140_v27  ;;  %v7141_v29 = vadd.f32 %v9827_v48, %v6937_v2  ;;  %v7038_v18 = vpop.f32.mrb[203].mxu1  ;;  %v7206_v44 = vld [vmem:[#allocation5 + $0x20] sm:$0xff] }
 0x41f   : > { %7439 = vst.msk [vmem:[#allocation5 + $0x8] sm:$0xff] %vm863_vm6, %v7407_v59  ;;  %7170 = vst.msk [vmem:[#allocation5 + $0x40] sm:$0xff] %vm863_vm6, %v7138_v3  ;;  %v7139_v51 = vadd.f32 %v7038_v18, %v6935_v13  ;;  %v7209_v37 = vld [vmem:[#allocation5 + $0x38] sm:$0xff]  ;;  %v6948_v3 = vld [vmem:[#allocation5 + $0xb0] sm:$0xff] }
 0x420   : > { %7173 = vst.msk [vmem:[#allocation5 + $0x58] sm:$0xff] %vm863_vm6, %v7141_v29  ;;  %v7207_v23 = vld [vmem:[#allocation5 + $0x28] sm:$0xff]  ;;  %v6946_v18 = vld [vmem:[#allocation5 + $0xa0] sm:$0xff] }
 0x421   : > { %v9856_v1 = vpop.f32.mrb[228].mxu0  ;;  %7171 = vst.msk [vmem:[#allocation5 + $0x48] sm:$0xff] %vm863_vm6, %v7139_v51 }
 0x422   : > { %v7412_v34 = vadd.f32 %v9856_v1, %v7208_v47  ;;  %v7295_v53 = vpop.f32.mrb[229].mxu0  ;;  %v6949_v1 = vld [vmem:[#allocation5 + $0xb8] sm:$0xff] }
 0x423   : > { %v7410_v56 = vadd.f32 %v7295_v53, %v7206_v44  ;;  %v9857_v43 = vpop.f32.mrb[230].mxu0  ;;  %v9830_v45 = vpop.f32.mrb[204].mxu1  ;;  %v6947_v53 = vld [vmem:[#allocation5 + $0xa8] sm:$0xff] }
 0x424   : > { %7444 = vst.msk [vmem:[#allocation5 + $0x30] sm:$0xff] %vm863_vm6, %v7412_v34  ;;  %v7413_v15 = vadd.f32 %v9857_v43, %v7209_v37  ;;  %v7298_v26 = vpop.f32.mrb[231].mxu0  ;;  %v7144_v25 = vadd.f32 %v9830_v45, %v6940_v63  ;;  %v7051_v7 = vpop.f32.mrb[205].mxu1 }
 0x425   : > { %7442 = vst.msk [vmem:[#allocation5 + $0x20] sm:$0xff] %vm863_vm6, %v7410_v56  ;;  %v7411_v24 = vadd.f32 %v7298_v26, %v7207_v23  ;;  %v7142_v46 = vadd.f32 %v7051_v7, %v6938_v8  ;;  %v9831_v50 = vpop.f32.mrb[206].mxu1  ;;  %v7212_v5 = vld [vmem:[#allocation5 + $0x50] sm:$0xff] }
 0x426   : > { %7445 = vst.msk [vmem:[#allocation5 + $0x38] sm:$0xff] %vm863_vm6, %v7413_v15  ;;  %7176 = vst.msk [vmem:[#allocation5 + $0x70] sm:$0xff] %vm863_vm6, %v7144_v25  ;;  %v7145_v39 = vadd.f32 %v9831_v50, %v6941_v17  ;;  %v7054_v20 = vpop.f32.mrb[207].mxu1  ;;  %v7210_v41 = vld [vmem:[#allocation5 + $0x40] sm:$0xff] }
 0x427   : > { %7443 = vst.msk [vmem:[#allocation5 + $0x28] sm:$0xff] %vm863_vm6, %v7411_v24  ;;  %7174 = vst.msk [vmem:[#allocation5 + $0x60] sm:$0xff] %vm863_vm6, %v7142_v46  ;;  %v7143_v54 = vadd.f32 %v7054_v20, %v6939_v0  ;;  %v7213_v4 = vld [vmem:[#allocation5 + $0x58] sm:$0xff]  ;;  %v6952_v46 = vld [vmem:[#allocation5 + $0xd0] sm:$0xff] }
 0x428   : > { %7177 = vst.msk [vmem:[#allocation5 + $0x78] sm:$0xff] %vm863_vm6, %v7145_v39  ;;  %v7211_v36 = vld [vmem:[#allocation5 + $0x48] sm:$0xff]  ;;  %v6950_v20 = vld [vmem:[#allocation5 + $0xc0] sm:$0xff] }
 0x429   : > { %v9860_v52 = vpop.f32.mrb[232].mxu0  ;;  %7175 = vst.msk [vmem:[#allocation5 + $0x68] sm:$0xff] %vm863_vm6, %v7143_v54 }
 0x42a   : > { %v7416_v31 = vadd.f32 %v9860_v52, %v7212_v5  ;;  %v7311_v12 = vpop.f32.mrb[233].mxu0  ;;  %v6953_v52 = vld [vmem:[#allocation5 + $0xd8] sm:$0xff] }
 0x42b   : > { %v7414_v33 = vadd.f32 %v7311_v12, %v7210_v41  ;;  %v9861_v40 = vpop.f32.mrb[234].mxu0  ;;  %v9834_v58 = vpop.f32.mrb[208].mxu1  ;;  %v6951_v12 = vld [vmem:[#allocation5 + $0xc8] sm:$0xff] }
 0x42c   : > { %7448 = vst.msk [vmem:[#allocation5 + $0x50] sm:$0xff] %vm863_vm6, %v7416_v31  ;;  %v7417_v6 = vadd.f32 %v9861_v40, %v7213_v4  ;;  %v7314_v21 = vpop.f32.mrb[235].mxu0  ;;  %v7148_v16 = vadd.f32 %v9834_v58, %v6944_v62  ;;  %v7067_v61 = vpop.f32.mrb[209].mxu1 }
 0x42d   : > { %7446 = vst.msk [vmem:[#allocation5 + $0x40] sm:$0xff] %vm863_vm6, %v7414_v33  ;;  %v7415_v35 = vadd.f32 %v7314_v21, %v7211_v36  ;;  %v7146_v9 = vadd.f32 %v7067_v61, %v6942_v28  ;;  %v9835_v49 = vpop.f32.mrb[210].mxu1  ;;  %v7216_v14 = vld [vmem:[#allocation5 + $0x70] sm:$0xff] }
 0x42e   : > { %7449 = vst.msk [vmem:[#allocation5 + $0x58] sm:$0xff] %vm863_vm6, %v7417_v6  ;;  %7180 = vst.msk [vmem:[#allocation5 + $0x90] sm:$0xff] %vm863_vm6, %v7148_v16  ;;  %v7149_v11 = vadd.f32 %v9835_v49, %v6945_v42  ;;  %v7070_v57 = vpop.f32.mrb[211].mxu1  ;;  %v7214_v38 = vld [vmem:[#allocation5 + $0x60] sm:$0xff] }
 0x42f   : > { %7447 = vst.msk [vmem:[#allocation5 + $0x48] sm:$0xff] %vm863_vm6, %v7415_v35  ;;  %7178 = vst.msk [vmem:[#allocation5 + $0x80] sm:$0xff] %vm863_vm6, %v7146_v9  ;;  %v7147_v32 = vadd.f32 %v7070_v57, %v6943_v19  ;;  %v7217_v30 = vld [vmem:[#allocation5 + $0x78] sm:$0xff]  ;;  %v6956_v9 = vld [vmem:[#allocation5 + $0xf0] sm:$0xff] }
 0x430   : > { %7181 = vst.msk [vmem:[#allocation5 + $0x98] sm:$0xff] %vm863_vm6, %v7149_v11  ;;  %v7215_v22 = vld [vmem:[#allocation5 + $0x68] sm:$0xff]  ;;  %v6954_v57 = vld [vmem:[#allocation5 + $0xe0] sm:$0xff] }
 0x431   : > { %v9864_v55 = vpop.f32.mrb[236].mxu0  ;;  %7179 = vst.msk [vmem:[#allocation5 + $0x88] sm:$0xff] %vm863_vm6, %v7147_v32 }
 0x432   : > { %v7420_v60 = vadd.f32 %v9864_v55, %v7216_v14  ;;  %v7327_v27 = vpop.f32.mrb[237].mxu0  ;;  %v6957_v55 = vld [vmem:[#allocation5 + $0xf8] sm:$0xff] }
 0x433   : > { %v7418_v10 = vadd.f32 %v7327_v27, %v7214_v38  ;;  %v9865_v59 = vpop.f32.mrb[238].mxu0  ;;  %v9838_v2 = vpop.f32.mrb[212].mxu1  ;;  %v6955_v27 = vld [vmem:[#allocation5 + $0xe8] sm:$0xff] }
 0x434   : > { %7452 = vst.msk [vmem:[#allocation5 + $0x70] sm:$0xff] %vm863_vm6, %v7420_v60  ;;  %v7421_v48 = vadd.f32 %v9865_v59, %v7217_v30  ;;  %v7330_v29 = vpop.f32.mrb[239].mxu0  ;;  %v7152_v13 = vadd.f32 %v9838_v2, %v6948_v3  ;;  %v7083_v47 = vpop.f32.mrb[213].mxu1 }
 0x435   : > { %7450 = vst.msk [vmem:[#allocation5 + $0x60] sm:$0xff] %vm863_vm6, %v7418_v10  ;;  %v7419_v51 = vadd.f32 %v7330_v29, %v7215_v22  ;;  %v7150_v44 = vadd.f32 %v7083_v47, %v6946_v18  ;;  %v9839_v37 = vpop.f32.mrb[214].mxu1  ;;  %v7220_v56 = vld [vmem:[#allocation5 + $0x90] sm:$0xff] }
 0x436   : > { %7453 = vst.msk [vmem:[#allocation5 + $0x78] sm:$0xff] %vm863_vm6, %v7421_v48  ;;  %7184 = vst.msk [vmem:[#allocation5 + $0xb0] sm:$0xff] %vm863_vm6, %v7152_v13  ;;  %v7153_v34 = vadd.f32 %v9839_v37, %v6949_v1  ;;  %v7086_v23 = vpop.f32.mrb[215].mxu1  ;;  %v7218_v63 = vld [vmem:[#allocation5 + $0x80] sm:$0xff] }
 0x437   : > { %7451 = vst.msk [vmem:[#allocation5 + $0x68] sm:$0xff] %vm863_vm6, %v7419_v51  ;;  %7182 = vst.msk [vmem:[#allocation5 + $0xa0] sm:$0xff] %vm863_vm6, %v7150_v44  ;;  %v7151_v43 = vadd.f32 %v7086_v23, %v6947_v53  ;;  %v7221_v15 = vld [vmem:[#allocation5 + $0x98] sm:$0xff]  ;;  %v7472_v44 = vld [vmem:[#allocation5 + $0x10] sm:$0xff] }
 0x438   : > { %7185 = vst.msk [vmem:[#allocation5 + $0xb8] sm:$0xff] %vm863_vm6, %v7153_v34  ;;  %v7219_v8 = vld [vmem:[#allocation5 + $0x88] sm:$0xff]  ;;  %v7470_v23 = vld [vmem:[#allocation5] sm:$0xff] }
 0x439   : > { %v9868_v45 = vpop.f32.mrb[240].mxu0  ;;  %7183 = vst.msk [vmem:[#allocation5 + $0xa8] sm:$0xff] %vm863_vm6, %v7151_v43 }
 0x43a   : > { %v7424_v26 = vadd.f32 %v9868_v45, %v7220_v56  ;;  %v7343_v25 = vpop.f32.mrb[241].mxu0  ;;  %v7473_v45 = vld [vmem:[#allocation5 + $0x18] sm:$0xff] }
 0x43b   : > { %v7422_v7 = vadd.f32 %v7343_v25, %v7218_v63  ;;  %v9869_v24 = vpop.f32.mrb[242].mxu0  ;;  %v9842_v17 = vpop.f32.mrb[216].mxu1  ;;  %v7471_v25 = vld [vmem:[#allocation5 + $0x8] sm:$0xff] }
 0x43c   : > { %7456 = vst.msk [vmem:[#allocation5 + $0x90] sm:$0xff] %vm863_vm6, %v7424_v26  ;;  %v7425_v50 = vadd.f32 %v9869_v24, %v7221_v15  ;;  %v7346_v39 = vpop.f32.mrb[243].mxu0  ;;  %v7156_v0 = vadd.f32 %v9842_v17, %v6952_v46  ;;  %v7099_v5 = vpop.f32.mrb[217].mxu1 }
 0x43d   : > { %7454 = vst.msk [vmem:[#allocation5 + $0x80] sm:$0xff] %vm863_vm6, %v7422_v7  ;;  %v7423_v54 = vadd.f32 %v7346_v39, %v7219_v8  ;;  %v7154_v41 = vadd.f32 %v7099_v5, %v6950_v20  ;;  %v9843_v4 = vpop.f32.mrb[218].mxu1  ;;  %v7224_v33 = vld [vmem:[#allocation5 + $0xb0] sm:$0xff] }
 0x43e   : > { %7457 = vst.msk [vmem:[#allocation5 + $0x98] sm:$0xff] %vm863_vm6, %v7425_v50  ;;  %7188 = vst.msk [vmem:[#allocation5 + $0xd0] sm:$0xff] %vm863_vm6, %v7156_v0  ;;  %v7157_v31 = vadd.f32 %v9843_v4, %v6953_v52  ;;  %v7102_v36 = vpop.f32.mrb[219].mxu1  ;;  %v7222_v62 = vld [vmem:[#allocation5 + $0xa0] sm:$0xff] }
 0x43f   : > { %7455 = vst.msk [vmem:[#allocation5 + $0x88] sm:$0xff] %vm863_vm6, %v7423_v54  ;;  %7186 = vst.msk [vmem:[#allocation5 + $0xc0] sm:$0xff] %vm863_vm6, %v7154_v41  ;;  %v7155_v40 = vadd.f32 %v7102_v36, %v6951_v12  ;;  %v7225_v6 = vld [vmem:[#allocation5 + $0xb8] sm:$0xff]  ;;  %v7476_v41 = vld [vmem:[#allocation5 + $0x30] sm:$0xff] }
 0x440   : > { %7189 = vst.msk [vmem:[#allocation5 + $0xd8] sm:$0xff] %vm863_vm6, %v7157_v31  ;;  %v7223_v28 = vld [vmem:[#allocation5 + $0xa8] sm:$0xff]  ;;  %v7474_v36 = vld [vmem:[#allocation5 + $0x20] sm:$0xff] }
 0x441   : > { %v9872_v58 = vpop.f32.mrb[244].mxu0  ;;  %7187 = vst.msk [vmem:[#allocation5 + $0xc8] sm:$0xff] %vm863_vm6, %v7155_v40 }
 0x442   : > { %v7428_v21 = vadd.f32 %v9872_v58, %v7224_v33  ;;  %v7359_v16 = vpop.f32.mrb[245].mxu0  ;;  %v7477_v58 = vld [vmem:[#allocation5 + $0x38] sm:$0xff] }
 0x443   : > { %v7426_v61 = vadd.f32 %v7359_v16, %v7222_v62  ;;  %v9873_v35 = vpop.f32.mrb[246].mxu0  ;;  %v9846_v42 = vpop.f32.mrb[220].mxu1  ;;  %v7475_v16 = vld [vmem:[#allocation5 + $0x28] sm:$0xff] }
 0x444   : > { %7460 = vst.msk [vmem:[#allocation5 + $0xb0] sm:$0xff] %vm863_vm6, %v7428_v21  ;;  %v7429_v49 = vadd.f32 %v9873_v35, %v7225_v6  ;;  %v7362_v11 = vpop.f32.mrb[247].mxu0  ;;  %v7160_v19 = vadd.f32 %v9846_v42, %v6956_v9  ;;  %v7115_v14 = vpop.f32.mrb[221].mxu1 }
 0x445   : > { %7458 = vst.msk [vmem:[#allocation5 + $0xa0] sm:$0xff] %vm863_vm6, %v7426_v61  ;;  %v7427_v32 = vadd.f32 %v7362_v11, %v7223_v28  ;;  %v7158_v38 = vadd.f32 %v7115_v14, %v6954_v57  ;;  %v9847_v30 = vpop.f32.mrb[222].mxu1  ;;  %v7228_v10 = vld [vmem:[#allocation5 + $0xd0] sm:$0xff] }
 0x446   : > { %7461 = vst.msk [vmem:[#allocation5 + $0xb8] sm:$0xff] %vm863_vm6, %v7429_v49  ;;  %7192 = vst.msk [vmem:[#allocation5 + $0xf0] sm:$0xff] %vm863_vm6, %v7160_v19  ;;  %v7161_v60 = vadd.f32 %v9847_v30, %v6957_v55  ;;  %v7118_v22 = vpop.f32.mrb[223].mxu1  ;;  %v7226_v3 = vld [vmem:[#allocation5 + $0xc0] sm:$0xff] }
 0x447   : > { %7459 = vst.msk [vmem:[#allocation5 + $0xa8] sm:$0xff] %vm863_vm6, %v7427_v32  ;;  %7190 = vst.msk [vmem:[#allocation5 + $0xe0] sm:$0xff] %vm863_vm6, %v7158_v38  ;;  %v7159_v59 = vadd.f32 %v7118_v22, %v6955_v27  ;;  %v7229_v48 = vld [vmem:[#allocation5 + $0xd8] sm:$0xff]  ;;  %v7480_v38 = vld [vmem:[#allocation5 + $0x50] sm:$0xff] }
 0x448   : > { %7193 = vst.msk [vmem:[#allocation5 + $0xf8] sm:$0xff] %vm863_vm6, %v7161_v60  ;;  %v7227_v18 = vld [vmem:[#allocation5 + $0xc8] sm:$0xff]  ;;  %v7478_v22 = vld [vmem:[#allocation5 + $0x40] sm:$0xff] }
 0x449   : > { %v9876_v2 = vpop.f32.mrb[248].mxu0  ;;  %7191 = vst.msk [vmem:[#allocation5 + $0xe8] sm:$0xff] %vm863_vm6, %v7159_v59 }
 0x44a   : > { %v7432_v29 = vadd.f32 %v9876_v2, %v7228_v10  ;;  %v7375_v13 = vpop.f32.mrb[249].mxu0  ;;  %v7481_v2 = vld [vmem:[#allocation5 + $0x58] sm:$0xff] }
 0x44b   : > { %v7430_v47 = vadd.f32 %v7375_v13, %v7226_v3  ;;  %v9877_v51 = vpop.f32.mrb[250].mxu0  ;;  %v9886_v1 = vpop.f32.mrb[224].mxu1  ;;  %v7479_v13 = vld [vmem:[#allocation5 + $0x48] sm:$0xff] }
 0x44c   : > { %7464 = vst.msk [vmem:[#allocation5 + $0xd0] sm:$0xff] %vm863_vm6, %v7432_v29  ;;  %v7433_v37 = vadd.f32 %v9877_v51, %v7229_v48  ;;  %v7378_v34 = vpop.f32.mrb[251].mxu0  ;;  %v7678_v53 = vadd.f32 %v9886_v1, %v7472_v44  ;;  %v7549_v56 = vpop.f32.mrb[225].mxu1 }
 0x44d   : > { %7462 = vst.msk [vmem:[#allocation5 + $0xc0] sm:$0xff] %vm863_vm6, %v7430_v47  ;;  %v7431_v43 = vadd.f32 %v7378_v34, %v7227_v18  ;;  %v7676_v63 = vadd.f32 %v7549_v56, %v7470_v23  ;;  %v9887_v15 = vpop.f32.mrb[226].mxu1  ;;  %v7232_v7 = vld [vmem:[#allocation5 + $0xf0] sm:$0xff] }
 0x44e   : > { %7465 = vst.msk [vmem:[#allocation5 + $0xd8] sm:$0xff] %vm863_vm6, %v7433_v37  ;;  %7710 = vst.msk [vmem:[#allocation5 + $0x10] sm:$0xff] %vm863_vm6, %v7678_v53  ;;  %v7679_v26 = vadd.f32 %v9887_v15, %v7473_v45  ;;  %v7552_v8 = vpop.f32.mrb[227].mxu1  ;;  %v7230_v46 = vld [vmem:[#allocation5 + $0xe0] sm:$0xff] }
 0x44f   : > { %7463 = vst.msk [vmem:[#allocation5 + $0xc8] sm:$0xff] %vm863_vm6, %v7431_v43  ;;  %7708 = vst.msk [vmem:[#allocation5] sm:$0xff] %vm863_vm6, %v7676_v63  ;;  %v7677_v24 = vadd.f32 %v7552_v8, %v7471_v25  ;;  %v7233_v50 = vld [vmem:[#allocation5 + $0xf8] sm:$0xff]  ;;  %v7484_v63 = vld [vmem:[#allocation5 + $0x70] sm:$0xff] }
 0x450   : > { %7711 = vst.msk [vmem:[#allocation5 + $0x18] sm:$0xff] %vm863_vm6, %v7679_v26  ;;  %v7231_v20 = vld [vmem:[#allocation5 + $0xe8] sm:$0xff]  ;;  %v7482_v8 = vld [vmem:[#allocation5 + $0x60] sm:$0xff] }
 0x451   : > { %v9880_v17 = vpop.f32.mrb[252].mxu0  ;;  %7709 = vst.msk [vmem:[#allocation5 + $0x8] sm:$0xff] %vm863_vm6, %v7677_v24 }
 0x452   : > { %v7436_v39 = vadd.f32 %v9880_v17, %v7232_v7  ;;  %v7391_v0 = vpop.f32.mrb[253].mxu0  ;;  %v7485_v17 = vld [vmem:[#allocation5 + $0x78] sm:$0xff] }
 0x453   : > { %v7434_v5 = vadd.f32 %v7391_v0, %v7230_v46  ;;  %v9881_v54 = vpop.f32.mrb[254].mxu0  ;;  %v9890_v52 = vpop.f32.mrb[228].mxu1  ;;  %v7483_v0 = vld [vmem:[#allocation5 + $0x68] sm:$0xff] }
 0x454   : > { %7468 = vst.msk [vmem:[#allocation5 + $0xf0] sm:$0xff] %vm863_vm6, %v7436_v39  ;;  %v7437_v4 = vadd.f32 %v9881_v54, %v7233_v50  ;;  %v7394_v31 = vpop.f32.mrb[255].mxu0  ;;  %v7682_v12 = vadd.f32 %v9890_v52, %v7476_v41  ;;  %v7565_v33 = vpop.f32.mrb[229].mxu1 }
 0x455   : > { %7466 = vst.msk [vmem:[#allocation5 + $0xe0] sm:$0xff] %vm863_vm6, %v7434_v5  ;;  %v7435_v40 = vadd.f32 %v7394_v31, %v7231_v20  ;;  %v7680_v62 = vadd.f32 %v7565_v33, %v7474_v36  ;;  %v9891_v6 = vpop.f32.mrb[230].mxu1  ;;  %v7766_v61 = vld [vmem:[#allocation5 + $0x10] sm:$0xff] }
 0x456   : > { %7469 = vst.msk [vmem:[#allocation5 + $0xf8] sm:$0xff] %vm863_vm6, %v7437_v4  ;;  %7714 = vst.msk [vmem:[#allocation5 + $0x30] sm:$0xff] %vm863_vm6, %v7682_v12  ;;  %v7683_v21 = vadd.f32 %v9891_v6, %v7477_v58  ;;  %v7568_v28 = vpop.f32.mrb[231].mxu1  ;;  %v7764_v9 = vld [vmem:[#allocation5] sm:$0xff] }
 0x457   : > { %7467 = vst.msk [vmem:[#allocation5 + $0xe8] sm:$0xff] %vm863_vm6, %v7435_v40  ;;  %7712 = vst.msk [vmem:[#allocation5 + $0x20] sm:$0xff] %vm863_vm6, %v7680_v62  ;;  %v7681_v35 = vadd.f32 %v7568_v28, %v7475_v16  ;;  %v7767_v49 = vld [vmem:[#allocation5 + $0x18] sm:$0xff]  ;;  %v7488_v62 = vld [vmem:[#allocation5 + $0x90] sm:$0xff] }
 0x458   : > { %7715 = vst.msk [vmem:[#allocation5 + $0x38] sm:$0xff] %vm863_vm6, %v7683_v21  ;;  %v7765_v57 = vld [vmem:[#allocation5 + $0x8] sm:$0xff]  ;;  %v7486_v28 = vld [vmem:[#allocation5 + $0x80] sm:$0xff] }
 0x459   : > { %v9920_v42 = vpop.f32.mrb[0].mxu0  ;;  %7713 = vst.msk [vmem:[#allocation5 + $0x28] sm:$0xff] %vm863_vm6, %v7681_v35 }
 0x45a   : > { %v7970_v11 = vadd.f32 %v9920_v42, %v7766_v61  ;;  %v7841_v19 = vpop.f32.mrb[1].mxu0  ;;  %v7489_v42 = vld [vmem:[#allocation5 + $0x98] sm:$0xff] }
 0x45b   : > { %v7968_v14 = vadd.f32 %v7841_v19, %v7764_v9  ;;  %v9921_v32 = vpop.f32.mrb[2].mxu0  ;;  %v9894_v55 = vpop.f32.mrb[232].mxu1  ;;  %v7487_v19 = vld [vmem:[#allocation5 + $0x88] sm:$0xff] }
 0x45c   : > { %8002 = vst.msk [vmem:[#allocation5 + $0x10] sm:$0xff] %vm863_vm6, %v7970_v11  ;;  %v7971_v30 = vadd.f32 %v9921_v32, %v7767_v49  ;;  %v7844_v60 = vpop.f32.mrb[3].mxu0  ;;  %v7686_v27 = vadd.f32 %v9894_v55, %v7480_v38  ;;  %v7581_v10 = vpop.f32.mrb[233].mxu1 }
 0x45d   : > { %8000 = vst.msk [vmem:[#allocation5] sm:$0xff] %vm863_vm6, %v7968_v14  ;;  %v7969_v59 = vadd.f32 %v7844_v60, %v7765_v57  ;;  %v7684_v3 = vadd.f32 %v7581_v10, %v7478_v22  ;;  %v9895_v48 = vpop.f32.mrb[234].mxu1  ;;  %v7770_v47 = vld [vmem:[#allocation5 + $0x30] sm:$0xff] }
 0x45e   : > { %8003 = vst.msk [vmem:[#allocation5 + $0x18] sm:$0xff] %vm863_vm6, %v7971_v30  ;;  %7718 = vst.msk [vmem:[#allocation5 + $0x50] sm:$0xff] %vm863_vm6, %v7686_v27  ;;  %v7687_v29 = vadd.f32 %v9895_v48, %v7481_v2  ;;  %v7584_v18 = vpop.f32.mrb[235].mxu1  ;;  %v7768_v44 = vld [vmem:[#allocation5 + $0x20] sm:$0xff] }
 0x45f   : > { %8001 = vst.msk [vmem:[#allocation5 + $0x8] sm:$0xff] %vm863_vm6, %v7969_v59  ;;  %7716 = vst.msk [vmem:[#allocation5 + $0x40] sm:$0xff] %vm863_vm6, %v7684_v3  ;;  %v7685_v51 = vadd.f32 %v7584_v18, %v7479_v13  ;;  %v7771_v37 = vld [vmem:[#allocation5 + $0x38] sm:$0xff]  ;;  %v7492_v3 = vld [vmem:[#allocation5 + $0xb0] sm:$0xff] }
 0x460   : > { %7719 = vst.msk [vmem:[#allocation5 + $0x58] sm:$0xff] %vm863_vm6, %v7687_v29  ;;  %v7769_v23 = vld [vmem:[#allocation5 + $0x28] sm:$0xff]  ;;  %v7490_v18 = vld [vmem:[#allocation5 + $0xa0] sm:$0xff] }
 0x461   : > { %v9924_v1 = vpop.f32.mrb[4].mxu0  ;;  %7717 = vst.msk [vmem:[#allocation5 + $0x48] sm:$0xff] %vm863_vm6, %v7685_v51 }
 0x462   : > { %v7974_v34 = vadd.f32 %v9924_v1, %v7770_v47  ;;  %v7857_v53 = vpop.f32.mrb[5].mxu0  ;;  %v7493_v1 = vld [vmem:[#allocation5 + $0xb8] sm:$0xff] }
 0x463   : > { %v7972_v56 = vadd.f32 %v7857_v53, %v7768_v44  ;;  %v9925_v43 = vpop.f32.mrb[6].mxu0  ;;  %v9898_v45 = vpop.f32.mrb[236].mxu1  ;;  %v7491_v53 = vld [vmem:[#allocation5 + $0xa8] sm:$0xff] }
 0x464   : > { %8006 = vst.msk [vmem:[#allocation5 + $0x30] sm:$0xff] %vm863_vm6, %v7974_v34  ;;  %v7975_v15 = vadd.f32 %v9925_v43, %v7771_v37  ;;  %v7860_v26 = vpop.f32.mrb[7].mxu0  ;;  %v7690_v25 = vadd.f32 %v9898_v45, %v7484_v63  ;;  %v7597_v7 = vpop.f32.mrb[237].mxu1 }
 0x465   : > { %8004 = vst.msk [vmem:[#allocation5 + $0x20] sm:$0xff] %vm863_vm6, %v7972_v56  ;;  %v7973_v24 = vadd.f32 %v7860_v26, %v7769_v23  ;;  %v7688_v46 = vadd.f32 %v7597_v7, %v7482_v8  ;;  %v9899_v50 = vpop.f32.mrb[238].mxu1  ;;  %v7774_v5 = vld [vmem:[#allocation5 + $0x50] sm:$0xff] }
 0x466   : > { %8007 = vst.msk [vmem:[#allocation5 + $0x38] sm:$0xff] %vm863_vm6, %v7975_v15  ;;  %7722 = vst.msk [vmem:[#allocation5 + $0x70] sm:$0xff] %vm863_vm6, %v7690_v25  ;;  %v7691_v39 = vadd.f32 %v9899_v50, %v7485_v17  ;;  %v7600_v20 = vpop.f32.mrb[239].mxu1  ;;  %v7772_v41 = vld [vmem:[#allocation5 + $0x40] sm:$0xff] }
 0x467   : > { %8005 = vst.msk [vmem:[#allocation5 + $0x28] sm:$0xff] %vm863_vm6, %v7973_v24  ;;  %7720 = vst.msk [vmem:[#allocation5 + $0x60] sm:$0xff] %vm863_vm6, %v7688_v46  ;;  %v7689_v54 = vadd.f32 %v7600_v20, %v7483_v0  ;;  %v7775_v4 = vld [vmem:[#allocation5 + $0x58] sm:$0xff]  ;;  %v7496_v46 = vld [vmem:[#allocation5 + $0xd0] sm:$0xff] }
 0x468   : > { %7723 = vst.msk [vmem:[#allocation5 + $0x78] sm:$0xff] %vm863_vm6, %v7691_v39  ;;  %v7773_v36 = vld [vmem:[#allocation5 + $0x48] sm:$0xff]  ;;  %v7494_v20 = vld [vmem:[#allocation5 + $0xc0] sm:$0xff] }
 0x469   : > { %v9928_v52 = vpop.f32.mrb[8].mxu0  ;;  %7721 = vst.msk [vmem:[#allocation5 + $0x68] sm:$0xff] %vm863_vm6, %v7689_v54 }
 0x46a   : > { %v7978_v31 = vadd.f32 %v9928_v52, %v7774_v5  ;;  %v7873_v12 = vpop.f32.mrb[9].mxu0  ;;  %v7497_v52 = vld [vmem:[#allocation5 + $0xd8] sm:$0xff] }
 0x46b   : > { %v7976_v33 = vadd.f32 %v7873_v12, %v7772_v41  ;;  %v9929_v40 = vpop.f32.mrb[10].mxu0  ;;  %v9902_v58 = vpop.f32.mrb[240].mxu1  ;;  %v7495_v12 = vld [vmem:[#allocation5 + $0xc8] sm:$0xff] }
 0x46c   : > { %8010 = vst.msk [vmem:[#allocation5 + $0x50] sm:$0xff] %vm863_vm6, %v7978_v31  ;;  %v7979_v6 = vadd.f32 %v9929_v40, %v7775_v4  ;;  %v7876_v21 = vpop.f32.mrb[11].mxu0  ;;  %v7694_v16 = vadd.f32 %v9902_v58, %v7488_v62  ;;  %v7613_v61 = vpop.f32.mrb[241].mxu1 }
 0x46d   : > { %8008 = vst.msk [vmem:[#allocation5 + $0x40] sm:$0xff] %vm863_vm6, %v7976_v33  ;;  %v7977_v35 = vadd.f32 %v7876_v21, %v7773_v36  ;;  %v7692_v9 = vadd.f32 %v7613_v61, %v7486_v28  ;;  %v9903_v49 = vpop.f32.mrb[242].mxu1  ;;  %v7778_v14 = vld [vmem:[#allocation5 + $0x70] sm:$0xff] }
 0x46e   : > { %8011 = vst.msk [vmem:[#allocation5 + $0x58] sm:$0xff] %vm863_vm6, %v7979_v6  ;;  %7726 = vst.msk [vmem:[#allocation5 + $0x90] sm:$0xff] %vm863_vm6, %v7694_v16  ;;  %v7695_v11 = vadd.f32 %v9903_v49, %v7489_v42  ;;  %v7616_v57 = vpop.f32.mrb[243].mxu1  ;;  %v7776_v38 = vld [vmem:[#allocation5 + $0x60] sm:$0xff] }
 0x46f   : > { %8009 = vst.msk [vmem:[#allocation5 + $0x48] sm:$0xff] %vm863_vm6, %v7977_v35  ;;  %7724 = vst.msk [vmem:[#allocation5 + $0x80] sm:$0xff] %vm863_vm6, %v7692_v9  ;;  %v7693_v32 = vadd.f32 %v7616_v57, %v7487_v19  ;;  %v7779_v30 = vld [vmem:[#allocation5 + $0x78] sm:$0xff]  ;;  %v7500_v9 = vld [vmem:[#allocation5 + $0xf0] sm:$0xff] }
 0x470   : > { %7727 = vst.msk [vmem:[#allocation5 + $0x98] sm:$0xff] %vm863_vm6, %v7695_v11  ;;  %v7777_v22 = vld [vmem:[#allocation5 + $0x68] sm:$0xff]  ;;  %v7498_v57 = vld [vmem:[#allocation5 + $0xe0] sm:$0xff] }
 0x471   : > { %v9932_v55 = vpop.f32.mrb[12].mxu0  ;;  %7725 = vst.msk [vmem:[#allocation5 + $0x88] sm:$0xff] %vm863_vm6, %v7693_v32 }
 0x472   : > { %v7982_v60 = vadd.f32 %v9932_v55, %v7778_v14  ;;  %v7889_v27 = vpop.f32.mrb[13].mxu0  ;;  %v7501_v55 = vld [vmem:[#allocation5 + $0xf8] sm:$0xff] }
 0x473   : > { %v7980_v10 = vadd.f32 %v7889_v27, %v7776_v38  ;;  %v9933_v59 = vpop.f32.mrb[14].mxu0  ;;  %v9906_v2 = vpop.f32.mrb[244].mxu1  ;;  %v7499_v27 = vld [vmem:[#allocation5 + $0xe8] sm:$0xff] }
 0x474   : > { %8014 = vst.msk [vmem:[#allocation5 + $0x70] sm:$0xff] %vm863_vm6, %v7982_v60  ;;  %v7983_v48 = vadd.f32 %v9933_v59, %v7779_v30  ;;  %v7892_v29 = vpop.f32.mrb[15].mxu0  ;;  %v7698_v13 = vadd.f32 %v9906_v2, %v7492_v3  ;;  %v7629_v47 = vpop.f32.mrb[245].mxu1 }
 0x475   : > { %8012 = vst.msk [vmem:[#allocation5 + $0x60] sm:$0xff] %vm863_vm6, %v7980_v10  ;;  %v7981_v51 = vadd.f32 %v7892_v29, %v7777_v22  ;;  %v7696_v44 = vadd.f32 %v7629_v47, %v7490_v18  ;;  %v9907_v37 = vpop.f32.mrb[246].mxu1  ;;  %v7782_v56 = vld [vmem:[#allocation5 + $0x90] sm:$0xff] }
 0x476   : > { %8015 = vst.msk [vmem:[#allocation5 + $0x78] sm:$0xff] %vm863_vm6, %v7983_v48  ;;  %7730 = vst.msk [vmem:[#allocation5 + $0xb0] sm:$0xff] %vm863_vm6, %v7698_v13  ;;  %v7699_v34 = vadd.f32 %v9907_v37, %v7493_v1  ;;  %v7632_v23 = vpop.f32.mrb[247].mxu1  ;;  %v7780_v63 = vld [vmem:[#allocation5 + $0x80] sm:$0xff] }
 0x477   : > { %8013 = vst.msk [vmem:[#allocation5 + $0x68] sm:$0xff] %vm863_vm6, %v7981_v51  ;;  %7728 = vst.msk [vmem:[#allocation5 + $0xa0] sm:$0xff] %vm863_vm6, %v7696_v44  ;;  %v7697_v43 = vadd.f32 %v7632_v23, %v7491_v53  ;;  %v7783_v15 = vld [vmem:[#allocation5 + $0x98] sm:$0xff]  ;;  %v8042_v44 = vld [vmem:[#allocation5 + $0x10] sm:$0xff] }
 0x478   : > { %7731 = vst.msk [vmem:[#allocation5 + $0xb8] sm:$0xff] %vm863_vm6, %v7699_v34  ;;  %v7781_v8 = vld [vmem:[#allocation5 + $0x88] sm:$0xff]  ;;  %v8040_v23 = vld [vmem:[#allocation5] sm:$0xff] }
 0x479   : > { %v9936_v45 = vpop.f32.mrb[16].mxu0  ;;  %7729 = vst.msk [vmem:[#allocation5 + $0xa8] sm:$0xff] %vm863_vm6, %v7697_v43 }
 0x47a   : > { %v7986_v26 = vadd.f32 %v9936_v45, %v7782_v56  ;;  %v7905_v25 = vpop.f32.mrb[17].mxu0  ;;  %v8043_v45 = vld [vmem:[#allocation5 + $0x18] sm:$0xff] }
 0x47b   : > { %v7984_v7 = vadd.f32 %v7905_v25, %v7780_v63  ;;  %v9937_v24 = vpop.f32.mrb[18].mxu0  ;;  %v9910_v17 = vpop.f32.mrb[248].mxu1  ;;  %v8041_v25 = vld [vmem:[#allocation5 + $0x8] sm:$0xff] }
 0x47c   : > { %8018 = vst.msk [vmem:[#allocation5 + $0x90] sm:$0xff] %vm863_vm6, %v7986_v26  ;;  %v7987_v50 = vadd.f32 %v9937_v24, %v7783_v15  ;;  %v7908_v39 = vpop.f32.mrb[19].mxu0  ;;  %v7702_v0 = vadd.f32 %v9910_v17, %v7496_v46  ;;  %v7645_v5 = vpop.f32.mrb[249].mxu1 }
 0x47d   : > { %8016 = vst.msk [vmem:[#allocation5 + $0x80] sm:$0xff] %vm863_vm6, %v7984_v7  ;;  %v7985_v54 = vadd.f32 %v7908_v39, %v7781_v8  ;;  %v7700_v41 = vadd.f32 %v7645_v5, %v7494_v20  ;;  %v9911_v4 = vpop.f32.mrb[250].mxu1  ;;  %v7786_v33 = vld [vmem:[#allocation5 + $0xb0] sm:$0xff] }
 0x47e   : > { %8019 = vst.msk [vmem:[#allocation5 + $0x98] sm:$0xff] %vm863_vm6, %v7987_v50  ;;  %7734 = vst.msk [vmem:[#allocation5 + $0xd0] sm:$0xff] %vm863_vm6, %v7702_v0  ;;  %v7703_v31 = vadd.f32 %v9911_v4, %v7497_v52  ;;  %v7648_v36 = vpop.f32.mrb[251].mxu1  ;;  %v7784_v62 = vld [vmem:[#allocation5 + $0xa0] sm:$0xff]  ;;  %v13711_v5 = vld [vmem:[%s13892_s5] ss:$0 sm:$0xff] }
 0x47f   : > { %8017 = vst.msk [vmem:[#allocation5 + $0x88] sm:$0xff] %vm863_vm6, %v7985_v54  ;;  %7732 = vst.msk [vmem:[#allocation5 + $0xc0] sm:$0xff] %vm863_vm6, %v7700_v41  ;;  %v7701_v40 = vadd.f32 %v7648_v36, %v7495_v12  ;;  %v7787_v6 = vld [vmem:[#allocation5 + $0xb8] sm:$0xff]  ;;  %v8046_v52 = vld [vmem:[#allocation5 + $0x30] sm:$0xff] }
 0x480   : > { %7735 = vst.msk [vmem:[#allocation5 + $0xd8] sm:$0xff] %vm863_vm6, %v7703_v31  ;;  %v7785_v28 = vld [vmem:[#allocation5 + $0xa8] sm:$0xff] }
 0x481   : > { %v9940_v58 = vpop.f32.mrb[20].mxu0  ;;  %7733 = vst.msk [vmem:[#allocation5 + $0xc8] sm:$0xff] %vm863_vm6, %v7701_v40 }
 0x482   : > { %v7990_v21 = vadd.f32 %v9940_v58, %v7786_v33  ;;  %v7921_v16 = vpop.f32.mrb[21].mxu0  ;;  %v8044_v33 = vld [vmem:[#allocation5 + $0x20] sm:$0xff]  ;;  %v13717_v58 = vld [vmem:[%s13893_s6] ss:$0 sm:$0xff] }
 0x483   : > { %v7988_v61 = vadd.f32 %v7921_v16, %v7784_v62  ;;  %v9941_v35 = vpop.f32.mrb[22].mxu0  ;;  %v9914_v42 = vpop.f32.mrb[252].mxu1  ;;  %v8047_v16 = vld [vmem:[#allocation5 + $0x38] sm:$0xff] }
 0x484   : > { %8022 = vst.msk [vmem:[#allocation5 + $0xb0] sm:$0xff] %vm863_vm6, %v7990_v21  ;;  %v7991_v49 = vadd.f32 %v9941_v35, %v7787_v6  ;;  %v7924_v11 = vpop.f32.mrb[23].mxu0  ;;  %v7706_v19 = vadd.f32 %v9914_v42, %v7500_v9  ;;  %v7661_v14 = vpop.f32.mrb[253].mxu1  ;;  %v8045_v42 = vld [vmem:[#allocation5 + $0x28] sm:$0xff] }
 0x485   : > { %8020 = vst.msk [vmem:[#allocation5 + $0xa0] sm:$0xff] %vm863_vm6, %v7988_v61  ;;  %v7989_v32 = vadd.f32 %v7924_v11, %v7785_v28  ;;  %v7704_v38 = vadd.f32 %v7661_v14, %v7498_v57  ;;  %v9915_v30 = vpop.f32.mrb[254].mxu1  ;;  %v7790_v10 = vld [vmem:[#allocation5 + $0xd0] sm:$0xff] }
 0x486   : > { %8023 = vst.msk [vmem:[#allocation5 + $0xb8] sm:$0xff] %vm863_vm6, %v7991_v49  ;;  %7738 = vst.msk [vmem:[#allocation5 + $0xf0] sm:$0xff] %vm863_vm6, %v7706_v19  ;;  %v7707_v60 = vadd.f32 %v9915_v30, %v7501_v55  ;;  %v7664_v22 = vpop.f32.mrb[255].mxu1  ;;  %v7788_v3 = vld [vmem:[#allocation5 + $0xc0] sm:$0xff] }
 0x487   : > { %8021 = vst.msk [vmem:[#allocation5 + $0xa8] sm:$0xff] %vm863_vm6, %v7989_v32  ;;  %7736 = vst.msk [vmem:[#allocation5 + $0xe0] sm:$0xff] %vm863_vm6, %v7704_v38  ;;  %v7705_v59 = vadd.f32 %v7664_v22, %v7499_v27  ;;  %v7791_v48 = vld [vmem:[#allocation5 + $0xd8] sm:$0xff] }
 0x488   : > { %7739 = vst.msk [vmem:[#allocation5 + $0xf8] sm:$0xff] %vm863_vm6, %v7707_v60  ;;  %v7789_v18 = vld [vmem:[#allocation5 + $0xc8] sm:$0xff] }
 0x489   : > { %v9944_v2 = vpop.f32.mrb[24].mxu0  ;;  %7737 = vst.msk [vmem:[#allocation5 + $0xe8] sm:$0xff] %vm863_vm6, %v7705_v59  ;;  %v8050_v59 = vld [vmem:[#allocation5 + $0x50] sm:$0xff] }
 0x48a   : > { %v7994_v29 = vadd.f32 %v9944_v2, %v7790_v10  ;;  %v7937_v13 = vpop.f32.mrb[25].mxu0 }
 0x48b   : > { %v7992_v47 = vadd.f32 %v7937_v13, %v7788_v3  ;;  %v9945_v51 = vpop.f32.mrb[26].mxu0  ;;  %v9954_v1 = vpop.f32.mrb[0].mxu1 }
 0x48c   : > { %8026 = vst.msk [vmem:[#allocation5 + $0xd0] sm:$0xff] %vm863_vm6, %v7994_v29  ;;  %v7995_v37 = vadd.f32 %v9945_v51, %v7791_v48  ;;  %v7940_v34 = vpop.f32.mrb[27].mxu0  ;;  %v8246_v53 = vadd.f32 %v9954_v1, %v8042_v44  ;;  %v8117_v56 = vpop.f32.mrb[1].mxu1  ;;  %v8048_v29 = vld [vmem:[#allocation5 + $0x40] sm:$0xff]  ;;  %v8051_v44 = vld [vmem:[#allocation5 + $0x58] sm:$0xff] }
 0x48d   : > { %8024 = vst.msk [vmem:[#allocation5 + $0xc0] sm:$0xff] %vm863_vm6, %v7992_v47  ;;  %v7993_v43 = vadd.f32 %v7940_v34, %v7789_v18  ;;  %v8244_v63 = vadd.f32 %v8117_v56, %v8040_v23  ;;  %v9955_v15 = vpop.f32.mrb[2].mxu1  ;;  %v7794_v7 = vld [vmem:[#allocation5 + $0xf0] sm:$0xff]  ;;  %v8049_v23 = vld [vmem:[#allocation5 + $0x48] sm:$0xff] }
 0x48e   : > { %8027 = vst.msk [vmem:[#allocation5 + $0xd8] sm:$0xff] %vm863_vm6, %v7995_v37  ;;  %8278 = vst.msk [vmem:[#allocation5 + $0x10] sm:$0xff] %vm863_vm6, %v8246_v53  ;;  %v8247_v26 = vadd.f32 %v9955_v15, %v8043_v45  ;;  %v8120_v8 = vpop.f32.mrb[3].mxu1  ;;  %v7792_v46 = vld [vmem:[#allocation5 + $0xe0] sm:$0xff] }
 0x48f   : > { %8025 = vst.msk [vmem:[#allocation5 + $0xc8] sm:$0xff] %vm863_vm6, %v7993_v43  ;;  %8276 = vst.msk [vmem:[#allocation5] sm:$0xff] %vm863_vm6, %v8244_v63  ;;  %v8245_v24 = vadd.f32 %v8120_v8, %v8041_v25  ;;  %v7795_v50 = vld [vmem:[#allocation5 + $0xf8] sm:$0xff] }
 0x490   : > { %8279 = vst.msk [vmem:[#allocation5 + $0x18] sm:$0xff] %vm863_vm6, %v8247_v26  ;;  %v7793_v20 = vld [vmem:[#allocation5 + $0xe8] sm:$0xff] }
 0x491   : > { %v9948_v17 = vpop.f32.mrb[28].mxu0  ;;  %8277 = vst.msk [vmem:[#allocation5 + $0x8] sm:$0xff] %vm863_vm6, %v8245_v24 }
 0x492   : > { %v7998_v39 = vadd.f32 %v9948_v17, %v7794_v7  ;;  %v7953_v0 = vpop.f32.mrb[29].mxu0 }
 0x493   : > { %v7996_v54 = vadd.f32 %v7953_v0, %v7792_v46  ;;  %v9949_v41 = vpop.f32.mrb[30].mxu0  ;;  %v9958_v4 = vpop.f32.mrb[4].mxu1 }
 0x494   : > { %8030 = vst.msk [vmem:[#allocation5 + $0xf0] sm:$0xff] %vm863_vm6, %v7998_v39  ;;  %v7999_v31 = vadd.f32 %v9949_v41, %v7795_v50  ;;  %v7956_v12 = vpop.f32.mrb[31].mxu0  ;;  %v8250_v36 = vadd.f32 %v9958_v4, %v8046_v52  ;;  %v8133_v40 = vpop.f32.mrb[5].mxu1  ;;  %v8054_v39 = vld [vmem:[#allocation5 + $0x70] sm:$0xff]  ;;  %v8052_v41 = vld [vmem:[#allocation5 + $0x60] sm:$0xff] }
 0x495   : > { %v8310_v62 = vld [vmem:[#allocation5 + $0x10] sm:$0xff]  ;;  %8028 = vst.msk [vmem:[#allocation5 + $0xe0] sm:$0xff] %vm863_vm6, %v7996_v54  ;;  %v7997_v6 = vadd.f32 %v7956_v12, %v7793_v20  ;;  %v8248_v21 = vadd.f32 %v8133_v40, %v8044_v33  ;;  %v9959_v28 = vpop.f32.mrb[6].mxu1 }
 0x496   : > { %v8349_v61 = vmul.f32 %v13711_v5, %v8310_v62  ;;  %v8308_v35 = vld [vmem:[#allocation5] sm:$0xff]  ;;  %8031 = vst.msk [vmem:[#allocation5 + $0xf8] sm:$0xff] %vm863_vm6, %v7999_v31  ;;  %8282 = vst.msk [vmem:[#allocation5 + $0x30] sm:$0xff] %vm863_vm6, %v8250_v36  ;;  %v8251_v9 = vadd.f32 %v9959_v28, %v8047_v16  ;;  %v8136_v49 = vpop.f32.mrb[7].mxu1  ;;  %v8055_v36 = vld [vmem:[#allocation5 + $0x78] sm:$0xff] }
 0x497   : > { %v8347_v11 = vmul.f32 %v13711_v5, %v8308_v35  ;;  %v8311_v19 = vld [vmem:[#allocation5 + $0x18] sm:$0xff]  ;;  %8029 = vst.msk [vmem:[#allocation5 + $0xe8] sm:$0xff] %vm863_vm6, %v7997_v6  ;;  %8280 = vst.msk [vmem:[#allocation5 + $0x20] sm:$0xff] %vm863_vm6, %v8248_v21  ;;  %v8249_v57 = vadd.f32 %v8136_v49, %v8045_v42  ;;  %v8053_v21 = vld [vmem:[#allocation5 + $0x68] sm:$0xff] }
 0x498   : > { %v8388_v14 = vadd.f32 %v13717_v58, %v8349_v61  ;;  %v8350_v32 = vmul.f32 %v13711_v5, %v8311_v19  ;;  %v8309_v38 = vld [vmem:[#allocation5 + $0x8] sm:$0xff]  ;;  %8283 = vst.msk [vmem:[#allocation5 + $0x38] sm:$0xff] %vm863_vm6, %v8251_v9 }
 0x499   : > { %v8386_v55 = vadd.f32 %v13717_v58, %v8347_v11  ;;  %v8348_v30 = vmul.f32 %v13711_v5, %v8309_v38  ;;  %8281 = vst.msk [vmem:[#allocation5 + $0x28] sm:$0xff] %vm863_vm6, %v8249_v57 }
 0x49a   : > { %v8420_v60 = vmax.f32 %v8388_v14, 0.0  ;;  %v8389_v27 = vadd.f32 %v13717_v58, %v8350_v32 }
 0x49b   : > { %v8418_v22 = vmax.f32 %v8386_v55, 0.0  ;;  %v8387_v10 = vadd.f32 %v13717_v58, %v8348_v30  ;;  %v9962_v3 = vpop.f32.mrb[8].mxu1  ;;  %v8058_v55 = vld [vmem:[#allocation5 + $0x90] sm:$0xff] }
 0x49c   : > { %8452 = vst.msk [vmem:[%s13733_s21 + $0x10] sm:$0xff] %vm863_vm6, %v8420_v60  ;;  %v8421_v2 = vmax.f32 %v8389_v27, 0.0  ;;  %v8254_v48 = vadd.f32 %v9962_v3, %v8050_v59  ;;  %v8149_v13 = vpop.f32.mrb[9].mxu1 }
 0x49d   : > { %8450 = vst.msk [vmem:[%s13733_s21] sm:$0xff] %vm863_vm6, %v8418_v22  ;;  %v8419_v18 = vmax.f32 %v8387_v10, 0.0  ;;  %v8314_v47 = vld [vmem:[#allocation5 + $0x30] sm:$0xff]  ;;  %v8252_v51 = vadd.f32 %v8149_v13, %v8048_v29  ;;  %v9963_v1 = vpop.f32.mrb[10].mxu1  ;;  %v8056_v22 = vld [vmem:[#allocation5 + $0x80] sm:$0xff] }
 0x49e   : > { %8453 = vst.msk [vmem:[%s13733_s21 + $0x18] sm:$0xff] %vm863_vm6, %v8421_v2  ;;  %v8353_v37 = vmul.f32 %v13711_v5, %v8314_v47  ;;  %v8312_v34 = vld [vmem:[#allocation5 + $0x20] sm:$0xff]  ;;  %8286 = vst.msk [vmem:[#allocation5 + $0x50] sm:$0xff] %vm863_vm6, %v8254_v48  ;;  %v8255_v53 = vadd.f32 %v9963_v1, %v8051_v44  ;;  %v8152_v56 = vpop.f32.mrb[11].mxu1  ;;  %v8059_v48 = vld [vmem:[#allocation5 + $0x98] sm:$0xff] }
 0x49f   : > { %8451 = vst.msk [vmem:[%s13733_s21 + $0x8] sm:$0xff] %vm863_vm6, %v8419_v18  ;;  %v8351_v43 = vmul.f32 %v13711_v5, %v8312_v34  ;;  %v8315_v63 = vld [vmem:[#allocation5 + $0x38] sm:$0xff]  ;;  %8284 = vst.msk [vmem:[#allocation5 + $0x40] sm:$0xff] %vm863_vm6, %v8252_v51  ;;  %v8253_v45 = vadd.f32 %v8152_v56, %v8049_v23  ;;  %v8057_v51 = vld [vmem:[#allocation5 + $0x88] sm:$0xff] }
 0x4a0   : > { %v8392_v15 = vadd.f32 %v13717_v58, %v8353_v37  ;;  %v8354_v26 = vmul.f32 %v13711_v5, %v8315_v63  ;;  %v8313_v25 = vld [vmem:[#allocation5 + $0x28] sm:$0xff]  ;;  %8287 = vst.msk [vmem:[#allocation5 + $0x58] sm:$0xff] %vm863_vm6, %v8255_v53 }
 0x4a1   : > { %v8390_v8 = vadd.f32 %v13717_v58, %v8351_v43  ;;  %v8352_v7 = vmul.f32 %v13711_v5, %v8313_v25  ;;  %8285 = vst.msk [vmem:[#allocation5 + $0x48] sm:$0xff] %vm863_vm6, %v8253_v45 }
 0x4a2   : > { %v8424_v24 = vmax.f32 %v8392_v15, 0.0  ;;  %v8393_v46 = vadd.f32 %v13717_v58, %v8354_v26 }
 0x4a3   : > { %v8422_v17 = vmax.f32 %v8390_v8, 0.0  ;;  %v8391_v50 = vadd.f32 %v13717_v58, %v8352_v7  ;;  %v9966_v0 = vpop.f32.mrb[12].mxu1  ;;  %v8062_v8 = vld [vmem:[#allocation5 + $0xb0] sm:$0xff] }
 0x4a4   : > { %8456 = vst.msk [vmem:[%s13733_s21 + $0x30] sm:$0xff] %vm863_vm6, %v8424_v24  ;;  %v8425_v20 = vmax.f32 %v8393_v46, 0.0  ;;  %v8258_v54 = vadd.f32 %v9966_v0, %v8054_v39  ;;  %v8165_v52 = vpop.f32.mrb[13].mxu1 }
 0x4a5   : > { %8454 = vst.msk [vmem:[%s13733_s21 + $0x20] sm:$0xff] %vm863_vm6, %v8422_v17  ;;  %v8423_v4 = vmax.f32 %v8391_v50, 0.0  ;;  %v8318_v31 = vld [vmem:[#allocation5 + $0x50] sm:$0xff]  ;;  %v8256_v12 = vadd.f32 %v8165_v52, %v8052_v41  ;;  %v9967_v33 = vpop.f32.mrb[14].mxu1  ;;  %v8060_v17 = vld [vmem:[#allocation5 + $0xa0] sm:$0xff] }
 0x4a6   : > { %8457 = vst.msk [vmem:[%s13733_s21 + $0x38] sm:$0xff] %vm863_vm6, %v8425_v20  ;;  %v8357_v40 = vmul.f32 %v13711_v5, %v8318_v31  ;;  %v8316_v62 = vld [vmem:[#allocation5 + $0x40] sm:$0xff]  ;;  %8290 = vst.msk [vmem:[#allocation5 + $0x70] sm:$0xff] %vm863_vm6, %v8258_v54  ;;  %v8259_v6 = vadd.f32 %v9967_v33, %v8055_v36  ;;  %v8168_v16 = vpop.f32.mrb[15].mxu1  ;;  %v8063_v54 = vld [vmem:[#allocation5 + $0xb8] sm:$0xff] }
 0x4a7   : > { %8455 = vst.msk [vmem:[%s13733_s21 + $0x28] sm:$0xff] %vm863_vm6, %v8423_v4  ;;  %v8355_v28 = vmul.f32 %v13711_v5, %v8316_v62  ;;  %v8319_v61 = vld [vmem:[#allocation5 + $0x58] sm:$0xff]  ;;  %8288 = vst.msk [vmem:[#allocation5 + $0x60] sm:$0xff] %vm863_vm6, %v8256_v12  ;;  %v8257_v35 = vadd.f32 %v8168_v16, %v8053_v21  ;;  %v8061_v12 = vld [vmem:[#allocation5 + $0xa8] sm:$0xff] }
 0x4a8   : > { %v8396_v9 = vadd.f32 %v13717_v58, %v8357_v40  ;;  %v8358_v42 = vmul.f32 %v13711_v5, %v8319_v61  ;;  %v8317_v49 = vld [vmem:[#allocation5 + $0x48] sm:$0xff]  ;;  %8291 = vst.msk [vmem:[#allocation5 + $0x78] sm:$0xff] %vm863_vm6, %v8259_v6 }
 0x4a9   : > { %v8394_v11 = vadd.f32 %v13717_v58, %v8355_v28  ;;  %v8356_v19 = vmul.f32 %v13711_v5, %v8317_v49  ;;  %8289 = vst.msk [vmem:[#allocation5 + $0x68] sm:$0xff] %vm863_vm6, %v8257_v35 }
 0x4aa   : > { %v8428_v57 = vmax.f32 %v8396_v9, 0.0  ;;  %v8397_v14 = vadd.f32 %v13717_v58, %v8358_v42 }
 0x4ab   : > { %v8426_v32 = vmax.f32 %v8394_v11, 0.0  ;;  %v8395_v38 = vadd.f32 %v13717_v58, %v8356_v19  ;;  %v9970_v30 = vpop.f32.mrb[16].mxu1  ;;  %v8066_v11 = vld [vmem:[#allocation5 + $0xd0] sm:$0xff] }
 0x4ac   : > { %8460 = vst.msk [vmem:[%s13733_s21 + $0x50] sm:$0xff] %vm863_vm6, %v8428_v57  ;;  %v8429_v60 = vmax.f32 %v8397_v14, 0.0  ;;  %v8262_v27 = vadd.f32 %v9970_v30, %v8058_v55  ;;  %v8181_v10 = vpop.f32.mrb[17].mxu1 }
 0x4ad   : > { %8458 = vst.msk [vmem:[%s13733_s21 + $0x40] sm:$0xff] %vm863_vm6, %v8426_v32  ;;  %v8427_v59 = vmax.f32 %v8395_v38, 0.0  ;;  %v8322_v3 = vld [vmem:[#allocation5 + $0x70] sm:$0xff]  ;;  %v8260_v2 = vadd.f32 %v8181_v10, %v8056_v22  ;;  %v9971_v29 = vpop.f32.mrb[18].mxu1  ;;  %v8064_v32 = vld [vmem:[#allocation5 + $0xc0] sm:$0xff] }
 0x4ae   : > { %8461 = vst.msk [vmem:[%s13733_s21 + $0x58] sm:$0xff] %vm863_vm6, %v8429_v60  ;;  %v8361_v13 = vmul.f32 %v13711_v5, %v8322_v3  ;;  %v8320_v18 = vld [vmem:[#allocation5 + $0x60] sm:$0xff]  ;;  %8294 = vst.msk [vmem:[#allocation5 + $0x90] sm:$0xff] %vm863_vm6, %v8262_v27  ;;  %v8263_v47 = vadd.f32 %v9971_v29, %v8059_v48  ;;  %v8184_v44 = vpop.f32.mrb[19].mxu1  ;;  %v8067_v27 = vld [vmem:[#allocation5 + $0xd8] sm:$0xff] }
 0x4af   : > { %8459 = vst.msk [vmem:[%s13733_s21 + $0x48] sm:$0xff] %vm863_vm6, %v8427_v59  ;;  %v8359_v1 = vmul.f32 %v13711_v5, %v8320_v18  ;;  %v8323_v37 = vld [vmem:[#allocation5 + $0x78] sm:$0xff]  ;;  %8292 = vst.msk [vmem:[#allocation5 + $0x80] sm:$0xff] %vm863_vm6, %v8260_v2  ;;  %v8261_v34 = vadd.f32 %v8184_v44, %v8057_v51  ;;  %v8065_v2 = vld [vmem:[#allocation5 + $0xc8] sm:$0xff] }
 0x4b0   : > { %v8400_v53 = vadd.f32 %v13717_v58, %v8361_v13  ;;  %v8362_v23 = vmul.f32 %v13711_v5, %v8323_v37  ;;  %v8321_v56 = vld [vmem:[#allocation5 + $0x68] sm:$0xff]  ;;  %8295 = vst.msk [vmem:[#allocation5 + $0x98] sm:$0xff] %vm863_vm6, %v8263_v47 }
 0x4b1   : > { %v8398_v43 = vadd.f32 %v13717_v58, %v8359_v1  ;;  %v8360_v63 = vmul.f32 %v13711_v5, %v8321_v56  ;;  %8293 = vst.msk [vmem:[#allocation5 + $0x88] sm:$0xff] %vm863_vm6, %v8261_v34 }
 0x4b2   : > { %v8432_v45 = vmax.f32 %v8400_v53, 0.0  ;;  %v8401_v15 = vadd.f32 %v13717_v58, %v8362_v23 }
 0x4b3   : > { %v8430_v26 = vmax.f32 %v8398_v43, 0.0  ;;  %v8399_v25 = vadd.f32 %v13717_v58, %v8360_v63  ;;  %v9974_v7 = vpop.f32.mrb[20].mxu1  ;;  %v8070_v43 = vld [vmem:[#allocation5 + $0xf0] sm:$0xff] }
 0x4b4   : > { %8464 = vst.msk [vmem:[%s13733_s21 + $0x70] sm:$0xff] %vm863_vm6, %v8432_v45  ;;  %v8433_v24 = vmax.f32 %v8401_v15, 0.0  ;;  %v8266_v46 = vadd.f32 %v9974_v7, %v8062_v8  ;;  %v8197_v50 = vpop.f32.mrb[21].mxu1 }
 0x4b5   : > { %8462 = vst.msk [vmem:[%s13733_s21 + $0x60] sm:$0xff] %vm863_vm6, %v8430_v26  ;;  %v8431_v39 = vmax.f32 %v8399_v25, 0.0  ;;  %v8326_v0 = vld [vmem:[#allocation5 + $0x90] sm:$0xff]  ;;  %v8264_v20 = vadd.f32 %v8197_v50, %v8060_v17  ;;  %v9975_v41 = vpop.f32.mrb[22].mxu1  ;;  %v8068_v26 = vld [vmem:[#allocation5 + $0xe0] sm:$0xff] }
 0x4b6   : > { %8465 = vst.msk [vmem:[%s13733_s21 + $0x78] sm:$0xff] %vm863_vm6, %v8433_v24  ;;  %v8365_v52 = vmul.f32 %v13711_v5, %v8326_v0  ;;  %v8324_v4 = vld [vmem:[#allocation5 + $0x80] sm:$0xff]  ;;  %8298 = vst.msk [vmem:[#allocation5 + $0xb0] sm:$0xff] %vm863_vm6, %v8266_v46  ;;  %v8267_v31 = vadd.f32 %v9975_v41, %v8063_v54  ;;  %v8200_v36 = vpop.f32.mrb[23].mxu1  ;;  %v8071_v46 = vld [vmem:[#allocation5 + $0xf8] sm:$0xff] }
 0x4b7   : > { %8463 = vst.msk [vmem:[%s13733_s21 + $0x68] sm:$0xff] %vm863_vm6, %v8431_v39  ;;  %v8363_v33 = vmul.f32 %v13711_v5, %v8324_v4  ;;  %v8327_v40 = vld [vmem:[#allocation5 + $0x98] sm:$0xff]  ;;  %8296 = vst.msk [vmem:[#allocation5 + $0xa0] sm:$0xff] %vm863_vm6, %v8264_v20  ;;  %v8265_v62 = vadd.f32 %v8200_v36, %v8061_v12  ;;  %v8069_v20 = vld [vmem:[#allocation5 + $0xe8] sm:$0xff] }
 0x4b8   : > { %v8404_v6 = vadd.f32 %v13717_v58, %v8365_v52  ;;  %v8366_v21 = vmul.f32 %v13711_v5, %v8327_v40  ;;  %v8325_v16 = vld [vmem:[#allocation5 + $0x88] sm:$0xff]  ;;  %8299 = vst.msk [vmem:[#allocation5 + $0xb8] sm:$0xff] %vm863_vm6, %v8267_v31 }
 0x4b9   : > { %v8402_v28 = vadd.f32 %v13717_v58, %v8363_v33  ;;  %v8364_v61 = vmul.f32 %v13711_v5, %v8325_v16  ;;  %8297 = vst.msk [vmem:[#allocation5 + $0xa8] sm:$0xff] %vm863_vm6, %v8265_v62 }
 0x4ba   : > { %v8436_v35 = vmax.f32 %v8404_v6, 0.0  ;;  %v8405_v9 = vadd.f32 %v13717_v58, %v8366_v21 }
 0x4bb   : > { %v8434_v42 = vmax.f32 %v8402_v28, 0.0  ;;  %v8403_v49 = vadd.f32 %v13717_v58, %v8364_v61  ;;  %v9978_v19 = vpop.f32.mrb[24].mxu1 }
 0x4bc   : > { %8468 = vst.msk [vmem:[%s13733_s21 + $0x90] sm:$0xff] %vm863_vm6, %v8436_v35  ;;  %v8437_v57 = vmax.f32 %v8405_v9, 0.0  ;;  %v8270_v14 = vadd.f32 %v9978_v19, %v8066_v11  ;;  %v8213_v38 = vpop.f32.mrb[25].mxu1 }
 0x4bd   : > { %8466 = vst.msk [vmem:[%s13733_s21 + $0x80] sm:$0xff] %vm863_vm6, %v8434_v42  ;;  %v8435_v55 = vmax.f32 %v8403_v49, 0.0  ;;  %v8330_v30 = vld [vmem:[#allocation5 + $0xb0] sm:$0xff]  ;;  %v8268_v60 = vadd.f32 %v8213_v38, %v8064_v32  ;;  %v9979_v22 = vpop.f32.mrb[26].mxu1 }
 0x4be   : > { %8469 = vst.msk [vmem:[%s13733_s21 + $0x98] sm:$0xff] %vm863_vm6, %v8437_v57  ;;  %v8369_v10 = vmul.f32 %v13711_v5, %v8330_v30  ;;  %v8328_v59 = vld [vmem:[#allocation5 + $0xa0] sm:$0xff]  ;;  %8302 = vst.msk [vmem:[#allocation5 + $0xd0] sm:$0xff] %vm863_vm6, %v8270_v14  ;;  %v8271_v3 = vadd.f32 %v9979_v22, %v8067_v27  ;;  %v8216_v48 = vpop.f32.mrb[27].mxu1 }
 0x4bf   : > { %8467 = vst.msk [vmem:[%s13733_s21 + $0x88] sm:$0xff] %vm863_vm6, %v8435_v55  ;;  %v8367_v29 = vmul.f32 %v13711_v5, %v8328_v59  ;;  %v8331_v13 = vld [vmem:[#allocation5 + $0xb8] sm:$0xff]  ;;  %8300 = vst.msk [vmem:[#allocation5 + $0xc0] sm:$0xff] %vm863_vm6, %v8268_v60  ;;  %v8269_v18 = vadd.f32 %v8216_v48, %v8065_v2 }
 0x4c0   : > { %v8408_v47 = vadd.f32 %v13717_v58, %v8369_v10  ;;  %v8370_v51 = vmul.f32 %v13711_v5, %v8331_v13  ;;  %v8329_v44 = vld [vmem:[#allocation5 + $0xa8] sm:$0xff]  ;;  %8303 = vst.msk [vmem:[#allocation5 + $0xd8] sm:$0xff] %vm863_vm6, %v8271_v3 }
 0x4c1   : > { %v8406_v1 = vadd.f32 %v13717_v58, %v8367_v29  ;;  %v8368_v37 = vmul.f32 %v13711_v5, %v8329_v44  ;;  %8301 = vst.msk [vmem:[#allocation5 + $0xc8] sm:$0xff] %vm863_vm6, %v8269_v18 }
 0x4c2   : > { %v8440_v34 = vmax.f32 %v8408_v47, 0.0  ;;  %v8409_v53 = vadd.f32 %v13717_v58, %v8370_v51 }
 0x4c3   : > { %v8438_v23 = vmax.f32 %v8406_v1, 0.0  ;;  %v8407_v56 = vadd.f32 %v13717_v58, %v8368_v37  ;;  %v9982_v63 = vpop.f32.mrb[28].mxu1 }
 0x4c4   : > { %8472 = vst.msk [vmem:[%s13733_s21 + $0xb0] sm:$0xff] %vm863_vm6, %v8440_v34  ;;  %v8441_v45 = vmax.f32 %v8409_v53, 0.0  ;;  %v8274_v15 = vadd.f32 %v9982_v63, %v8070_v43  ;;  %v8229_v25 = vpop.f32.mrb[29].mxu1 }
 0x4c5   : > { %8470 = vst.msk [vmem:[%s13733_s21 + $0xa0] sm:$0xff] %vm863_vm6, %v8438_v23  ;;  %v8439_v8 = vmax.f32 %v8407_v56, 0.0  ;;  %v8334_v7 = vld [vmem:[#allocation5 + $0xd0] sm:$0xff]  ;;  %v8272_v24 = vadd.f32 %v8229_v25, %v8068_v26  ;;  %v9983_v17 = vpop.f32.mrb[30].mxu1 }
 0x4c6   : > { %8473 = vst.msk [vmem:[%s13733_s21 + $0xb8] sm:$0xff] %vm863_vm6, %v8441_v45  ;;  %v8373_v50 = vmul.f32 %v13711_v5, %v8334_v7  ;;  %v8332_v39 = vld [vmem:[#allocation5 + $0xc0] sm:$0xff]  ;;  %8306 = vst.msk [vmem:[#allocation5 + $0xf0] sm:$0xff] %vm863_vm6, %v8274_v15  ;;  %v8275_v0 = vadd.f32 %v9983_v17, %v8071_v46  ;;  %v8232_v54 = vpop.f32.mrb[31].mxu1 }
 0x4c7   : > { %8471 = vst.msk [vmem:[%s13733_s21 + $0xa8] sm:$0xff] %vm863_vm6, %v8439_v8  ;;  %v8371_v41 = vmul.f32 %v13711_v5, %v8332_v39  ;;  %v8335_v52 = vld [vmem:[#allocation5 + $0xd8] sm:$0xff]  ;;  %8304 = vst.msk [vmem:[#allocation5 + $0xe0] sm:$0xff] %vm863_vm6, %v8272_v24  ;;  %v8273_v4 = vadd.f32 %v8232_v54, %v8069_v20 }
 0x4c8   : > { %v8412_v31 = vadd.f32 %v13717_v58, %v8373_v50  ;;  %v8374_v12 = vmul.f32 %v13711_v5, %v8335_v52  ;;  %v8333_v36 = vld [vmem:[#allocation5 + $0xc8] sm:$0xff]  ;;  %8307 = vst.msk [vmem:[#allocation5 + $0xf8] sm:$0xff] %vm863_vm6, %v8275_v0 }
 0x4c9   : > { %v8410_v33 = vadd.f32 %v13717_v58, %v8371_v41  ;;  %v8372_v40 = vmul.f32 %v13711_v5, %v8333_v36  ;;  %8305 = vst.msk [vmem:[#allocation5 + $0xe8] sm:$0xff] %vm863_vm6, %v8273_v4 }
 0x4ca   : > { %v8444_v62 = vmax.f32 %v8412_v31, 0.0  ;;  %v8413_v6 = vadd.f32 %v13717_v58, %v8374_v12 }
 0x4cb   : > { %v8442_v21 = vmax.f32 %v8410_v33, 0.0  ;;  %v8411_v16 = vadd.f32 %v13717_v58, %v8372_v40 }
 0x4cc   : > { %8476 = vst.msk [vmem:[%s13733_s21 + $0xd0] sm:$0xff] %vm863_vm6, %v8444_v62  ;;  %v8445_v28 = vmax.f32 %v8413_v6, 0.0 }
 0x4cd   : > { %8474 = vst.msk [vmem:[%s13733_s21 + $0xc0] sm:$0xff] %vm863_vm6, %v8442_v21  ;;  %v8443_v61 = vmax.f32 %v8411_v16, 0.0  ;;  %v8338_v35 = vld [vmem:[#allocation5 + $0xf0] sm:$0xff] }
 0x4ce   : > { %8477 = vst.msk [vmem:[%s13733_s21 + $0xd8] sm:$0xff] %vm863_vm6, %v8445_v28  ;;  %v8377_v9 = vmul.f32 %v13711_v5, %v8338_v35  ;;  %v8336_v42 = vld [vmem:[#allocation5 + $0xe0] sm:$0xff] }
 0x4cf   : > { %8475 = vst.msk [vmem:[%s13733_s21 + $0xc8] sm:$0xff] %vm863_vm6, %v8443_v61  ;;  %v8375_v49 = vmul.f32 %v13711_v5, %v8336_v42  ;;  %v8339_v11 = vld [vmem:[#allocation5 + $0xf8] sm:$0xff] }
 0x4d0   : > { %v8416_v19 = vadd.f32 %v13717_v58, %v8377_v9  ;;  %v8378_v57 = vmul.f32 %v13711_v5, %v8339_v11  ;;  %v8337_v14 = vld [vmem:[#allocation5 + $0xe8] sm:$0xff] }
 0x4d1   : > { %v8414_v32 = vadd.f32 %v13717_v58, %v8375_v49  ;;  %v8376_v38 = vmul.f32 %v13711_v5, %v8337_v14 }
 0x4d2   : > { %v8448_v55 = vmax.f32 %v8416_v19, 0.0  ;;  %v8417_v30 = vadd.f32 %v13717_v58, %v8378_v57 }
 0x4d3   : > { %v8446_v60 = vmax.f32 %v8414_v32, 0.0  ;;  %v8415_v27 = vadd.f32 %v13717_v58, %v8376_v38 }
 0x4d4   : > { %8480 = vst.msk [vmem:[%s13733_s21 + $0xf0] sm:$0xff] %vm863_vm6, %v8448_v55  ;;  %v8449_v22 = vmax.f32 %v8417_v30, 0.0 }
 0x4d5   : > { %8478 = vst.msk [vmem:[%s13733_s21 + $0xe0] sm:$0xff] %vm863_vm6, %v8446_v60  ;;  %v8447_v10 = vmax.f32 %v8415_v27, 0.0 }
 0x4d6   : > { %8481 = vst.msk [vmem:[%s13733_s21 + $0xf8] sm:$0xff] %vm863_vm6, %v8449_v22 }
 0x4d7   : > { %8479 = vst.msk [vmem:[%s13733_s21 + $0xe8] sm:$0xff] %vm863_vm6, %v8447_v10 }
 0x4d8 PF: > { %s17_s24 = sadd.s32 1, %s10077_s24  }
 0x4d9   : > { %p14_p4 = scmp.ge.s32.totalorder %s17_s24, 4  }
 0x4db   :  { %16 = sbr.rel (!%p14_p4) target bundleno = 1 (0x1), region = 96 }

</bundles_post_ra>
